<compile_context>
chip_gen: v5e
topology: v5e:2x2
jax: 0.10.0
libtpu: 0.0.40
codegen_flags: <defaults>
</compile_context>

<pallas_src>
import jax
import jax.numpy as jnp
from jax.experimental import pallas as pl
from jax.experimental.pallas import tpu as pltpu

WIN = 5        # window_size
EPS = 1e-5     # InstanceNorm3d / GroupNorm eps (PyTorch default)


def window_params(i, snip):
    # mirrors the torch forward() branch order for mode1 / window_size=5
    if i == 0:
        return 0, 3, 2          # start, S, addition
    elif i == 1:
        return 0, 4, 1
    elif i == snip - 2:
        return i - 2, 4, 0
    elif i == snip - 1:
        return i - 2, 3, 0
    else:
        return i - 2, 5, 0


def _tcb_kernel(x_ref, w1_ref, b1_ref, w2_ref, b2_ref, w3c_ref, b3_ref,
                wg_ref, bg_ref, gamma_ref, beta_ref, out_ref, r_scratch):
    snip = x_ref.shape[1]
    C = x_ref.shape[2]
    HW = x_ref.shape[3]

    # load tiny weight tensors once per grid step
    W1 = w1_ref[...]        # (WIN, C)
    B1 = b1_ref[...]        # (WIN, 1)
    W2 = w2_ref[...]        # (WIN, C, C)
    B2 = b2_ref[...]        # (WIN, C)
    W3C = w3c_ref[...]      # (C, WIN*C)   layout [o, s*C + c]
    B3 = b3_ref[...]        # (WIN, C)
    gamma = gamma_ref[...]  # (C, 1)
    beta = beta_ref[...]    # (C, 1)

    for i in range(snip):   # static unroll: window geometry is compile-time
        start, S, add = window_params(i, snip)
        f = x_ref[0, start:start + S]                         # (S, C, HW)

        w1 = W1[add:add + S]                                  # (S, C)
        b1 = B1[add:add + S]                                  # (S, 1)
        w2 = W2[add:add + S]                                  # (S, C, C)
        b2 = B2[add:add + S]                                  # (S, C)
        b3 = B3[add:add + S]                                  # (S, C)

        # temporal attention logits (tconv_1_*): one contraction over C
        logits = jnp.sum(w1[:, :, None] * f, axis=1) + b1     # (S, HW)
        mx = jnp.max(logits, axis=0, keepdims=True)
        e = jnp.exp(logits - mx)
        sm = e / jnp.sum(e, axis=0, keepdims=True)            # softmax over window
        attn = sm * jnp.mean(sm, axis=-1, keepdims=True)      # local_mean weighting

        # fused tconv_2 + attention pooling (step2s never materialized)
        fr = jnp.sum(f * attn[:, None, :], axis=-1)           # (S, C)  = f[s] @ attn[s]
        asum = jnp.sum(attn, axis=-1, keepdims=True)          # (S, 1)
        pooled = jnp.sum(w2 * fr[:, None, :], axis=-1) + b2 * asum   # (S, C)

        fm = f + pooled[:, :, None]                           # (S, C, HW)

        # InstanceNorm3d: per-channel mean/var over (window, H, W), biased var
        sh = jnp.sum(fm, axis=2, keepdims=True)               # (S, C, 1)
        mean = jnp.sum(sh, axis=0, keepdims=True) / (S * HW)  # (1, C, 1)
        centered = fm - mean
        sq = jnp.sum(centered * centered, axis=2, keepdims=True)
        var = jnp.sum(sq, axis=0, keepdims=True) / (S * HW)
        normed = centered * jax.lax.rsqrt(var + EPS)          # (S, C, HW)

        # sum of per-slot tconv_3 1x1 convs as ONE MXU dot with K = S*C
        w3sel = W3C[:, add * C:(add + S) * C]                 # (C, S*C)
        out_i = jnp.dot(w3sel, normed.reshape(S * C, HW),
                        preferred_element_type=jnp.float32)
        out_i = out_i + jnp.sum(b3, axis=0)[:, None]          # (C, HW)

        # GroupNorm(1, C) (per frame) + ReLU -> lane-concatenated scratch slab
        gmean = jnp.mean(out_i)
        gc = out_i - gmean
        gvar = jnp.mean(gc * gc)
        gn = gc * jax.lax.rsqrt(gvar + EPS) * gamma + beta
        r_scratch[:, i * HW:(i + 1) * HW] = jnp.maximum(gn, 0.0)

    # batched global 1x1 conv over all frames, then residual add per frame
    go = jnp.dot(wg_ref[...], r_scratch[...],
                 preferred_element_type=jnp.float32) + bg_ref[...]   # (C, snip*HW)
    for i in range(snip):
        out_ref[0, i] = go[:, i * HW:(i + 1) * HW] + x_ref[0, i]


def temporal_context_block(x, params, snip):
    BS, C, H, W = x.shape
    assert BS % snip == 0 and snip >= 5
    B = BS // snip
    HW = H * W
    x5 = x.reshape(B, snip, C, HW)

    W1 = params['W1']                                          # (WIN, C)
    b1 = params['b1'].reshape(WIN, 1)                          # (WIN, 1)
    W2 = params['W2']                                          # (WIN, C, C)
    b2 = params['b2']                                          # (WIN, C)
    # tconv_3 weights pre-laid-out as one (C_out, WIN*C_in) slab: [o, s*C + c]
    W3c = jnp.transpose(params['W3'], (1, 0, 2)).reshape(C, WIN * C)
    b3 = params['b3']                                          # (WIN, C)
    Wg = params['Wg']                                          # (C, C)
    bg = params['bg'].reshape(C, 1)
    gamma = params['gamma'].reshape(C, 1)
    beta = params['beta'].reshape(C, 1)

    out = pl.pallas_call(
        _tcb_kernel,
        out_shape=jax.ShapeDtypeStruct((B, snip, C, HW), jnp.float32),
        grid_spec=pltpu.PrefetchScalarGridSpec(
            num_scalar_prefetch=0,
            grid=(B,),
            in_specs=[
                pl.BlockSpec((1, snip, C, HW), lambda b: (b, 0, 0, 0)),  # x, read once
                pl.BlockSpec((WIN, C), lambda b: (0, 0)),                # W1
                pl.BlockSpec((WIN, 1), lambda b: (0, 0)),                # b1
                pl.BlockSpec((WIN, C, C), lambda b: (0, 0, 0)),          # W2
                pl.BlockSpec((WIN, C), lambda b: (0, 0)),                # b2
                pl.BlockSpec((C, WIN * C), lambda b: (0, 0)),            # W3 (concat)
                pl.BlockSpec((WIN, C), lambda b: (0, 0)),                # b3
                pl.BlockSpec((C, C), lambda b: (0, 0)),                  # Wg
                pl.BlockSpec((C, 1), lambda b: (0, 0)),                  # bg
                pl.BlockSpec((C, 1), lambda b: (0, 0)),                  # gamma
                pl.BlockSpec((C, 1), lambda b: (0, 0)),                  # beta
            ],
            out_specs=pl.BlockSpec((1, snip, C, HW), lambda b: (b, 0, 0, 0)),
            scratch_shapes=[pltpu.VMEM((C, snip * HW), jnp.float32)],
        ),
        compiler_params=pltpu.CompilerParams(
            dimension_semantics=("parallel",)),
    )(x5, W1, b1, W2, b2, W3c, b3, Wg, bg, gamma, beta)

    return out.reshape(BS, C, H, W)


def init_params(key, C):
    ks = jax.random.split(key, 8)
    return {
        'W1': jax.random.normal(ks[0], (WIN, C), jnp.float32) * 0.1,
        'b1': jax.random.normal(ks[1], (WIN,), jnp.float32) * 0.1,
        'W2': jax.random.normal(ks[2], (WIN, C, C), jnp.float32) * 0.1,
        'b2': jax.random.normal(ks[3], (WIN, C), jnp.float32) * 0.1,
        'W3': jax.random.normal(ks[4], (WIN, C, C), jnp.float32) * 0.1,
        'b3': jax.random.normal(ks[5], (WIN, C), jnp.float32) * 0.1,
        # NOTE: the PyTorch module zero-inits global_conv (last_zero_init);
        # we use small random weights so the final conv path is exercised.
        'Wg': jax.random.normal(ks[6], (C, C), jnp.float32) * 0.1,
        'bg': jax.random.normal(ks[7], (C,), jnp.float32) * 0.1,
        'gamma': jnp.ones((C,), jnp.float32),   # GroupNorm default affine init
        'beta': jnp.zeros((C,), jnp.float32),
    }


def ref_forward(x, p, snip):
    """Pure-JAX reference mirroring the PyTorch forward (mode1, window=5)."""
    BS, C, H, W = x.shape
    B = BS // snip
    HW = H * W
    x5 = x.reshape(B, snip, C, HW)
    outs = []
    for i in range(snip):
        start, S, add = window_params(i, snip)
        ff = x5[:, start:start + S]                                  # (B, S, C, HW)
        step2s = jnp.stack(
            [jnp.einsum('oc,bch->boh', p['W2'][j + add], ff[:, j])
             + p['b2'][j + add][None, :, None] for j in range(S)], axis=1)
        step1s = jnp.stack(
            [jnp.einsum('c,bch->bh', p['W1'][j + add], ff[:, j])
             + p['b1'][j + add] for j in range(S)], axis=1)          # (B, S, HW)
        sm = jax.nn.softmax(step1s, axis=1)
        attn = sm * sm.mean(-1, keepdims=True)
        pooled = jnp.einsum('bsch,bsh->bsc', step2s, attn)
        fm = ff + pooled[..., None]
        mean = fm.mean(axis=(1, 3), keepdims=True)
        var = fm.var(axis=(1, 3), keepdims=True)
        normed = (fm - mean) / jnp.sqrt(var + EPS)
        out = sum(jnp.einsum('oc,bch->boh', p['W3'][j + add], normed[:, j])
                  + p['b3'][j + add][None, :, None] for j in range(S))
        outs.append(out)
    outs = jnp.stack(outs, 1).reshape(BS, C, HW)
    gmean = outs.mean(axis=(1, 2), keepdims=True)
    gvar = outs.var(axis=(1, 2), keepdims=True)
    gn = (outs - gmean) / jnp.sqrt(gvar + EPS) * p['gamma'][None, :, None] \
        + p['beta'][None, :, None]
    r = jnp.maximum(gn, 0.0)
    go = jnp.einsum('oc,bch->boh', p['Wg'], r) + p['bg'][None, :, None]
    return (go + x.reshape(BS, C, HW)).reshape(BS, C, H, W)


if __name__ == "__main__":
    key = jax.random.PRNGKey(0)
    kx, kp = jax.random.split(key)
    B, snip, C, H, W = 2, 8, 8, 16, 16
    x = jax.random.normal(kx, (B * snip, C, H, W), jnp.float32)
    params = init_params(kp, C)

    out = jax.block_until_ready(temporal_context_block(x, params, snip))
    assert out.shape == (B * snip, C, H, W)

    ref = ref_forward(x, params, snip)
    err = float(jnp.max(jnp.abs(out - ref)))
    assert err < 1e-3, f"kernel/reference mismatch: {err}"
    print("KERNEL_OK")
</pallas_src>

<mosaic_0001>
module attributes {stable_mosaic.version = 11 : i64} {
  func.func @_tcb_kernel(%arg0: i32, %arg1: memref<1x8x8x256xf32, #tpu.memory_space<vmem>>, %arg2: memref<5x8xf32, #tpu.memory_space<vmem>>, %arg3: memref<5x1xf32, #tpu.memory_space<vmem>>, %arg4: memref<5x8x8xf32, #tpu.memory_space<vmem>>, %arg5: memref<5x8xf32, #tpu.memory_space<vmem>>, %arg6: memref<8x40xf32, #tpu.memory_space<vmem>>, %arg7: memref<5x8xf32, #tpu.memory_space<vmem>>, %arg8: memref<8x8xf32, #tpu.memory_space<vmem>>, %arg9: memref<8x1xf32, #tpu.memory_space<vmem>>, %arg10: memref<8x1xf32, #tpu.memory_space<vmem>>, %arg11: memref<8x1xf32, #tpu.memory_space<vmem>>, %arg12: memref<1x8x8x256xf32, #tpu.memory_space<vmem>>, %arg13: memref<8x2048xf32, #tpu.memory_space<vmem>>) attributes {dimension_semantics = [#tpu.dimension_semantics<parallel>], iteration_bounds = array<i64: 2>, scalar_prefetch = 0 : i64, scratch_operands = 1 : i64, tpu.core_type = #tpu.core_type<tc>, window_params = [{transform_indices = @transform_0, window_bounds = array<i64: 1, 8, 8, 256>}, {pipeline_mode = #tpu.pipeline_mode<synchronous>, transform_indices = @transform_1, window_bounds = array<i64: 5, 8>}, {pipeline_mode = #tpu.pipeline_mode<synchronous>, transform_indices = @transform_2, window_bounds = array<i64: 5, 1>}, {pipeline_mode = #tpu.pipeline_mode<synchronous>, transform_indices = @transform_3, window_bounds = array<i64: 5, 8, 8>}, {pipeline_mode = #tpu.pipeline_mode<synchronous>, transform_indices = @transform_4, window_bounds = array<i64: 5, 8>}, {pipeline_mode = #tpu.pipeline_mode<synchronous>, transform_indices = @transform_5, window_bounds = array<i64: 8, 40>}, {pipeline_mode = #tpu.pipeline_mode<synchronous>, transform_indices = @transform_6, window_bounds = array<i64: 5, 8>}, {pipeline_mode = #tpu.pipeline_mode<synchronous>, transform_indices = @transform_7, window_bounds = array<i64: 8, 8>}, {pipeline_mode = #tpu.pipeline_mode<synchronous>, transform_indices = @transform_8, window_bounds = array<i64: 8, 1>}, {pipeline_mode = #tpu.pipeline_mode<synchronous>, transform_indices = @transform_9, window_bounds = array<i64: 8, 1>}, {pipeline_mode = #tpu.pipeline_mode<synchronous>, transform_indices = @transform_10, window_bounds = array<i64: 8, 1>}, {transform_indices = @transform_11, window_bounds = array<i64: 1, 8, 8, 256>}]} {
    %c0 = arith.constant 0 : index
    %c0_0 = arith.constant 0 : index
    %0 = vector.load %arg2[%c0, %c0_0] : memref<5x8xf32, #tpu.memory_space<vmem>>, vector<5x8xf32>
    %c0_1 = arith.constant 0 : index
    %c0_2 = arith.constant 0 : index
    %1 = vector.load %arg3[%c0_1, %c0_2] : memref<5x1xf32, #tpu.memory_space<vmem>>, vector<5x1xf32>
    %c0_3 = arith.constant 0 : index
    %c0_4 = arith.constant 0 : index
    %c0_5 = arith.constant 0 : index
    %2 = vector.load %arg4[%c0_3, %c0_4, %c0_5] : memref<5x8x8xf32, #tpu.memory_space<vmem>>, vector<5x8x8xf32>
    %c0_6 = arith.constant 0 : index
    %c0_7 = arith.constant 0 : index
    %3 = vector.load %arg5[%c0_6, %c0_7] : memref<5x8xf32, #tpu.memory_space<vmem>>, vector<5x8xf32>
    %c0_8 = arith.constant 0 : index
    %c0_9 = arith.constant 0 : index
    %4 = vector.load %arg6[%c0_8, %c0_9] : memref<8x40xf32, #tpu.memory_space<vmem>>, vector<8x40xf32>
    %c0_10 = arith.constant 0 : index
    %c0_11 = arith.constant 0 : index
    %5 = vector.load %arg7[%c0_10, %c0_11] : memref<5x8xf32, #tpu.memory_space<vmem>>, vector<5x8xf32>
    %c0_12 = arith.constant 0 : index
    %c0_13 = arith.constant 0 : index
    %6 = vector.load %arg10[%c0_12, %c0_13] : memref<8x1xf32, #tpu.memory_space<vmem>>, vector<8x1xf32>
    %c0_14 = arith.constant 0 : index
    %c0_15 = arith.constant 0 : index
    %7 = vector.load %arg11[%c0_14, %c0_15] : memref<8x1xf32, #tpu.memory_space<vmem>>, vector<8x1xf32>
    %c0_16 = arith.constant 0 : index
    %c0_17 = arith.constant 0 : index
    %c0_18 = arith.constant 0 : index
    %c0_19 = arith.constant 0 : index
    %8 = vector.load %arg1[%c0_16, %c0_17, %c0_18, %c0_19] : memref<1x8x8x256xf32, #tpu.memory_space<vmem>>, vector<1x3x8x256xf32>
    %9 = vector.shape_cast %8 : vector<1x3x8x256xf32> to vector<3x8x256xf32>
    %10 = vector.extract_strided_slice %0 {offsets = [2, 0], sizes = [3, 8], strides = [1, 1]} : vector<5x8xf32> to vector<3x8xf32>
    %11 = vector.extract_strided_slice %1 {offsets = [2, 0], sizes = [3, 1], strides = [1, 1]} : vector<5x1xf32> to vector<3x1xf32>
    %12 = vector.extract_strided_slice %2 {offsets = [2, 0, 0], sizes = [3, 8, 8], strides = [1, 1, 1]} : vector<5x8x8xf32> to vector<3x8x8xf32>
    %13 = vector.extract_strided_slice %3 {offsets = [2, 0], sizes = [3, 8], strides = [1, 1]} : vector<5x8xf32> to vector<3x8xf32>
    %14 = vector.extract_strided_slice %5 {offsets = [2, 0], sizes = [3, 8], strides = [1, 1]} : vector<5x8xf32> to vector<3x8xf32>
    %15 = vector.shape_cast %10 : vector<3x8xf32> to vector<3x8x1xf32>
    %16 = vector.broadcast %15 : vector<3x8x1xf32> to vector<3x8x256xf32>
    %17 = arith.mulf %16, %9 : vector<3x8x256xf32>
    %cst = arith.constant dense<0.000000e+00> : vector<3x256xf32>
    %18 = vector.multi_reduction <add>, %17, %cst [1] : vector<3x8x256xf32> to vector<3x256xf32>
    %19 = vector.broadcast %11 : vector<3x1xf32> to vector<3x256xf32>
    %20 = arith.addf %18, %19 : vector<3x256xf32>
    %cst_20 = arith.constant dense<0xFF800000> : vector<256xf32>
    %21 = vector.multi_reduction <maximumf>, %20, %cst_20 [0] : vector<3x256xf32> to vector<256xf32>
    %22 = vector.shape_cast %21 : vector<256xf32> to vector<1x256xf32>
    %23 = vector.broadcast %22 : vector<1x256xf32> to vector<3x256xf32>
    %24 = arith.subf %20, %23 : vector<3x256xf32>
    %25 = math.exp %24 : vector<3x256xf32>
    %cst_21 = arith.constant dense<0.000000e+00> : vector<256xf32>
    %26 = vector.multi_reduction <add>, %25, %cst_21 [0] : vector<3x256xf32> to vector<256xf32>
    %27 = vector.shape_cast %26 : vector<256xf32> to vector<1x256xf32>
    %28 = vector.broadcast %27 : vector<1x256xf32> to vector<3x256xf32>
    %29 = arith.divf %25, %28 : vector<3x256xf32>
    %cst_22 = arith.constant dense<0.000000e+00> : vector<3xf32>
    %30 = vector.multi_reduction <add>, %29, %cst_22 [1] : vector<3x256xf32> to vector<3xf32>
    %31 = vector.shape_cast %30 : vector<3xf32> to vector<3x1xf32>
    %cst_23 = arith.constant 2.560000e+02 : f32
    %32 = vector.broadcast %cst_23 : f32 to vector<3x1xf32>
    %33 = arith.divf %31, %32 : vector<3x1xf32>
    %34 = vector.broadcast %33 : vector<3x1xf32> to vector<3x256xf32>
    %35 = arith.mulf %29, %34 : vector<3x256xf32>
    %36 = vector.shape_cast %35 : vector<3x256xf32> to vector<3x1x256xf32>
    %37 = vector.broadcast %36 : vector<3x1x256xf32> to vector<3x8x256xf32>
    %38 = arith.mulf %9, %37 : vector<3x8x256xf32>
    %cst_24 = arith.constant dense<0.000000e+00> : vector<3x8xf32>
    %39 = vector.multi_reduction <add>, %38, %cst_24 [2] : vector<3x8x256xf32> to vector<3x8xf32>
    %cst_25 = arith.constant dense<0.000000e+00> : vector<3xf32>
    %40 = vector.multi_reduction <add>, %35, %cst_25 [1] : vector<3x256xf32> to vector<3xf32>
    %41 = vector.shape_cast %40 : vector<3xf32> to vector<3x1xf32>
    %42 = vector.shape_cast %39 : vector<3x8xf32> to vector<3x1x8xf32>
    %43 = vector.broadcast %42 : vector<3x1x8xf32> to vector<3x8x8xf32>
    %44 = arith.mulf %12, %43 : vector<3x8x8xf32>
    %cst_26 = arith.constant dense<0.000000e+00> : vector<3x8xf32>
    %45 = vector.multi_reduction <add>, %44, %cst_26 [2] : vector<3x8x8xf32> to vector<3x8xf32>
    %46 = vector.broadcast %41 : vector<3x1xf32> to vector<3x8xf32>
    %47 = arith.mulf %13, %46 : vector<3x8xf32>
    %48 = arith.addf %45, %47 : vector<3x8xf32>
    %49 = vector.shape_cast %48 : vector<3x8xf32> to vector<3x8x1xf32>
    %50 = vector.broadcast %49 : vector<3x8x1xf32> to vector<3x8x256xf32>
    %51 = arith.addf %9, %50 : vector<3x8x256xf32>
    %cst_27 = arith.constant dense<0.000000e+00> : vector<3x8xf32>
    %52 = vector.multi_reduction <add>, %51, %cst_27 [2] : vector<3x8x256xf32> to vector<3x8xf32>
    %53 = vector.shape_cast %52 : vector<3x8xf32> to vector<3x8x1xf32>
    %cst_28 = arith.constant dense<0.000000e+00> : vector<8x1xf32>
    %54 = vector.multi_reduction <add>, %53, %cst_28 [0] : vector<3x8x1xf32> to vector<8x1xf32>
    %55 = vector.shape_cast %54 : vector<8x1xf32> to vector<1x8x1xf32>
    %cst_29 = arith.constant 7.680000e+02 : f32
    %56 = vector.broadcast %cst_29 : f32 to vector<1x8x1xf32>
    %57 = arith.divf %55, %56 : vector<1x8x1xf32>
    %58 = vector.broadcast %57 : vector<1x8x1xf32> to vector<3x8x256xf32>
    %59 = arith.subf %51, %58 : vector<3x8x256xf32>
    %60 = arith.mulf %59, %59 : vector<3x8x256xf32>
    %cst_30 = arith.constant dense<0.000000e+00> : vector<3x8xf32>
    %61 = vector.multi_reduction <add>, %60, %cst_30 [2] : vector<3x8x256xf32> to vector<3x8xf32>
    %62 = vector.shape_cast %61 : vector<3x8xf32> to vector<3x8x1xf32>
    %cst_31 = arith.constant dense<0.000000e+00> : vector<8x1xf32>
    %63 = vector.multi_reduction <add>, %62, %cst_31 [0] : vector<3x8x1xf32> to vector<8x1xf32>
    %64 = vector.shape_cast %63 : vector<8x1xf32> to vector<1x8x1xf32>
    %cst_32 = arith.constant 7.680000e+02 : f32
    %65 = vector.broadcast %cst_32 : f32 to vector<1x8x1xf32>
    %66 = arith.divf %64, %65 : vector<1x8x1xf32>
    %cst_33 = arith.constant 9.99999974E-6 : f32
    %67 = vector.broadcast %cst_33 : f32 to vector<1x8x1xf32>
    %68 = arith.addf %66, %67 : vector<1x8x1xf32>
    %69 = math.rsqrt %68 : vector<1x8x1xf32>
    %70 = vector.broadcast %69 : vector<1x8x1xf32> to vector<3x8x256xf32>
    %71 = arith.mulf %59, %70 : vector<3x8x256xf32>
    %72 = vector.extract_strided_slice %4 {offsets = [0, 16], sizes = [8, 24], strides = [1, 1]} : vector<8x40xf32> to vector<8x24xf32>
    %73 = vector.shape_cast %71 : vector<3x8x256xf32> to vector<24x256xf32>
    %cst_34 = arith.constant dense<0.000000e+00> : vector<8x256xf32>
    %74 = tpu.matmul %72, %73, %cst_34 {dimension_numbers = #tpu.dot_dimension_numbers<[1], [0], [0], [1], [0, 0, 1, 1], [], []>} : vector<8x24xf32>, vector<24x256xf32>, vector<8x256xf32> -> vector<8x256xf32>
    %cst_35 = arith.constant dense<0.000000e+00> : vector<8xf32>
    %75 = vector.multi_reduction <add>, %14, %cst_35 [0] : vector<3x8xf32> to vector<8xf32>
    %76 = vector.shape_cast %75 : vector<8xf32> to vector<8x1xf32>
    %77 = vector.broadcast %76 : vector<8x1xf32> to vector<8x256xf32>
    %78 = arith.addf %74, %77 : vector<8x256xf32>
    %79 = vector.shape_cast %78 : vector<8x256xf32> to vector<1x8x256xf32>
    %cst_36 = arith.constant dense<0.000000e+00> : vector<1xf32>
    %80 = vector.multi_reduction <add>, %79, %cst_36 [1, 2] : vector<1x8x256xf32> to vector<1xf32>
    %81 = vector.shape_cast %80 : vector<1xf32> to vector<1x1x1xf32>
    %82 = vector.extract %81[0, 0, 0] : f32 from vector<1x1x1xf32>
    %cst_37 = arith.constant 2.048000e+03 : f32
    %83 = arith.divf %82, %cst_37 : f32
    %84 = vector.broadcast %83 : f32 to vector<8x256xf32>
    %85 = arith.subf %78, %84 : vector<8x256xf32>
    %86 = arith.mulf %85, %85 : vector<8x256xf32>
    %87 = vector.shape_cast %86 : vector<8x256xf32> to vector<1x8x256xf32>
    %cst_38 = arith.constant dense<0.000000e+00> : vector<1xf32>
    %88 = vector.multi_reduction <add>, %87, %cst_38 [1, 2] : vector<1x8x256xf32> to vector<1xf32>
    %89 = vector.shape_cast %88 : vector<1xf32> to vector<1x1x1xf32>
    %90 = vector.extract %89[0, 0, 0] : f32 from vector<1x1x1xf32>
    %cst_39 = arith.constant 2.048000e+03 : f32
    %91 = arith.divf %90, %cst_39 : f32
    %cst_40 = arith.constant 9.99999974E-6 : f32
    %92 = arith.addf %91, %cst_40 : f32
    %93 = math.rsqrt %92 : f32
    %94 = vector.broadcast %93 : f32 to vector<8x256xf32>
    %95 = arith.mulf %85, %94 : vector<8x256xf32>
    %96 = vector.broadcast %6 : vector<8x1xf32> to vector<8x256xf32>
    %97 = arith.mulf %95, %96 : vector<8x256xf32>
    %98 = vector.broadcast %7 : vector<8x1xf32> to vector<8x256xf32>
    %99 = arith.addf %97, %98 : vector<8x256xf32>
    %cst_41 = arith.constant 0.000000e+00 : f32
    %100 = vector.broadcast %cst_41 : f32 to vector<8x256xf32>
    %101 = arith.maximumf %99, %100 : vector<8x256xf32>
    %c0_42 = arith.constant 0 : index
    %c0_43 = arith.constant 0 : index
    %102 = vector.load %arg13[%c0_42, %c0_43] : memref<8x2048xf32, #tpu.memory_space<vmem>>, vector<8x256xf32>
    tpu.vector_store %arg13[%c0_42, %c0_43], %101 {strides = array<i32>} : memref<8x2048xf32, #tpu.memory_space<vmem>>, vector<8x256xf32>,
    %c0_44 = arith.constant 0 : index
    %c0_45 = arith.constant 0 : index
    %c0_46 = arith.constant 0 : index
    %c0_47 = arith.constant 0 : index
    %103 = vector.load %arg1[%c0_44, %c0_45, %c0_46, %c0_47] : memref<1x8x8x256xf32, #tpu.memory_space<vmem>>, vector<1x4x8x256xf32>
    %104 = vector.shape_cast %103 : vector<1x4x8x256xf32> to vector<4x8x256xf32>
    %105 = vector.extract_strided_slice %0 {offsets = [1, 0], sizes = [4, 8], strides = [1, 1]} : vector<5x8xf32> to vector<4x8xf32>
    %106 = vector.extract_strided_slice %1 {offsets = [1, 0], sizes = [4, 1], strides = [1, 1]} : vector<5x1xf32> to vector<4x1xf32>
    %107 = vector.extract_strided_slice %2 {offsets = [1, 0, 0], sizes = [4, 8, 8], strides = [1, 1, 1]} : vector<5x8x8xf32> to vector<4x8x8xf32>
    %108 = vector.extract_strided_slice %3 {offsets = [1, 0], sizes = [4, 8], strides = [1, 1]} : vector<5x8xf32> to vector<4x8xf32>
    %109 = vector.extract_strided_slice %5 {offsets = [1, 0], sizes = [4, 8], strides = [1, 1]} : vector<5x8xf32> to vector<4x8xf32>
    %110 = vector.shape_cast %105 : vector<4x8xf32> to vector<4x8x1xf32>
    %111 = vector.broadcast %110 : vector<4x8x1xf32> to vector<4x8x256xf32>
    %112 = arith.mulf %111, %104 : vector<4x8x256xf32>
    %cst_48 = arith.constant dense<0.000000e+00> : vector<4x256xf32>
    %113 = vector.multi_reduction <add>, %112, %cst_48 [1] : vector<4x8x256xf32> to vector<4x256xf32>
    %114 = vector.broadcast %106 : vector<4x1xf32> to vector<4x256xf32>
    %115 = arith.addf %113, %114 : vector<4x256xf32>
    %cst_49 = arith.constant dense<0xFF800000> : vector<256xf32>
    %116 = vector.multi_reduction <maximumf>, %115, %cst_49 [0] : vector<4x256xf32> to vector<256xf32>
    %117 = vector.shape_cast %116 : vector<256xf32> to vector<1x256xf32>
    %118 = vector.broadcast %117 : vector<1x256xf32> to vector<4x256xf32>
    %119 = arith.subf %115, %118 : vector<4x256xf32>
    %120 = math.exp %119 : vector<4x256xf32>
    %cst_50 = arith.constant dense<0.000000e+00> : vector<256xf32>
    %121 = vector.multi_reduction <add>, %120, %cst_50 [0] : vector<4x256xf32> to vector<256xf32>
    %122 = vector.shape_cast %121 : vector<256xf32> to vector<1x256xf32>
    %123 = vector.broadcast %122 : vector<1x256xf32> to vector<4x256xf32>
    %124 = arith.divf %120, %123 : vector<4x256xf32>
    %cst_51 = arith.constant dense<0.000000e+00> : vector<4xf32>
    %125 = vector.multi_reduction <add>, %124, %cst_51 [1] : vector<4x256xf32> to vector<4xf32>
    %126 = vector.shape_cast %125 : vector<4xf32> to vector<4x1xf32>
    %cst_52 = arith.constant 2.560000e+02 : f32
    %127 = vector.broadcast %cst_52 : f32 to vector<4x1xf32>
    %128 = arith.divf %126, %127 : vector<4x1xf32>
    %129 = vector.broadcast %128 : vector<4x1xf32> to vector<4x256xf32>
    %130 = arith.mulf %124, %129 : vector<4x256xf32>
    %131 = vector.shape_cast %130 : vector<4x256xf32> to vector<4x1x256xf32>
    %132 = vector.broadcast %131 : vector<4x1x256xf32> to vector<4x8x256xf32>
    %133 = arith.mulf %104, %132 : vector<4x8x256xf32>
    %cst_53 = arith.constant dense<0.000000e+00> : vector<4x8xf32>
    %134 = vector.multi_reduction <add>, %133, %cst_53 [2] : vector<4x8x256xf32> to vector<4x8xf32>
    %cst_54 = arith.constant dense<0.000000e+00> : vector<4xf32>
    %135 = vector.multi_reduction <add>, %130, %cst_54 [1] : vector<4x256xf32> to vector<4xf32>
    %136 = vector.shape_cast %135 : vector<4xf32> to vector<4x1xf32>
    %137 = vector.shape_cast %134 : vector<4x8xf32> to vector<4x1x8xf32>
    %138 = vector.broadcast %137 : vector<4x1x8xf32> to vector<4x8x8xf32>
    %139 = arith.mulf %107, %138 : vector<4x8x8xf32>
    %cst_55 = arith.constant dense<0.000000e+00> : vector<4x8xf32>
    %140 = vector.multi_reduction <add>, %139, %cst_55 [2] : vector<4x8x8xf32> to vector<4x8xf32>
    %141 = vector.broadcast %136 : vector<4x1xf32> to vector<4x8xf32>
    %142 = arith.mulf %108, %141 : vector<4x8xf32>
    %143 = arith.addf %140, %142 : vector<4x8xf32>
    %144 = vector.shape_cast %143 : vector<4x8xf32> to vector<4x8x1xf32>
    %145 = vector.broadcast %144 : vector<4x8x1xf32> to vector<4x8x256xf32>
    %146 = arith.addf %104, %145 : vector<4x8x256xf32>
    %cst_56 = arith.constant dense<0.000000e+00> : vector<4x8xf32>
    %147 = vector.multi_reduction <add>, %146, %cst_56 [2] : vector<4x8x256xf32> to vector<4x8xf32>
    %148 = vector.shape_cast %147 : vector<4x8xf32> to vector<4x8x1xf32>
    %cst_57 = arith.constant dense<0.000000e+00> : vector<8x1xf32>
    %149 = vector.multi_reduction <add>, %148, %cst_57 [0] : vector<4x8x1xf32> to vector<8x1xf32>
    %150 = vector.shape_cast %149 : vector<8x1xf32> to vector<1x8x1xf32>
    %cst_58 = arith.constant 1.024000e+03 : f32
    %151 = vector.broadcast %cst_58 : f32 to vector<1x8x1xf32>
    %152 = arith.divf %150, %151 : vector<1x8x1xf32>
    %153 = vector.broadcast %152 : vector<1x8x1xf32> to vector<4x8x256xf32>
    %154 = arith.subf %146, %153 : vector<4x8x256xf32>
    %155 = arith.mulf %154, %154 : vector<4x8x256xf32>
    %cst_59 = arith.constant dense<0.000000e+00> : vector<4x8xf32>
    %156 = vector.multi_reduction <add>, %155, %cst_59 [2] : vector<4x8x256xf32> to vector<4x8xf32>
    %157 = vector.shape_cast %156 : vector<4x8xf32> to vector<4x8x1xf32>
    %cst_60 = arith.constant dense<0.000000e+00> : vector<8x1xf32>
    %158 = vector.multi_reduction <add>, %157, %cst_60 [0] : vector<4x8x1xf32> to vector<8x1xf32>
    %159 = vector.shape_cast %158 : vector<8x1xf32> to vector<1x8x1xf32>
    %cst_61 = arith.constant 1.024000e+03 : f32
    %160 = vector.broadcast %cst_61 : f32 to vector<1x8x1xf32>
    %161 = arith.divf %159, %160 : vector<1x8x1xf32>
    %cst_62 = arith.constant 9.99999974E-6 : f32
    %162 = vector.broadcast %cst_62 : f32 to vector<1x8x1xf32>
    %163 = arith.addf %161, %162 : vector<1x8x1xf32>
    %164 = math.rsqrt %163 : vector<1x8x1xf32>
    %165 = vector.broadcast %164 : vector<1x8x1xf32> to vector<4x8x256xf32>
    %166 = arith.mulf %154, %165 : vector<4x8x256xf32>
    %167 = vector.extract_strided_slice %4 {offsets = [0, 8], sizes = [8, 32], strides = [1, 1]} : vector<8x40xf32> to vector<8x32xf32>
    %168 = vector.shape_cast %166 : vector<4x8x256xf32> to vector<32x256xf32>
    %cst_63 = arith.constant dense<0.000000e+00> : vector<8x256xf32>
    %169 = tpu.matmul %167, %168, %cst_63 {dimension_numbers = #tpu.dot_dimension_numbers<[1], [0], [0], [1], [0, 0, 1, 1], [], []>} : vector<8x32xf32>, vector<32x256xf32>, vector<8x256xf32> -> vector<8x256xf32>
    %cst_64 = arith.constant dense<0.000000e+00> : vector<8xf32>
    %170 = vector.multi_reduction <add>, %109, %cst_64 [0] : vector<4x8xf32> to vector<8xf32>
    %171 = vector.shape_cast %170 : vector<8xf32> to vector<8x1xf32>
    %172 = vector.broadcast %171 : vector<8x1xf32> to vector<8x256xf32>
    %173 = arith.addf %169, %172 : vector<8x256xf32>
    %174 = vector.shape_cast %173 : vector<8x256xf32> to vector<1x8x256xf32>
    %cst_65 = arith.constant dense<0.000000e+00> : vector<1xf32>
    %175 = vector.multi_reduction <add>, %174, %cst_65 [1, 2] : vector<1x8x256xf32> to vector<1xf32>
    %176 = vector.shape_cast %175 : vector<1xf32> to vector<1x1x1xf32>
    %177 = vector.extract %176[0, 0, 0] : f32 from vector<1x1x1xf32>
    %cst_66 = arith.constant 2.048000e+03 : f32
    %178 = arith.divf %177, %cst_66 : f32
    %179 = vector.broadcast %178 : f32 to vector<8x256xf32>
    %180 = arith.subf %173, %179 : vector<8x256xf32>
    %181 = arith.mulf %180, %180 : vector<8x256xf32>
    %182 = vector.shape_cast %181 : vector<8x256xf32> to vector<1x8x256xf32>
    %cst_67 = arith.constant dense<0.000000e+00> : vector<1xf32>
    %183 = vector.multi_reduction <add>, %182, %cst_67 [1, 2] : vector<1x8x256xf32> to vector<1xf32>
    %184 = vector.shape_cast %183 : vector<1xf32> to vector<1x1x1xf32>
    %185 = vector.extract %184[0, 0, 0] : f32 from vector<1x1x1xf32>
    %cst_68 = arith.constant 2.048000e+03 : f32
    %186 = arith.divf %185, %cst_68 : f32
    %cst_69 = arith.constant 9.99999974E-6 : f32
    %187 = arith.addf %186, %cst_69 : f32
    %188 = math.rsqrt %187 : f32
    %189 = vector.broadcast %188 : f32 to vector<8x256xf32>
    %190 = arith.mulf %180, %189 : vector<8x256xf32>
    %191 = vector.broadcast %6 : vector<8x1xf32> to vector<8x256xf32>
    %192 = arith.mulf %190, %191 : vector<8x256xf32>
    %193 = vector.broadcast %7 : vector<8x1xf32> to vector<8x256xf32>
    %194 = arith.addf %192, %193 : vector<8x256xf32>
    %cst_70 = arith.constant 0.000000e+00 : f32
    %195 = vector.broadcast %cst_70 : f32 to vector<8x256xf32>
    %196 = arith.maximumf %194, %195 : vector<8x256xf32>
    %c0_71 = arith.constant 0 : index
    %c256 = arith.constant 256 : index
    %197 = vector.load %arg13[%c0_71, %c256] : memref<8x2048xf32, #tpu.memory_space<vmem>>, vector<8x256xf32>
    tpu.vector_store %arg13[%c0_71, %c256], %196 {strides = array<i32>} : memref<8x2048xf32, #tpu.memory_space<vmem>>, vector<8x256xf32>,
    %c0_72 = arith.constant 0 : index
    %c0_73 = arith.constant 0 : index
    %c0_74 = arith.constant 0 : index
    %c0_75 = arith.constant 0 : index
    %198 = vector.load %arg1[%c0_72, %c0_73, %c0_74, %c0_75] : memref<1x8x8x256xf32, #tpu.memory_space<vmem>>, vector<1x5x8x256xf32>
    %199 = vector.shape_cast %198 : vector<1x5x8x256xf32> to vector<5x8x256xf32>
    %200 = vector.shape_cast %0 : vector<5x8xf32> to vector<5x8x1xf32>
    %201 = vector.broadcast %200 : vector<5x8x1xf32> to vector<5x8x256xf32>
    %202 = arith.mulf %201, %199 : vector<5x8x256xf32>
    %cst_76 = arith.constant dense<0.000000e+00> : vector<5x256xf32>
    %203 = vector.multi_reduction <add>, %202, %cst_76 [1] : vector<5x8x256xf32> to vector<5x256xf32>
    %204 = vector.broadcast %1 : vector<5x1xf32> to vector<5x256xf32>
    %205 = arith.addf %203, %204 : vector<5x256xf32>
    %cst_77 = arith.constant dense<0xFF800000> : vector<256xf32>
    %206 = vector.multi_reduction <maximumf>, %205, %cst_77 [0] : vector<5x256xf32> to vector<256xf32>
    %207 = vector.shape_cast %206 : vector<256xf32> to vector<1x256xf32>
    %208 = vector.broadcast %207 : vector<1x256xf32> to vector<5x256xf32>
    %209 = arith.subf %205, %208 : vector<5x256xf32>
    %210 = math.exp %209 : vector<5x256xf32>
    %cst_78 = arith.constant dense<0.000000e+00> : vector<256xf32>
    %211 = vector.multi_reduction <add>, %210, %cst_78 [0] : vector<5x256xf32> to vector<256xf32>
    %212 = vector.shape_cast %211 : vector<256xf32> to vector<1x256xf32>
    %213 = vector.broadcast %212 : vector<1x256xf32> to vector<5x256xf32>
    %214 = arith.divf %210, %213 : vector<5x256xf32>
    %cst_79 = arith.constant dense<0.000000e+00> : vector<5xf32>
    %215 = vector.multi_reduction <add>, %214, %cst_79 [1] : vector<5x256xf32> to vector<5xf32>
    %216 = vector.shape_cast %215 : vector<5xf32> to vector<5x1xf32>
    %cst_80 = arith.constant 2.560000e+02 : f32
    %217 = vector.broadcast %cst_80 : f32 to vector<5x1xf32>
    %218 = arith.divf %216, %217 : vector<5x1xf32>
    %219 = vector.broadcast %218 : vector<5x1xf32> to vector<5x256xf32>
    %220 = arith.mulf %214, %219 : vector<5x256xf32>
    %221 = vector.shape_cast %220 : vector<5x256xf32> to vector<5x1x256xf32>
    %222 = vector.broadcast %221 : vector<5x1x256xf32> to vector<5x8x256xf32>
    %223 = arith.mulf %199, %222 : vector<5x8x256xf32>
    %cst_81 = arith.constant dense<0.000000e+00> : vector<5x8xf32>
    %224 = vector.multi_reduction <add>, %223, %cst_81 [2] : vector<5x8x256xf32> to vector<5x8xf32>
    %cst_82 = arith.constant dense<0.000000e+00> : vector<5xf32>
    %225 = vector.multi_reduction <add>, %220, %cst_82 [1] : vector<5x256xf32> to vector<5xf32>
    %226 = vector.shape_cast %225 : vector<5xf32> to vector<5x1xf32>
    %227 = vector.shape_cast %224 : vector<5x8xf32> to vector<5x1x8xf32>
    %228 = vector.broadcast %227 : vector<5x1x8xf32> to vector<5x8x8xf32>
    %229 = arith.mulf %2, %228 : vector<5x8x8xf32>
    %cst_83 = arith.constant dense<0.000000e+00> : vector<5x8xf32>
    %230 = vector.multi_reduction <add>, %229, %cst_83 [2] : vector<5x8x8xf32> to vector<5x8xf32>
    %231 = vector.broadcast %226 : vector<5x1xf32> to vector<5x8xf32>
    %232 = arith.mulf %3, %231 : vector<5x8xf32>
    %233 = arith.addf %230, %232 : vector<5x8xf32>
    %234 = vector.shape_cast %233 : vector<5x8xf32> to vector<5x8x1xf32>
    %235 = vector.broadcast %234 : vector<5x8x1xf32> to vector<5x8x256xf32>
    %236 = arith.addf %199, %235 : vector<5x8x256xf32>
    %cst_84 = arith.constant dense<0.000000e+00> : vector<5x8xf32>
    %237 = vector.multi_reduction <add>, %236, %cst_84 [2] : vector<5x8x256xf32> to vector<5x8xf32>
    %238 = vector.shape_cast %237 : vector<5x8xf32> to vector<5x8x1xf32>
    %cst_85 = arith.constant dense<0.000000e+00> : vector<8x1xf32>
    %239 = vector.multi_reduction <add>, %238, %cst_85 [0] : vector<5x8x1xf32> to vector<8x1xf32>
    %240 = vector.shape_cast %239 : vector<8x1xf32> to vector<1x8x1xf32>
    %cst_86 = arith.constant 1.280000e+03 : f32
    %241 = vector.broadcast %cst_86 : f32 to vector<1x8x1xf32>
    %242 = arith.divf %240, %241 : vector<1x8x1xf32>
    %243 = vector.broadcast %242 : vector<1x8x1xf32> to vector<5x8x256xf32>
    %244 = arith.subf %236, %243 : vector<5x8x256xf32>
    %245 = arith.mulf %244, %244 : vector<5x8x256xf32>
    %cst_87 = arith.constant dense<0.000000e+00> : vector<5x8xf32>
    %246 = vector.multi_reduction <add>, %245, %cst_87 [2] : vector<5x8x256xf32> to vector<5x8xf32>
    %247 = vector.shape_cast %246 : vector<5x8xf32> to vector<5x8x1xf32>
    %cst_88 = arith.constant dense<0.000000e+00> : vector<8x1xf32>
    %248 = vector.multi_reduction <add>, %247, %cst_88 [0] : vector<5x8x1xf32> to vector<8x1xf32>
    %249 = vector.shape_cast %248 : vector<8x1xf32> to vector<1x8x1xf32>
    %cst_89 = arith.constant 1.280000e+03 : f32
    %250 = vector.broadcast %cst_89 : f32 to vector<1x8x1xf32>
    %251 = arith.divf %249, %250 : vector<1x8x1xf32>
    %cst_90 = arith.constant 9.99999974E-6 : f32
    %252 = vector.broadcast %cst_90 : f32 to vector<1x8x1xf32>
    %253 = arith.addf %251, %252 : vector<1x8x1xf32>
    %254 = math.rsqrt %253 : vector<1x8x1xf32>
    %255 = vector.broadcast %254 : vector<1x8x1xf32> to vector<5x8x256xf32>
    %256 = arith.mulf %244, %255 : vector<5x8x256xf32>
    %257 = vector.shape_cast %256 : vector<5x8x256xf32> to vector<40x256xf32>
    %cst_91 = arith.constant dense<0.000000e+00> : vector<8x256xf32>
    %258 = tpu.matmul %4, %257, %cst_91 {dimension_numbers = #tpu.dot_dimension_numbers<[1], [0], [0], [1], [0, 0, 1, 1], [], []>} : vector<8x40xf32>, vector<40x256xf32>, vector<8x256xf32> -> vector<8x256xf32>
    %cst_92 = arith.constant dense<0.000000e+00> : vector<8xf32>
    %259 = vector.multi_reduction <add>, %5, %cst_92 [0] : vector<5x8xf32> to vector<8xf32>
    %260 = vector.shape_cast %259 : vector<8xf32> to vector<8x1xf32>
    %261 = vector.broadcast %260 : vector<8x1xf32> to vector<8x256xf32>
    %262 = arith.addf %258, %261 : vector<8x256xf32>
    %263 = vector.shape_cast %262 : vector<8x256xf32> to vector<1x8x256xf32>
    %cst_93 = arith.constant dense<0.000000e+00> : vector<1xf32>
    %264 = vector.multi_reduction <add>, %263, %cst_93 [1, 2] : vector<1x8x256xf32> to vector<1xf32>
    %265 = vector.shape_cast %264 : vector<1xf32> to vector<1x1x1xf32>
    %266 = vector.extract %265[0, 0, 0] : f32 from vector<1x1x1xf32>
    %cst_94 = arith.constant 2.048000e+03 : f32
    %267 = arith.divf %266, %cst_94 : f32
    %268 = vector.broadcast %267 : f32 to vector<8x256xf32>
    %269 = arith.subf %262, %268 : vector<8x256xf32>
    %270 = arith.mulf %269, %269 : vector<8x256xf32>
    %271 = vector.shape_cast %270 : vector<8x256xf32> to vector<1x8x256xf32>
    %cst_95 = arith.constant dense<0.000000e+00> : vector<1xf32>
    %272 = vector.multi_reduction <add>, %271, %cst_95 [1, 2] : vector<1x8x256xf32> to vector<1xf32>
    %273 = vector.shape_cast %272 : vector<1xf32> to vector<1x1x1xf32>
    %274 = vector.extract %273[0, 0, 0] : f32 from vector<1x1x1xf32>
    %cst_96 = arith.constant 2.048000e+03 : f32
    %275 = arith.divf %274, %cst_96 : f32
    %cst_97 = arith.constant 9.99999974E-6 : f32
    %276 = arith.addf %275, %cst_97 : f32
    %277 = math.rsqrt %276 : f32
    %278 = vector.broadcast %277 : f32 to vector<8x256xf32>
    %279 = arith.mulf %269, %278 : vector<8x256xf32>
    %280 = vector.broadcast %6 : vector<8x1xf32> to vector<8x256xf32>
    %281 = arith.mulf %279, %280 : vector<8x256xf32>
    %282 = vector.broadcast %7 : vector<8x1xf32> to vector<8x256xf32>
    %283 = arith.addf %281, %282 : vector<8x256xf32>
    %cst_98 = arith.constant 0.000000e+00 : f32
    %284 = vector.broadcast %cst_98 : f32 to vector<8x256xf32>
    %285 = arith.maximumf %283, %284 : vector<8x256xf32>
    %c0_99 = arith.constant 0 : index
    %c512 = arith.constant 512 : index
    %286 = vector.load %arg13[%c0_99, %c512] : memref<8x2048xf32, #tpu.memory_space<vmem>>, vector<8x256xf32>
    tpu.vector_store %arg13[%c0_99, %c512], %285 {strides = array<i32>} : memref<8x2048xf32, #tpu.memory_space<vmem>>, vector<8x256xf32>,
    %c0_100 = arith.constant 0 : index
    %c1 = arith.constant 1 : index
    %c0_101 = arith.constant 0 : index
    %c0_102 = arith.constant 0 : index
    %287 = vector.load %arg1[%c0_100, %c1, %c0_101, %c0_102] : memref<1x8x8x256xf32, #tpu.memory_space<vmem>>, vector<1x5x8x256xf32>
    %288 = vector.shape_cast %287 : vector<1x5x8x256xf32> to vector<5x8x256xf32>
    %289 = vector.shape_cast %0 : vector<5x8xf32> to vector<5x8x1xf32>
    %290 = vector.broadcast %289 : vector<5x8x1xf32> to vector<5x8x256xf32>
    %291 = arith.mulf %290, %288 : vector<5x8x256xf32>
    %cst_103 = arith.constant dense<0.000000e+00> : vector<5x256xf32>
    %292 = vector.multi_reduction <add>, %291, %cst_103 [1] : vector<5x8x256xf32> to vector<5x256xf32>
    %293 = vector.broadcast %1 : vector<5x1xf32> to vector<5x256xf32>
    %294 = arith.addf %292, %293 : vector<5x256xf32>
    %cst_104 = arith.constant dense<0xFF800000> : vector<256xf32>
    %295 = vector.multi_reduction <maximumf>, %294, %cst_104 [0] : vector<5x256xf32> to vector<256xf32>
    %296 = vector.shape_cast %295 : vector<256xf32> to vector<1x256xf32>
    %297 = vector.broadcast %296 : vector<1x256xf32> to vector<5x256xf32>
    %298 = arith.subf %294, %297 : vector<5x256xf32>
    %299 = math.exp %298 : vector<5x256xf32>
    %cst_105 = arith.constant dense<0.000000e+00> : vector<256xf32>
    %300 = vector.multi_reduction <add>, %299, %cst_105 [0] : vector<5x256xf32> to vector<256xf32>
    %301 = vector.shape_cast %300 : vector<256xf32> to vector<1x256xf32>
    %302 = vector.broadcast %301 : vector<1x256xf32> to vector<5x256xf32>
    %303 = arith.divf %299, %302 : vector<5x256xf32>
    %cst_106 = arith.constant dense<0.000000e+00> : vector<5xf32>
    %304 = vector.multi_reduction <add>, %303, %cst_106 [1] : vector<5x256xf32> to vector<5xf32>
    %305 = vector.shape_cast %304 : vector<5xf32> to vector<5x1xf32>
    %cst_107 = arith.constant 2.560000e+02 : f32
    %306 = vector.broadcast %cst_107 : f32 to vector<5x1xf32>
    %307 = arith.divf %305, %306 : vector<5x1xf32>
    %308 = vector.broadcast %307 : vector<5x1xf32> to vector<5x256xf32>
    %309 = arith.mulf %303, %308 : vector<5x256xf32>
    %310 = vector.shape_cast %309 : vector<5x256xf32> to vector<5x1x256xf32>
    %311 = vector.broadcast %310 : vector<5x1x256xf32> to vector<5x8x256xf32>
    %312 = arith.mulf %288, %311 : vector<5x8x256xf32>
    %cst_108 = arith.constant dense<0.000000e+00> : vector<5x8xf32>
    %313 = vector.multi_reduction <add>, %312, %cst_108 [2] : vector<5x8x256xf32> to vector<5x8xf32>
    %cst_109 = arith.constant dense<0.000000e+00> : vector<5xf32>
    %314 = vector.multi_reduction <add>, %309, %cst_109 [1] : vector<5x256xf32> to vector<5xf32>
    %315 = vector.shape_cast %314 : vector<5xf32> to vector<5x1xf32>
    %316 = vector.shape_cast %313 : vector<5x8xf32> to vector<5x1x8xf32>
    %317 = vector.broadcast %316 : vector<5x1x8xf32> to vector<5x8x8xf32>
    %318 = arith.mulf %2, %317 : vector<5x8x8xf32>
    %cst_110 = arith.constant dense<0.000000e+00> : vector<5x8xf32>
    %319 = vector.multi_reduction <add>, %318, %cst_110 [2] : vector<5x8x8xf32> to vector<5x8xf32>
    %320 = vector.broadcast %315 : vector<5x1xf32> to vector<5x8xf32>
    %321 = arith.mulf %3, %320 : vector<5x8xf32>
    %322 = arith.addf %319, %321 : vector<5x8xf32>
    %323 = vector.shape_cast %322 : vector<5x8xf32> to vector<5x8x1xf32>
    %324 = vector.broadcast %323 : vector<5x8x1xf32> to vector<5x8x256xf32>
    %325 = arith.addf %288, %324 : vector<5x8x256xf32>
    %cst_111 = arith.constant dense<0.000000e+00> : vector<5x8xf32>
    %326 = vector.multi_reduction <add>, %325, %cst_111 [2] : vector<5x8x256xf32> to vector<5x8xf32>
    %327 = vector.shape_cast %326 : vector<5x8xf32> to vector<5x8x1xf32>
    %cst_112 = arith.constant dense<0.000000e+00> : vector<8x1xf32>
    %328 = vector.multi_reduction <add>, %327, %cst_112 [0] : vector<5x8x1xf32> to vector<8x1xf32>
    %329 = vector.shape_cast %328 : vector<8x1xf32> to vector<1x8x1xf32>
    %cst_113 = arith.constant 1.280000e+03 : f32
    %330 = vector.broadcast %cst_113 : f32 to vector<1x8x1xf32>
    %331 = arith.divf %329, %330 : vector<1x8x1xf32>
    %332 = vector.broadcast %331 : vector<1x8x1xf32> to vector<5x8x256xf32>
    %333 = arith.subf %325, %332 : vector<5x8x256xf32>
    %334 = arith.mulf %333, %333 : vector<5x8x256xf32>
    %cst_114 = arith.constant dense<0.000000e+00> : vector<5x8xf32>
    %335 = vector.multi_reduction <add>, %334, %cst_114 [2] : vector<5x8x256xf32> to vector<5x8xf32>
    %336 = vector.shape_cast %335 : vector<5x8xf32> to vector<5x8x1xf32>
    %cst_115 = arith.constant dense<0.000000e+00> : vector<8x1xf32>
    %337 = vector.multi_reduction <add>, %336, %cst_115 [0] : vector<5x8x1xf32> to vector<8x1xf32>
    %338 = vector.shape_cast %337 : vector<8x1xf32> to vector<1x8x1xf32>
    %cst_116 = arith.constant 1.280000e+03 : f32
    %339 = vector.broadcast %cst_116 : f32 to vector<1x8x1xf32>
    %340 = arith.divf %338, %339 : vector<1x8x1xf32>
    %cst_117 = arith.constant 9.99999974E-6 : f32
    %341 = vector.broadcast %cst_117 : f32 to vector<1x8x1xf32>
    %342 = arith.addf %340, %341 : vector<1x8x1xf32>
    %343 = math.rsqrt %342 : vector<1x8x1xf32>
    %344 = vector.broadcast %343 : vector<1x8x1xf32> to vector<5x8x256xf32>
    %345 = arith.mulf %333, %344 : vector<5x8x256xf32>
    %346 = vector.shape_cast %345 : vector<5x8x256xf32> to vector<40x256xf32>
    %cst_118 = arith.constant dense<0.000000e+00> : vector<8x256xf32>
    %347 = tpu.matmul %4, %346, %cst_118 {dimension_numbers = #tpu.dot_dimension_numbers<[1], [0], [0], [1], [0, 0, 1, 1], [], []>} : vector<8x40xf32>, vector<40x256xf32>, vector<8x256xf32> -> vector<8x256xf32>
    %cst_119 = arith.constant dense<0.000000e+00> : vector<8xf32>
    %348 = vector.multi_reduction <add>, %5, %cst_119 [0] : vector<5x8xf32> to vector<8xf32>
    %349 = vector.shape_cast %348 : vector<8xf32> to vector<8x1xf32>
    %350 = vector.broadcast %349 : vector<8x1xf32> to vector<8x256xf32>
    %351 = arith.addf %347, %350 : vector<8x256xf32>
    %352 = vector.shape_cast %351 : vector<8x256xf32> to vector<1x8x256xf32>
    %cst_120 = arith.constant dense<0.000000e+00> : vector<1xf32>
    %353 = vector.multi_reduction <add>, %352, %cst_120 [1, 2] : vector<1x8x256xf32> to vector<1xf32>
    %354 = vector.shape_cast %353 : vector<1xf32> to vector<1x1x1xf32>
    %355 = vector.extract %354[0, 0, 0] : f32 from vector<1x1x1xf32>
    %cst_121 = arith.constant 2.048000e+03 : f32
    %356 = arith.divf %355, %cst_121 : f32
    %357 = vector.broadcast %356 : f32 to vector<8x256xf32>
    %358 = arith.subf %351, %357 : vector<8x256xf32>
    %359 = arith.mulf %358, %358 : vector<8x256xf32>
    %360 = vector.shape_cast %359 : vector<8x256xf32> to vector<1x8x256xf32>
    %cst_122 = arith.constant dense<0.000000e+00> : vector<1xf32>
    %361 = vector.multi_reduction <add>, %360, %cst_122 [1, 2] : vector<1x8x256xf32> to vector<1xf32>
    %362 = vector.shape_cast %361 : vector<1xf32> to vector<1x1x1xf32>
    %363 = vector.extract %362[0, 0, 0] : f32 from vector<1x1x1xf32>
    %cst_123 = arith.constant 2.048000e+03 : f32
    %364 = arith.divf %363, %cst_123 : f32
    %cst_124 = arith.constant 9.99999974E-6 : f32
    %365 = arith.addf %364, %cst_124 : f32
    %366 = math.rsqrt %365 : f32
    %367 = vector.broadcast %366 : f32 to vector<8x256xf32>
    %368 = arith.mulf %358, %367 : vector<8x256xf32>
    %369 = vector.broadcast %6 : vector<8x1xf32> to vector<8x256xf32>
    %370 = arith.mulf %368, %369 : vector<8x256xf32>
    %371 = vector.broadcast %7 : vector<8x1xf32> to vector<8x256xf32>
    %372 = arith.addf %370, %371 : vector<8x256xf32>
    %cst_125 = arith.constant 0.000000e+00 : f32
    %373 = vector.broadcast %cst_125 : f32 to vector<8x256xf32>
    %374 = arith.maximumf %372, %373 : vector<8x256xf32>
    %c0_126 = arith.constant 0 : index
    %c768 = arith.constant 768 : index
    %375 = vector.load %arg13[%c0_126, %c768] : memref<8x2048xf32, #tpu.memory_space<vmem>>, vector<8x256xf32>
    tpu.vector_store %arg13[%c0_126, %c768], %374 {strides = array<i32>} : memref<8x2048xf32, #tpu.memory_space<vmem>>, vector<8x256xf32>,
    %c0_127 = arith.constant 0 : index
    %c2 = arith.constant 2 : index
    %c0_128 = arith.constant 0 : index
    %c0_129 = arith.constant 0 : index
    %376 = vector.load %arg1[%c0_127, %c2, %c0_128, %c0_129] : memref<1x8x8x256xf32, #tpu.memory_space<vmem>>, vector<1x5x8x256xf32>
    %377 = vector.shape_cast %376 : vector<1x5x8x256xf32> to vector<5x8x256xf32>
    %378 = vector.shape_cast %0 : vector<5x8xf32> to vector<5x8x1xf32>
    %379 = vector.broadcast %378 : vector<5x8x1xf32> to vector<5x8x256xf32>
    %380 = arith.mulf %379, %377 : vector<5x8x256xf32>
    %cst_130 = arith.constant dense<0.000000e+00> : vector<5x256xf32>
    %381 = vector.multi_reduction <add>, %380, %cst_130 [1] : vector<5x8x256xf32> to vector<5x256xf32>
    %382 = vector.broadcast %1 : vector<5x1xf32> to vector<5x256xf32>
    %383 = arith.addf %381, %382 : vector<5x256xf32>
    %cst_131 = arith.constant dense<0xFF800000> : vector<256xf32>
    %384 = vector.multi_reduction <maximumf>, %383, %cst_131 [0] : vector<5x256xf32> to vector<256xf32>
    %385 = vector.shape_cast %384 : vector<256xf32> to vector<1x256xf32>
    %386 = vector.broadcast %385 : vector<1x256xf32> to vector<5x256xf32>
    %387 = arith.subf %383, %386 : vector<5x256xf32>
    %388 = math.exp %387 : vector<5x256xf32>
    %cst_132 = arith.constant dense<0.000000e+00> : vector<256xf32>
    %389 = vector.multi_reduction <add>, %388, %cst_132 [0] : vector<5x256xf32> to vector<256xf32>
    %390 = vector.shape_cast %389 : vector<256xf32> to vector<1x256xf32>
    %391 = vector.broadcast %390 : vector<1x256xf32> to vector<5x256xf32>
    %392 = arith.divf %388, %391 : vector<5x256xf32>
    %cst_133 = arith.constant dense<0.000000e+00> : vector<5xf32>
    %393 = vector.multi_reduction <add>, %392, %cst_133 [1] : vector<5x256xf32> to vector<5xf32>
    %394 = vector.shape_cast %393 : vector<5xf32> to vector<5x1xf32>
    %cst_134 = arith.constant 2.560000e+02 : f32
    %395 = vector.broadcast %cst_134 : f32 to vector<5x1xf32>
    %396 = arith.divf %394, %395 : vector<5x1xf32>
    %397 = vector.broadcast %396 : vector<5x1xf32> to vector<5x256xf32>
    %398 = arith.mulf %392, %397 : vector<5x256xf32>
    %399 = vector.shape_cast %398 : vector<5x256xf32> to vector<5x1x256xf32>
    %400 = vector.broadcast %399 : vector<5x1x256xf32> to vector<5x8x256xf32>
    %401 = arith.mulf %377, %400 : vector<5x8x256xf32>
    %cst_135 = arith.constant dense<0.000000e+00> : vector<5x8xf32>
    %402 = vector.multi_reduction <add>, %401, %cst_135 [2] : vector<5x8x256xf32> to vector<5x8xf32>
    %cst_136 = arith.constant dense<0.000000e+00> : vector<5xf32>
    %403 = vector.multi_reduction <add>, %398, %cst_136 [1] : vector<5x256xf32> to vector<5xf32>
    %404 = vector.shape_cast %403 : vector<5xf32> to vector<5x1xf32>
    %405 = vector.shape_cast %402 : vector<5x8xf32> to vector<5x1x8xf32>
    %406 = vector.broadcast %405 : vector<5x1x8xf32> to vector<5x8x8xf32>
    %407 = arith.mulf %2, %406 : vector<5x8x8xf32>
    %cst_137 = arith.constant dense<0.000000e+00> : vector<5x8xf32>
    %408 = vector.multi_reduction <add>, %407, %cst_137 [2] : vector<5x8x8xf32> to vector<5x8xf32>
    %409 = vector.broadcast %404 : vector<5x1xf32> to vector<5x8xf32>
    %410 = arith.mulf %3, %409 : vector<5x8xf32>
    %411 = arith.addf %408, %410 : vector<5x8xf32>
    %412 = vector.shape_cast %411 : vector<5x8xf32> to vector<5x8x1xf32>
    %413 = vector.broadcast %412 : vector<5x8x1xf32> to vector<5x8x256xf32>
    %414 = arith.addf %377, %413 : vector<5x8x256xf32>
    %cst_138 = arith.constant dense<0.000000e+00> : vector<5x8xf32>
    %415 = vector.multi_reduction <add>, %414, %cst_138 [2] : vector<5x8x256xf32> to vector<5x8xf32>
    %416 = vector.shape_cast %415 : vector<5x8xf32> to vector<5x8x1xf32>
    %cst_139 = arith.constant dense<0.000000e+00> : vector<8x1xf32>
    %417 = vector.multi_reduction <add>, %416, %cst_139 [0] : vector<5x8x1xf32> to vector<8x1xf32>
    %418 = vector.shape_cast %417 : vector<8x1xf32> to vector<1x8x1xf32>
    %cst_140 = arith.constant 1.280000e+03 : f32
    %419 = vector.broadcast %cst_140 : f32 to vector<1x8x1xf32>
    %420 = arith.divf %418, %419 : vector<1x8x1xf32>
    %421 = vector.broadcast %420 : vector<1x8x1xf32> to vector<5x8x256xf32>
    %422 = arith.subf %414, %421 : vector<5x8x256xf32>
    %423 = arith.mulf %422, %422 : vector<5x8x256xf32>
    %cst_141 = arith.constant dense<0.000000e+00> : vector<5x8xf32>
    %424 = vector.multi_reduction <add>, %423, %cst_141 [2] : vector<5x8x256xf32> to vector<5x8xf32>
    %425 = vector.shape_cast %424 : vector<5x8xf32> to vector<5x8x1xf32>
    %cst_142 = arith.constant dense<0.000000e+00> : vector<8x1xf32>
    %426 = vector.multi_reduction <add>, %425, %cst_142 [0] : vector<5x8x1xf32> to vector<8x1xf32>
    %427 = vector.shape_cast %426 : vector<8x1xf32> to vector<1x8x1xf32>
    %cst_143 = arith.constant 1.280000e+03 : f32
    %428 = vector.broadcast %cst_143 : f32 to vector<1x8x1xf32>
    %429 = arith.divf %427, %428 : vector<1x8x1xf32>
    %cst_144 = arith.constant 9.99999974E-6 : f32
    %430 = vector.broadcast %cst_144 : f32 to vector<1x8x1xf32>
    %431 = arith.addf %429, %430 : vector<1x8x1xf32>
    %432 = math.rsqrt %431 : vector<1x8x1xf32>
    %433 = vector.broadcast %432 : vector<1x8x1xf32> to vector<5x8x256xf32>
    %434 = arith.mulf %422, %433 : vector<5x8x256xf32>
    %435 = vector.shape_cast %434 : vector<5x8x256xf32> to vector<40x256xf32>
    %cst_145 = arith.constant dense<0.000000e+00> : vector<8x256xf32>
    %436 = tpu.matmul %4, %435, %cst_145 {dimension_numbers = #tpu.dot_dimension_numbers<[1], [0], [0], [1], [0, 0, 1, 1], [], []>} : vector<8x40xf32>, vector<40x256xf32>, vector<8x256xf32> -> vector<8x256xf32>
    %cst_146 = arith.constant dense<0.000000e+00> : vector<8xf32>
    %437 = vector.multi_reduction <add>, %5, %cst_146 [0] : vector<5x8xf32> to vector<8xf32>
    %438 = vector.shape_cast %437 : vector<8xf32> to vector<8x1xf32>
    %439 = vector.broadcast %438 : vector<8x1xf32> to vector<8x256xf32>
    %440 = arith.addf %436, %439 : vector<8x256xf32>
    %441 = vector.shape_cast %440 : vector<8x256xf32> to vector<1x8x256xf32>
    %cst_147 = arith.constant dense<0.000000e+00> : vector<1xf32>
    %442 = vector.multi_reduction <add>, %441, %cst_147 [1, 2] : vector<1x8x256xf32> to vector<1xf32>
    %443 = vector.shape_cast %442 : vector<1xf32> to vector<1x1x1xf32>
    %444 = vector.extract %443[0, 0, 0] : f32 from vector<1x1x1xf32>
    %cst_148 = arith.constant 2.048000e+03 : f32
    %445 = arith.divf %444, %cst_148 : f32
    %446 = vector.broadcast %445 : f32 to vector<8x256xf32>
    %447 = arith.subf %440, %446 : vector<8x256xf32>
    %448 = arith.mulf %447, %447 : vector<8x256xf32>
    %449 = vector.shape_cast %448 : vector<8x256xf32> to vector<1x8x256xf32>
    %cst_149 = arith.constant dense<0.000000e+00> : vector<1xf32>
    %450 = vector.multi_reduction <add>, %449, %cst_149 [1, 2] : vector<1x8x256xf32> to vector<1xf32>
    %451 = vector.shape_cast %450 : vector<1xf32> to vector<1x1x1xf32>
    %452 = vector.extract %451[0, 0, 0] : f32 from vector<1x1x1xf32>
    %cst_150 = arith.constant 2.048000e+03 : f32
    %453 = arith.divf %452, %cst_150 : f32
    %cst_151 = arith.constant 9.99999974E-6 : f32
    %454 = arith.addf %453, %cst_151 : f32
    %455 = math.rsqrt %454 : f32
    %456 = vector.broadcast %455 : f32 to vector<8x256xf32>
    %457 = arith.mulf %447, %456 : vector<8x256xf32>
    %458 = vector.broadcast %6 : vector<8x1xf32> to vector<8x256xf32>
    %459 = arith.mulf %457, %458 : vector<8x256xf32>
    %460 = vector.broadcast %7 : vector<8x1xf32> to vector<8x256xf32>
    %461 = arith.addf %459, %460 : vector<8x256xf32>
    %cst_152 = arith.constant 0.000000e+00 : f32
    %462 = vector.broadcast %cst_152 : f32 to vector<8x256xf32>
    %463 = arith.maximumf %461, %462 : vector<8x256xf32>
    %c0_153 = arith.constant 0 : index
    %c1024 = arith.constant 1024 : index
    %464 = vector.load %arg13[%c0_153, %c1024] : memref<8x2048xf32, #tpu.memory_space<vmem>>, vector<8x256xf32>
    tpu.vector_store %arg13[%c0_153, %c1024], %463 {strides = array<i32>} : memref<8x2048xf32, #tpu.memory_space<vmem>>, vector<8x256xf32>,
    %c0_154 = arith.constant 0 : index
    %c3 = arith.constant 3 : index
    %c0_155 = arith.constant 0 : index
    %c0_156 = arith.constant 0 : index
    %465 = vector.load %arg1[%c0_154, %c3, %c0_155, %c0_156] : memref<1x8x8x256xf32, #tpu.memory_space<vmem>>, vector<1x5x8x256xf32>
    %466 = vector.shape_cast %465 : vector<1x5x8x256xf32> to vector<5x8x256xf32>
    %467 = vector.shape_cast %0 : vector<5x8xf32> to vector<5x8x1xf32>
    %468 = vector.broadcast %467 : vector<5x8x1xf32> to vector<5x8x256xf32>
    %469 = arith.mulf %468, %466 : vector<5x8x256xf32>
    %cst_157 = arith.constant dense<0.000000e+00> : vector<5x256xf32>
    %470 = vector.multi_reduction <add>, %469, %cst_157 [1] : vector<5x8x256xf32> to vector<5x256xf32>
    %471 = vector.broadcast %1 : vector<5x1xf32> to vector<5x256xf32>
    %472 = arith.addf %470, %471 : vector<5x256xf32>
    %cst_158 = arith.constant dense<0xFF800000> : vector<256xf32>
    %473 = vector.multi_reduction <maximumf>, %472, %cst_158 [0] : vector<5x256xf32> to vector<256xf32>
    %474 = vector.shape_cast %473 : vector<256xf32> to vector<1x256xf32>
    %475 = vector.broadcast %474 : vector<1x256xf32> to vector<5x256xf32>
    %476 = arith.subf %472, %475 : vector<5x256xf32>
    %477 = math.exp %476 : vector<5x256xf32>
    %cst_159 = arith.constant dense<0.000000e+00> : vector<256xf32>
    %478 = vector.multi_reduction <add>, %477, %cst_159 [0] : vector<5x256xf32> to vector<256xf32>
    %479 = vector.shape_cast %478 : vector<256xf32> to vector<1x256xf32>
    %480 = vector.broadcast %479 : vector<1x256xf32> to vector<5x256xf32>
    %481 = arith.divf %477, %480 : vector<5x256xf32>
    %cst_160 = arith.constant dense<0.000000e+00> : vector<5xf32>
    %482 = vector.multi_reduction <add>, %481, %cst_160 [1] : vector<5x256xf32> to vector<5xf32>
    %483 = vector.shape_cast %482 : vector<5xf32> to vector<5x1xf32>
    %cst_161 = arith.constant 2.560000e+02 : f32
    %484 = vector.broadcast %cst_161 : f32 to vector<5x1xf32>
    %485 = arith.divf %483, %484 : vector<5x1xf32>
    %486 = vector.broadcast %485 : vector<5x1xf32> to vector<5x256xf32>
    %487 = arith.mulf %481, %486 : vector<5x256xf32>
    %488 = vector.shape_cast %487 : vector<5x256xf32> to vector<5x1x256xf32>
    %489 = vector.broadcast %488 : vector<5x1x256xf32> to vector<5x8x256xf32>
    %490 = arith.mulf %466, %489 : vector<5x8x256xf32>
    %cst_162 = arith.constant dense<0.000000e+00> : vector<5x8xf32>
    %491 = vector.multi_reduction <add>, %490, %cst_162 [2] : vector<5x8x256xf32> to vector<5x8xf32>
    %cst_163 = arith.constant dense<0.000000e+00> : vector<5xf32>
    %492 = vector.multi_reduction <add>, %487, %cst_163 [1] : vector<5x256xf32> to vector<5xf32>
    %493 = vector.shape_cast %492 : vector<5xf32> to vector<5x1xf32>
    %494 = vector.shape_cast %491 : vector<5x8xf32> to vector<5x1x8xf32>
    %495 = vector.broadcast %494 : vector<5x1x8xf32> to vector<5x8x8xf32>
    %496 = arith.mulf %2, %495 : vector<5x8x8xf32>
    %cst_164 = arith.constant dense<0.000000e+00> : vector<5x8xf32>
    %497 = vector.multi_reduction <add>, %496, %cst_164 [2] : vector<5x8x8xf32> to vector<5x8xf32>
    %498 = vector.broadcast %493 : vector<5x1xf32> to vector<5x8xf32>
    %499 = arith.mulf %3, %498 : vector<5x8xf32>
    %500 = arith.addf %497, %499 : vector<5x8xf32>
    %501 = vector.shape_cast %500 : vector<5x8xf32> to vector<5x8x1xf32>
    %502 = vector.broadcast %501 : vector<5x8x1xf32> to vector<5x8x256xf32>
    %503 = arith.addf %466, %502 : vector<5x8x256xf32>
    %cst_165 = arith.constant dense<0.000000e+00> : vector<5x8xf32>
    %504 = vector.multi_reduction <add>, %503, %cst_165 [2] : vector<5x8x256xf32> to vector<5x8xf32>
    %505 = vector.shape_cast %504 : vector<5x8xf32> to vector<5x8x1xf32>
    %cst_166 = arith.constant dense<0.000000e+00> : vector<8x1xf32>
    %506 = vector.multi_reduction <add>, %505, %cst_166 [0] : vector<5x8x1xf32> to vector<8x1xf32>
    %507 = vector.shape_cast %506 : vector<8x1xf32> to vector<1x8x1xf32>
    %cst_167 = arith.constant 1.280000e+03 : f32
    %508 = vector.broadcast %cst_167 : f32 to vector<1x8x1xf32>
    %509 = arith.divf %507, %508 : vector<1x8x1xf32>
    %510 = vector.broadcast %509 : vector<1x8x1xf32> to vector<5x8x256xf32>
    %511 = arith.subf %503, %510 : vector<5x8x256xf32>
    %512 = arith.mulf %511, %511 : vector<5x8x256xf32>
    %cst_168 = arith.constant dense<0.000000e+00> : vector<5x8xf32>
    %513 = vector.multi_reduction <add>, %512, %cst_168 [2] : vector<5x8x256xf32> to vector<5x8xf32>
    %514 = vector.shape_cast %513 : vector<5x8xf32> to vector<5x8x1xf32>
    %cst_169 = arith.constant dense<0.000000e+00> : vector<8x1xf32>
    %515 = vector.multi_reduction <add>, %514, %cst_169 [0] : vector<5x8x1xf32> to vector<8x1xf32>
    %516 = vector.shape_cast %515 : vector<8x1xf32> to vector<1x8x1xf32>
    %cst_170 = arith.constant 1.280000e+03 : f32
    %517 = vector.broadcast %cst_170 : f32 to vector<1x8x1xf32>
    %518 = arith.divf %516, %517 : vector<1x8x1xf32>
    %cst_171 = arith.constant 9.99999974E-6 : f32
    %519 = vector.broadcast %cst_171 : f32 to vector<1x8x1xf32>
    %520 = arith.addf %518, %519 : vector<1x8x1xf32>
    %521 = math.rsqrt %520 : vector<1x8x1xf32>
    %522 = vector.broadcast %521 : vector<1x8x1xf32> to vector<5x8x256xf32>
    %523 = arith.mulf %511, %522 : vector<5x8x256xf32>
    %524 = vector.shape_cast %523 : vector<5x8x256xf32> to vector<40x256xf32>
    %cst_172 = arith.constant dense<0.000000e+00> : vector<8x256xf32>
    %525 = tpu.matmul %4, %524, %cst_172 {dimension_numbers = #tpu.dot_dimension_numbers<[1], [0], [0], [1], [0, 0, 1, 1], [], []>} : vector<8x40xf32>, vector<40x256xf32>, vector<8x256xf32> -> vector<8x256xf32>
    %cst_173 = arith.constant dense<0.000000e+00> : vector<8xf32>
    %526 = vector.multi_reduction <add>, %5, %cst_173 [0] : vector<5x8xf32> to vector<8xf32>
    %527 = vector.shape_cast %526 : vector<8xf32> to vector<8x1xf32>
    %528 = vector.broadcast %527 : vector<8x1xf32> to vector<8x256xf32>
    %529 = arith.addf %525, %528 : vector<8x256xf32>
    %530 = vector.shape_cast %529 : vector<8x256xf32> to vector<1x8x256xf32>
    %cst_174 = arith.constant dense<0.000000e+00> : vector<1xf32>
    %531 = vector.multi_reduction <add>, %530, %cst_174 [1, 2] : vector<1x8x256xf32> to vector<1xf32>
    %532 = vector.shape_cast %531 : vector<1xf32> to vector<1x1x1xf32>
    %533 = vector.extract %532[0, 0, 0] : f32 from vector<1x1x1xf32>
    %cst_175 = arith.constant 2.048000e+03 : f32
    %534 = arith.divf %533, %cst_175 : f32
    %535 = vector.broadcast %534 : f32 to vector<8x256xf32>
    %536 = arith.subf %529, %535 : vector<8x256xf32>
    %537 = arith.mulf %536, %536 : vector<8x256xf32>
    %538 = vector.shape_cast %537 : vector<8x256xf32> to vector<1x8x256xf32>
    %cst_176 = arith.constant dense<0.000000e+00> : vector<1xf32>
    %539 = vector.multi_reduction <add>, %538, %cst_176 [1, 2] : vector<1x8x256xf32> to vector<1xf32>
    %540 = vector.shape_cast %539 : vector<1xf32> to vector<1x1x1xf32>
    %541 = vector.extract %540[0, 0, 0] : f32 from vector<1x1x1xf32>
    %cst_177 = arith.constant 2.048000e+03 : f32
    %542 = arith.divf %541, %cst_177 : f32
    %cst_178 = arith.constant 9.99999974E-6 : f32
    %543 = arith.addf %542, %cst_178 : f32
    %544 = math.rsqrt %543 : f32
    %545 = vector.broadcast %544 : f32 to vector<8x256xf32>
    %546 = arith.mulf %536, %545 : vector<8x256xf32>
    %547 = vector.broadcast %6 : vector<8x1xf32> to vector<8x256xf32>
    %548 = arith.mulf %546, %547 : vector<8x256xf32>
    %549 = vector.broadcast %7 : vector<8x1xf32> to vector<8x256xf32>
    %550 = arith.addf %548, %549 : vector<8x256xf32>
    %cst_179 = arith.constant 0.000000e+00 : f32
    %551 = vector.broadcast %cst_179 : f32 to vector<8x256xf32>
    %552 = arith.maximumf %550, %551 : vector<8x256xf32>
    %c0_180 = arith.constant 0 : index
    %c1280 = arith.constant 1280 : index
    %553 = vector.load %arg13[%c0_180, %c1280] : memref<8x2048xf32, #tpu.memory_space<vmem>>, vector<8x256xf32>
    tpu.vector_store %arg13[%c0_180, %c1280], %552 {strides = array<i32>} : memref<8x2048xf32, #tpu.memory_space<vmem>>, vector<8x256xf32>,
    %c0_181 = arith.constant 0 : index
    %c4 = arith.constant 4 : index
    %c0_182 = arith.constant 0 : index
    %c0_183 = arith.constant 0 : index
    %554 = vector.load %arg1[%c0_181, %c4, %c0_182, %c0_183] : memref<1x8x8x256xf32, #tpu.memory_space<vmem>>, vector<1x4x8x256xf32>
    %555 = vector.shape_cast %554 : vector<1x4x8x256xf32> to vector<4x8x256xf32>
    %556 = vector.extract_strided_slice %0 {offsets = [0, 0], sizes = [4, 8], strides = [1, 1]} : vector<5x8xf32> to vector<4x8xf32>
    %557 = vector.extract_strided_slice %1 {offsets = [0, 0], sizes = [4, 1], strides = [1, 1]} : vector<5x1xf32> to vector<4x1xf32>
    %558 = vector.extract_strided_slice %2 {offsets = [0, 0, 0], sizes = [4, 8, 8], strides = [1, 1, 1]} : vector<5x8x8xf32> to vector<4x8x8xf32>
    %559 = vector.extract_strided_slice %3 {offsets = [0, 0], sizes = [4, 8], strides = [1, 1]} : vector<5x8xf32> to vector<4x8xf32>
    %560 = vector.extract_strided_slice %5 {offsets = [0, 0], sizes = [4, 8], strides = [1, 1]} : vector<5x8xf32> to vector<4x8xf32>
    %561 = vector.shape_cast %556 : vector<4x8xf32> to vector<4x8x1xf32>
    %562 = vector.broadcast %561 : vector<4x8x1xf32> to vector<4x8x256xf32>
    %563 = arith.mulf %562, %555 : vector<4x8x256xf32>
    %cst_184 = arith.constant dense<0.000000e+00> : vector<4x256xf32>
    %564 = vector.multi_reduction <add>, %563, %cst_184 [1] : vector<4x8x256xf32> to vector<4x256xf32>
    %565 = vector.broadcast %557 : vector<4x1xf32> to vector<4x256xf32>
    %566 = arith.addf %564, %565 : vector<4x256xf32>
    %cst_185 = arith.constant dense<0xFF800000> : vector<256xf32>
    %567 = vector.multi_reduction <maximumf>, %566, %cst_185 [0] : vector<4x256xf32> to vector<256xf32>
    %568 = vector.shape_cast %567 : vector<256xf32> to vector<1x256xf32>
    %569 = vector.broadcast %568 : vector<1x256xf32> to vector<4x256xf32>
    %570 = arith.subf %566, %569 : vector<4x256xf32>
    %571 = math.exp %570 : vector<4x256xf32>
    %cst_186 = arith.constant dense<0.000000e+00> : vector<256xf32>
    %572 = vector.multi_reduction <add>, %571, %cst_186 [0] : vector<4x256xf32> to vector<256xf32>
    %573 = vector.shape_cast %572 : vector<256xf32> to vector<1x256xf32>
    %574 = vector.broadcast %573 : vector<1x256xf32> to vector<4x256xf32>
    %575 = arith.divf %571, %574 : vector<4x256xf32>
    %cst_187 = arith.constant dense<0.000000e+00> : vector<4xf32>
    %576 = vector.multi_reduction <add>, %575, %cst_187 [1] : vector<4x256xf32> to vector<4xf32>
    %577 = vector.shape_cast %576 : vector<4xf32> to vector<4x1xf32>
    %cst_188 = arith.constant 2.560000e+02 : f32
    %578 = vector.broadcast %cst_188 : f32 to vector<4x1xf32>
    %579 = arith.divf %577, %578 : vector<4x1xf32>
    %580 = vector.broadcast %579 : vector<4x1xf32> to vector<4x256xf32>
    %581 = arith.mulf %575, %580 : vector<4x256xf32>
    %582 = vector.shape_cast %581 : vector<4x256xf32> to vector<4x1x256xf32>
    %583 = vector.broadcast %582 : vector<4x1x256xf32> to vector<4x8x256xf32>
    %584 = arith.mulf %555, %583 : vector<4x8x256xf32>
    %cst_189 = arith.constant dense<0.000000e+00> : vector<4x8xf32>
    %585 = vector.multi_reduction <add>, %584, %cst_189 [2] : vector<4x8x256xf32> to vector<4x8xf32>
    %cst_190 = arith.constant dense<0.000000e+00> : vector<4xf32>
    %586 = vector.multi_reduction <add>, %581, %cst_190 [1] : vector<4x256xf32> to vector<4xf32>
    %587 = vector.shape_cast %586 : vector<4xf32> to vector<4x1xf32>
    %588 = vector.shape_cast %585 : vector<4x8xf32> to vector<4x1x8xf32>
    %589 = vector.broadcast %588 : vector<4x1x8xf32> to vector<4x8x8xf32>
    %590 = arith.mulf %558, %589 : vector<4x8x8xf32>
    %cst_191 = arith.constant dense<0.000000e+00> : vector<4x8xf32>
    %591 = vector.multi_reduction <add>, %590, %cst_191 [2] : vector<4x8x8xf32> to vector<4x8xf32>
    %592 = vector.broadcast %587 : vector<4x1xf32> to vector<4x8xf32>
    %593 = arith.mulf %559, %592 : vector<4x8xf32>
    %594 = arith.addf %591, %593 : vector<4x8xf32>
    %595 = vector.shape_cast %594 : vector<4x8xf32> to vector<4x8x1xf32>
    %596 = vector.broadcast %595 : vector<4x8x1xf32> to vector<4x8x256xf32>
    %597 = arith.addf %555, %596 : vector<4x8x256xf32>
    %cst_192 = arith.constant dense<0.000000e+00> : vector<4x8xf32>
    %598 = vector.multi_reduction <add>, %597, %cst_192 [2] : vector<4x8x256xf32> to vector<4x8xf32>
    %599 = vector.shape_cast %598 : vector<4x8xf32> to vector<4x8x1xf32>
    %cst_193 = arith.constant dense<0.000000e+00> : vector<8x1xf32>
    %600 = vector.multi_reduction <add>, %599, %cst_193 [0] : vector<4x8x1xf32> to vector<8x1xf32>
    %601 = vector.shape_cast %600 : vector<8x1xf32> to vector<1x8x1xf32>
    %cst_194 = arith.constant 1.024000e+03 : f32
    %602 = vector.broadcast %cst_194 : f32 to vector<1x8x1xf32>
    %603 = arith.divf %601, %602 : vector<1x8x1xf32>
    %604 = vector.broadcast %603 : vector<1x8x1xf32> to vector<4x8x256xf32>
    %605 = arith.subf %597, %604 : vector<4x8x256xf32>
    %606 = arith.mulf %605, %605 : vector<4x8x256xf32>
    %cst_195 = arith.constant dense<0.000000e+00> : vector<4x8xf32>
    %607 = vector.multi_reduction <add>, %606, %cst_195 [2] : vector<4x8x256xf32> to vector<4x8xf32>
    %608 = vector.shape_cast %607 : vector<4x8xf32> to vector<4x8x1xf32>
    %cst_196 = arith.constant dense<0.000000e+00> : vector<8x1xf32>
    %609 = vector.multi_reduction <add>, %608, %cst_196 [0] : vector<4x8x1xf32> to vector<8x1xf32>
    %610 = vector.shape_cast %609 : vector<8x1xf32> to vector<1x8x1xf32>
    %cst_197 = arith.constant 1.024000e+03 : f32
    %611 = vector.broadcast %cst_197 : f32 to vector<1x8x1xf32>
    %612 = arith.divf %610, %611 : vector<1x8x1xf32>
    %cst_198 = arith.constant 9.99999974E-6 : f32
    %613 = vector.broadcast %cst_198 : f32 to vector<1x8x1xf32>
    %614 = arith.addf %612, %613 : vector<1x8x1xf32>
    %615 = math.rsqrt %614 : vector<1x8x1xf32>
    %616 = vector.broadcast %615 : vector<1x8x1xf32> to vector<4x8x256xf32>
    %617 = arith.mulf %605, %616 : vector<4x8x256xf32>
    %618 = vector.extract_strided_slice %4 {offsets = [0, 0], sizes = [8, 32], strides = [1, 1]} : vector<8x40xf32> to vector<8x32xf32>
    %619 = vector.shape_cast %617 : vector<4x8x256xf32> to vector<32x256xf32>
    %cst_199 = arith.constant dense<0.000000e+00> : vector<8x256xf32>
    %620 = tpu.matmul %618, %619, %cst_199 {dimension_numbers = #tpu.dot_dimension_numbers<[1], [0], [0], [1], [0, 0, 1, 1], [], []>} : vector<8x32xf32>, vector<32x256xf32>, vector<8x256xf32> -> vector<8x256xf32>
    %cst_200 = arith.constant dense<0.000000e+00> : vector<8xf32>
    %621 = vector.multi_reduction <add>, %560, %cst_200 [0] : vector<4x8xf32> to vector<8xf32>
    %622 = vector.shape_cast %621 : vector<8xf32> to vector<8x1xf32>
    %623 = vector.broadcast %622 : vector<8x1xf32> to vector<8x256xf32>
    %624 = arith.addf %620, %623 : vector<8x256xf32>
    %625 = vector.shape_cast %624 : vector<8x256xf32> to vector<1x8x256xf32>
    %cst_201 = arith.constant dense<0.000000e+00> : vector<1xf32>
    %626 = vector.multi_reduction <add>, %625, %cst_201 [1, 2] : vector<1x8x256xf32> to vector<1xf32>
    %627 = vector.shape_cast %626 : vector<1xf32> to vector<1x1x1xf32>
    %628 = vector.extract %627[0, 0, 0] : f32 from vector<1x1x1xf32>
    %cst_202 = arith.constant 2.048000e+03 : f32
    %629 = arith.divf %628, %cst_202 : f32
    %630 = vector.broadcast %629 : f32 to vector<8x256xf32>
    %631 = arith.subf %624, %630 : vector<8x256xf32>
    %632 = arith.mulf %631, %631 : vector<8x256xf32>
    %633 = vector.shape_cast %632 : vector<8x256xf32> to vector<1x8x256xf32>
    %cst_203 = arith.constant dense<0.000000e+00> : vector<1xf32>
    %634 = vector.multi_reduction <add>, %633, %cst_203 [1, 2] : vector<1x8x256xf32> to vector<1xf32>
    %635 = vector.shape_cast %634 : vector<1xf32> to vector<1x1x1xf32>
    %636 = vector.extract %635[0, 0, 0] : f32 from vector<1x1x1xf32>
    %cst_204 = arith.constant 2.048000e+03 : f32
    %637 = arith.divf %636, %cst_204 : f32
    %cst_205 = arith.constant 9.99999974E-6 : f32
    %638 = arith.addf %637, %cst_205 : f32
    %639 = math.rsqrt %638 : f32
    %640 = vector.broadcast %639 : f32 to vector<8x256xf32>
    %641 = arith.mulf %631, %640 : vector<8x256xf32>
    %642 = vector.broadcast %6 : vector<8x1xf32> to vector<8x256xf32>
    %643 = arith.mulf %641, %642 : vector<8x256xf32>
    %644 = vector.broadcast %7 : vector<8x1xf32> to vector<8x256xf32>
    %645 = arith.addf %643, %644 : vector<8x256xf32>
    %cst_206 = arith.constant 0.000000e+00 : f32
    %646 = vector.broadcast %cst_206 : f32 to vector<8x256xf32>
    %647 = arith.maximumf %645, %646 : vector<8x256xf32>
    %c0_207 = arith.constant 0 : index
    %c1536 = arith.constant 1536 : index
    %648 = vector.load %arg13[%c0_207, %c1536] : memref<8x2048xf32, #tpu.memory_space<vmem>>, vector<8x256xf32>
    tpu.vector_store %arg13[%c0_207, %c1536], %647 {strides = array<i32>} : memref<8x2048xf32, #tpu.memory_space<vmem>>, vector<8x256xf32>,
    %c0_208 = arith.constant 0 : index
    %c5 = arith.constant 5 : index
    %c0_209 = arith.constant 0 : index
    %c0_210 = arith.constant 0 : index
    %649 = vector.load %arg1[%c0_208, %c5, %c0_209, %c0_210] : memref<1x8x8x256xf32, #tpu.memory_space<vmem>>, vector<1x3x8x256xf32>
    %650 = vector.shape_cast %649 : vector<1x3x8x256xf32> to vector<3x8x256xf32>
    %651 = vector.extract_strided_slice %0 {offsets = [0, 0], sizes = [3, 8], strides = [1, 1]} : vector<5x8xf32> to vector<3x8xf32>
    %652 = vector.extract_strided_slice %1 {offsets = [0, 0], sizes = [3, 1], strides = [1, 1]} : vector<5x1xf32> to vector<3x1xf32>
    %653 = vector.extract_strided_slice %2 {offsets = [0, 0, 0], sizes = [3, 8, 8], strides = [1, 1, 1]} : vector<5x8x8xf32> to vector<3x8x8xf32>
    %654 = vector.extract_strided_slice %3 {offsets = [0, 0], sizes = [3, 8], strides = [1, 1]} : vector<5x8xf32> to vector<3x8xf32>
    %655 = vector.extract_strided_slice %5 {offsets = [0, 0], sizes = [3, 8], strides = [1, 1]} : vector<5x8xf32> to vector<3x8xf32>
    %656 = vector.shape_cast %651 : vector<3x8xf32> to vector<3x8x1xf32>
    %657 = vector.broadcast %656 : vector<3x8x1xf32> to vector<3x8x256xf32>
    %658 = arith.mulf %657, %650 : vector<3x8x256xf32>
    %cst_211 = arith.constant dense<0.000000e+00> : vector<3x256xf32>
    %659 = vector.multi_reduction <add>, %658, %cst_211 [1] : vector<3x8x256xf32> to vector<3x256xf32>
    %660 = vector.broadcast %652 : vector<3x1xf32> to vector<3x256xf32>
    %661 = arith.addf %659, %660 : vector<3x256xf32>
    %cst_212 = arith.constant dense<0xFF800000> : vector<256xf32>
    %662 = vector.multi_reduction <maximumf>, %661, %cst_212 [0] : vector<3x256xf32> to vector<256xf32>
    %663 = vector.shape_cast %662 : vector<256xf32> to vector<1x256xf32>
    %664 = vector.broadcast %663 : vector<1x256xf32> to vector<3x256xf32>
    %665 = arith.subf %661, %664 : vector<3x256xf32>
    %666 = math.exp %665 : vector<3x256xf32>
    %cst_213 = arith.constant dense<0.000000e+00> : vector<256xf32>
    %667 = vector.multi_reduction <add>, %666, %cst_213 [0] : vector<3x256xf32> to vector<256xf32>
    %668 = vector.shape_cast %667 : vector<256xf32> to vector<1x256xf32>
    %669 = vector.broadcast %668 : vector<1x256xf32> to vector<3x256xf32>
    %670 = arith.divf %666, %669 : vector<3x256xf32>
    %cst_214 = arith.constant dense<0.000000e+00> : vector<3xf32>
    %671 = vector.multi_reduction <add>, %670, %cst_214 [1] : vector<3x256xf32> to vector<3xf32>
    %672 = vector.shape_cast %671 : vector<3xf32> to vector<3x1xf32>
    %cst_215 = arith.constant 2.560000e+02 : f32
    %673 = vector.broadcast %cst_215 : f32 to vector<3x1xf32>
    %674 = arith.divf %672, %673 : vector<3x1xf32>
    %675 = vector.broadcast %674 : vector<3x1xf32> to vector<3x256xf32>
    %676 = arith.mulf %670, %675 : vector<3x256xf32>
    %677 = vector.shape_cast %676 : vector<3x256xf32> to vector<3x1x256xf32>
    %678 = vector.broadcast %677 : vector<3x1x256xf32> to vector<3x8x256xf32>
    %679 = arith.mulf %650, %678 : vector<3x8x256xf32>
    %cst_216 = arith.constant dense<0.000000e+00> : vector<3x8xf32>
    %680 = vector.multi_reduction <add>, %679, %cst_216 [2] : vector<3x8x256xf32> to vector<3x8xf32>
    %cst_217 = arith.constant dense<0.000000e+00> : vector<3xf32>
    %681 = vector.multi_reduction <add>, %676, %cst_217 [1] : vector<3x256xf32> to vector<3xf32>
    %682 = vector.shape_cast %681 : vector<3xf32> to vector<3x1xf32>
    %683 = vector.shape_cast %680 : vector<3x8xf32> to vector<3x1x8xf32>
    %684 = vector.broadcast %683 : vector<3x1x8xf32> to vector<3x8x8xf32>
    %685 = arith.mulf %653, %684 : vector<3x8x8xf32>
    %cst_218 = arith.constant dense<0.000000e+00> : vector<3x8xf32>
    %686 = vector.multi_reduction <add>, %685, %cst_218 [2] : vector<3x8x8xf32> to vector<3x8xf32>
    %687 = vector.broadcast %682 : vector<3x1xf32> to vector<3x8xf32>
    %688 = arith.mulf %654, %687 : vector<3x8xf32>
    %689 = arith.addf %686, %688 : vector<3x8xf32>
    %690 = vector.shape_cast %689 : vector<3x8xf32> to vector<3x8x1xf32>
    %691 = vector.broadcast %690 : vector<3x8x1xf32> to vector<3x8x256xf32>
    %692 = arith.addf %650, %691 : vector<3x8x256xf32>
    %cst_219 = arith.constant dense<0.000000e+00> : vector<3x8xf32>
    %693 = vector.multi_reduction <add>, %692, %cst_219 [2] : vector<3x8x256xf32> to vector<3x8xf32>
    %694 = vector.shape_cast %693 : vector<3x8xf32> to vector<3x8x1xf32>
    %cst_220 = arith.constant dense<0.000000e+00> : vector<8x1xf32>
    %695 = vector.multi_reduction <add>, %694, %cst_220 [0] : vector<3x8x1xf32> to vector<8x1xf32>
    %696 = vector.shape_cast %695 : vector<8x1xf32> to vector<1x8x1xf32>
    %cst_221 = arith.constant 7.680000e+02 : f32
    %697 = vector.broadcast %cst_221 : f32 to vector<1x8x1xf32>
    %698 = arith.divf %696, %697 : vector<1x8x1xf32>
    %699 = vector.broadcast %698 : vector<1x8x1xf32> to vector<3x8x256xf32>
    %700 = arith.subf %692, %699 : vector<3x8x256xf32>
    %701 = arith.mulf %700, %700 : vector<3x8x256xf32>
    %cst_222 = arith.constant dense<0.000000e+00> : vector<3x8xf32>
    %702 = vector.multi_reduction <add>, %701, %cst_222 [2] : vector<3x8x256xf32> to vector<3x8xf32>
    %703 = vector.shape_cast %702 : vector<3x8xf32> to vector<3x8x1xf32>
    %cst_223 = arith.constant dense<0.000000e+00> : vector<8x1xf32>
    %704 = vector.multi_reduction <add>, %703, %cst_223 [0] : vector<3x8x1xf32> to vector<8x1xf32>
    %705 = vector.shape_cast %704 : vector<8x1xf32> to vector<1x8x1xf32>
    %cst_224 = arith.constant 7.680000e+02 : f32
    %706 = vector.broadcast %cst_224 : f32 to vector<1x8x1xf32>
    %707 = arith.divf %705, %706 : vector<1x8x1xf32>
    %cst_225 = arith.constant 9.99999974E-6 : f32
    %708 = vector.broadcast %cst_225 : f32 to vector<1x8x1xf32>
    %709 = arith.addf %707, %708 : vector<1x8x1xf32>
    %710 = math.rsqrt %709 : vector<1x8x1xf32>
    %711 = vector.broadcast %710 : vector<1x8x1xf32> to vector<3x8x256xf32>
    %712 = arith.mulf %700, %711 : vector<3x8x256xf32>
    %713 = vector.extract_strided_slice %4 {offsets = [0, 0], sizes = [8, 24], strides = [1, 1]} : vector<8x40xf32> to vector<8x24xf32>
    %714 = vector.shape_cast %712 : vector<3x8x256xf32> to vector<24x256xf32>
    %cst_226 = arith.constant dense<0.000000e+00> : vector<8x256xf32>
    %715 = tpu.matmul %713, %714, %cst_226 {dimension_numbers = #tpu.dot_dimension_numbers<[1], [0], [0], [1], [0, 0, 1, 1], [], []>} : vector<8x24xf32>, vector<24x256xf32>, vector<8x256xf32> -> vector<8x256xf32>
    %cst_227 = arith.constant dense<0.000000e+00> : vector<8xf32>
    %716 = vector.multi_reduction <add>, %655, %cst_227 [0] : vector<3x8xf32> to vector<8xf32>
    %717 = vector.shape_cast %716 : vector<8xf32> to vector<8x1xf32>
    %718 = vector.broadcast %717 : vector<8x1xf32> to vector<8x256xf32>
    %719 = arith.addf %715, %718 : vector<8x256xf32>
    %720 = vector.shape_cast %719 : vector<8x256xf32> to vector<1x8x256xf32>
    %cst_228 = arith.constant dense<0.000000e+00> : vector<1xf32>
    %721 = vector.multi_reduction <add>, %720, %cst_228 [1, 2] : vector<1x8x256xf32> to vector<1xf32>
    %722 = vector.shape_cast %721 : vector<1xf32> to vector<1x1x1xf32>
    %723 = vector.extract %722[0, 0, 0] : f32 from vector<1x1x1xf32>
    %cst_229 = arith.constant 2.048000e+03 : f32
    %724 = arith.divf %723, %cst_229 : f32
    %725 = vector.broadcast %724 : f32 to vector<8x256xf32>
    %726 = arith.subf %719, %725 : vector<8x256xf32>
    %727 = arith.mulf %726, %726 : vector<8x256xf32>
    %728 = vector.shape_cast %727 : vector<8x256xf32> to vector<1x8x256xf32>
    %cst_230 = arith.constant dense<0.000000e+00> : vector<1xf32>
    %729 = vector.multi_reduction <add>, %728, %cst_230 [1, 2] : vector<1x8x256xf32> to vector<1xf32>
    %730 = vector.shape_cast %729 : vector<1xf32> to vector<1x1x1xf32>
    %731 = vector.extract %730[0, 0, 0] : f32 from vector<1x1x1xf32>
    %cst_231 = arith.constant 2.048000e+03 : f32
    %732 = arith.divf %731, %cst_231 : f32
    %cst_232 = arith.constant 9.99999974E-6 : f32
    %733 = arith.addf %732, %cst_232 : f32
    %734 = math.rsqrt %733 : f32
    %735 = vector.broadcast %734 : f32 to vector<8x256xf32>
    %736 = arith.mulf %726, %735 : vector<8x256xf32>
    %737 = vector.broadcast %6 : vector<8x1xf32> to vector<8x256xf32>
    %738 = arith.mulf %736, %737 : vector<8x256xf32>
    %739 = vector.broadcast %7 : vector<8x1xf32> to vector<8x256xf32>
    %740 = arith.addf %738, %739 : vector<8x256xf32>
    %cst_233 = arith.constant 0.000000e+00 : f32
    %741 = vector.broadcast %cst_233 : f32 to vector<8x256xf32>
    %742 = arith.maximumf %740, %741 : vector<8x256xf32>
    %c0_234 = arith.constant 0 : index
    %c1792 = arith.constant 1792 : index
    %743 = vector.load %arg13[%c0_234, %c1792] : memref<8x2048xf32, #tpu.memory_space<vmem>>, vector<8x256xf32>
    tpu.vector_store %arg13[%c0_234, %c1792], %742 {strides = array<i32>} : memref<8x2048xf32, #tpu.memory_space<vmem>>, vector<8x256xf32>,
    %c0_235 = arith.constant 0 : index
    %c0_236 = arith.constant 0 : index
    %744 = vector.load %arg8[%c0_235, %c0_236] : memref<8x8xf32, #tpu.memory_space<vmem>>, vector<8x8xf32>
    %c0_237 = arith.constant 0 : index
    %c0_238 = arith.constant 0 : index
    %745 = vector.load %arg13[%c0_237, %c0_238] : memref<8x2048xf32, #tpu.memory_space<vmem>>, vector<8x2048xf32>
    %cst_239 = arith.constant dense<0.000000e+00> : vector<8x2048xf32>
    %746 = tpu.matmul %744, %745, %cst_239 {dimension_numbers = #tpu.dot_dimension_numbers<[1], [0], [0], [1], [0, 0, 1, 1], [], []>} : vector<8x8xf32>, vector<8x2048xf32>, vector<8x2048xf32> -> vector<8x2048xf32>
    %c0_240 = arith.constant 0 : index
    %c0_241 = arith.constant 0 : index
    %747 = vector.load %arg9[%c0_240, %c0_241] : memref<8x1xf32, #tpu.memory_space<vmem>>, vector<8x1xf32>
    %748 = vector.broadcast %747 : vector<8x1xf32> to vector<8x2048xf32>
    %749 = arith.addf %746, %748 : vector<8x2048xf32>
    %750 = vector.extract_strided_slice %749 {offsets = [0, 0], sizes = [8, 256], strides = [1, 1]} : vector<8x2048xf32> to vector<8x256xf32>
    %c0_242 = arith.constant 0 : index
    %c0_243 = arith.constant 0 : index
    %c0_244 = arith.constant 0 : index
    %c0_245 = arith.constant 0 : index
    %751 = vector.load %arg1[%c0_242, %c0_243, %c0_244, %c0_245] : memref<1x8x8x256xf32, #tpu.memory_space<vmem>>, vector<1x1x8x256xf32>
    %752 = vector.shape_cast %751 : vector<1x1x8x256xf32> to vector<8x256xf32>
    %753 = arith.addf %750, %752 : vector<8x256xf32>
    %c0_246 = arith.constant 0 : index
    %c0_247 = arith.constant 0 : index
    %c0_248 = arith.constant 0 : index
    %c0_249 = arith.constant 0 : index
    %754 = vector.load %arg12[%c0_246, %c0_247, %c0_248, %c0_249] : memref<1x8x8x256xf32, #tpu.memory_space<vmem>>, vector<1x1x8x256xf32>
    %755 = vector.shape_cast %754 : vector<1x1x8x256xf32> to vector<8x256xf32>
    %756 = vector.shape_cast %753 : vector<8x256xf32> to vector<1x1x8x256xf32>
    tpu.vector_store %arg12[%c0_246, %c0_247, %c0_248, %c0_249], %756 {strides = array<i32>} : memref<1x8x8x256xf32, #tpu.memory_space<vmem>>, vector<1x1x8x256xf32>,
    %757 = vector.extract_strided_slice %749 {offsets = [0, 256], sizes = [8, 256], strides = [1, 1]} : vector<8x2048xf32> to vector<8x256xf32>
    %c0_250 = arith.constant 0 : index
    %c1_251 = arith.constant 1 : index
    %c0_252 = arith.constant 0 : index
    %c0_253 = arith.constant 0 : index
    %758 = vector.load %arg1[%c0_250, %c1_251, %c0_252, %c0_253] : memref<1x8x8x256xf32, #tpu.memory_space<vmem>>, vector<1x1x8x256xf32>
    %759 = vector.shape_cast %758 : vector<1x1x8x256xf32> to vector<8x256xf32>
    %760 = arith.addf %757, %759 : vector<8x256xf32>
    %c0_254 = arith.constant 0 : index
    %c1_255 = arith.constant 1 : index
    %c0_256 = arith.constant 0 : index
    %c0_257 = arith.constant 0 : index
    %761 = vector.load %arg12[%c0_254, %c1_255, %c0_256, %c0_257] : memref<1x8x8x256xf32, #tpu.memory_space<vmem>>, vector<1x1x8x256xf32>
    %762 = vector.shape_cast %761 : vector<1x1x8x256xf32> to vector<8x256xf32>
    %763 = vector.shape_cast %760 : vector<8x256xf32> to vector<1x1x8x256xf32>
    tpu.vector_store %arg12[%c0_254, %c1_255, %c0_256, %c0_257], %763 {strides = array<i32>} : memref<1x8x8x256xf32, #tpu.memory_space<vmem>>, vector<1x1x8x256xf32>,
    %764 = vector.extract_strided_slice %749 {offsets = [0, 512], sizes = [8, 256], strides = [1, 1]} : vector<8x2048xf32> to vector<8x256xf32>
    %c0_258 = arith.constant 0 : index
    %c2_259 = arith.constant 2 : index
    %c0_260 = arith.constant 0 : index
    %c0_261 = arith.constant 0 : index
    %765 = vector.load %arg1[%c0_258, %c2_259, %c0_260, %c0_261] : memref<1x8x8x256xf32, #tpu.memory_space<vmem>>, vector<1x1x8x256xf32>
    %766 = vector.shape_cast %765 : vector<1x1x8x256xf32> to vector<8x256xf32>
    %767 = arith.addf %764, %766 : vector<8x256xf32>
    %c0_262 = arith.constant 0 : index
    %c2_263 = arith.constant 2 : index
    %c0_264 = arith.constant 0 : index
    %c0_265 = arith.constant 0 : index
    %768 = vector.load %arg12[%c0_262, %c2_263, %c0_264, %c0_265] : memref<1x8x8x256xf32, #tpu.memory_space<vmem>>, vector<1x1x8x256xf32>
    %769 = vector.shape_cast %768 : vector<1x1x8x256xf32> to vector<8x256xf32>
    %770 = vector.shape_cast %767 : vector<8x256xf32> to vector<1x1x8x256xf32>
    tpu.vector_store %arg12[%c0_262, %c2_263, %c0_264, %c0_265], %770 {strides = array<i32>} : memref<1x8x8x256xf32, #tpu.memory_space<vmem>>, vector<1x1x8x256xf32>,
    %771 = vector.extract_strided_slice %749 {offsets = [0, 768], sizes = [8, 256], strides = [1, 1]} : vector<8x2048xf32> to vector<8x256xf32>
    %c0_266 = arith.constant 0 : index
    %c3_267 = arith.constant 3 : index
    %c0_268 = arith.constant 0 : index
    %c0_269 = arith.constant 0 : index
    %772 = vector.load %arg1[%c0_266, %c3_267, %c0_268, %c0_269] : memref<1x8x8x256xf32, #tpu.memory_space<vmem>>, vector<1x1x8x256xf32>
    %773 = vector.shape_cast %772 : vector<1x1x8x256xf32> to vector<8x256xf32>
    %774 = arith.addf %771, %773 : vector<8x256xf32>
    %c0_270 = arith.constant 0 : index
    %c3_271 = arith.constant 3 : index
    %c0_272 = arith.constant 0 : index
    %c0_273 = arith.constant 0 : index
    %775 = vector.load %arg12[%c0_270, %c3_271, %c0_272, %c0_273] : memref<1x8x8x256xf32, #tpu.memory_space<vmem>>, vector<1x1x8x256xf32>
    %776 = vector.shape_cast %775 : vector<1x1x8x256xf32> to vector<8x256xf32>
    %777 = vector.shape_cast %774 : vector<8x256xf32> to vector<1x1x8x256xf32>
    tpu.vector_store %arg12[%c0_270, %c3_271, %c0_272, %c0_273], %777 {strides = array<i32>} : memref<1x8x8x256xf32, #tpu.memory_space<vmem>>, vector<1x1x8x256xf32>,
    %778 = vector.extract_strided_slice %749 {offsets = [0, 1024], sizes = [8, 256], strides = [1, 1]} : vector<8x2048xf32> to vector<8x256xf32>
    %c0_274 = arith.constant 0 : index
    %c4_275 = arith.constant 4 : index
    %c0_276 = arith.constant 0 : index
    %c0_277 = arith.constant 0 : index
    %779 = vector.load %arg1[%c0_274, %c4_275, %c0_276, %c0_277] : memref<1x8x8x256xf32, #tpu.memory_space<vmem>>, vector<1x1x8x256xf32>
    %780 = vector.shape_cast %779 : vector<1x1x8x256xf32> to vector<8x256xf32>
    %781 = arith.addf %778, %780 : vector<8x256xf32>
    %c0_278 = arith.constant 0 : index
    %c4_279 = arith.constant 4 : index
    %c0_280 = arith.constant 0 : index
    %c0_281 = arith.constant 0 : index
    %782 = vector.load %arg12[%c0_278, %c4_279, %c0_280, %c0_281] : memref<1x8x8x256xf32, #tpu.memory_space<vmem>>, vector<1x1x8x256xf32>
    %783 = vector.shape_cast %782 : vector<1x1x8x256xf32> to vector<8x256xf32>
    %784 = vector.shape_cast %781 : vector<8x256xf32> to vector<1x1x8x256xf32>
    tpu.vector_store %arg12[%c0_278, %c4_279, %c0_280, %c0_281], %784 {strides = array<i32>} : memref<1x8x8x256xf32, #tpu.memory_space<vmem>>, vector<1x1x8x256xf32>,
    %785 = vector.extract_strided_slice %749 {offsets = [0, 1280], sizes = [8, 256], strides = [1, 1]} : vector<8x2048xf32> to vector<8x256xf32>
    %c0_282 = arith.constant 0 : index
    %c5_283 = arith.constant 5 : index
    %c0_284 = arith.constant 0 : index
    %c0_285 = arith.constant 0 : index
    %786 = vector.load %arg1[%c0_282, %c5_283, %c0_284, %c0_285] : memref<1x8x8x256xf32, #tpu.memory_space<vmem>>, vector<1x1x8x256xf32>
    %787 = vector.shape_cast %786 : vector<1x1x8x256xf32> to vector<8x256xf32>
    %788 = arith.addf %785, %787 : vector<8x256xf32>
    %c0_286 = arith.constant 0 : index
    %c5_287 = arith.constant 5 : index
    %c0_288 = arith.constant 0 : index
    %c0_289 = arith.constant 0 : index
    %789 = vector.load %arg12[%c0_286, %c5_287, %c0_288, %c0_289] : memref<1x8x8x256xf32, #tpu.memory_space<vmem>>, vector<1x1x8x256xf32>
    %790 = vector.shape_cast %789 : vector<1x1x8x256xf32> to vector<8x256xf32>
    %791 = vector.shape_cast %788 : vector<8x256xf32> to vector<1x1x8x256xf32>
    tpu.vector_store %arg12[%c0_286, %c5_287, %c0_288, %c0_289], %791 {strides = array<i32>} : memref<1x8x8x256xf32, #tpu.memory_space<vmem>>, vector<1x1x8x256xf32>,
    %792 = vector.extract_strided_slice %749 {offsets = [0, 1536], sizes = [8, 256], strides = [1, 1]} : vector<8x2048xf32> to vector<8x256xf32>
    %c0_290 = arith.constant 0 : index
    %c6 = arith.constant 6 : index
    %c0_291 = arith.constant 0 : index
    %c0_292 = arith.constant 0 : index
    %793 = vector.load %arg1[%c0_290, %c6, %c0_291, %c0_292] : memref<1x8x8x256xf32, #tpu.memory_space<vmem>>, vector<1x1x8x256xf32>
    %794 = vector.shape_cast %793 : vector<1x1x8x256xf32> to vector<8x256xf32>
    %795 = arith.addf %792, %794 : vector<8x256xf32>
    %c0_293 = arith.constant 0 : index
    %c6_294 = arith.constant 6 : index
    %c0_295 = arith.constant 0 : index
    %c0_296 = arith.constant 0 : index
    %796 = vector.load %arg12[%c0_293, %c6_294, %c0_295, %c0_296] : memref<1x8x8x256xf32, #tpu.memory_space<vmem>>, vector<1x1x8x256xf32>
    %797 = vector.shape_cast %796 : vector<1x1x8x256xf32> to vector<8x256xf32>
    %798 = vector.shape_cast %795 : vector<8x256xf32> to vector<1x1x8x256xf32>
    tpu.vector_store %arg12[%c0_293, %c6_294, %c0_295, %c0_296], %798 {strides = array<i32>} : memref<1x8x8x256xf32, #tpu.memory_space<vmem>>, vector<1x1x8x256xf32>,
    %799 = vector.extract_strided_slice %749 {offsets = [0, 1792], sizes = [8, 256], strides = [1, 1]} : vector<8x2048xf32> to vector<8x256xf32>
    %c0_297 = arith.constant 0 : index
    %c7 = arith.constant 7 : index
    %c0_298 = arith.constant 0 : index
    %c0_299 = arith.constant 0 : index
    %800 = vector.load %arg1[%c0_297, %c7, %c0_298, %c0_299] : memref<1x8x8x256xf32, #tpu.memory_space<vmem>>, vector<1x1x8x256xf32>
    %801 = vector.shape_cast %800 : vector<1x1x8x256xf32> to vector<8x256xf32>
    %802 = arith.addf %799, %801 : vector<8x256xf32>
    %c0_300 = arith.constant 0 : index
    %c7_301 = arith.constant 7 : index
    %c0_302 = arith.constant 0 : index
    %c0_303 = arith.constant 0 : index
    %803 = vector.load %arg12[%c0_300, %c7_301, %c0_302, %c0_303] : memref<1x8x8x256xf32, #tpu.memory_space<vmem>>, vector<1x1x8x256xf32>
    %804 = vector.shape_cast %803 : vector<1x1x8x256xf32> to vector<8x256xf32>
    %805 = vector.shape_cast %802 : vector<8x256xf32> to vector<1x1x8x256xf32>
    tpu.vector_store %arg12[%c0_300, %c7_301, %c0_302, %c0_303], %805 {strides = array<i32>} : memref<1x8x8x256xf32, #tpu.memory_space<vmem>>, vector<1x1x8x256xf32>,
    return
  }
  func.func @transform_0(%arg0: i32) -> (i32, i32, i32, i32) {
    %c0_i32 = arith.constant 0 : i32
    %c0_i32_0 = arith.constant 0 : i32
    %c0_i32_1 = arith.constant 0 : i32
    %c0_i32_2 = arith.constant 0 : i32
    return %arg0, %c0_i32, %c0_i32_0, %c0_i32_1 : i32, i32, i32, i32
  }
  func.func @transform_1(%arg0: i32) -> (i32, i32) {
    %c0_i32 = arith.constant 0 : i32
    %c0_i32_0 = arith.constant 0 : i32
    %c0_i32_1 = arith.constant 0 : i32
    return %c0_i32, %c0_i32_0 : i32, i32
  }
  func.func @transform_2(%arg0: i32) -> (i32, i32) {
    %c0_i32 = arith.constant 0 : i32
    %c0_i32_0 = arith.constant 0 : i32
    %c0_i32_1 = arith.constant 0 : i32
    return %c0_i32, %c0_i32_0 : i32, i32
  }
  func.func @transform_3(%arg0: i32) -> (i32, i32, i32) {
    %c0_i32 = arith.constant 0 : i32
    %c0_i32_0 = arith.constant 0 : i32
    %c0_i32_1 = arith.constant 0 : i32
    %c0_i32_2 = arith.constant 0 : i32
    return %c0_i32, %c0_i32_0, %c0_i32_1 : i32, i32, i32
  }
  func.func @transform_4(%arg0: i32) -> (i32, i32) {
    %c0_i32 = arith.constant 0 : i32
    %c0_i32_0 = arith.constant 0 : i32
    %c0_i32_1 = arith.constant 0 : i32
    return %c0_i32, %c0_i32_0 : i32, i32
  }
  func.func @transform_5(%arg0: i32) -> (i32, i32) {
    %c0_i32 = arith.constant 0 : i32
    %c0_i32_0 = arith.constant 0 : i32
    %c0_i32_1 = arith.constant 0 : i32
    return %c0_i32, %c0_i32_0 : i32, i32
  }
  func.func @transform_6(%arg0: i32) -> (i32, i32) {
    %c0_i32 = arith.constant 0 : i32
    %c0_i32_0 = arith.constant 0 : i32
    %c0_i32_1 = arith.constant 0 : i32
    return %c0_i32, %c0_i32_0 : i32, i32
  }
  func.func @transform_7(%arg0: i32) -> (i32, i32) {
    %c0_i32 = arith.constant 0 : i32
    %c0_i32_0 = arith.constant 0 : i32
    %c0_i32_1 = arith.constant 0 : i32
    return %c0_i32, %c0_i32_0 : i32, i32
  }
  func.func @transform_8(%arg0: i32) -> (i32, i32) {
    %c0_i32 = arith.constant 0 : i32
    %c0_i32_0 = arith.constant 0 : i32
    %c0_i32_1 = arith.constant 0 : i32
    return %c0_i32, %c0_i32_0 : i32, i32
  }
  func.func @transform_9(%arg0: i32) -> (i32, i32) {
    %c0_i32 = arith.constant 0 : i32
    %c0_i32_0 = arith.constant 0 : i32
    %c0_i32_1 = arith.constant 0 : i32
    return %c0_i32, %c0_i32_0 : i32, i32
  }
  func.func @transform_10(%arg0: i32) -> (i32, i32) {
    %c0_i32 = arith.constant 0 : i32
    %c0_i32_0 = arith.constant 0 : i32
    %c0_i32_1 = arith.constant 0 : i32
    return %c0_i32, %c0_i32_0 : i32, i32
  }
  func.func @transform_11(%arg0: i32) -> (i32, i32, i32, i32) {
    %c0_i32 = arith.constant 0 : i32
    %c0_i32_0 = arith.constant 0 : i32
    %c0_i32_1 = arith.constant 0 : i32
    %c0_i32_2 = arith.constant 0 : i32
    return %arg0, %c0_i32, %c0_i32_0, %c0_i32_1 : i32, i32, i32, i32
  }
}

</mosaic_0001>

<bundles_post_ra>
// kernel: tpu_custom_call.1
= control target key start
LH: loop header
LB: loop body
LE: loop exit
PB: predicated region body
PF: predicated region fallthrough
CT: control target
= control target key end

     0   :  { %s9474_s0 = inlined_call_operand.hbm [shape: f32[2,8,8,256], index: 0, kind: input, shape index: {}]   ;;  %s9475_s1 = inlined_call_operand.vmem [shape: f32[5,8], index: 1, kind: input, shape index: {}]   ;;  %s9476_s2 = inlined_call_operand.vmem [shape: f32[5,1], index: 2, kind: input, shape index: {}]   ;;  %s9477_s3 = inlined_call_operand.hbm [shape: f32[5,8,8], index: 3, kind: input, shape index: {}]   ;;  %s9478_s4 = inlined_call_operand.vmem [shape: f32[5,8], index: 4, kind: input, shape index: {}]   ;;  %s9479_s5 = inlined_call_operand.vmem [shape: f32[8,40], index: 5, kind: input, shape index: {}]   ;;  %s9480_s6 = inlined_call_operand.vmem [shape: f32[5,8], index: 6, kind: input, shape index: {}]   ;;  %s9481_s7 = inlined_call_operand.hbm [shape: f32[8,8], index: 7, kind: input, shape index: {}]   ;;  %s9482_s8 = inlined_call_operand.vmem [shape: f32[8,1], index: 8, kind: input, shape index: {}]   ;;  %s9483_s9 = inlined_call_operand.vmem [shape: f32[8,1], index: 9, kind: input, shape index: {}]   ;;  %s9484_s10 = inlined_call_operand.vmem [shape: f32[8,1], index: 10, kind: input, shape index: {}]   ;;  %s9485_s11 = inlined_call_operand.hbm [shape: f32[2,8,8,256], index: 11, kind: output, shape index: {}]  }
   0x1   :  { %9546 = sst [smem:[#allocation32_spill]] %s9477_s3 }
   0x2   :  { %9547 = sst [smem:[#allocation33_spill]] %s9481_s7 }
   0x3   :  { %16 = vsyncpa [#allocation4], 0 }
   0x4   :  { %18 = vsyncpa [#allocation4 + $0x1], 0 }
   0x5   :  { %19 = vsyncpa [#allocation7], 0 }
   0x6   :  { %20 = vsyncpa [#allocation5], 0 }
   0x7   :  { %22 = vsyncpa [#allocation5 + $0x1], 0  ;;  %s6815_s17 = smov 0   ;;  %s6817_s18 = smov 0  }
   0x8   :  { %s6819_s19 = smov 0   ;;  %s6821_s20 = smov 0  }
   0x9 LB: > { %9548 = sst [smem:[#allocation13_spill]] %s6733_s19  ;;  %s6836_s21 = sadd.s32 4294967295, %s6737_s20   ;;  %s6737_s20 = sphi %s6821_s20, %s9638_s20   ;;  %s6733_s19 = sphi %s6819_s19, %s9640_s19   ;;  %s6729_s18 = sphi %s6817_s18, %s9642_s18   ;;  %s6725_s17 = sphi %s6815_s17, %s9641_s17  }
   0xa   : > { %s5983_s22 = sadd.s32 4294967294, %s6737_s20   ;;  %p48_p0 = scmp.ne.s32.totalorder %s6729_s18, %s6725_s17 }
   0xb   : > { %p49_p1 = scmp.eq.s32.totalorder %s6836_s21, 0  ;;  %p282_p2 = scmp.eq.s32.totalorder %s6836_s21, 1 }
   0xc   : > { %p288_p3 = scmp.eq.s32.totalorder %s5983_s22, 1  ;;  %p5984_p5 = scmp.ge.s32.totalorder %s6737_s20, 1 }
   0xd   : > { %p6845_p4 = por %p49_p1, %p48_p0  ;;  %p295_p7 = scmp.lt.s32.totalorder %s6737_s20, 3 }
   0xe   : > { %p6850_p6 = por %p288_p3, %p48_p0  ;;  %s9551_s3 = sld [smem:[#allocation32_spill]] }
   0xf   : > { %p6858_p8 = pnand %p5984_p5, %p295_p7  ;;  %s6739_s29 = smov [#allocation6]  }
  0x10   : > { %s314_s30 = sshll.u32 %s6739_s29, 4  ;;  %s9553_s7 = sld [smem:[#allocation33_spill]]  ;;  %s315_s30 = int_to_ptr.vmem [resolvable:$true] %s314_s30 }
  0x11   : > { %p6169_p9 = pneg %p6858_p8  ;;  %s6740_s15 = smov 128  }
  0x12   : > { %s6741_s16 = smov 8   ;;  %s6742_s22 = smov [#allocation8]  }
  0x13   : > { %p6170_p10 = pnand %p6169_p9, %p49_p1  ;;  %s338_s25 = sshll.u32 %s6742_s22, 4  ;;  %s339_s25 = int_to_ptr.vmem [resolvable:$true] %s338_s25 }
  0x14   : > { %s312_s27 = sshll.u32 %s9551_s3, 4  ;;  %s6871_s26 = sadd.s32 1, %s6737_s20   ;;  %s313_s27 = int_to_ptr.hbm [resolvable:$true] %s312_s27 }
  0x15   : > { %6172 = dma.hbm_to_vmem [thread:$0]  (!%p6170_p10), %s313_s27, 640, %s315_s30, [#allocation7], %s6740_s15, %s6740_s15, %s6741_s16  }
  0x16   : > { %s336_s14 = sshll.u32 %s9553_s7, 4  ;;  %9554 = sst [smem:[#allocation14_spill]] %s6871_s26  ;;  %s337_s14 = int_to_ptr.hbm [resolvable:$true] %s336_s14 }
  0x17   : > { %6175 = dma.hbm_to_vmem [thread:$0]  (!%p6170_p10), %s337_s14, 128, %s339_s25, [#allocation7]  }
  0x18   : > { %s35_s29 = sadd.s32 1, %s6733_s19  ;;  %s32_s3 = ssub.s32 %s6737_s20, %s6871_s26 }
  0x19   : > { %p42_p12 = scmp.ne.s32.totalorder %s6733_s19, %s6729_s18  ;;  %p33_p13 = scmp.eq.s32.totalorder %s32_s3, 0 }
  0x1a   : > { %p43_p0 = scmp.eq.s32.totalorder %s6737_s20, 0  ;;  %p6186_p5 = scmp.lt.s32.totalorder %s6737_s20, 2 }
  0x1b   : > { %p6881_p3 = por %p282_p2, %p42_p12  ;;  %s358_s30 = sand.u32 1, %s6733_s19  }
  0x1c   : > { %s6887_s27 = scalar_select %p33_p13, %s6733_s19, %s35_s29  }
  0x1d   : > { %p44_p7 = por %p43_p0, %p42_p12  ;;  %s5988_s13 = sshll.u32 %s358_s30, 7 }
  0x1e   : > { %9556 = sst [smem:[#allocation15_spill]] %s6887_s27  ;;  %s6105_s14 = sshll.u32 %s6737_s20, 7 }
  0x1f   : > { %s367_s22 = scalar_lea.hbm %s9474_s0, %s6105_s14  ;;  %s362_s25 = scalar_lea.vmem [#allocation3], %s5988_s13 }
  0x20   : > { %s370_s7 = sshll.u32 %s362_s25, 4  ;;  %s368_s3 = sshll.u32 %s367_s22, 4  ;;  %s371_s7 = int_to_ptr.vmem [resolvable:$true] %s370_s7  ;;  %s369_s3 = int_to_ptr.hbm [resolvable:$true] %s368_s3 }
  0x21   : > { %p6894_p2 = pnand %p6186_p5, %p44_p7  ;;  %s359_s29 = scalar_lea.sflag [#allocation4], %s358_s30 }
  0x22   : > { %s6637_s27 = sshra.s32 %s369_s3, 4  ;;  %s6644_s15 = scalar_lea.hbm %s9474_s0, 256  ;;  %s6638_s27 = int_to_ptr.hbm [resolvable:$true] %s6637_s27 }
  0x23   : > { %s6639_s19 = scalar_lea.hbm %s6638_s27, 128  ;;  %p6641_p10 = pneg %p6894_p2 }
  0x24   : > { %p6640_p9 = scmp.ne.s32.totalorder %s6638_s27, %s6639_s19  ;;  %p6645_p0 = scmp.lt.s32.totalorder %s6638_s27, %s9474_s0 }
  0x25   : > { %p6646_p5 = scmp.lt.s32.totalorder %s6644_s15, %s6639_s19 }
  0x26   : > { %p6642_p12 = pnand %p6641_p10, %p6640_p9 }
  0x27   : > { %p6647_p7 = por %p6646_p5, %p6645_p0 }
  0x28   : > { %p6643_p13 = pneg %p6642_p12 }
  0x2a   : > { %p6648_p11 = pnand %p6647_p7, %p6643_p13 }
  0x2c   : > { %6651 = shalt.err (!%p6648_p11)
}
  0x2d   : > { %s6743_s30 = smov 256   ;;  %s6744_s25 = smov 16  }
  0x2e   : > { %6179 = dma.hbm_to_vmem [thread:$0]  (!%p6894_p2), %s369_s3, 2048, %s371_s7, %s359_s29, %s6743_s30, %s6743_s30, %s6744_s25  }
  0x2f   : > { %382 = sbr.rel (%p6858_p8) target bundleno = 5260 (0x148c), region = 64 }
  0x34   : > { %s6911_s14 = sand.u32 1, %s6729_s18  }
  0x35   : > { %s5992_s27 = sshll.u32 %s6911_s14, 7  ;;  %s385_s19 = scalar_lea.sflag [#allocation4], %s6911_s14 }
  0x36   : > { %s6917_s13 = scalar_lea.vmem [#allocation3], %s5992_s27 }
  0x37   : > { %6712 = dma.done.wait (%p6845_p4), %s385_s19, 2048  }
  0x38   : > { %6714 = vsyncadd (%p6845_p4), %s385_s19, 4294965248 }
  0x39   : > { %6716 = dma.done.wait (%p49_p1), [#allocation7], 768  }
  0x3a   : > { %6718 = vsyncadd (%p49_p1), [#allocation7], 4294966528  ;;  %v457_v0 = vlaneseq  ;;  %v438_v2 = vld [vmem:[%s9475_s1] sm:$0x1f]  ;;  %v9489_v8 = vmov 0   ;;  %v6945_v10 = vld [vmem:[%s6917_s13 + $0x8] sm:$0xff] }
  0x3b   : > { %v456_v3 = vperm.slane %v438_v2, 2  ;;  %v463_v4 = vperm.slane %v438_v2, 3  ;;  %v1026_v5 = vperm.slane %v438_v2, 1  ;;  %v470_v6 = vperm.slane %v438_v2, 4  ;;  %v439_v7 = vld [vmem:[%s9476_s2] sm:$0x1f] }
  0x3c   : > { %v6928_v1 = vshrl.u32 %v457_v0, 7  ;;  %v6942_v9 = vld [vmem:[%s6917_s13] sm:$0xff]  ;;  %v6952_v13 = vld [vmem:[%s6917_s13 + $0x10] sm:$0xff]  ;;  %v6955_v14 = vld [vmem:[%s6917_s13 + $0x18] sm:$0xff]  ;;  %vm535_vm0 = vcmask 1040384   ;;  %vm573_vm1 = vcmask 1041409  }
  0x3d   : > { %v6968_v30 = vld [vmem:[%s6917_s13 + $0x20] sm:$0xff]  ;;  %v6971_v31 = vld [vmem:[%s6917_s13 + $0x28] sm:$0xff]  ;;  %vm576_vm2 = vcmask 1042434   ;;  %vm9509_vm3 = vcmask 1042432   ;;  %vm727_vm13 = vcmask 1043459   ;;  %vm9542_vm14 = vcmask 1043456  }
  0x3e   : > { %6238 = vset.pattern.permute.xlu0 %v6928_v1  ;;  %6239 = vset.pattern.permute.xlu1 %v6928_v1  ;;  %vm755_vm15 = vcmask 64512   ;;  %s6747_s22 = smov 112   ;;  %s6749_s23 = smov 120  }
  0x3f   : > { %6241 = vset.pattern.permute.xlu2 %v6928_v1 }
  0x46   : > { %461 = vperm.xlu0 %6238, %v456_v3   ;;  %468 = vperm.xlu1 %6239, %v463_v4  }
  0x47   : > { %1031 = vperm.xlu2 %6241, %v1026_v5  }
  0x4e   : > { %475 = vperm.xlu0 %6238, %v470_v6   ;;  %6240 = vset.pattern.permute.xlu1 %v9489_v8 }
  0x4f   : > { %521 = vperm.xlu1 %6240, %v439_v7  }
  0x57   : > { %6242 = vset.pattern.permute.xlu1 %v6928_v1 }
  0xb8   : > { %v6947_v11 = vpop.permute.xlu0 %461  ;;  %v6949_v12 = vpop.permute.xlu1 %468 }
  0xb9   : > { %9558 = vst [vmem:[#allocation16_spill] sm:$0xff] %v6947_v11  ;;  %v477_v15 = vmul.f32 %v6947_v11, %v6942_v9  ;;  %v478_v16 = vmul.f32 %v6947_v11, %v6945_v10  ;;  %v479_v17 = vmul.f32 %v6949_v12, %v6952_v13  ;;  %v480_v18 = vmul.f32 %v6949_v12, %v6955_v14 }
  0xba   : > { %9559 = vst [vmem:[#allocation17_spill] sm:$0xff] %v6949_v12 }
  0xbb   : > { %v483_v19 = vrot.slane %v477_v15, 4  ;;  %v489_v20 = vrot.slane %v478_v16, 4  ;;  %v495_v21 = vrot.slane %v479_v17, 4  ;;  %v501_v22 = vrot.slane %v480_v18, 4 }
  0xbd   : > { %v484_v23 = vadd.f32 %v483_v19, %v477_v15  ;;  %v490_v24 = vadd.f32 %v489_v20, %v478_v16  ;;  %v496_v25 = vadd.f32 %v495_v21, %v479_v17  ;;  %v502_v26 = vadd.f32 %v501_v22, %v480_v18 }
  0xbf   : > { %v485_v27 = vrot.slane %v484_v23, 2  ;;  %v491_v28 = vrot.slane %v490_v24, 2  ;;  %v497_v32 = vrot.slane %v496_v25, 2  ;;  %v503_v33 = vrot.slane %v502_v26, 2 }
  0xc0   : > { %v6965_v29 = vpop.permute.xlu0 %475 }
  0xc1   : > { %9560 = vst [vmem:[#allocation18_spill] sm:$0xff] %v6965_v29  ;;  %v481_v34 = vmul.f32 %v6965_v29, %v6968_v30  ;;  %v482_v35 = vmul.f32 %v6965_v29, %v6971_v31  ;;  %v486_v36 = vadd.f32 %v485_v27, %v484_v23  ;;  %v492_v37 = vadd.f32 %v491_v28, %v490_v24  ;;  %v6977_v42 = vpop.permute.xlu1 %521 }
  0xc2   : > { %v498_v38 = vadd.f32 %v497_v32, %v496_v25  ;;  %v504_v39 = vadd.f32 %v503_v33, %v502_v26  ;;  %v6980_v51 = vrot.slane %v6977_v42, 2  ;;  %v6983_v56 = vrot.slane %v6977_v42, 3 }
  0xc3   : > { %v507_v40 = vrot.slane %v481_v34, 4  ;;  %v513_v41 = vrot.slane %v482_v35, 4  ;;  %v487_v43 = vrot.slane %v486_v36, 1  ;;  %v493_v44 = vrot.slane %v492_v37, 1 }
  0xc4   : > { %v499_v47 = vrot.slane %v498_v38, 1  ;;  %v505_v48 = vrot.slane %v504_v39, 1  ;;  %9561 = vst [vmem:[#allocation19_spill] sm:$0xff] %v6983_v56  ;;  %v6986_v57 = vrot.slane %v6977_v42, 4 }
  0xc5   : > { %v508_v45 = vadd.f32 %v507_v40, %v481_v34  ;;  %v514_v46 = vadd.f32 %v513_v41, %v482_v35  ;;  %v488_v52 = vadd.f32 %v487_v43, %v486_v36  ;;  %v494_v53 = vadd.f32 %v493_v44, %v492_v37 }
  0xc6   : > { %9562 = vst [vmem:[#allocation20_spill] sm:$0xff] %v6986_v57  ;;  %v500_v58 = vadd.f32 %v499_v47, %v498_v38  ;;  %v506_v59 = vadd.f32 %v505_v48, %v504_v39 }
  0xc7   : > { %v509_v49 = vrot.slane %v508_v45, 2  ;;  %v515_v50 = vrot.slane %v514_v46, 2  ;;  %v529_v2 = vadd.f32 %v6980_v51, %v488_v52  ;;  %v530_v3 = vadd.f32 %v6980_v51, %v494_v53 }
  0xc8   : > { %v531_v4 = vadd.f32 %v6983_v56, %v500_v58  ;;  %v532_v5 = vadd.f32 %v6983_v56, %v506_v59 }
  0xc9   : > { %v510_v54 = vadd.f32 %v509_v49, %v508_v45  ;;  %v516_v55 = vadd.f32 %v515_v50, %v514_v46  ;;  %v536_v15 = vsel %vm535_vm0, %v529_v2, -inf  ;;  %v541_v17 = vsel %vm535_vm0, %v530_v3, -inf }
  0xca   : > { %v537_v21 = vsel %vm535_vm0, %v531_v4, -inf  ;;  %v542_v22 = vsel %vm535_vm0, %v532_v5, -inf }
  0xcb   : > { %v511_v60 = vrot.slane %v510_v54, 1  ;;  %v517_v61 = vrot.slane %v516_v55, 1 }
  0xcd   : > { %v512_v62 = vadd.f32 %v511_v60, %v510_v54  ;;  %v518_v63 = vadd.f32 %v517_v61, %v516_v55 }
  0xcf   : > { %v533_v6 = vadd.f32 %v6986_v57, %v512_v62  ;;  %v534_v7 = vadd.f32 %v6986_v57, %v518_v63 }
  0xd1   : > { %v538_v16 = vsel %vm535_vm0, %v533_v6, -inf  ;;  %v543_v18 = vsel %vm535_vm0, %v534_v7, -inf }
  0xd2   : > { %v539_v19 = vmax.f32 %v536_v15, %v538_v16  ;;  %v544_v20 = vmax.f32 %v541_v17, %v543_v18 }
  0xd4   : > { %v540_v23 = vmax.f32 %v539_v19, %v537_v21  ;;  %v545_v24 = vmax.f32 %v544_v20, %v542_v22 }
  0xd6   : > { %v546_v25 = vperm.slane %v540_v23, 0  ;;  %v547_v26 = vperm.slane %v545_v24, 0 }
  0xd8   : > { %v548_v27 = vsub.f32 %v529_v2, %v546_v25  ;;  %v549_v28 = vsub.f32 %v530_v3, %v547_v26  ;;  %v550_v32 = vsub.f32 %v531_v4, %v546_v25  ;;  %v551_v33 = vsub.f32 %v532_v5, %v547_v26 }
  0xd9   : > { %v552_v34 = vsub.f32 %v533_v6, %v546_v25  ;;  %v553_v35 = vsub.f32 %v534_v7, %v547_v26 }
  0xda   : > { %v554_v36 = vmul.f32 1.442695, %v548_v27  ;;  %v556_v37 = vmul.f32 1.442695, %v549_v28  ;;  %v558_v38 = vmul.f32 1.442695, %v550_v32 }
  0xdb   : > { %v560_v39 = vmul.f32 1.442695, %v551_v33  ;;  %v562_v40 = vmul.f32 1.442695, %v552_v34  ;;  %v564_v41 = vmul.f32 1.442695, %v553_v35 }
  0xdc   : > { %6284 = vpow2.f32 %v554_v36 }
  0xdd   : > { %6286 = vpow2.f32 %v556_v37 }
  0xde   : > { %6288 = vpow2.f32 %v558_v38 }
  0xdf   : > { %6290 = vpow2.f32 %v560_v39 }
  0xe0   : > { %6292 = vpow2.f32 %v562_v40 }
  0xe1   : > { %6294 = vpow2.f32 %v564_v41 }
  0xe2   : > { %v7000_v43 = vpop.eup %6284 }
  0xe3   : > { %v7002_v44 = vpop.eup %6286 }
  0xe4   : > { %v6289_v45 = vpop.eup %6288 }
  0xe5   : > { %v6291_v46 = vpop.eup %6290  ;;  %v572_v47 = vrot.slane %v6289_v45, 7 }
  0xe6   : > { %v6293_v48 = vpop.eup %6292  ;;  %v578_v49 = vrot.slane %v6291_v46, 7 }
  0xe7   : > { %v6295_v50 = vpop.eup %6294  ;;  %v574_v52 = vsel %vm573_vm1, %v572_v47, %v7000_v43  ;;  %v575_v53 = vrot.slane %v6293_v48, 6 }
  0xe8   : > { %v579_v54 = vsel %vm573_vm1, %v578_v49, %v7002_v44  ;;  %v580_v55 = vrot.slane %v6295_v50, 6 }
  0xe9   : > { %v577_v58 = vsel %vm576_vm2, %v575_v53, %v574_v52 }
  0xea   : > { %v581_v59 = vsel %vm576_vm2, %v580_v55, %v579_v54  ;;  %v585_v60 = vsel %vm9509_vm3, %v577_v58, 0.0 }
  0xeb   : > { %v586_v61 = vrot.slane %v585_v60, 4  ;;  %v592_v62 = vsel %vm9509_vm3, %v581_v59, 0.0 }
  0xec   : > { %v593_v63 = vrot.slane %v592_v62, 4 }
  0xed   : > { %v587_v2 = vadd.f32 %v586_v61, %v585_v60 }
  0xee   : > { %v594_v3 = vadd.f32 %v593_v63, %v592_v62 }
  0xef   : > { %v588_v4 = vrot.slane %v587_v2, 2 }
  0xf0   : > { %v595_v5 = vrot.slane %v594_v3, 2 }
  0xf1   : > { %v589_v6 = vadd.f32 %v588_v4, %v587_v2 }
  0xf2   : > { %v596_v7 = vadd.f32 %v595_v5, %v594_v3 }
  0xf3   : > { %v590_v15 = vrot.slane %v589_v6, 1 }
  0xf4   : > { %v597_v16 = vrot.slane %v596_v7, 1 }
  0xf5   : > { %v591_v17 = vadd.f32 %v590_v15, %v589_v6  ;;  %v7020_v15 = vpop.permute.xlu2 %1031 }
  0xf6   : > { %v598_v18 = vadd.f32 %v597_v16, %v596_v7  ;;  %9563 = vst [vmem:[#allocation21_spill] sm:$0xff] %v7020_v15 }
  0xf7   : > { %v599_v19 = vperm.slane %v591_v17, 0 }
  0xf8   : > { %v600_v20 = vperm.slane %v598_v18, 0 }
  0xf9   : > { %6296 = vrcp.f32 %v599_v19  ;;  %v612_v26 = vand.u32 2147483648, %v599_v19  ;;  %v610_v32 = vand.u32 2147483647, %v599_v19  ;;  %vm606_vm6 = vweird.f32 %v599_v19 }
  0xfa   : > { %6298 = vrcp.f32 %v600_v20  ;;  %v627_v33 = vand.u32 2147483648, %v600_v20  ;;  %v625_v35 = vand.u32 2147483647, %v600_v20  ;;  %vm621_vm8 = vweird.f32 %v600_v20 }
  0xfb   : > { %v613_v37 = vor.u32 1.1754944e-38, %v612_v26  ;;  %vm611_vm9 = vcmp.eq.f32.partialorder %v610_v32, 8.507059e+37 }
  0xfc   : > { %v628_v40 = vor.u32 1.1754944e-38, %v627_v33  ;;  %vm626_vm11 = vcmp.eq.f32.partialorder %v625_v35, 8.507059e+37 }
  0xff   : > { %v6297_v21 = vpop.eup %6296 }
 0x100   : > { %v6299_v22 = vpop.eup %6298  ;;  %v602_v23 = vmul.f32 %v6297_v21, %v599_v19  ;;  %vm607_vm4 = vweird.f32 %v6297_v21 }
 0x101   : > { %v617_v24 = vmul.f32 %v6299_v22, %v600_v20  ;;  %vm622_vm5 = vweird.f32 %v6299_v22  ;;  %vm608_vm7 = vmor %vm606_vm6, %vm607_vm4 }
 0x102   : > { %v603_v25 = vsub.f32 1.0, %v602_v23  ;;  %vm623_vm10 = vmor %vm621_vm8, %vm622_vm5 }
 0x103   : > { %v618_v27 = vsub.f32 1.0, %v617_v24 }
 0x104   : > { %v604_v28 = vmul.f32 %v6297_v21, %v603_v25 }
 0x105   : > { %v619_v34 = vmul.f32 %v6299_v22, %v618_v27 }
 0x106   : > { %v605_v36 = vadd.f32 %v6297_v21, %v604_v28 }
 0x107   : > { %v620_v38 = vadd.f32 %v6299_v22, %v619_v34 }
 0x108   : > { %v609_v39 = vsel %vm608_vm7, %v6297_v21, %v605_v36 }
 0x109   : > { %v614_v41 = vsel %vm611_vm9, %v613_v37, %v609_v39  ;;  %v624_v47 = vsel %vm623_vm10, %v6299_v22, %v620_v38 }
 0x10a   : > { %v629_v49 = vsel %vm626_vm11, %v628_v40, %v624_v47  ;;  %v631_v52 = vmul.f32 %v6289_v45, %v614_v41  ;;  %v633_v53 = vmul.f32 %v6293_v48, %v614_v41  ;;  %v615_v58 = vmul.f32 %v7000_v43, %v614_v41 }
 0x10b   : > { %v632_v54 = vmul.f32 %v6291_v46, %v629_v49  ;;  %v634_v55 = vmul.f32 %v6295_v50, %v629_v49  ;;  %v630_v61 = vmul.f32 %v7002_v44, %v629_v49  ;;  %v6746_v43 = vmov 256.0  }
 0x10c   : > { %v641_v59 = vrot.slane %v631_v52, 7  ;;  %v643_v60 = vrot.slane %v633_v53, 6  ;;  %6300 = vrcp.f32 %v6746_v43  ;;  %v1033_v43 = vmul.f32 %v7020_v15, %v6942_v9 }
 0x10d   : > { %v645_v62 = vrot.slane %v632_v54, 7  ;;  %v647_v63 = vrot.slane %v634_v55, 6 }
 0x10e   : > { %v642_v2 = vsel %vm573_vm1, %v641_v59, %v615_v58 }
 0x10f   : > { %v644_v3 = vsel %vm576_vm2, %v643_v60, %v642_v2  ;;  %v646_v4 = vsel %vm573_vm1, %v645_v62, %v630_v61 }
 0x110   : > { %v648_v5 = vsel %vm576_vm2, %v647_v63, %v646_v4  ;;  %v651_v45 = vsel %vm9509_vm3, %v644_v3, 0.0 }
 0x111   : > { %v652_v46 = vsel %vm9509_vm3, %v648_v5, 0.0  ;;  %v7038_v5 = vld [vmem:[%s6917_s13 + $0x30] sm:$0xff] }
 0x112   : > { %v653_v48 = vadd.f32 %v652_v46, %v651_v45  ;;  %v6301_v50 = vpop.eup %6300  ;;  %v7041_v45 = vld [vmem:[%s6917_s13 + $0x38] sm:$0xff]  ;;  %v1039_v46 = vmul.f32 %v7038_v5, %v6965_v29 }
 0x113   : > { %v657_v44 = vmul.f32 256.0, %v6301_v50  ;;  %vm661_vm12 = vweird.f32 %v6301_v50 }
 0x114   : > { %654 = vadd.xlane.f32.xlu2 %v653_v48  ;;  %v1040_v48 = vmul.f32 %v7041_v45, %v6965_v29 }
 0x115   : > { %v658_v6 = vsub.f32 1.0, %v657_v44  ;;  %v1037_v44 = vmul.f32 %v6949_v12, %v6968_v30 }
 0x117   : > { %v659_v7 = vmul.f32 %v6301_v50, %v658_v6  ;;  %v1034_v6 = vmul.f32 %v7020_v15, %v6945_v10 }
 0x119   : > { %v660_v16 = vadd.f32 %v6301_v50, %v659_v7  ;;  %v1036_v7 = vmul.f32 %v6947_v11, %v6955_v14 }
 0x11b   : > { %v7022_v17 = vsel %vm661_vm12, %v6301_v50, %v660_v16  ;;  %v1035_v50 = vmul.f32 %v6947_v11, %v6952_v13  ;;  %v1038_v16 = vmul.f32 %v6949_v12, %v6971_v31 }
 0x11c   : > { %9564 = vst [vmem:[#allocation22_spill] sm:$0xff] %v7022_v17 }
 0x187   : > { %v655_v18 = vpop.xlane.xlu2 %654 }
 0x188   : > { %v663_v19 = vmul.f32 %v7022_v17, %v655_v18  ;;  %v1077_v18 = vrot.slane %v1039_v46, 4 }
 0x18a   : > { %v666_v20 = vrot.slane %v663_v19, 2  ;;  %v670_v21 = vmul.f32 %v663_v19, %v615_v58  ;;  %v671_v22 = vmul.f32 %v663_v19, %v630_v61  ;;  %v665_v23 = vrot.slane %v663_v19, 1 }
 0x18b   : > { %v1083_v19 = vrot.slane %v1040_v48, 4 }
 0x18c   : > { %v676_v24 = vperm.slane %v670_v21, 0  ;;  %v677_v25 = vperm.slane %v671_v22, 0  ;;  %v672_v26 = vmul.f32 %v665_v23, %v631_v52  ;;  %v673_v27 = vmul.f32 %v665_v23, %v632_v54 }
 0x18d   : > { %v674_v28 = vmul.f32 %v666_v20, %v633_v53  ;;  %v675_v32 = vmul.f32 %v666_v20, %v634_v55  ;;  %v1041_v20 = vrot.slane %v1033_v43, 4  ;;  %v1047_v23 = vrot.slane %v1034_v6, 4 }
 0x18e   : > { %v682_v33 = vmul.f32 %v676_v24, %v6942_v9  ;;  %v683_v34 = vmul.f32 %v677_v25, %v6945_v10  ;;  %v678_v35 = vperm.slane %v672_v26, 0  ;;  %v679_v36 = vperm.slane %v673_v27, 0 }
 0x18f   : > { %v703_v37 = vrot.slane %v672_v26, 7  ;;  %v707_v38 = vrot.slane %v673_v27, 7  ;;  %v705_v39 = vrot.slane %v674_v28, 6  ;;  %v709_v40 = vrot.slane %v675_v32, 6 }
 0x190   : > { %v688_v41 = vadd.f32 %v683_v34, %v682_v33  ;;  %v684_v47 = vmul.f32 %v678_v35, %v6952_v13  ;;  %v685_v49 = vmul.f32 %v679_v36, %v6955_v14  ;;  %v680_v58 = vperm.slane %v674_v28, 0 }
 0x191   : > { %v704_v52 = vsel %vm573_vm1, %v703_v37, %v670_v21  ;;  %v708_v53 = vsel %vm573_vm1, %v707_v38, %v671_v22  ;;  %v681_v54 = vperm.slane %v675_v32, 0  ;;  %v1053_v21 = vrot.slane %v1035_v50, 4 }
 0x192   : > { %689 = vadd.xlane.f32.xlu0 %v688_v41  ;;  %v691_v55 = vadd.f32 %v685_v49, %v684_v47  ;;  %v706_v59 = vsel %vm576_vm2, %v705_v39, %v704_v52  ;;  %v710_v60 = vsel %vm576_vm2, %v709_v40, %v708_v53  ;;  %v686_v2 = vmul.f32 %v680_v58, %v6968_v30 }
 0x193   : > { %v713_v61 = vsel %vm9509_vm3, %v706_v59, 0.0  ;;  %v714_v62 = vsel %vm9509_vm3, %v710_v60, 0.0  ;;  %v687_v3 = vmul.f32 %v681_v54, %v6971_v31  ;;  %v1065_v22 = vrot.slane %v1037_v44, 4 }
 0x194   : > { %692 = vadd.xlane.f32.xlu1 %v691_v55  ;;  %v715_v63 = vadd.f32 %v714_v62, %v713_v61  ;;  %v1059_v24 = vrot.slane %v1036_v7, 4  ;;  %v1071_v25 = vrot.slane %v1038_v16, 4  ;;  %v1078_v26 = vadd.f32 %v1077_v18, %v1039_v46 }
 0x195   : > { %v694_v4 = vadd.f32 %v687_v3, %v686_v2  ;;  %v1084_v27 = vadd.f32 %v1083_v19, %v1040_v48  ;;  %v1042_v28 = vadd.f32 %v1041_v20, %v1033_v43  ;;  %v1054_v32 = vadd.f32 %v1053_v21, %v1035_v50 }
 0x196   : > { %716 = vadd.xlane.f32.xlu2 %v715_v63  ;;  %v1066_v33 = vadd.f32 %v1065_v22, %v1037_v44  ;;  %v1048_v34 = vadd.f32 %v1047_v23, %v1034_v6  ;;  %v1060_v35 = vadd.f32 %v1059_v24, %v1036_v7  ;;  %v1072_v36 = vadd.f32 %v1071_v25, %v1038_v16 }
 0x197   : > { %v1079_v37 = vrot.slane %v1078_v26, 2  ;;  %v1085_v38 = vrot.slane %v1084_v27, 2  ;;  %v1043_v39 = vrot.slane %v1042_v28, 2  ;;  %v1055_v40 = vrot.slane %v1054_v32, 2 }
 0x198   : > { %v1067_v41 = vrot.slane %v1066_v33, 2  ;;  %v1049_v47 = vrot.slane %v1048_v34, 2  ;;  %v1061_v49 = vrot.slane %v1060_v35, 2  ;;  %v1073_v58 = vrot.slane %v1072_v36, 2 }
 0x199   : > { %v1080_v52 = vadd.f32 %v1079_v37, %v1078_v26  ;;  %v1086_v53 = vadd.f32 %v1085_v38, %v1084_v27  ;;  %v1044_v54 = vadd.f32 %v1043_v39, %v1042_v28  ;;  %v1056_v55 = vadd.f32 %v1055_v40, %v1054_v32 }
 0x19a   : > { %695 = vadd.xlane.f32.xlu0 %v694_v4  ;;  %v1068_v59 = vadd.f32 %v1067_v41, %v1066_v33  ;;  %v1050_v60 = vadd.f32 %v1049_v47, %v1048_v34  ;;  %v1062_v61 = vadd.f32 %v1061_v49, %v1060_v35  ;;  %v1074_v62 = vadd.f32 %v1073_v58, %v1072_v36 }
 0x19b   : > { %v1081_v63 = vrot.slane %v1080_v52, 1  ;;  %v1087_v2 = vrot.slane %v1086_v53, 1  ;;  %v1045_v3 = vrot.slane %v1044_v54, 1  ;;  %v1057_v4 = vrot.slane %v1056_v55, 1 }
 0x19c   : > { %v1069_v46 = vrot.slane %v1068_v59, 1  ;;  %v1051_v48 = vrot.slane %v1050_v60, 1  ;;  %v1063_v43 = vrot.slane %v1062_v61, 1  ;;  %v1075_v50 = vrot.slane %v1074_v62, 1 }
 0x19d   : > { %v1082_v44 = vadd.f32 %v1081_v63, %v1080_v52  ;;  %v1088_v6 = vadd.f32 %v1087_v2, %v1086_v53  ;;  %v7060_v7 = vrot.slane %v6977_v42, 1  ;;  %v1046_v16 = vadd.f32 %v1045_v3, %v1044_v54 }
 0x19e   : > { %v1058_v18 = vadd.f32 %v1057_v4, %v1056_v55  ;;  %v1070_v19 = vadd.f32 %v1069_v46, %v1068_v59  ;;  %v1052_v20 = vadd.f32 %v1051_v48, %v1050_v60  ;;  %v1064_v21 = vadd.f32 %v1063_v43, %v1062_v61 }
 0x19f   : > { %v1076_v22 = vadd.f32 %v1075_v50, %v1074_v62  ;;  %v1097_v23 = vadd.f32 %v1082_v44, %v6986_v57  ;;  %v1098_v24 = vadd.f32 %v1088_v6, %v6986_v57  ;;  %v1091_v25 = vadd.f32 %v7060_v7, %v1046_v16 }
 0x1a0   : > { %v1093_v26 = vadd.f32 %v1058_v18, %v6980_v51  ;;  %v1095_v27 = vadd.f32 %v1070_v19, %v6983_v56  ;;  %v1092_v28 = vadd.f32 %v7060_v7, %v1052_v20  ;;  %v1094_v32 = vadd.f32 %v1064_v21, %v6980_v51 }
 0x1a1   : > { %v1096_v33 = vadd.f32 %v1076_v22, %v6983_v56  ;;  %v1103_v34 = vsel %vm535_vm0, %v1097_v23, -inf  ;;  %v1110_v35 = vsel %vm535_vm0, %v1098_v24, -inf  ;;  %v1099_v36 = vsel %vm535_vm0, %v1091_v25, -inf }
 0x1a2   : > { %v1100_v37 = vsel %vm535_vm0, %v1093_v26, -inf  ;;  %v1101_v38 = vsel %vm535_vm0, %v1095_v27, -inf  ;;  %v1106_v40 = vsel %vm535_vm0, %v1092_v28, -inf  ;;  %v1107_v41 = vsel %vm535_vm0, %v1094_v32, -inf }
 0x1a3   : > { %v1104_v39 = vmax.f32 %v1100_v37, %v1103_v34  ;;  %v1108_v47 = vsel %vm535_vm0, %v1096_v33, -inf  ;;  %v1111_v49 = vmax.f32 %v1107_v41, %v1110_v35  ;;  %v1102_v58 = vmax.f32 %v1099_v36, %v1101_v38 }
 0x1a4   : > { %v1109_v52 = vmax.f32 %v1106_v40, %v1108_v47 }
 0x1a5   : > { %v1105_v53 = vmax.f32 %v1102_v58, %v1104_v39 }
 0x1a6   : > { %v1112_v54 = vmax.f32 %v1109_v52, %v1111_v49 }
 0x1a7   : > { %v1113_v55 = vperm.slane %v1105_v53, 0  ;;  %v7111_v53 = vand.u32 127, %v457_v0  ;;  %v7123_v0 = vld [vmem:[%s9478_s4] sm:$0x1f] }
 0x1a8   : > { %v1114_v59 = vperm.slane %v1112_v54, 0 }
 0x1a9   : > { %v1117_v60 = vsub.f32 %v1093_v26, %v1113_v55  ;;  %v1119_v62 = vsub.f32 %v1095_v27, %v1113_v55  ;;  %v1115_v4 = vsub.f32 %v1091_v25, %v1113_v55  ;;  %v1121_v43 = vsub.f32 %v1097_v23, %v1113_v55  ;;  %9565 = vst [vmem:[#allocation23_spill] sm:$0xff] %v7111_v53 }
 0x1aa   : > { %v1118_v61 = vsub.f32 %v1094_v32, %v1114_v59  ;;  %v1120_v63 = vsub.f32 %v1096_v33, %v1114_v59  ;;  %v1116_v46 = vsub.f32 %v1092_v28, %v1114_v59  ;;  %v1122_v44 = vsub.f32 %v1098_v24, %v1114_v59  ;;  %v7113_v59 = vld [vmem:[#allocation6 + $0x10] sm:$0xff] }
 0x1ab   : > { %v1127_v2 = vmul.f32 1.442695, %v1117_v60  ;;  %v1131_v48 = vmul.f32 1.442695, %v1119_v62  ;;  %v1123_v6 = vmul.f32 1.442695, %v1115_v4 }
 0x1ac   : > { %v1129_v3 = vmul.f32 1.442695, %v1118_v61  ;;  %v1133_v50 = vmul.f32 1.442695, %v1120_v63  ;;  %v1125_v16 = vmul.f32 1.442695, %v1116_v46 }
 0x1ad   : > { %6302 = vpow2.f32 %v1127_v2  ;;  %v1135_v18 = vmul.f32 1.442695, %v1121_v43  ;;  %v1137_v19 = vmul.f32 1.442695, %v1122_v44  ;;  %v7116_v2 = vld [vmem:[#allocation6 + $0x18] sm:$0xff] }
 0x1ae   : > { %6304 = vpow2.f32 %v1129_v3 }
 0x1af   : > { %6306 = vpow2.f32 %v1131_v48 }
 0x1b0   : > { %6308 = vpow2.f32 %v1133_v50 }
 0x1b1   : > { %6310 = vpow2.f32 %v1123_v6 }
 0x1b2   : > { %6312 = vpow2.f32 %v1125_v16 }
 0x1b3   : > { %v7078_v20 = vpop.eup %6302  ;;  %6314 = vpow2.f32 %v1135_v18 }
 0x1b4   : > { %v7080_v21 = vpop.eup %6304  ;;  %6316 = vpow2.f32 %v1137_v19  ;;  %v1147_v23 = vrot.slane %v7078_v20, 7 }
 0x1b5   : > { %v7082_v22 = vpop.eup %6306  ;;  %v1153_v25 = vrot.slane %v7080_v21, 7 }
 0x1b6   : > { %v7085_v24 = vpop.eup %6308  ;;  %v1149_v27 = vrot.slane %v7082_v22, 6 }
 0x1b7   : > { %v7088_v26 = vpop.eup %6310  ;;  %v1155_v33 = vrot.slane %v7085_v24, 6 }
 0x1b8   : > { %v7091_v28 = vpop.eup %6312  ;;  %v1148_v32 = vsel %vm573_vm1, %v1147_v23, %v7088_v26  ;;  %v7129_v23 = vld [vmem:[#allocation6 + $0x20] sm:$0xff] }
 0x1b9   : > { %v7096_v34 = vpop.eup %6314  ;;  %v1154_v35 = vsel %vm573_vm1, %v1153_v25, %v7091_v28  ;;  %v1150_v37 = vsel %vm576_vm2, %v1149_v27, %v1148_v32 }
 0x1ba   : > { %v7100_v36 = vpop.eup %6316  ;;  %v1151_v38 = vrot.slane %v7096_v34, 5  ;;  %v1156_v39 = vsel %vm576_vm2, %v1155_v33, %v1154_v35 }
 0x1bb   : > { %v1157_v40 = vrot.slane %v7100_v36, 5 }
 0x1bc   : > { %v1152_v41 = vsel %vm727_vm13, %v1151_v38, %v1150_v37 }
 0x1bd   : > { %v1158_v47 = vsel %vm727_vm13, %v1157_v40, %v1156_v39  ;;  %v1162_v49 = vsel %vm9542_vm14, %v1152_v41, 0.0 }
 0x1be   : > { %v1169_v58 = vsel %vm9542_vm14, %v1158_v47, 0.0  ;;  %v1163_v52 = vrot.slane %v1162_v49, 4 }
 0x1bf   : > { %v1170_v54 = vrot.slane %v1169_v58, 4 }
 0x1c0   : > { %v1164_v60 = vadd.f32 %v1163_v52, %v1162_v49 }
 0x1c1   : > { %v1171_v62 = vadd.f32 %v1170_v54, %v1169_v58 }
 0x1c2   : > { %v1165_v48 = vrot.slane %v1164_v60, 2 }
 0x1c3   : > { %v1172_v6 = vrot.slane %v1171_v62, 2 }
 0x1c4   : > { %v1166_v25 = vadd.f32 %v1165_v48, %v1164_v60 }
 0x1c5   : > { %v1173_v33 = vadd.f32 %v1172_v6, %v1171_v62 }
 0x1c6   : > { %v1167_v37 = vrot.slane %v1166_v25, 1 }
 0x1c7   : > { %v1174_v38 = vrot.slane %v1173_v33, 1 }
 0x1c8   : > { %v1168_v40 = vadd.f32 %v1167_v37, %v1166_v25 }
 0x1c9   : > { %v1175_v41 = vadd.f32 %v1174_v38, %v1173_v33 }
 0x1ca   : > { %v1176_v47 = vperm.slane %v1168_v40, 0 }
 0x1cb   : > { %v1177_v49 = vperm.slane %v1175_v41, 0 }
 0x1cc   : > { %6318 = vrcp.f32 %v1176_v47  ;;  %vm1183_vm6 = vweird.f32 %v1176_v47 }
 0x1cd   : > { %6320 = vrcp.f32 %v1177_v49  ;;  %vm1198_vm8 = vweird.f32 %v1177_v49  ;;  %v1202_v6 = vand.u32 2147483647, %v1177_v49 }
 0x1cf   : > { %vm1203_vm11 = vcmp.eq.f32.partialorder %v1202_v6, 8.507059e+37 }
 0x1d2   : > { %v6319_v52 = vpop.eup %6318 }
 0x1d3   : > { %v6321_v54 = vpop.eup %6320  ;;  %v1179_v60 = vmul.f32 %v6319_v52, %v1176_v47  ;;  %vm1184_vm4 = vweird.f32 %v6319_v52 }
 0x1d4   : > { %vm1199_vm5 = vweird.f32 %v6321_v54  ;;  %vm1185_vm7 = vmor %vm1183_vm6, %vm1184_vm4  ;;  %vm729_vm4 = vcmask 1044484  }
 0x1d5   : > { %v1180_v62 = vsub.f32 1.0, %v1179_v60  ;;  %vm1200_vm9 = vmor %vm1198_vm8, %vm1199_vm5  ;;  %vm1812_vm5 = vcmask 1044480  }
 0x205   : > { %v690_v55 = vpop.xlane.xlu0 %689 }
 0x206   : > { %v723_v61 = vperm.slane %v690_v55, %v7111_v53 }
 0x207   : > { %v693_v63 = vpop.xlane.xlu1 %692 }
 0x208   : > { %v724_v3 = vperm.slane %v693_v63, %v7111_v53  ;;  %v752_v4 = vmul.f32 %v723_v61, %v7113_v59  ;;  %v1194_v61 = vmul.f32 %v6321_v54, %v1177_v49 }
 0x209   : > { %v717_v46 = vpop.xlane.xlu2 %716 }
 0x20a   : > { %v766_v43 = vrot.slane %v717_v46, 6  ;;  %v756_v50 = vsel %vm755_vm15, %v752_v4, 0.0  ;;  %v753_v44 = vmul.f32 %v724_v3, %v7116_v2  ;;  %v1195_v63 = vsub.f32 1.0, %v1194_v61 }
 0x20b   : > { %757 = vadd.xlane.f32.xlu1 %v756_v50  ;;  %v1181_v3 = vmul.f32 %v6319_v52, %v1180_v62  ;;  %v1204_v50 = vand.u32 2147483648, %v1177_v49 }
 0x20c   : > { %v768_v16 = vmul.f32 %v766_v43, %v7123_v0  ;;  %v759_v18 = vsel %vm755_vm15, %v753_v44, 0.0  ;;  %v1196_v4 = vmul.f32 %v6321_v54, %v1195_v63  ;;  %v1189_v43 = vand.u32 2147483648, %v1176_v47 }
 0x20d   : > { %v696_v19 = vpop.xlane.xlu0 %695  ;;  %760 = vadd.xlane.f32.xlu0 %v759_v18  ;;  %v1182_v46 = vadd.f32 %v6319_v52, %v1181_v3  ;;  %v1187_v44 = vand.u32 2147483647, %v1176_v47  ;;  %v1205_v25 = vor.u32 1.1754944e-38, %v1204_v50 }
 0x20e   : > { %v725_v27 = vperm.slane %v696_v19, %v7111_v53  ;;  %v777_v32 = vperm.slane %v768_v16, 3  ;;  %v770_v58 = vperm.slane %v768_v16, 2  ;;  %v784_v55 = vperm.slane %v768_v16, 4 }
 0x20f   : > { %v1197_v48 = vadd.f32 %v6321_v54, %v1196_v4  ;;  %v1186_v16 = vsel %vm1185_vm7, %v6319_v52, %v1182_v46  ;;  %v1190_v19 = vor.u32 1.1754944e-38, %v1189_v43  ;;  %vm1188_vm10 = vcmp.eq.f32.partialorder %v1187_v44, 8.507059e+37 }
 0x210   : > { %782 = vperm.xlu2 %6241, %v777_v32   ;;  %v754_v35 = vmul.f32 %v725_v27, %v7129_v23 }
 0x211   : > { %v1201_v18 = vsel %vm1200_vm9, %v6321_v54, %v1197_v48  ;;  %v1191_v27 = vsel %vm1188_vm10, %v1190_v19, %v1186_v16 }
 0x212   : > { %v762_v39 = vsel %vm755_vm15, %v754_v35, 0.0  ;;  %v1206_v32 = vsel %vm1203_vm11, %v1205_v25, %v1201_v18  ;;  %v1208_v33 = vmul.f32 %v7078_v20, %v1191_v27  ;;  %v1210_v37 = vmul.f32 %v7082_v22, %v1191_v27 }
 0x213   : > { %v1209_v35 = vmul.f32 %v7080_v21, %v1206_v32  ;;  %v1211_v38 = vmul.f32 %v7085_v24, %v1206_v32  ;;  %v1192_v41 = vmul.f32 %v7088_v26, %v1191_v27  ;;  %v1207_v47 = vmul.f32 %v7091_v28, %v1206_v32 }
 0x214   : > { %v1224_v49 = vrot.slane %v1210_v37, 6  ;;  %v1212_v52 = vmul.f32 %v7096_v34, %v1191_v27  ;;  %v1213_v54 = vmul.f32 %v7100_v36, %v1206_v32 }
 0x215   : > { %763 = vadd.xlane.f32.xlu0 %v762_v39  ;;  %v1222_v39 = vrot.slane %v1208_v33, 7  ;;  %v1228_v40 = vrot.slane %v1209_v35, 7 }
 0x216   : > { %v1232_v60 = vrot.slane %v1213_v54, 5 }
 0x217   : > { %v1223_v20 = vsel %vm573_vm1, %v1222_v39, %v1192_v41  ;;  %v1229_v21 = vsel %vm573_vm1, %v1228_v40, %v1207_v47 }
 0x218   : > { %6244 = vset.pattern.permute.xlu2 %v9489_v8  ;;  %v1225_v22 = vsel %vm576_vm2, %v1224_v49, %v1223_v20 }
 0x224   : > { %775 = vperm.xlu1 %6242, %v770_v58   ;;  %v1230_v58 = vrot.slane %v1211_v38, 6 }
 0x226   : > { %v1231_v24 = vsel %vm576_vm2, %v1230_v58, %v1229_v21 }
 0x227   : > { %v1233_v28 = vsel %vm727_vm13, %v1232_v60, %v1231_v24 }
 0x228   : > { %v1237_v34 = vsel %vm9542_vm14, %v1233_v28, 0.0 }
 0x229   : > { %789 = vperm.xlu0 %6238, %v784_v55   ;;  %v1226_v55 = vrot.slane %v1212_v52, 5 }
 0x22b   : > { %v1227_v26 = vsel %vm727_vm13, %v1226_v55, %v1225_v22 }
 0x22c   : > { %6243 = vset.pattern.permute.xlu1 %v9489_v8  ;;  %v1236_v61 = vsel %vm9542_vm14, %v1227_v26, 0.0 }
 0x22d   : > { %v1238_v62 = vadd.f32 %v1237_v34, %v1236_v61 }
 0x253   : > { %1239 = vadd.xlane.f32.xlu0 %v1238_v62 }
 0x280   : > { %v761_v36 = vpop.xlane.xlu0 %760 }
 0x288   : > { %v7152_v63 = vpop.xlane.xlu0 %763 }
 0x29b   : > { %v790_v3 = vpop.permute.xlu0 %789 }
 0x2c6   : > { %v1240_v4 = vpop.xlane.xlu0 %1239 }
 0x2c7   : > { %v1241_v46 = vmul.f32 %v1240_v4, %v7022_v17 }
 0x2c9   : > { %v1250_v48 = vmul.f32 %v1241_v46, %v1192_v41  ;;  %v1251_v43 = vmul.f32 %v1241_v46, %v1207_v47  ;;  %v1243_v50 = vrot.slane %v1241_v46, 1  ;;  %v1244_v44 = vrot.slane %v1241_v46, 2 }
 0x2ca   : > { %v1245_v6 = vrot.slane %v1241_v46, 3 }
 0x2cb   : > { %v1258_v16 = vperm.slane %v1250_v48, 0  ;;  %v1259_v18 = vperm.slane %v1251_v43, 0  ;;  %v1252_v19 = vmul.f32 %v1243_v50, %v1208_v33  ;;  %v1253_v25 = vmul.f32 %v1243_v50, %v1209_v35 }
 0x2cc   : > { %v1254_v27 = vmul.f32 %v1244_v44, %v1210_v37  ;;  %v1255_v32 = vmul.f32 %v1244_v44, %v1211_v38  ;;  %v1256_v39 = vmul.f32 %v1245_v6, %v1212_v52  ;;  %v1257_v40 = vmul.f32 %v1245_v6, %v1213_v54 }
 0x2cd   : > { %v1266_v49 = vmul.f32 %v1258_v16, %v6942_v9  ;;  %v1267_v58 = vmul.f32 %v1259_v18, %v6945_v10  ;;  %v1260_v20 = vperm.slane %v1252_v19, 0  ;;  %v1261_v21 = vperm.slane %v1253_v25, 0  ;;  %v783_v18 = vpop.permute.xlu2 %782 }
 0x2ce   : > { %v1294_v22 = vrot.slane %v1252_v19, 7  ;;  %v1300_v41 = vrot.slane %v1253_v25, 7  ;;  %v1296_v47 = vrot.slane %v1254_v27, 6  ;;  %v1298_v24 = vrot.slane %v1256_v39, 5 }
 0x2cf   : > { %v1274_v55 = vadd.f32 %v1267_v58, %v1266_v49  ;;  %v1268_v60 = vmul.f32 %v1260_v20, %v6952_v13  ;;  %v1269_v33 = vmul.f32 %v1261_v21, %v6955_v14  ;;  %v1302_v35 = vrot.slane %v1255_v32, 6  ;;  %v7175_v58 = vld [vmem:[%s6917_s13 + $0x10] sm:$0xff]  ;;  %v7181_v20 = vld [vmem:[%s6917_s13 + $0x18] sm:$0xff] }
 0x2d0   : > { %v1295_v37 = vsel %vm573_vm1, %v1294_v22, %v1250_v48  ;;  %v1301_v38 = vsel %vm573_vm1, %v1300_v41, %v1251_v43  ;;  %v1304_v52 = vrot.slane %v1257_v40, 5  ;;  %v1262_v9 = vperm.slane %v1254_v27, 0  ;;  %v7189_v41 = vld [vmem:[%s6917_s13] sm:$0xff] }
 0x2d1   : > { %1275 = vadd.xlane.f32.xlu2 %v1274_v55  ;;  %v1277_v10 = vadd.f32 %v1269_v33, %v1268_v60  ;;  %v1297_v54 = vsel %vm576_vm2, %v1296_v47, %v1295_v37  ;;  %v1303_v26 = vsel %vm576_vm2, %v1302_v35, %v1301_v38  ;;  %v1263_v28 = vperm.slane %v1255_v32, 0  ;;  %v7203_v35 = vld [vmem:[#allocation6 + $0x8] sm:$0xff] }
 0x2d2   : > { %v1299_v61 = vsel %vm727_vm13, %v1298_v24, %v1297_v54  ;;  %v1305_v13 = vsel %vm727_vm13, %v1304_v52, %v1303_v26  ;;  %v1270_v14 = vmul.f32 %v1262_v9, %v6968_v30  ;;  %v1264_v34 = vperm.slane %v1256_v39, 0  ;;  %v758_v30 = vpop.xlane.xlu1 %757  ;;  %v7195_v24 = vld [vmem:[%s6917_s13 + $0x8] sm:$0xff]  ;;  %9566 = vst [vmem:[#allocation24_spill] sm:$0xff] %v7203_v35  ;;  %v7209_v9 = vld [vmem:[%s9479_s5] sm:$0xff] }
 0x2d3   : > { %1278 = vadd.xlane.f32.xlu1 %v1277_v10  ;;  %v1308_v62 = vsel %vm9542_vm14, %v1299_v61, 0.0  ;;  %v1309_v4 = vsel %vm9542_vm14, %v1305_v13, 0.0  ;;  %v1271_v46 = vmul.f32 %v1263_v28, %v6971_v31  ;;  %v1265_v48 = vperm.slane %v1257_v40, 0  ;;  %9567 = vst [vmem:[#allocation25_spill] sm:$0xff] %v7209_v9  ;;  %v7212_v10 = vld [vmem:[%s6917_s13 + $0x20] sm:$0xff]  ;;  %v7218_v26 = vld [vmem:[%s6917_s13 + $0x28] sm:$0xff] }
 0x2d4   : > { %v1310_v43 = vadd.f32 %v1309_v4, %v1308_v62  ;;  %v1272_v50 = vmul.f32 %v1264_v34, %v7038_v5  ;;  %v795_v19 = vadd.f32 %v783_v18, %v761_v36  ;;  %v796_v31 = vadd.f32 %v790_v3, %v7152_v63  ;;  %v6500_v4 = vld [vmem:[%s9475_s1] sm:$0x1f] }
 0x2d5   : > { %v1273_v44 = vmul.f32 %v1265_v48, %v7041_v45  ;;  %v1280_v6 = vadd.f32 %v1271_v46, %v1270_v14  ;;  %v1646_v46 = vperm.slane %v6500_v4, 0 }
 0x2d6   : > { %1311 = vadd.xlane.f32.xlu0 %v1310_v43 }
 0x2d7   : > { %v1283_v16 = vadd.f32 %v1273_v44, %v1272_v50 }
 0x2d9   : > { %1281 = vadd.xlane.f32.xlu2 %v1280_v6 }
 0x2da   : > { %v776_v25 = vpop.permute.xlu1 %775 }
 0x2db   : > { %1284 = vadd.xlane.f32.xlu1 %v1283_v16  ;;  %v794_v27 = vadd.f32 %v776_v25, %v758_v30 }
 0x2f1   : > { %804 = vperm.xlu2 %6244, %v795_v19  }
 0x2f4   : > { %799 = vperm.xlu1 %6243, %v794_v27  }
 0x2f9   : > { %6245 = vset.pattern.permute.xlu2 %v6928_v1 }
 0x2fc   : > { %809 = vperm.xlu1 %6243, %v796_v31  }
 0x304   : > { %6246 = vset.pattern.permute.xlu1 %v6928_v1 }
 0x344   : > { %v1276_v32 = vpop.xlane.xlu2 %1275 }
 0x345   : > { %v1317_v33 = vperm.slane %v1276_v32, %v7111_v53 }
 0x346   : > { %v1279_v40 = vpop.xlane.xlu1 %1278 }
 0x347   : > { %v1349_v52 = vmul.f32 %v1317_v33, %v7203_v35  ;;  %v1318_v6 = vperm.slane %v1279_v40, %v7111_v53 }
 0x349   : > { %v1312_v37 = vpop.xlane.xlu0 %1311  ;;  %v1353_v14 = vsel %vm755_vm15, %v1349_v52, 0.0  ;;  %v1350_v16 = vmul.f32 %v1318_v6, %v7113_v59  ;;  %v7281_v6 = vld [vmem:[%s6917_s13] sm:$0xff] }
 0x34a   : > { %v1366_v61 = vrot.slane %v1312_v37, 7 }
 0x34b   : > { %v1356_v30 = vsel %vm755_vm15, %v1350_v16, 0.0  ;;  %v7287_v16 = vld [vmem:[%s6917_s13 + $0x10] sm:$0xff] }
 0x34c   : > { %v1282_v39 = vpop.xlane.xlu2 %1281  ;;  %v1368_v34 = vmul.f32 %v1366_v61, %v7123_v0 }
 0x34d   : > { %v1319_v50 = vperm.slane %v1282_v39, %v7111_v53 }
 0x34e   : > { %v1285_v3 = vpop.xlane.xlu1 %1284  ;;  %v1377_v62 = vperm.slane %v1368_v34, 2  ;;  %v1370_v48 = vperm.slane %v1368_v34, 1  ;;  %v1384_v43 = vperm.slane %v1368_v34, 3  ;;  %v1391_v27 = vperm.slane %v1368_v34, 4 }
 0x34f   : > { %v1351_v0 = vmul.f32 %v1319_v50, %v7116_v2  ;;  %v1320_v18 = vperm.slane %v1285_v3, %v7111_v53  ;;  %v6748_v2 = vmov 768.0  }
 0x350   : > { %6322 = vrcp.f32 %v6748_v2  ;;  %v7304_v2 = vld [vmem:[%s6917_s13 + $0x48] sm:$0xff] }
 0x351   : > { %v1359_v44 = vsel %vm755_vm15, %v1351_v0, 0.0  ;;  %v1352_v19 = vmul.f32 %v1320_v18, %v7129_v23  ;;  %v7293_v18 = vld [vmem:[%s6917_s13 + $0x18] sm:$0xff]  ;;  %9573 = vst [vmem:[#allocation31_spill] sm:$0xff] %v7304_v2 }
 0x353   : > { %v1362_v25 = vsel %vm755_vm15, %v1352_v19, 0.0  ;;  %v7296_v19 = vld [vmem:[%s6917_s13 + $0x28] sm:$0xff] }
 0x354   : > { %v805_v49 = vpop.permute.xlu2 %804  ;;  %9571 = vst [vmem:[#allocation29_spill] sm:$0xff] %v7296_v19 }
 0x355   : > { %v7178_v36 = vadd.f32 %v7175_v58, %v805_v49  ;;  %v7184_v21 = vadd.f32 %v7181_v20, %v805_v49 }
 0x356   : > { %v6323_v31 = vpop.eup %6322 }
 0x357   : > { %v821_v63 = vadd.f32 %v7184_v21, %v7178_v36  ;;  %v830_v32 = vmul.f32 768.0, %v6323_v31  ;;  %vm834_vm12 = vweird.f32 %v6323_v31 }
 0x359   : > { %822 = vadd.xlane.f32.xlu1 %v821_v63  ;;  %v831_v39 = vsub.f32 1.0, %v830_v32  ;;  %v1655_v32 = vmul.f32 %v7287_v16, %v7020_v15 }
 0x35b   : > { %v832_v40 = vmul.f32 %v6323_v31, %v831_v39 }
 0x35d   : > { %v833_v49 = vadd.f32 %v6323_v31, %v832_v40 }
 0x35f   : > { %v7243_v23 = vsel %vm834_vm12, %v6323_v31, %v833_v49  ;;  %v1656_v49 = vmul.f32 %v7293_v18, %v7020_v15 }
 0x360   : > { %9568 = vst [vmem:[#allocation26_spill] sm:$0xff] %v7243_v23 }
 0x366   : > { %v800_v22 = vpop.permute.xlu1 %799 }
 0x367   : > { %v7192_v47 = vadd.f32 %v7189_v41, %v800_v22  ;;  %v7198_v55 = vadd.f32 %v7195_v24, %v800_v22 }
 0x369   : > { %v818_v60 = vadd.f32 %v7198_v55, %v7192_v47 }
 0x36b   : > { %819 = vadd.xlane.f32.xlu2 %v818_v60 }
 0x36e   : > { %v810_v38 = vpop.permute.xlu1 %809 }
 0x36f   : > { %v7215_v54 = vadd.f32 %v7212_v10, %v810_v38  ;;  %v7221_v28 = vadd.f32 %v7218_v26, %v810_v38 }
 0x371   : > { %v824_v13 = vadd.f32 %v7221_v28, %v7215_v54 }
 0x372   : > { %896 = vrot.lane.b32.xlu1 %v7209_v9, %s6747_s22 }
 0x373   : > { %1354 = vadd.xlane.f32.xlu2 %v1353_v14  ;;  %825 = vadd.xlane.f32.xlu0 %v824_v13 }
 0x37a   : > { %1382 = vperm.xlu1 %6246, %v1377_v62  }
 0x382   : > { %6248 = vset.pattern.permute.xlu1 %v9489_v8 }
 0x387   : > { %1651 = vperm.xlu0 %6238, %v1646_v46  }
 0x38b   : > { %1375 = vperm.xlu2 %6245, %v1370_v48  }
 0x393   : > { %1389 = vperm.xlu2 %6245, %v1384_v43  }
 0x39b   : > { %6249 = vset.pattern.permute.xlu2 %v9489_v8 }
 0x3a4   : > { %1360 = vadd.xlane.f32.xlu1 %v1359_v44 }
 0x3b1   : > { %1357 = vadd.xlane.f32.xlu0 %v1356_v30  ;;  %v7290_v30 = vld [vmem:[%s6917_s13 + $0x20] sm:$0xff] }
 0x3b2   : > { %9570 = vst [vmem:[#allocation28_spill] sm:$0xff] %v7290_v30  ;;  %v1657_v39 = vmul.f32 %v7290_v30, %v6947_v11 }
 0x3bc   : > { %1363 = vadd.xlane.f32.xlu2 %v1362_v25 }
 0x3c5   : > { %1396 = vperm.xlu0 %6238, %v1391_v27   ;;  %v7301_v27 = vld [vmem:[%s6917_s13 + $0x40] sm:$0xff] }
 0x3c6   : > { %9572 = vst [vmem:[#allocation30_spill] sm:$0xff] %v7301_v27 }
 0x3cc   : > { %v823_v63 = vpop.xlane.xlu1 %822 }
 0x3cd   : > { %6247 = vset.pattern.permute.xlu0 %v9489_v8 }
 0x3de   : > { %v820_v59 = vpop.xlane.xlu2 %819 }
 0x3df   : > { %v827_v3 = vadd.f32 %v823_v63, %v820_v59  ;;  %v1659_v59 = vmul.f32 %v7038_v5, %v6949_v12  ;;  %v1658_v63 = vmul.f32 %v7296_v19, %v6947_v11  ;;  %v1687_v5 = vrot.slane %v1657_v39, 4 }
 0x3e4   : > { %v7276_v44 = vpop.permute.xlu1 %896 }
 0x3e6   : > { %v1355_v22 = vpop.xlane.xlu2 %1354  ;;  %v826_v60 = vpop.xlane.xlu0 %825 }
 0x3e7   : > { %v828_v33 = vadd.f32 %v827_v3, %v826_v60  ;;  %v1660_v3 = vmul.f32 %v7041_v45, %v6949_v12  ;;  %v1688_v45 = vadd.f32 %v1687_v5, %v1657_v39 }
 0x3e9   : > { %v836_v37 = vmul.f32 %v7243_v23, %v828_v33  ;;  %v1662_v33 = vmul.f32 %v7304_v2, %v6965_v29 }
 0x3eb   : > { %v7247_v38 = vsub.f32 %v7178_v36, %v836_v37  ;;  %v7250_v52 = vsub.f32 %v7184_v21, %v836_v37  ;;  %v7253_v61 = vsub.f32 %v7192_v47, %v836_v37  ;;  %v7256_v13 = vsub.f32 %v7198_v55, %v836_v37 }
 0x3ec   : > { %v7267_v46 = vsub.f32 %v7215_v54, %v836_v37  ;;  %v7270_v48 = vsub.f32 %v7221_v28, %v836_v37  ;;  %v7284_v28 = vld [vmem:[%s6917_s13 + $0x8] sm:$0xff]  ;;  %v1383_v40 = vpop.permute.xlu1 %1382 }
 0x3ed   : > { %v845_v14 = vmul.f32 %v7247_v38, %v7247_v38  ;;  %v846_v34 = vmul.f32 %v7250_v52, %v7250_v52  ;;  %v843_v62 = vmul.f32 %v7253_v61, %v7253_v61  ;;  %v844_v36 = vmul.f32 %v7256_v13, %v7256_v13 }
 0x3ee   : > { %v1376_v21 = vpop.permute.xlu2 %1375  ;;  %v847_v43 = vmul.f32 %v7267_v46, %v7267_v46  ;;  %v848_v50 = vmul.f32 %v7270_v48, %v7270_v48 }
 0x3ef   : > { %v1402_v47 = vadd.f32 %v1376_v21, %v1355_v22  ;;  %v852_v4 = vadd.f32 %v846_v34, %v845_v14  ;;  %v849_v55 = vadd.f32 %v844_v36, %v843_v62  ;;  %v1661_v22 = vmul.f32 %v7301_v27, %v6965_v29 }
 0x3f0   : > { %v855_v0 = vadd.f32 %v848_v50, %v847_v43  ;;  %v1675_v14 = vrot.slane %v1655_v32, 4  ;;  %v1699_v34 = vrot.slane %v1659_v59, 4  ;;  %v1681_v62 = vrot.slane %v1656_v49, 4 }
 0x3f1   : > { %1408 = vperm.xlu0 %6247, %v1402_v47   ;;  %853 = vadd.xlane.f32.xlu1 %v852_v4  ;;  %v1693_v36 = vrot.slane %v1658_v63, 4  ;;  %v1705_v47 = vrot.slane %v1660_v3, 4  ;;  %v1711_v4 = vrot.slane %v1661_v22, 4 }
 0x3f2   : > { %850 = vadd.xlane.f32.xlu2 %v849_v55  ;;  %v1717_v55 = vrot.slane %v1662_v33, 4  ;;  %v1676_v50 = vadd.f32 %v1675_v14, %v1655_v32  ;;  %v1682_v15 = vadd.f32 %v1681_v62, %v1656_v49 }
 0x3f3   : > { %v1694_v11 = vadd.f32 %v1693_v36, %v1658_v63  ;;  %v1706_v35 = vadd.f32 %v1705_v47, %v1660_v3  ;;  %v1712_v53 = vadd.f32 %v1711_v4, %v1661_v22 }
 0x3f4   : > { %v1718_v9 = vadd.f32 %v1717_v55, %v1662_v33  ;;  %v1677_v30 = vrot.slane %v1676_v50, 2  ;;  %v1683_v2 = vrot.slane %v1682_v15, 2 }
 0x3f5   : > { %v1707_v32 = vrot.slane %v1706_v35, 2  ;;  %v1713_v39 = vrot.slane %v1712_v53, 2 }
 0x3f6   : > { %v1390_v8 = vpop.permute.xlu2 %1389  ;;  %v1678_v14 = vadd.f32 %v1677_v30, %v1676_v50 }
 0x3f7   : > { %v1708_v22 = vadd.f32 %v1707_v32, %v1706_v35  ;;  %v1714_v33 = vadd.f32 %v1713_v39, %v1712_v53 }
 0x3f9   : > { %v7278_v54 = vpop.permute.xlu0 %1651  ;;  %v1715_v30 = vrot.slane %v1714_v33, 1 }
 0x3fa   : > { %856 = vadd.xlane.f32.xlu2 %v855_v0  ;;  %9569 = vst [vmem:[#allocation27_spill] sm:$0xff] %v7278_v54  ;;  %v1653_v25 = vmul.f32 %v7278_v54, %v7281_v6  ;;  %v1654_v31 = vmul.f32 %v7278_v54, %v7284_v28  ;;  %v1700_v0 = vadd.f32 %v1699_v34, %v1659_v59  ;;  %v1719_v59 = vrot.slane %v1718_v9, 2 }
 0x3fb   : > { %v1679_v34 = vrot.slane %v1678_v14, 1 }
 0x3fc   : > { %v1663_v60 = vrot.slane %v1653_v25, 4  ;;  %v1669_v37 = vrot.slane %v1654_v31, 4 }
 0x3fe   : > { %v1664_v21 = vadd.f32 %v1663_v60, %v1653_v25  ;;  %v1670_v43 = vadd.f32 %v1669_v37, %v1654_v31  ;;  %v1689_v25 = vrot.slane %v1688_v45, 2  ;;  %v1701_v60 = vrot.slane %v1700_v0, 2 }
 0x3ff   : > { %v1695_v31 = vrot.slane %v1694_v11, 2 }
 0x400   : > { %v1665_v29 = vrot.slane %v1664_v21, 2  ;;  %v1671_v19 = vrot.slane %v1670_v43, 2  ;;  %v1690_v49 = vadd.f32 %v1689_v25, %v1688_v45  ;;  %v1702_v63 = vadd.f32 %v1701_v60, %v1700_v0 }
 0x401   : > { %v1696_v3 = vadd.f32 %v1695_v31, %v1694_v11  ;;  %v1716_v45 = vadd.f32 %v1715_v30, %v1714_v33 }
 0x402   : > { %v1666_v27 = vadd.f32 %v1665_v29, %v1664_v21  ;;  %v1672_v37 = vadd.f32 %v1671_v19, %v1670_v43  ;;  %v1691_v62 = vrot.slane %v1690_v49, 1  ;;  %v1703_v36 = vrot.slane %v1702_v63, 1 }
 0x403   : > { %v1697_v4 = vrot.slane %v1696_v3, 1  ;;  %v1709_v19 = vrot.slane %v1708_v22, 1 }
 0x404   : > { %v1673_v5 = vrot.slane %v1672_v37, 1  ;;  %v1692_v11 = vadd.f32 %v1691_v62, %v1690_v49  ;;  %v1704_v35 = vadd.f32 %v1703_v36, %v1702_v63 }
 0x405   : > { %v1710_v50 = vadd.f32 %v1709_v19, %v1708_v22 }
 0x406   : > { %v1728_v31 = vadd.f32 %v1692_v11, %v6980_v51 }
 0x417   : > { %v1361_v12 = vpop.xlane.xlu1 %1360 }
 0x418   : > { %v1404_v54 = vadd.f32 %v1390_v8, %v1361_v12  ;;  %v1684_v8 = vadd.f32 %v1683_v2, %v1682_v15  ;;  %v1667_v12 = vrot.slane %v1666_v27, 1  ;;  %v1674_v15 = vadd.f32 %v1673_v5, %v1672_v37 }
 0x419   : > { %v1680_v2 = vadd.f32 %v1679_v34, %v1678_v14  ;;  %v1732_v37 = vadd.f32 %v1716_v45, %v6986_v57 }
 0x41a   : > { %1418 = vperm.xlu0 %6247, %v1404_v54   ;;  %v1720_v54 = vadd.f32 %v1719_v59, %v1718_v9  ;;  %v1685_v29 = vrot.slane %v1684_v8, 1  ;;  %v1668_v47 = vadd.f32 %v1667_v12, %v1666_v27  ;;  %v1698_v9 = vadd.f32 %v1697_v4, %v1696_v3 }
 0x41b   : > { %v1725_v60 = vadd.f32 %v1674_v15, %v6977_v42  ;;  %v1726_v27 = vadd.f32 %v1680_v2, %v7060_v7  ;;  %v1731_v59 = vadd.f32 %v1710_v50, %v6983_v56  ;;  %v1740_v33 = vsel %vm535_vm0, %v1732_v37, -inf }
 0x41c   : > { %v1721_v43 = vrot.slane %v1720_v54, 1  ;;  %v1686_v53 = vadd.f32 %v1685_v29, %v1684_v8  ;;  %v1724_v0 = vadd.f32 %v1668_v47, %v6977_v42  ;;  %v1729_v39 = vadd.f32 %v1698_v9, %v6980_v51 }
 0x41d   : > { %v1735_v63 = vsel %vm535_vm0, %v1726_v27, -inf  ;;  %v1736_v8 = vsel %vm535_vm0, %v1728_v31, -inf  ;;  %v1743_v3 = vsel %vm535_vm0, %v1725_v60, -inf  ;;  %v1747_v34 = vsel %vm535_vm0, %v1731_v59, -inf }
 0x41e   : > { %v1722_v25 = vadd.f32 %v1721_v43, %v1720_v54  ;;  %v1727_v32 = vadd.f32 %v1686_v53, %v7060_v7  ;;  %v1734_v14 = vsel %vm535_vm0, %v1724_v0, -inf  ;;  %v1745_v5 = vsel %vm535_vm0, %v1729_v39, -inf }
 0x41f   : > { %v1737_v22 = vmax.f32 %v1734_v14, %v1736_v8  ;;  %v1746_v29 = vmax.f32 %v1743_v3, %v1745_v5 }
 0x420   : > { %v1733_v49 = vadd.f32 %v1722_v25, %v6986_v57  ;;  %v1744_v54 = vsel %vm535_vm0, %v1727_v32, -inf }
 0x421   : > { %v1741_v36 = vmax.f32 %v1737_v22, %v1740_v33  ;;  %v1748_v4 = vmax.f32 %v1744_v54, %v1747_v34 }
 0x422   : > { %6250 = vset.pattern.permute.xlu0 %v6928_v1 }
 0x424   : > { %v1358_v21 = vpop.xlane.xlu0 %1357 }
 0x425   : > { %v1403_v55 = vadd.f32 %v1383_v40, %v1358_v21  ;;  %v1730_v40 = vadd.f32 %v1704_v35, %v6983_v56  ;;  %v1749_v21 = vsel %vm535_vm0, %v1733_v49, -inf }
 0x426   : > { %v1750_v19 = vmax.f32 %v1746_v29, %v1749_v21 }
 0x427   : > { %1413 = vperm.xlu1 %6248, %v1403_v55   ;;  %v1738_v12 = vsel %vm535_vm0, %v1730_v40, -inf }
 0x428   : > { %v1739_v62 = vmax.f32 %v1735_v63, %v1738_v12  ;;  %v1751_v30 = vmax.f32 %v1750_v19, %v1748_v4 }
 0x42a   : > { %v1742_v47 = vmax.f32 %v1741_v36, %v1739_v62  ;;  %v1753_v2 = vperm.slane %v1751_v30, 0 }
 0x42c   : > { %v1752_v15 = vperm.slane %v1742_v47, 0  ;;  %v1755_v53 = vsub.f32 %v1725_v60, %v1753_v2  ;;  %v1757_v50 = vsub.f32 %v1727_v32, %v1753_v2  ;;  %v1759_v25 = vsub.f32 %v1729_v39, %v1753_v2 }
 0x42d   : > { %v1761_v12 = vsub.f32 %v1731_v59, %v1753_v2  ;;  %v1763_v5 = vsub.f32 %v1733_v49, %v1753_v2 }
 0x42e   : > { %v1754_v35 = vsub.f32 %v1724_v0, %v1752_v15  ;;  %v1756_v9 = vsub.f32 %v1726_v27, %v1752_v15  ;;  %v1758_v45 = vsub.f32 %v1728_v31, %v1752_v15  ;;  %v1760_v14 = vsub.f32 %v1730_v40, %v1752_v15 }
 0x42f   : > { %6252 = vset.pattern.permute.xlu1 %v6928_v1  ;;  %v1364_v55 = vpop.xlane.xlu2 %1363  ;;  %v1766_v8 = vmul.f32 1.442695, %v1755_v53  ;;  %v1770_v22 = vmul.f32 1.442695, %v1757_v50  ;;  %v1762_v33 = vsub.f32 %v1732_v37, %v1752_v15  ;;  %v1774_v34 = vmul.f32 1.442695, %v1759_v25 }
 0x430   : > { %v1764_v63 = vmul.f32 1.442695, %v1754_v35  ;;  %v1768_v3 = vmul.f32 1.442695, %v1756_v9  ;;  %v1772_v54 = vmul.f32 1.442695, %v1758_v45 }
 0x431   : > { %v1776_v0 = vmul.f32 1.442695, %v1760_v14  ;;  %v1778_v60 = vmul.f32 1.442695, %v1761_v12  ;;  %v1780_v27 = vmul.f32 1.442695, %v1762_v33 }
 0x432   : > { %6324 = vpow2.f32 %v1764_v63  ;;  %v1782_v31 = vmul.f32 1.442695, %v1763_v5 }
 0x433   : > { %6326 = vpow2.f32 %v1766_v8 }
 0x434   : > { %6328 = vpow2.f32 %v1768_v3 }
 0x435   : > { %6330 = vpow2.f32 %v1770_v22 }
 0x436   : > { %6332 = vpow2.f32 %v1772_v54 }
 0x437   : > { %v1397_v43 = vpop.permute.xlu0 %1396  ;;  %6334 = vpow2.f32 %v1774_v34 }
 0x438   : > { %v1405_v11 = vadd.f32 %v1397_v43, %v1364_v55  ;;  %v7347_v40 = vpop.eup %6324  ;;  %6336 = vpow2.f32 %v1776_v0 }
 0x439   : > { %v7349_v32 = vpop.eup %6326  ;;  %6338 = vpow2.f32 %v1778_v60 }
 0x43a   : > { %1423 = vperm.xlu2 %6249, %v1405_v11   ;;  %v7351_v39 = vpop.eup %6328  ;;  %6340 = vpow2.f32 %v1780_v27 }
 0x43b   : > { %v7353_v59 = vpop.eup %6330  ;;  %6342 = vpow2.f32 %v1782_v31  ;;  %v1794_v37 = vrot.slane %v7351_v39, 7 }
 0x43c   : > { %v7356_v49 = vpop.eup %6332  ;;  %v1802_v62 = vrot.slane %v7353_v59, 7 }
 0x43d   : > { %v7359_v36 = vpop.eup %6334  ;;  %v1795_v29 = vsel %vm573_vm1, %v1794_v37, %v7347_v40  ;;  %v1796_v21 = vrot.slane %v7356_v49, 6 }
 0x43e   : > { %v7364_v47 = vpop.eup %6336  ;;  %v1803_v4 = vsel %vm573_vm1, %v1802_v62, %v7349_v32  ;;  %v1804_v19 = vrot.slane %v7359_v36, 6 }
 0x43f   : > { %v7369_v30 = vpop.eup %6338  ;;  %v1797_v55 = vsel %vm576_vm2, %v1796_v21, %v1795_v29  ;;  %v1798_v43 = vrot.slane %v7364_v47, 5 }
 0x440   : > { %v7373_v15 = vpop.eup %6340  ;;  %v1805_v2 = vsel %vm576_vm2, %v1804_v19, %v1803_v4  ;;  %v1806_v11 = vrot.slane %v7369_v30, 5 }
 0x441   : > { %v7377_v35 = vpop.eup %6342  ;;  %v1799_v53 = vsel %vm727_vm13, %v1798_v43, %v1797_v55  ;;  %v1800_v9 = vrot.slane %v7373_v15, 4 }
 0x442   : > { %6251 = vset.pattern.permute.xlu2 %v6928_v1  ;;  %v1807_v50 = vsel %vm727_vm13, %v1806_v11, %v1805_v2  ;;  %v1808_v45 = vrot.slane %v7377_v35, 4 }
 0x443   : > { %v1801_v25 = vsel %vm729_vm4, %v1800_v9, %v1799_v53 }
 0x444   : > { %v1809_v14 = vsel %vm729_vm4, %v1808_v45, %v1807_v50  ;;  %v1813_v63 = vsel %vm1812_vm5, %v1801_v25, 0.0 }
 0x445   : > { %v1814_v8 = vrot.slane %v1813_v63, 4  ;;  %v1820_v12 = vsel %vm1812_vm5, %v1809_v14, 0.0 }
 0x446   : > { %v1821_v3 = vrot.slane %v1820_v12, 4 }
 0x447   : > { %v1815_v22 = vadd.f32 %v1814_v8, %v1813_v63 }
 0x448   : > { %v1822_v33 = vadd.f32 %v1821_v3, %v1820_v12 }
 0x449   : > { %v1816_v54 = vrot.slane %v1815_v22, 2 }
 0x44a   : > { %v1823_v5 = vrot.slane %v1822_v33, 2 }
 0x44b   : > { %v1817_v34 = vadd.f32 %v1816_v54, %v1815_v22 }
 0x44c   : > { %v1824_v0 = vadd.f32 %v1823_v5, %v1822_v33 }
 0x44d   : > { %v1818_v60 = vrot.slane %v1817_v34, 1 }
 0x44e   : > { %v1825_v27 = vrot.slane %v1824_v0, 1 }
 0x44f   : > { %v1819_v31 = vadd.f32 %v1818_v60, %v1817_v34 }
 0x450   : > { %v1826_v37 = vadd.f32 %v1825_v27, %v1824_v0 }
 0x451   : > { %v1827_v62 = vperm.slane %v1819_v31, 0 }
 0x452   : > { %v1828_v29 = vperm.slane %v1826_v37, 0 }
 0x453   : > { %6344 = vrcp.f32 %v1827_v62  ;;  %v1840_v45 = vand.u32 2147483648, %v1827_v62  ;;  %v1838_v63 = vand.u32 2147483647, %v1827_v62  ;;  %vm1834_vm8 = vweird.f32 %v1827_v62 }
 0x454   : > { %6346 = vrcp.f32 %v1828_v29  ;;  %v1855_v8 = vand.u32 2147483648, %v1828_v29  ;;  %v1853_v12 = vand.u32 2147483647, %v1828_v29  ;;  %vm1849_vm10 = vweird.f32 %v1828_v29 }
 0x455   : > { %v1841_v22 = vor.u32 1.1754944e-38, %v1840_v45  ;;  %vm1839_vm11 = vcmp.eq.f32.partialorder %v1838_v63, 8.507059e+37 }
 0x456   : > { %v1856_v5 = vor.u32 1.1754944e-38, %v1855_v8  ;;  %vm1854_vm3 = vcmp.eq.f32.partialorder %v1853_v12, 8.507059e+37 }
 0x459   : > { %v6345_v4 = vpop.eup %6344 }
 0x45a   : > { %v6347_v43 = vpop.eup %6346  ;;  %v1830_v2 = vmul.f32 %v6345_v4, %v1827_v62  ;;  %vm1835_vm6 = vweird.f32 %v6345_v4 }
 0x45b   : > { %v1845_v53 = vmul.f32 %v6347_v43, %v1828_v29  ;;  %vm1850_vm7 = vweird.f32 %v6347_v43  ;;  %vm1836_vm9 = vmor %vm1834_vm8, %vm1835_vm6  ;;  %vm9523_vm8 = vcmask 195584  }
 0x45c   : > { %v1831_v50 = vsub.f32 1.0, %v1830_v2  ;;  %vm1851_vm12 = vmor %vm1849_vm10, %vm1850_vm7 }
 0x45d   : > { %v1846_v25 = vsub.f32 1.0, %v1845_v53 }
 0x45e   : > { %v1832_v14 = vmul.f32 %v6345_v4, %v1831_v50 }
 0x460   : > { %v1833_v3 = vadd.f32 %v6345_v4, %v1832_v14 }
 0x462   : > { %v1837_v54 = vsel %vm1836_vm9, %v6345_v4, %v1833_v3  ;;  %vm9524_vm9 = vcmask 59392  }
 0x463   : > { %v1409_v21 = vpop.permute.xlu0 %1408  ;;  %v1842_v60 = vsel %vm1839_vm11, %v1841_v22, %v1837_v54 }
 0x464   : > { %v7388_v19 = vadd.f32 %v7189_v41, %v1409_v21  ;;  %v7391_v55 = vadd.f32 %v7195_v24, %v1409_v21  ;;  %v1847_v41 = vmul.f32 %v6347_v43, %v1846_v25  ;;  %v854_v24 = vpop.xlane.xlu1 %853  ;;  %v7396_v37 = vmul.f32 %v7351_v39, %v1842_v60 }
 0x465   : > { %v851_v11 = vpop.xlane.xlu2 %850  ;;  %v7399_v21 = vmul.f32 %v7356_v49, %v1842_v60  ;;  %v7402_v2 = vmul.f32 %v7347_v40, %v1842_v60  ;;  %v7417_v39 = vmul.f32 %v7373_v15, %v1842_v60 }
 0x466   : > { %v1434_v9 = vadd.f32 %v7391_v55, %v7388_v19  ;;  %v1848_v33 = vadd.f32 %v6347_v43, %v1847_v41  ;;  %v858_v34 = vadd.f32 %v854_v24, %v851_v11  ;;  %v1877_v40 = vrot.slane %v7396_v37, 7 }
 0x468   : > { %1435 = vadd.xlane.f32.xlu0 %v1434_v9  ;;  %v1852_v27 = vsel %vm1851_vm12, %v6347_v43, %v1848_v33  ;;  %v7411_v43 = vmul.f32 %v7364_v47, %v1842_v60  ;;  %v1883_v9 = vrot.slane %v7417_v39, 4 }
 0x469   : > { %v1857_v31 = vsel %vm1854_vm3, %v1856_v5, %v1852_v27 }
 0x46a   : > { %v7405_v29 = vmul.f32 %v7353_v59, %v1857_v31  ;;  %v7408_v4 = vmul.f32 %v7359_v36, %v1857_v31  ;;  %v7414_v11 = vmul.f32 %v7369_v30, %v1857_v31  ;;  %v7420_v49 = vmul.f32 %v7377_v35, %v1857_v31 }
 0x46b   : > { %v7424_v59 = vmul.f32 %v7349_v32, %v1857_v31  ;;  %v1879_v36 = vrot.slane %v7399_v21, 6  ;;  %v1878_v30 = vsel %vm573_vm1, %v1877_v40, %v7402_v2  ;;  %v1881_v15 = vrot.slane %v7411_v43, 5 }
 0x46c   : > { %v1885_v53 = vrot.slane %v7405_v29, 7  ;;  %v1887_v47 = vrot.slane %v7408_v4, 6  ;;  %v1889_v32 = vrot.slane %v7414_v11, 5  ;;  %v1891_v63 = vrot.slane %v7420_v49, 4 }
 0x46d   : > { %v857_v0 = vpop.xlane.xlu2 %856  ;;  %v1880_v35 = vsel %vm576_vm2, %v1879_v36, %v1878_v30 }
 0x46e   : > { %v859_v62 = vadd.f32 %v858_v34, %v857_v0  ;;  %v1886_v50 = vsel %vm573_vm1, %v1885_v53, %v7424_v59  ;;  %v1882_v25 = vsel %vm727_vm13, %v1881_v15, %v1880_v35 }
 0x46f   : > { %v1888_v14 = vsel %vm576_vm2, %v1887_v47, %v1886_v50  ;;  %v1884_v8 = vsel %vm729_vm4, %v1883_v9, %v1882_v25  ;;  %v7473_v9 = vld [vmem:[%s6917_s13 + $0x30] sm:$0xff]  ;;  %v7479_v50 = vld [vmem:[%s6917_s13 + $0x38] sm:$0xff] }
 0x470   : > { %v860_v45 = vmul.f32 %v859_v62, %v7243_v23  ;;  %v1890_v41 = vsel %vm727_vm13, %v1889_v32, %v1888_v14  ;;  %v1895_v3 = vsel %vm1812_vm5, %v1884_v8, 0.0 }
 0x471   : > { %v1892_v24 = vsel %vm729_vm4, %v1891_v63, %v1890_v41 }
 0x472   : > { %v861_v12 = vadd.f32 1e-05, %v860_v45  ;;  %v1896_v22 = vsel %vm1812_vm5, %v1892_v24, 0.0 }
 0x473   : > { %v1897_v33 = vadd.f32 %v1896_v22, %v1895_v3 }
 0x474   : > { %6348 = vrsqrt.f32 %v861_v12  ;;  %vm868_vm6 = vweird.f32 %v861_v12 }
 0x475   : > { %1898 = vadd.xlane.f32.xlu2 %v1897_v33 }
 0x47a   : > { %v6349_v54 = vpop.eup %6348 }
 0x47b   : > { %v863_v5 = vmul.f32 %v6349_v54, %v861_v12  ;;  %vm869_vm3 = vweird.f32 %v6349_v54 }
 0x47c   : > { %vm870_vm7 = vmor %vm868_vm6, %vm869_vm3 }
 0x47d   : > { %v864_v34 = vmul.f32 %v6349_v54, %v863_v5 }
 0x47f   : > { %v865_v0 = vmul.f32 0.5, %v864_v34 }
 0x481   : > { %v866_v60 = vsub.f32 1.5, %v865_v0 }
 0x483   : > { %v867_v27 = vmul.f32 %v6349_v54, %v866_v60 }
 0x485   : > { %v871_v31 = vsel %vm870_vm7, %v6349_v54, %v867_v27 }
 0x486   : > { %v876_v62 = vmul.f32 %v871_v31, %v7267_v46  ;;  %v877_v40 = vmul.f32 %v871_v31, %v7270_v48  ;;  %v874_v36 = vmul.f32 %v871_v31, %v7247_v38  ;;  %v875_v53 = vmul.f32 %v871_v31, %v7250_v52 }
 0x487   : > { %v872_v46 = vmul.f32 %v871_v31, %v7253_v61  ;;  %v873_v48 = vmul.f32 %v871_v31, %v7256_v13 }
 0x488   : > { %914 = vmatpush.msra.mxu0 %v876_v62  ;;  %934 = vmatpush.msra.mxu1 %v877_v40 }
 0x48a   : > { %915 = vmatpush.msra.mxu0 %v874_v36  ;;  %935 = vmatpush.msra.mxu1 %v875_v53 }
 0x48c   : > { %v1419_v47 = vpop.permute.xlu0 %1418  ;;  %916 = vmatpush.msra.mxu0 %v872_v46  ;;  %936 = vmatpush.msra.mxu1 %v873_v48 }
 0x48d   : > { %v7451_v30 = vadd.f32 %v7212_v10, %v1419_v47  ;;  %v7454_v15 = vadd.f32 %v7218_v26, %v1419_v47  ;;  %5996 = vmatmul.msk.f32.vlgmr.msra.gmra.mxu0 %vm9523_vm8, %v7276_v44  ;;  %5997 = vmatmul.msk.f32.vlgmr.msra.gmra.mxu1 %vm9523_vm8, %v7276_v44 }
 0x48f   : > { %v1440_v38 = vadd.f32 %v7454_v15, %v7451_v30 }
 0x491   : > { %1441 = vadd.xlane.f32.xlu0 %v1440_v38 }
 0x494   : > { %v1424_v13 = vpop.permute.xlu2 %1423 }
 0x495   : > { %v7476_v35 = vadd.f32 %v7473_v9, %v1424_v13  ;;  %v7482_v44 = vadd.f32 %v7479_v50, %v1424_v13 }
 0x499   : > { %v1414_v10 = vpop.permute.xlu1 %1413 }
 0x49a   : > { %v7465_v26 = vadd.f32 %v7175_v58, %v1414_v10  ;;  %v7468_v52 = vadd.f32 %v7181_v20, %v1414_v10  ;;  %v1443_v58 = vadd.f32 %v7482_v44, %v7476_v35  ;;  %v7489_v20 = vld [vmem:[%s9480_s6] sm:$0x1f] }
 0x49b   : > { %v879_v32 = vrot.slane %v7489_v20, 2 }
 0x49c   : > { %v1437_v61 = vadd.f32 %v7468_v52, %v7465_v26 }
 0x49d   : > { %v882_v14 = vsel %vm9524_vm9, %v879_v32, 0.0 }
 0x49e   : > { %1438 = vadd.xlane.f32.xlu1 %v1437_v61  ;;  %v883_v22 = vrot.slane %v882_v14, 4 }
 0x4a6   : > { %1444 = vadd.xlane.f32.xlu1 %v1443_v58 }
 0x4e8   : > { %v1899_v45 = vpop.xlane.xlu2 %1898 }
 0x4e9   : > { %v1900_v25 = vmul.f32 %v1899_v45, %v7022_v17 }
 0x4eb   : > { %v1911_v63 = vmul.f32 %v1900_v25, %v7402_v2  ;;  %v1912_v8 = vmul.f32 %v1900_v25, %v7424_v59  ;;  %v1902_v41 = vrot.slane %v1900_v25, 1  ;;  %v1905_v12 = vrot.slane %v1900_v25, 4 }
 0x4ec   : > { %v1903_v24 = vrot.slane %v1900_v25, 2  ;;  %v1904_v3 = vrot.slane %v1900_v25, 3 }
 0x4ed   : > { %v1921_v33 = vperm.slane %v1911_v63, 0  ;;  %v1922_v54 = vperm.slane %v1912_v8, 0  ;;  %v1913_v5 = vmul.f32 %v1902_v41, %v7396_v37  ;;  %v1914_v34 = vmul.f32 %v1902_v41, %v7405_v29 }
 0x4ee   : > { %v1919_v0 = vmul.f32 %v1905_v12, %v7417_v39  ;;  %v1920_v60 = vmul.f32 %v1905_v12, %v7420_v49  ;;  %v1915_v27 = vmul.f32 %v1903_v24, %v7399_v21  ;;  %v1916_v2 = vmul.f32 %v1903_v24, %v7408_v4  ;;  %v9574_v21 = vld [vmem:[#allocation30_spill] sm:$0xff]  ;;  %v9575_v4 = vld [vmem:[#allocation31_spill] sm:$0xff] }
 0x4ef   : > { %v1931_v59 = vmul.f32 %v1921_v33, %v7281_v6  ;;  %v1932_v31 = vmul.f32 %v1922_v54, %v7284_v28  ;;  %v1923_v62 = vperm.slane %v1913_v5, 0  ;;  %v1924_v40 = vperm.slane %v1914_v34, 0  ;;  %v9576_v54 = vld [vmem:[#allocation28_spill] sm:$0xff] }
 0x4f0   : > { %v1966_v36 = vrot.slane %v1913_v5, 7  ;;  %v1974_v53 = vrot.slane %v1914_v34, 7  ;;  %v1929_v47 = vperm.slane %v1919_v0, 0  ;;  %v1930_v37 = vperm.slane %v1920_v60, 0  ;;  %v9577_v5 = vld [vmem:[#allocation29_spill] sm:$0xff] }
 0x4f1   : > { %v1941_v46 = vadd.f32 %v1932_v31, %v1931_v59  ;;  %v1933_v29 = vmul.f32 %v1923_v62, %v7287_v16  ;;  %v1934_v39 = vmul.f32 %v1924_v40, %v7293_v18  ;;  %v1917_v49 = vmul.f32 %v1904_v3, %v7411_v43 }
 0x4f2   : > { %v1939_v48 = vmul.f32 %v1929_v47, %v9574_v21  ;;  %v1940_v38 = vmul.f32 %v1930_v37, %v9575_v4  ;;  %v1918_v6 = vmul.f32 %v1904_v3, %v7414_v11  ;;  %v1967_v28 = vsel %vm573_vm1, %v1966_v36, %v1911_v63  ;;  %v1436_v4 = vpop.xlane.xlu0 %1435 }
 0x4f3   : > { %1942 = vadd.xlane.f32.xlu1 %v1941_v46  ;;  %v1944_v10 = vadd.f32 %v1934_v39, %v1933_v29  ;;  %v1968_v61 = vrot.slane %v1915_v27, 6  ;;  %v1970_v13 = vrot.slane %v1917_v49, 5  ;;  %v1972_v32 = vrot.slane %v1919_v0, 4  ;;  %v9578_v46 = vld [vmem:[#allocation25_spill] sm:$0xff] }
 0x4f4   : > { %v1953_v58 = vadd.f32 %v1940_v38, %v1939_v48  ;;  %v1975_v16 = vsel %vm573_vm1, %v1974_v53, %v1912_v8  ;;  %v1976_v45 = vrot.slane %v1916_v2, 6  ;;  %v1978_v43 = vrot.slane %v1918_v6, 5 }
 0x4f5   : > { %1945 = vadd.xlane.f32.xlu2 %v1944_v10  ;;  %v1969_v18 = vsel %vm576_vm2, %v1968_v61, %v1967_v28  ;;  %v1925_v25 = vperm.slane %v1915_v27, 0  ;;  %v1926_v41 = vperm.slane %v1916_v2, 0  ;;  %v1980_v12 = vrot.slane %v1920_v60, 4  ;;  %v440_v28 = vld [vmem:[#allocation6] sm:$0xff]  ;;  %v9579_v10 = vld [vmem:[#allocation23_spill] sm:$0xff] }
 0x4f6   : > { %1954 = vadd.xlane.f32.xlu0 %v1953_v58  ;;  %v1971_v11 = vsel %vm727_vm13, %v1970_v13, %v1969_v18  ;;  %v1977_v63 = vsel %vm576_vm2, %v1976_v45, %v1975_v16  ;;  %v884_v24 = vadd.f32 %v883_v22, %v882_v14  ;;  %v1927_v31 = vperm.slane %v1917_v49, 0 }
 0x4f7   : > { %v1973_v3 = vsel %vm729_vm4, %v1972_v32, %v1971_v11  ;;  %v1979_v33 = vsel %vm727_vm13, %v1978_v43, %v1977_v63  ;;  %v1935_v8 = vmul.f32 %v1925_v25, %v9576_v54  ;;  %v1936_v34 = vmul.f32 %v1926_v41, %v9577_v5  ;;  %v9581_v63 = vld [vmem:[#allocation24_spill] sm:$0xff] }
 0x4f8   : > { %v1981_v0 = vsel %vm729_vm4, %v1980_v12, %v1979_v33  ;;  %v1984_v27 = vsel %vm1812_vm5, %v1973_v3, 0.0  ;;  %v1928_v62 = vperm.slane %v1918_v6, 0  ;;  %v885_v40 = vrot.slane %v884_v24, 2  ;;  %v6503_v3 = vld [vmem:[%s9478_s4] sm:$0x1f] }
 0x4f9   : > { %v1985_v2 = vsel %vm1812_vm5, %v1981_v0, 0.0  ;;  %v1947_v60 = vadd.f32 %v1936_v34, %v1935_v8  ;;  %v1937_v14 = vmul.f32 %v7473_v9, %v1927_v31  ;;  %v6750_v39 = vmov 1024.0   ;;  %v6504_v0 = vld [vmem:[#allocation6 + $0x10] sm:$0xff] }
 0x4fa   : > { %v1986_v59 = vadd.f32 %v1985_v2, %v1984_v27  ;;  %v1938_v22 = vmul.f32 %v7479_v50, %v1928_v62  ;;  %v886_v36 = vadd.f32 %v885_v40, %v884_v24  ;;  %6350 = vrcp.f32 %v6750_v39 }
 0x4fc   : > { %1987 = vadd.xlane.f32.xlu1 %v1986_v59  ;;  %v1950_v53 = vadd.f32 %v1938_v22, %v1937_v14  ;;  %v887_v47 = vrot.slane %v886_v36, 1 }
 0x4fd   : > { %1948 = vadd.xlane.f32.xlu2 %v1947_v60 }
 0x4fe   : > { %v888_v37 = vadd.f32 %v887_v47, %v886_v36  ;;  %v9582_v47 = vmov 0  }
 0x500   : > { %v6351_v49 = vpop.eup %6350 }
 0x501   : > { %v1450_v21 = vmul.f32 1024.0, %v6351_v49  ;;  %vm1454_vm10 = vweird.f32 %v6351_v49 }
 0x503   : > { %v1451_v38 = vsub.f32 1.0, %v1450_v21 }
 0x504   : > { %1951 = vadd.xlane.f32.xlu1 %v1950_v53  ;;  %v1442_v58 = vpop.xlane.xlu0 %1441 }
 0x505   : > { %v1452_v9 = vmul.f32 %v6351_v49, %v1451_v38  ;;  %v7577_v38 = vld [vmem:[%s6917_s13 + $0x10] sm:$0xff] }
 0x507   : > { %v1453_v32 = vadd.f32 %v6351_v49, %v1452_v9  ;;  %v7580_v9 = vld [vmem:[%s6917_s13 + $0x18] sm:$0xff] }
 0x509   : > { %v7528_v41 = vsel %vm1454_vm10, %v6351_v49, %v1453_v32  ;;  %v7598_v32 = vld [vmem:[%s6917_s13 + $0x20] sm:$0xff] }
 0x50a   : > { %893 = vperm.xlu0 %6250, %v888_v37   ;;  %9580 = vst [vmem:[#allocation30_spill] sm:$0xff] %v7528_v41 }
 0x511   : > { %v1439_v29 = vpop.xlane.xlu1 %1438 }
 0x512   : > { %v1446_v6 = vadd.f32 %v1439_v29, %v1436_v4  ;;  %v6505_v29 = vld [vmem:[#allocation6 + $0x20] sm:$0xff] }
 0x514   : > { %v1447_v45 = vadd.f32 %v1446_v6, %v1442_v58 }
 0x519   : > { %v1445_v48 = vpop.xlane.xlu1 %1444 }
 0x51a   : > { %v1448_v25 = vadd.f32 %v1447_v45, %v1445_v48  ;;  %v9584_v45 = vld [vmem:[#allocation16_spill] sm:$0xff] }
 0x51c   : > { %v7532_v24 = vmul.f32 %v7528_v41, %v1448_v25 }
 0x51d   : > { %1524 = vrot.lane.b32.xlu1 %v9578_v46, %s6749_s23 }
 0x51e   : > { %v7541_v2 = vsub.f32 %v7388_v19, %v7532_v24  ;;  %v7545_v59 = vsub.f32 %v7391_v55, %v7532_v24  ;;  %v7554_v19 = vsub.f32 %v7451_v30, %v7532_v24  ;;  %v7558_v55 = vsub.f32 %v7454_v15, %v7532_v24 }
 0x51f   : > { %v7570_v48 = vsub.f32 %v7465_v26, %v7532_v24  ;;  %v7574_v4 = vsub.f32 %v7468_v52, %v7532_v24  ;;  %v7588_v26 = vld [vmem:[%s6917_s13 + $0x30] sm:$0xff]  ;;  %v7591_v52 = vld [vmem:[%s6917_s13 + $0x38] sm:$0xff] }
 0x520   : > { %v1465_v62 = vmul.f32 %v7541_v2, %v7541_v2  ;;  %v1466_v40 = vmul.f32 %v7545_v59, %v7545_v59  ;;  %v1469_v22 = vmul.f32 %v7554_v19, %v7554_v19  ;;  %v1470_v36 = vmul.f32 %v7558_v55, %v7558_v55 }
 0x521   : > { %v1467_v6 = vmul.f32 %v7570_v48, %v7570_v48 }
 0x522   : > { %v1473_v14 = vadd.f32 %v1466_v40, %v1465_v62  ;;  %v1479_v53 = vadd.f32 %v1470_v36, %v1469_v22  ;;  %v9587_v62 = vld [vmem:[#allocation18_spill] sm:$0xff] }
 0x566   : > { %v1943_v50 = vpop.xlane.xlu1 %1942 }
 0x567   : > { %v1994_v61 = vperm.slane %v1943_v50, %v9579_v10  ;;  %v1468_v50 = vmul.f32 %v7574_v4, %v7574_v4 }
 0x568   : > { %v1946_v13 = vpop.xlane.xlu2 %1945 }
 0x569   : > { %v2034_v16 = vmul.f32 %v1994_v61, %v440_v28  ;;  %v1995_v18 = vperm.slane %v1946_v13, %v9579_v10  ;;  %v1955_v30 = vpop.xlane.xlu0 %1954  ;;  %v9583_v28 = vld [vmem:[#allocation27_spill] sm:$0xff]  ;;  %v1476_v25 = vadd.f32 %v1468_v50, %v1467_v6  ;;  %v7634_v50 = vsub.f32 %v7476_v35, %v7532_v24 }
 0x56a   : > { %v1998_v15 = vperm.slane %v1955_v30, %v9579_v10  ;;  %v2359_v61 = vmul.f32 %v7577_v38, %v9583_v28  ;;  %v2360_v58 = vmul.f32 %v7580_v9, %v9583_v28 }
 0x56b   : > { %v2039_v43 = vsel %vm755_vm15, %v2034_v16, 0.0  ;;  %v2035_v12 = vmul.f32 %v1995_v18, %v9581_v63  ;;  %v7601_v16 = vld [vmem:[%s6917_s13 + $0x28] sm:$0xff]  ;;  %v2363_v18 = vmul.f32 %v7588_v26, %v9584_v45  ;;  %v7611_v63 = vld [vmem:[%s6917_s13 + $0x50] sm:$0xff]  ;;  %v1471_v35 = vmul.f32 %v7634_v50, %v7634_v50 }
 0x56c   : > { %2040 = vadd.xlane.f32.xlu2 %v2039_v43  ;;  %v2038_v39 = vmul.f32 %v6505_v29, %v1998_v15  ;;  %v2364_v43 = vmul.f32 %v7591_v52, %v9584_v45  ;;  %v2367_v40 = vmul.f32 %v7611_v63, %v9587_v62 }
 0x56d   : > { %v2042_v34 = vsel %vm755_vm15, %v2035_v12, 0.0 }
 0x56e   : > { %v2051_v49 = vsel %vm755_vm15, %v2038_v39, 0.0  ;;  %v2417_v6 = vrot.slane %v2367_v40, 4 }
 0x56f   : > { %v1988_v11 = vpop.xlane.xlu1 %1987 }
 0x570   : > { %v2054_v33 = vmul.f32 %v6503_v3, %v1988_v11  ;;  %v1949_v54 = vpop.xlane.xlu2 %1948  ;;  %v7608_v11 = vld [vmem:[%s6917_s13 + $0x40] sm:$0xff]  ;;  %v7615_v3 = vld [vmem:[%s6917_s13 + $0x48] sm:$0xff] }
 0x571   : > { %v1996_v8 = vperm.slane %v1949_v54, %v9579_v10  ;;  %v2369_v54 = vrot.slane %v2359_v61, 4 }
 0x572   : > { %v2070_v5 = vperm.slane %v2054_v33, 2  ;;  %v2077_v60 = vperm.slane %v2054_v33, 3  ;;  %v2056_v37 = vperm.slane %v2054_v33, 0  ;;  %v2063_v46 = vperm.slane %v2054_v33, 1 }
 0x573   : > { %v2036_v27 = vmul.f32 %v6504_v0, %v1996_v8  ;;  %v2084_v21 = vperm.slane %v2054_v33, 4  ;;  %v7618_v33 = vld [vmem:[%s6917_s13 + $0x58] sm:$0xff]  ;;  %v2375_v0 = vrot.slane %v2360_v58, 4  ;;  %v2370_v30 = vadd.f32 %v2369_v54, %v2359_v61 }
 0x574   : > { %2075 = vperm.xlu0 %6250, %v2070_v5   ;;  %2043 = vadd.xlane.f32.xlu2 %v2042_v34  ;;  %v9585_v8 = vld [vmem:[#allocation21_spill] sm:$0xff]  ;;  %v2368_v36 = vmul.f32 %v7618_v33, %v9587_v62 }
 0x575   : > { %v2045_v31 = vsel %vm755_vm15, %v2036_v27, 0.0  ;;  %v2361_v5 = vmul.f32 %v7598_v32, %v9585_v8  ;;  %v2362_v34 = vmul.f32 %v7601_v16, %v9585_v8  ;;  %v9586_v27 = vld [vmem:[#allocation17_spill] sm:$0xff]  ;;  %v2376_v15 = vadd.f32 %v2375_v0, %v2360_v58 }
 0x576   : > { %2046 = vadd.xlane.f32.xlu1 %v2045_v31  ;;  %v2365_v31 = vmul.f32 %v7608_v11, %v9586_v27  ;;  %v2366_v22 = vmul.f32 %v7615_v3, %v9586_v27  ;;  %v2423_v23 = vrot.slane %v2368_v36, 4  ;;  %v2371_v61 = vrot.slane %v2370_v30, 2 }
 0x577   : > { %v1952_v13 = vpop.xlane.xlu1 %1951  ;;  %v2387_v29 = vrot.slane %v2362_v34, 4  ;;  %v2377_v58 = vrot.slane %v2376_v15, 2 }
 0x578   : > { %v1997_v12 = vperm.slane %v1952_v13, %v9579_v10  ;;  %v7638_v13 = vsub.f32 %v7482_v44, %v7532_v24  ;;  %v2372_v62 = vadd.f32 %v2371_v61, %v2370_v30 }
 0x579   : > { %v2378_v27 = vadd.f32 %v2377_v58, %v2376_v15 }
 0x57a   : > { %v1472_v44 = vmul.f32 %v7638_v13, %v7638_v13 }
 0x57c   : > { %2082 = vperm.xlu0 %6250, %v2077_v60   ;;  %v2393_v60 = vrot.slane %v2363_v18, 4 }
 0x57e   : > { %1474 = vadd.xlane.f32.xlu1 %v1473_v14  ;;  %v2399_v14 = vrot.slane %v2364_v43, 4  ;;  %v2394_v39 = vadd.f32 %v2393_v60, %v2363_v18  ;;  %v2388_v18 = vadd.f32 %v2387_v29, %v2362_v34  ;;  %v1482_v34 = vadd.f32 %v1472_v44, %v1471_v35 }
 0x580   : > { %v2389_v8 = vrot.slane %v2388_v18, 2 }
 0x582   : > { %v2390_v28 = vadd.f32 %v2389_v8, %v2388_v18 }
 0x584   : > { %6255 = vset.pattern.permute.xlu0 %v9582_v47  ;;  %v2391_v61 = vrot.slane %v2390_v28, 1 }
 0x586   : > { %1480 = vadd.xlane.f32.xlu1 %v1479_v53  ;;  %v6506_v53 = vld [vmem:[#allocation6 + $0x18] sm:$0xff] }
 0x58c   : > { %2061 = vperm.xlu2 %6251, %v2056_v37   ;;  %v2037_v37 = vmul.f32 %v6506_v53, %v1997_v12  ;;  %v2424_v53 = vadd.f32 %v2423_v23, %v2368_v36 }
 0x58e   : > { %v2048_v12 = vsel %vm755_vm15, %v2037_v37, 0.0 }
 0x594   : > { %6253 = vset.pattern.permute.xlu2 %v9582_v47 }
 0x59f   : > { %2068 = vperm.xlu1 %6252, %v2063_v46   ;;  %v2381_v46 = vrot.slane %v2361_v5, 4 }
 0x5a1   : > { %v2382_v54 = vadd.f32 %v2381_v46, %v2361_v5 }
 0x5a3   : > { %v2383_v37 = vrot.slane %v2382_v54, 2 }
 0x5a6   : > { %2052 = vadd.xlane.f32.xlu0 %v2051_v49  ;;  %v2400_v49 = vadd.f32 %v2399_v14, %v2364_v43  ;;  %v2395_v43 = vrot.slane %v2394_v39, 2  ;;  %v2418_v14 = vadd.f32 %v2417_v6, %v2367_v40  ;;  %v2373_v40 = vrot.slane %v2372_v62, 1 }
 0x5a7   : > { %2089 = vperm.xlu1 %6252, %v2084_v21   ;;  %v2405_v21 = vrot.slane %v2365_v31, 4  ;;  %v2384_v6 = vadd.f32 %v2383_v37, %v2382_v54 }
 0x5a8   : > { %v2401_v0 = vrot.slane %v2400_v49, 2  ;;  %v2419_v5 = vrot.slane %v2418_v14, 2  ;;  %v2374_v15 = vadd.f32 %v2373_v40, %v2372_v62 }
 0x5a9   : > { %v2406_v60 = vadd.f32 %v2405_v21, %v2365_v31  ;;  %v2425_v31 = vrot.slane %v2424_v53, 2  ;;  %v2379_v21 = vrot.slane %v2378_v27, 1 }
 0x5aa   : > { %v2402_v46 = vadd.f32 %v2401_v0, %v2400_v49 }
 0x5ab   : > { %v2407_v45 = vrot.slane %v2406_v60, 2  ;;  %v2426_v30 = vadd.f32 %v2425_v31, %v2424_v53 }
 0x5ac   : > { %v2403_v23 = vrot.slane %v2402_v46, 1 }
 0x5ad   : > { %v2408_v10 = vadd.f32 %v2407_v45, %v2406_v60  ;;  %v2427_v44 = vrot.slane %v2426_v30, 1  ;;  %v2392_v45 = vadd.f32 %v2391_v61, %v2390_v28 }
 0x5ae   : > { %v2404_v0 = vadd.f32 %v2403_v23, %v2402_v46 }
 0x5af   : > { %6254 = vset.pattern.permute.xlu1 %v9582_v47 }
 0x5b5   : > { %1477 = vadd.xlane.f32.xlu2 %v1476_v25  ;;  %v2411_v25 = vrot.slane %v2366_v22, 4 }
 0x5b7   : > { %v2412_v24 = vadd.f32 %v2411_v25, %v2366_v22  ;;  %v2420_v22 = vadd.f32 %v2419_v5, %v2418_v14  ;;  %v2380_v25 = vadd.f32 %v2379_v21, %v2378_v27  ;;  %v2428_v27 = vadd.f32 %v2427_v44, %v2426_v30 }
 0x5b9   : > { %v2413_v29 = vrot.slane %v2412_v24, 2  ;;  %v2421_v49 = vrot.slane %v2420_v22, 1  ;;  %v2430_v8 = vadd.f32 %v2380_v25, %v6977_v42 }
 0x5bb   : > { %v2414_v36 = vadd.f32 %v2413_v29, %v2412_v24  ;;  %v2422_v60 = vadd.f32 %v2421_v49, %v2420_v22  ;;  %v2434_v24 = vadd.f32 %v2404_v0, %v6980_v51  ;;  %v2448_v37 = vsel %vm535_vm0, %v2430_v8, -inf }
 0x5bc   : > { %v2438_v29 = vadd.f32 %v2428_v27, %v6986_v57 }
 0x5bd   : > { %2049 = vadd.xlane.f32.xlu2 %v2048_v12  ;;  %v2396_v12 = vadd.f32 %v2395_v43, %v2394_v39  ;;  %v2385_v39 = vrot.slane %v2384_v6, 1  ;;  %v2409_v43 = vrot.slane %v2408_v10, 1  ;;  %v2415_v35 = vrot.slane %v2414_v36, 1 }
 0x5be   : > { %v2437_v28 = vadd.f32 %v2422_v60, %v6986_v57  ;;  %v2450_v40 = vsel %vm535_vm0, %v2434_v24, -inf  ;;  %v2454_v25 = vsel %vm535_vm0, %v2438_v29, -inf }
 0x5bf   : > { %v2397_v47 = vrot.slane %v2396_v12, 1  ;;  %v2386_v54 = vadd.f32 %v2385_v39, %v2384_v6  ;;  %v2410_v18 = vadd.f32 %v2409_v43, %v2408_v10  ;;  %v2416_v62 = vadd.f32 %v2415_v35, %v2414_v36  ;;  %v7665_v35 = vpop.permute.xlu1 %1524 }
 0x5c0   : > { %v2451_v21 = vmax.f32 %v2448_v37, %v2450_v40  ;;  %v2445_v23 = vsel %vm535_vm0, %v2437_v28, -inf }
 0x5c1   : > { %v2398_v58 = vadd.f32 %v2397_v47, %v2396_v12  ;;  %v2431_v53 = vadd.f32 %v2386_v54, %v7060_v7  ;;  %v2432_v12 = vadd.f32 %v2392_v45, %v7060_v7  ;;  %v2435_v5 = vadd.f32 %v2410_v18, %v6983_v56  ;;  %v7667_v45 = vpop.permute.xlu0 %893 }
 0x5c2   : > { %v2436_v46 = vadd.f32 %v2416_v62, %v6983_v56  ;;  %v2455_v39 = vmax.f32 %v2451_v21, %v2454_v25 }
 0x5c3   : > { %v2433_v14 = vadd.f32 %v2398_v58, %v6980_v51  ;;  %v2440_v6 = vsel %vm535_vm0, %v2431_v53, -inf  ;;  %v2443_v22 = vsel %vm535_vm0, %v2435_v5, -inf  ;;  %v2449_v30 = vsel %vm535_vm0, %v2432_v12, -inf }
 0x5c4   : > { %v2444_v61 = vmax.f32 %v2440_v6, %v2443_v22 }
 0x5c5   : > { %1483 = vadd.xlane.f32.xlu2 %v1482_v34  ;;  %v2429_v34 = vadd.f32 %v2374_v15, %v6977_v42  ;;  %v2441_v10 = vsel %vm535_vm0, %v2433_v14, -inf  ;;  %v2452_v15 = vsel %vm535_vm0, %v2436_v46, -inf }
 0x5c6   : > { %v2453_v58 = vmax.f32 %v2449_v30, %v2452_v15 }
 0x5c7   : > { %v2439_v47 = vsel %vm535_vm0, %v2429_v34, -inf }
 0x5c8   : > { %v2442_v31 = vmax.f32 %v2439_v47, %v2441_v10  ;;  %v2456_v49 = vmax.f32 %v2455_v39, %v2453_v58 }
 0x5ca   : > { %v2446_v36 = vmax.f32 %v2442_v31, %v2445_v23  ;;  %v2458_v54 = vperm.slane %v2456_v49, 0 }
 0x5cc   : > { %v2447_v43 = vmax.f32 %v2446_v36, %v2444_v61  ;;  %v2462_v60 = vsub.f32 %v2432_v12, %v2458_v54  ;;  %v2464_v47 = vsub.f32 %v2434_v24, %v2458_v54  ;;  %v2460_v22 = vsub.f32 %v2430_v8, %v2458_v54 }
 0x5cd   : > { %v2466_v15 = vsub.f32 %v2436_v46, %v2458_v54  ;;  %v2468_v24 = vsub.f32 %v2438_v29, %v2458_v54 }
 0x5ce   : > { %v2457_v44 = vperm.slane %v2447_v43, 0  ;;  %v2475_v10 = vmul.f32 1.442695, %v2462_v60  ;;  %v2479_v30 = vmul.f32 1.442695, %v2464_v47 }
 0x5cf   : > { %v2483_v58 = vmul.f32 1.442695, %v2466_v15  ;;  %v2487_v46 = vmul.f32 1.442695, %v2468_v24 }
 0x5d0   : > { %v2461_v18 = vsub.f32 %v2431_v53, %v2457_v44  ;;  %v2463_v62 = vsub.f32 %v2433_v14, %v2457_v44  ;;  %v2459_v21 = vsub.f32 %v2429_v34, %v2457_v44  ;;  %v2465_v36 = vsub.f32 %v2435_v5, %v2457_v44 }
 0x5d1   : > { %v2467_v12 = vsub.f32 %v2437_v28, %v2457_v44  ;;  %v2471_v14 = vmul.f32 1.442695, %v2460_v22 }
 0x5d2   : > { %v2473_v37 = vmul.f32 1.442695, %v2461_v18  ;;  %v2477_v23 = vmul.f32 1.442695, %v2463_v62  ;;  %v2469_v53 = vmul.f32 1.442695, %v2459_v21 }
 0x5d3   : > { %v2481_v39 = vmul.f32 1.442695, %v2465_v36  ;;  %v2485_v5 = vmul.f32 1.442695, %v2467_v12 }
 0x5d4   : > { %6352 = vpow2.f32 %v2473_v37 }
 0x5d5   : > { %6354 = vpow2.f32 %v2475_v10 }
 0x5d6   : > { %6356 = vpow2.f32 %v2477_v23 }
 0x5d7   : > { %6358 = vpow2.f32 %v2479_v30 }
 0x5d8   : > { %6360 = vpow2.f32 %v2469_v53 }
 0x5d9   : > { %6362 = vpow2.f32 %v2471_v14 }
 0x5da   : > { %v7671_v34 = vpop.eup %6352  ;;  %6364 = vpow2.f32 %v2481_v39 }
 0x5db   : > { %v7673_v8 = vpop.eup %6354  ;;  %6366 = vpow2.f32 %v2483_v58  ;;  %v2499_v28 = vrot.slane %v7671_v34, 7 }
 0x5dc   : > { %v7675_v43 = vpop.eup %6356  ;;  %v2507_v49 = vrot.slane %v7673_v8, 7  ;;  %6368 = vpow2.f32 %v2485_v5 }
 0x5dd   : > { %v7679_v29 = vpop.eup %6358  ;;  %6370 = vpow2.f32 %v2487_v46  ;;  %v2501_v44 = vrot.slane %v7675_v43, 6 }
 0x5de   : > { %v2509_v60 = vrot.slane %v7679_v29, 6 }
 0x5df   : > { %v2041_v0 = vpop.xlane.xlu2 %2040 }
 0x5e6   : > { %v2076_v31 = vpop.permute.xlu0 %2075 }
 0x5e7   : > { %v7669_v27 = vpop.xlane.xlu2 %2043 }
 0x5e9   : > { %v2047_v40 = vpop.xlane.xlu1 %2046 }
 0x5ea   : > { %v2098_v6 = vadd.f32 %v2076_v31, %v2047_v40 }
 0x5ec   : > { %2113 = vperm.xlu0 %6255, %v2098_v6  }
 0x5ef   : > { %v2062_v25 = vpop.permute.xlu2 %2061 }
 0x5f0   : > { %v2096_v61 = vadd.f32 %v2062_v25, %v2041_v0  ;;  %v7682_v0 = vpop.eup %6360 }
 0x5f1   : > { %v7685_v54 = vpop.eup %6362  ;;  %v2500_v18 = vsel %vm573_vm1, %v2499_v28, %v7682_v0  ;;  %v1475_v36 = vpop.xlane.xlu1 %1474 }
 0x5f2   : > { %2103 = vperm.xlu2 %6253, %v2096_v61   ;;  %v7690_v62 = vpop.eup %6364  ;;  %v2508_v47 = vsel %vm573_vm1, %v2507_v49, %v7685_v54  ;;  %v2502_v10 = vsel %vm576_vm2, %v2501_v44, %v2500_v18  ;;  %v2083_v44 = vpop.permute.xlu0 %2082 }
 0x5f3   : > { %v7694_v37 = vpop.eup %6366  ;;  %v2503_v40 = vrot.slane %v7690_v62, 5  ;;  %v2510_v21 = vsel %vm576_vm2, %v2509_v60, %v2508_v47 }
 0x5f4   : > { %6258 = vset.pattern.permute.xlu0 %v6928_v1  ;;  %v7697_v31 = vpop.eup %6368  ;;  %v2511_v22 = vrot.slane %v7694_v37, 5 }
 0x5f5   : > { %v7701_v6 = vpop.eup %6370  ;;  %v2504_v23 = vsel %vm727_vm13, %v2503_v40, %v2502_v10  ;;  %v2505_v30 = vrot.slane %v7697_v31, 4  ;;  %v918_v10 = vpop.f32.mrf.mxu0 }
 0x5f6   : > { %v2512_v15 = vsel %vm727_vm13, %v2511_v22, %v2510_v21  ;;  %v2513_v53 = vrot.slane %v7701_v6, 4  ;;  %v938_v40 = vpop.f32.mrf.mxu1  ;;  %v7714_v22 = vadd.f32 %v918_v10, %v7667_v45 }
 0x5f7   : > { %v2506_v12 = vsel %vm729_vm4, %v2505_v30, %v2504_v23  ;;  %v7717_v23 = vadd.f32 %v938_v40, %v7667_v45 }
 0x5f8   : > { %v2514_v14 = vsel %vm729_vm4, %v2513_v53, %v2512_v15  ;;  %v2517_v25 = vsel %vm1812_vm5, %v2506_v12, 0.0 }
 0x5f9   : > { %v2524_v24 = vsel %vm1812_vm5, %v2514_v14, 0.0  ;;  %v2518_v39 = vrot.slane %v2517_v25, 4  ;;  %v1481_v58 = vpop.xlane.xlu1 %1480  ;;  %v941_v14 = vadd.f32 %v7717_v23, %v7714_v22 }
 0x5fa   : > { %v2525_v61 = vrot.slane %v2524_v24, 4 }
 0x5fb   : > { %v2519_v5 = vadd.f32 %v2518_v39, %v2517_v25 }
 0x5fc   : > { %v2526_v46 = vadd.f32 %v2525_v61, %v2524_v24 }
 0x5fd   : > { %v2520_v28 = vrot.slane %v2519_v5, 2 }
 0x5fe   : > { %v2527_v49 = vrot.slane %v2526_v46, 2 }
 0x5ff   : > { %v2521_v47 = vadd.f32 %v2520_v28, %v2519_v5 }
 0x600   : > { %v2528_v21 = vadd.f32 %v2527_v49, %v2526_v46 }
 0x601   : > { %v2522_v30 = vrot.slane %v2521_v47, 1 }
 0x602   : > { %v2529_v15 = vrot.slane %v2528_v21, 1 }
 0x604   : > { %v2530_v24 = vadd.f32 %v2529_v15, %v2528_v21 }
 0x606   : > { %v2532_v61 = vperm.slane %v2530_v24, 0 }
 0x608   : > { %v2559_v57 = vand.u32 2147483648, %v2532_v61  ;;  %vm2553_vm7 = vweird.f32 %v2532_v61 }
 0x611   : > { %v2069_v18 = vpop.permute.xlu1 %2068 }
 0x612   : > { %v2097_v60 = vadd.f32 %v2069_v18, %v7669_v27  ;;  %v2523_v27 = vadd.f32 %v2522_v30, %v2521_v47 }
 0x614   : > { %2108 = vperm.xlu1 %6254, %v2097_v60   ;;  %v2531_v39 = vperm.slane %v2523_v27, 0 }
 0x616   : > { %6372 = vrcp.f32 %v2531_v39  ;;  %vm2538_vm3 = vweird.f32 %v2531_v39  ;;  %v2542_v24 = vand.u32 2147483647, %v2531_v39 }
 0x617   : > { %6374 = vrcp.f32 %v2532_v61 }
 0x618   : > { %vm2543_vm8 = vcmp.eq.f32.partialorder %v2542_v24, 8.507059e+37 }
 0x619   : > { %v2053_v53 = vpop.xlane.xlu0 %2052  ;;  %v2090_v12 = vpop.permute.xlu1 %2089 }
 0x61a   : > { %v2100_v25 = vadd.f32 %v2090_v12, %v2053_v53 }
 0x61b   : > { %942 = vadd.xlane.f32.xlu2 %v941_v14 }
 0x61c   : > { %2123 = vperm.xlu1 %6254, %v2100_v25   ;;  %v6373_v5 = vpop.eup %6372  ;;  %v2544_v25 = vand.u32 2147483648, %v2531_v39 }
 0x61d   : > { %v6375_v46 = vpop.eup %6374  ;;  %v2534_v28 = vmul.f32 %v6373_v5, %v2531_v39  ;;  %vm2539_vm11 = vweird.f32 %v6373_v5 }
 0x61e   : > { %v2549_v49 = vmul.f32 %v6375_v46, %v2532_v61  ;;  %vm2554_vm12 = vweird.f32 %v6375_v46  ;;  %vm2540_vm6 = vmor %vm2538_vm3, %vm2539_vm11  ;;  %vm9532_vm3 = vcmask 60416  }
 0x61f   : > { %v2535_v60 = vsub.f32 1.0, %v2534_v28  ;;  %vm2555_vm10 = vmor %vm2553_vm7, %vm2554_vm12  ;;  %vm9533_vm12 = vcmask 261120  }
 0x620   : > { %v2550_v40 = vsub.f32 1.0, %v2549_v49  ;;  %v2560_v49 = vor.u32 1.1754944e-38, %v2559_v57 }
 0x621   : > { %v2536_v47 = vmul.f32 %v6373_v5, %v2535_v60 }
 0x622   : > { %v2551_v30 = vmul.f32 %v6375_v46, %v2550_v40 }
 0x623   : > { %v2537_v12 = vadd.f32 %v6373_v5, %v2536_v47 }
 0x624   : > { %6257 = vset.pattern.permute.xlu1 %v6928_v1  ;;  %v2552_v27 = vadd.f32 %v6375_v46, %v2551_v30 }
 0x626   : > { %v2556_v28 = vsel %vm2555_vm10, %v6375_v46, %v2552_v27  ;;  %v6508_v27 = vld [vmem:[%s6917_s13 + $0x8] sm:$0xff] }
 0x628   : > { %v1478_v45 = vpop.xlane.xlu2 %1477 }
 0x629   : > { %v1485_v53 = vadd.f32 %v1478_v45, %v1475_v36  ;;  %v2541_v36 = vsel %vm2540_vm6, %v6373_v5, %v2537_v12  ;;  %v2545_v45 = vor.u32 1.1754944e-38, %v2544_v25  ;;  %v6507_v25 = vld [vmem:[%s6917_s13] sm:$0xff] }
 0x62b   : > { %v1486_v21 = vadd.f32 %v1485_v53, %v1481_v58 }
 0x630   : > { %v2050_v18 = vpop.xlane.xlu2 %2049 }
 0x631   : > { %v2099_v10 = vadd.f32 %v2083_v44, %v2050_v18  ;;  %v2557_v44 = vand.u32 2147483647, %v2532_v61  ;;  %v2546_v18 = vsel %vm2543_vm8, %v2545_v45, %v2541_v36 }
 0x632   : > { %v7725_v39 = vmul.f32 %v7671_v34, %v2546_v18  ;;  %v7731_v40 = vmul.f32 %v7675_v43, %v2546_v18  ;;  %v7739_v34 = vmul.f32 %v7682_v0, %v2546_v18  ;;  %v7746_v30 = vmul.f32 %v7690_v62, %v2546_v18 }
 0x633   : > { %2118 = vperm.xlu2 %6253, %v2099_v10   ;;  %vm2558_vm9 = vcmp.eq.f32.partialorder %v2557_v44, 8.507059e+37 }
 0x634   : > { %v2561_v60 = vsel %vm2558_vm9, %v2560_v49, %v2556_v28  ;;  %v2581_v57 = vrot.slane %v7725_v39, 7  ;;  %v2583_v43 = vrot.slane %v7731_v40, 6  ;;  %v2585_v45 = vrot.slane %v7746_v30, 5 }
 0x635   : > { %v7728_v10 = vmul.f32 %v7673_v8, %v2561_v60  ;;  %v7742_v8 = vmul.f32 %v7685_v54, %v2561_v60  ;;  %v7766_v44 = vmul.f32 %v7701_v6, %v2561_v60 }
 0x637   : > { %v2589_v46 = vrot.slane %v7728_v10, 7 }
 0x638   : > { %v1484_v15 = vpop.xlane.xlu2 %1483 }
 0x639   : > { %v1487_v14 = vadd.f32 %v1486_v21, %v1484_v15  ;;  %v7752_v15 = vmul.f32 %v7694_v37, %v2561_v60  ;;  %v2590_v0 = vsel %vm573_vm1, %v2589_v46, %v7742_v8  ;;  %v2595_v46 = vrot.slane %v7766_v44, 4 }
 0x63b   : > { %v1488_v56 = vmul.f32 %v1487_v14, %v7528_v41  ;;  %6256 = vset.pattern.permute.xlu2 %v6928_v1  ;;  %v7757_v14 = vmul.f32 %v7697_v31, %v2546_v18  ;;  %v2593_v49 = vrot.slane %v7752_v15, 5 }
 0x63d   : > { %v1489_v58 = vadd.f32 1e-05, %v1488_v56  ;;  %v7734_v56 = vmul.f32 %v7679_v29, %v2561_v60  ;;  %v2582_v29 = vsel %vm573_vm1, %v2581_v57, %v7739_v34 }
 0x63e   : > { %v2584_v37 = vsel %vm576_vm2, %v2583_v43, %v2582_v29 }
 0x63f   : > { %6376 = vrsqrt.f32 %v1489_v58  ;;  %v2591_v21 = vrot.slane %v7734_v56, 6  ;;  %vm1496_vm9 = vweird.f32 %v1489_v58 }
 0x641   : > { %v2592_v28 = vsel %vm576_vm2, %v2591_v21, %v2590_v0  ;;  %v6509_v0 = vld [vmem:[%s6917_s13 + $0x20] sm:$0xff] }
 0x642   : > { %v2594_v57 = vsel %vm727_vm13, %v2593_v49, %v2592_v28 }
 0x645   : > { %v6377_v61 = vpop.eup %6376 }
 0x646   : > { %v1491_v5 = vmul.f32 %v6377_v61, %v1489_v58  ;;  %vm1497_vm8 = vweird.f32 %v6377_v61  ;;  %v2587_v58 = vrot.slane %v7757_v14, 4 }
 0x647   : > { %vm1498_vm11 = vmor %vm1496_vm9, %vm1497_vm8 }
 0x648   : > { %v1492_v53 = vmul.f32 %v6377_v61, %v1491_v5  ;;  %v2586_v5 = vsel %vm727_vm13, %v2585_v45, %v2584_v37  ;;  %v6512_v45 = vld [vmem:[%s6917_s13 + $0x18] sm:$0xff] }
 0x64a   : > { %v1493_v47 = vmul.f32 0.5, %v1492_v53 }
 0x64c   : > { %v1494_v12 = vsub.f32 1.5, %v1493_v47  ;;  %v2104_v54 = vpop.permute.xlu2 %2103  ;;  %v2596_v47 = vsel %vm729_vm4, %v2595_v46, %v2594_v57  ;;  %v6513_v57 = vld [vmem:[%s6917_s13 + $0x40] sm:$0xff] }
 0x64d   : > { %v7760_v62 = vadd.f32 %v6507_v25, %v2104_v54  ;;  %v7763_v24 = vadd.f32 %v6508_v27, %v2104_v54  ;;  %v2600_v21 = vsel %vm1812_vm5, %v2596_v47, 0.0  ;;  %v6751_v25 = vmov 2048.0  }
 0x64e   : > { %v1495_v36 = vmul.f32 %v6377_v61, %v1494_v12  ;;  %6378 = vrcp.f32 %v6751_v25 }
 0x64f   : > { %v2136_v31 = vadd.f32 %v7763_v24, %v7760_v62 }
 0x650   : > { %v1499_v18 = vsel %vm1498_vm11, %v6377_v61, %v1495_v36  ;;  %v2588_v61 = vsel %vm729_vm4, %v2587_v58, %v2586_v5 }
 0x651   : > { %2137 = vadd.xlane.f32.xlu1 %v2136_v31  ;;  %v1506_v6 = vmul.f32 %v1499_v18, %v7634_v50  ;;  %v1507_v60 = vmul.f32 %v1499_v18, %v7638_v13  ;;  %v1504_v53 = vmul.f32 %v1499_v18, %v7554_v19  ;;  %v1505_v43 = vmul.f32 %v1499_v18, %v7558_v55 }
 0x652   : > { %v1502_v50 = vmul.f32 %v1499_v18, %v7570_v48  ;;  %v1503_v13 = vmul.f32 %v1499_v18, %v7574_v4  ;;  %v2599_v29 = vsel %vm1812_vm5, %v2588_v61, 0.0  ;;  %v1500_v19 = vmul.f32 %v1499_v18, %v7541_v2 }
 0x653   : > { %1541 = vmatpush.msra.mxu2 %v1506_v6  ;;  %1561 = vmatpush.msra.mxu3 %v1507_v60  ;;  %v1501_v55 = vmul.f32 %v1499_v18, %v7545_v59  ;;  %v2601_v48 = vadd.f32 %v2600_v21, %v2599_v29  ;;  %v6510_v59 = vld [vmem:[%s6917_s13 + $0x28] sm:$0xff]  ;;  %v1508_v18 = vrot.slane %v7489_v20, 1 }
 0x654   : > { %v6379_v27 = vpop.eup %6378 }
 0x655   : > { %1542 = vmatpush.msra.mxu2 %v1504_v53  ;;  %1562 = vmatpush.msra.mxu3 %v1505_v43  ;;  %v952_v49 = vmul.f32 2048.0, %v6379_v27  ;;  %v6514_v53 = vld [vmem:[%s6917_s13 + $0x48] sm:$0xff]  ;;  %v1511_v61 = vsel %vm9532_vm3, %v1508_v18, 0.0  ;;  %vm956_vm6 = vweird.f32 %v6379_v27 }
 0x656   : > { %v1512_v29 = vrot.slane %v1511_v61, 4 }
 0x657   : > { %1543 = vmatpush.msra.mxu2 %v1502_v50  ;;  %1563 = vmatpush.msra.mxu3 %v1503_v13  ;;  %v953_v5 = vsub.f32 1.0, %v952_v49 }
 0x658   : > { %v1513_v25 = vadd.f32 %v1512_v29, %v1511_v61 }
 0x659   : > { %1544 = vmatpush.msra.mxu2 %v1500_v19  ;;  %1564 = vmatpush.msra.mxu3 %v1501_v55  ;;  %v954_v20 = vmul.f32 %v6379_v27, %v953_v5 }
 0x65a   : > { %5998 = vmatmul.msk.f32.vlgmr.msra.gmra.mxu2 %vm9533_vm12, %v7665_v35  ;;  %5999 = vmatmul.msk.f32.vlgmr.msra.gmra.mxu3 %vm9533_vm12, %v7665_v35  ;;  %v6511_v35 = vld [vmem:[%s6917_s13 + $0x10] sm:$0xff] }
 0x65b   : > { %v955_v55 = vadd.f32 %v6379_v27, %v954_v20 }
 0x65c   : > { %2602 = vadd.xlane.f32.xlu2 %v2601_v48 }
 0x65e   : > { %v2114_v4 = vpop.permute.xlu0 %2113 }
 0x65f   : > { %v7795_v2 = vadd.f32 %v6509_v0, %v2114_v4  ;;  %v7798_v12 = vadd.f32 %v6510_v59, %v2114_v4  ;;  %v6515_v4 = vld [vmem:[%s6917_s13 + $0x30] sm:$0xff]  ;;  %v6516_v59 = vld [vmem:[%s6917_s13 + $0x38] sm:$0xff] }
 0x661   : > { %v2142_v54 = vadd.f32 %v7798_v12, %v7795_v2 }
 0x664   : > { %2143 = vadd.xlane.f32.xlu2 %v2142_v54 }
 0x686   : > { %v2109_v37 = vpop.permute.xlu1 %2108 }
 0x687   : > { %v7803_v36 = vadd.f32 %v6511_v35, %v2109_v37  ;;  %v7806_v28 = vadd.f32 %v6512_v45, %v2109_v37  ;;  %v957_v35 = vsel %vm956_vm6, %v6379_v27, %v955_v55 }
 0x689   : > { %v2139_v31 = vadd.f32 %v7806_v28, %v7803_v36 }
 0x68b   : > { %2140 = vadd.xlane.f32.xlu0 %v2139_v31  ;;  %v1514_v31 = vrot.slane %v1513_v25, 2 }
 0x68d   : > { %v1515_v49 = vadd.f32 %v1514_v31, %v1513_v25 }
 0x68e   : > { %v943_v6 = vpop.xlane.xlu2 %942  ;;  %v2124_v60 = vpop.permute.xlu1 %2123 }
 0x68f   : > { %v944_v58 = vrot.slane %v943_v6, 4  ;;  %v7812_v46 = vadd.f32 %v6513_v57, %v2124_v60  ;;  %v7815_v43 = vadd.f32 %v6514_v53, %v2124_v60  ;;  %v1516_v18 = vrot.slane %v1515_v49, 1 }
 0x691   : > { %v945_v47 = vadd.f32 %v944_v58, %v943_v6  ;;  %v2148_v50 = vadd.f32 %v7815_v43, %v7812_v46  ;;  %v1517_v5 = vadd.f32 %v1516_v18, %v1515_v49 }
 0x693   : > { %2149 = vadd.xlane.f32.xlu2 %v2148_v50  ;;  %v946_v13 = vrot.slane %v945_v47, 2 }
 0x695   : > { %v947_v19 = vadd.f32 %v946_v13, %v945_v47 }
 0x696   : > { %v2119_v21 = vpop.permute.xlu2 %2118 }
 0x697   : > { %v948_v48 = vrot.slane %v947_v19, 1  ;;  %v7821_v0 = vadd.f32 %v6515_v4, %v2119_v21  ;;  %v7824_v54 = vadd.f32 %v6516_v59, %v2119_v21 }
 0x699   : > { %v949_v37 = vadd.f32 %v948_v48, %v947_v19  ;;  %v2145_v45 = vadd.f32 %v7824_v54, %v7821_v0 }
 0x69b   : > { %6107 = vpush %v949_v37  ;;  %2146 = vadd.xlane.f32.xlu1 %v2145_v45 }
 0x69c   : > { %6109 = vpush %v957_v35 }
 0x6ab   : > { %1522 = vperm.xlu2 %6256, %v1517_v5  }
 0x6cc   : > { %s6108_s3 = spop %6107 }
 0x6cd   : > { %s7859_s29 = spop %6109 }
 0x6ce   : > { %s959_s15 = smul.f32 %s7859_s29, %s6108_s3 }
 0x6cf   : > { %v2603_v6 = vpop.xlane.xlu2 %2602 }
 0x6d0   : > { %v2604_v60 = vmul.f32 %v2603_v6, %v7022_v17 }
 0x6d2   : > { %v2615_v58 = vmul.f32 %v2604_v60, %v7739_v34  ;;  %v2616_v57 = vmul.f32 %v2604_v60, %v7742_v8  ;;  %v2607_v53 = vrot.slane %v2604_v60, 2  ;;  %v2609_v27 = vrot.slane %v2604_v60, 4 }
 0x6d3   : > { %v2606_v61 = vrot.slane %v2604_v60, 1  ;;  %v2608_v47 = vrot.slane %v2604_v60, 3 }
 0x6d4   : > { %v2625_v50 = vperm.slane %v2615_v58, 0  ;;  %v2626_v20 = vperm.slane %v2616_v57, 0  ;;  %v2619_v13 = vmul.f32 %v2607_v53, %v7731_v40  ;;  %v2620_v29 = vmul.f32 %v2607_v53, %v7734_v56 }
 0x6d5   : > { %v2623_v19 = vmul.f32 %v2609_v27, %v7757_v14  ;;  %v2624_v55 = vmul.f32 %v2609_v27, %v7766_v44  ;;  %v2617_v21 = vmul.f32 %v2606_v61, %v7725_v39  ;;  %v2618_v34 = vmul.f32 %v2606_v61, %v7728_v10 }
 0x6d6   : > { %v2635_v8 = vmul.f32 %v7577_v38, %v2625_v50  ;;  %v2636_v48 = vmul.f32 %v7580_v9, %v2626_v20  ;;  %v2629_v4 = vperm.slane %v2619_v13, 0  ;;  %v2630_v59 = vperm.slane %v2620_v29, 0 }
 0x6d7   : > { %v2672_v25 = vrot.slane %v2619_v13, 6  ;;  %v2633_v37 = vperm.slane %v2623_v19, 0  ;;  %v2634_v35 = vperm.slane %v2624_v55, 0  ;;  %v2627_v45 = vperm.slane %v2617_v21, 0 }
 0x6d8   : > { %v2645_v40 = vadd.f32 %v2636_v48, %v2635_v8  ;;  %v2639_v56 = vmul.f32 %v7588_v26, %v2629_v4  ;;  %v2640_v14 = vmul.f32 %v7591_v52, %v2630_v59  ;;  %v2628_v10 = vperm.slane %v2618_v34, 0 }
 0x6d9   : > { %v2643_v44 = vmul.f32 %v7611_v63, %v2633_v37  ;;  %v2644_v39 = vmul.f32 %v7618_v33, %v2634_v35  ;;  %v2670_v31 = vrot.slane %v2617_v21, 7  ;;  %v2680_v9 = vrot.slane %v2620_v29, 6 }
 0x6da   : > { %2646 = vadd.xlane.f32.xlu1 %v2645_v40  ;;  %v2651_v38 = vadd.f32 %v2640_v14, %v2639_v56  ;;  %v2678_v49 = vrot.slane %v2618_v34, 7  ;;  %v2621_v18 = vmul.f32 %v2608_v47, %v7746_v30  ;;  %v2622_v6 = vmul.f32 %v2608_v47, %v7752_v15 }
 0x6db   : > { %v2657_v5 = vadd.f32 %v2644_v39, %v2643_v44  ;;  %v2671_v26 = vsel %vm573_vm1, %v2670_v31, %v2615_v58  ;;  %v2637_v52 = vmul.f32 %v7598_v32, %v2627_v45  ;;  %v2638_v63 = vmul.f32 %v7601_v16, %v2628_v10 }
 0x6dc   : > { %2652 = vadd.xlane.f32.xlu0 %v2651_v38  ;;  %v2631_v60 = vperm.slane %v2621_v18, 0  ;;  %v2673_v33 = vsel %vm576_vm2, %v2672_v25, %v2671_v26  ;;  %v2632_v53 = vperm.slane %v2622_v6, 0  ;;  %v2674_v27 = vrot.slane %v2621_v18, 5  ;;  %v2144_v25 = vpop.xlane.xlu2 %2143 }
 0x6dd   : > { %2658 = vadd.xlane.f32.xlu2 %v2657_v5  ;;  %v2682_v61 = vrot.slane %v2622_v6, 5  ;;  %v2679_v50 = vsel %vm573_vm1, %v2678_v49, %v2616_v57  ;;  %v2648_v16 = vadd.f32 %v2638_v63, %v2637_v52  ;;  %v2676_v20 = vrot.slane %v2623_v19, 4  ;;  %v2138_v19 = vpop.xlane.xlu1 %2137 }
 0x6de   : > { %v2641_v30 = vmul.f32 %v7608_v11, %v2631_v60  ;;  %v2681_v15 = vsel %vm576_vm2, %v2680_v9, %v2679_v50  ;;  %v2642_v58 = vmul.f32 %v7615_v3, %v2632_v53  ;;  %v2675_v47 = vsel %vm727_vm13, %v2674_v27, %v2673_v33 }
 0x6df   : > { %v2683_v32 = vsel %vm727_vm13, %v2682_v61, %v2681_v15  ;;  %v2684_v13 = vrot.slane %v2624_v55, 4  ;;  %v2677_v21 = vsel %vm729_vm4, %v2676_v20, %v2675_v47  ;;  %v6752_v3 = vmov 1280.0   ;;  %v1546_v15 = vpop.f32.mrf.mxu2 }
 0x6e0   : > { %v2654_v29 = vadd.f32 %v2642_v58, %v2641_v30  ;;  %v2688_v11 = vsel %vm1812_vm5, %v2677_v21, 0.0  ;;  %6380 = vrcp.f32 %v6752_v3  ;;  %v960_v38 = vstv %s959_s15  ;;  %v1566_v58 = vpop.f32.mrf.mxu3 }
 0x6e1   : > { %v2685_v34 = vsel %vm729_vm4, %v2684_v13, %v2683_v32 }
 0x6e2   : > { %2649 = vadd.xlane.f32.xlu1 %v2648_v16  ;;  %v2689_v57 = vsel %vm1812_vm5, %v2685_v34, 0.0 }
 0x6e3   : > { %v2690_v8 = vadd.f32 %v2689_v57, %v2688_v11 }
 0x6e4   : > { %2655 = vadd.xlane.f32.xlu0 %v2654_v29 }
 0x6e6   : > { %v6381_v48 = vpop.eup %6380 }
 0x6e7   : > { %v2156_v4 = vmul.f32 1280.0, %v6381_v48  ;;  %vm2160_vm7 = vweird.f32 %v6381_v48 }
 0x6e9   : > { %v2157_v59 = vsub.f32 1.0, %v2156_v4  ;;  %v6517_v4 = vld [vmem:[#allocation6] sm:$0xff] }
 0x6ea   : > { %2691 = vadd.xlane.f32.xlu1 %v2690_v8  ;;  %v9590_v8 = vld [vmem:[#allocation23_spill] sm:$0xff] }
 0x6eb   : > { %v2158_v37 = vmul.f32 %v6381_v48, %v2157_v59 }
 0x6ed   : > { %v2159_v40 = vadd.f32 %v6381_v48, %v2158_v37 }
 0x6ef   : > { %v7861_v39 = vsel %vm2160_vm7, %v6381_v48, %v2159_v40  ;;  %v6519_v40 = vld [vmem:[#allocation6 + $0x8] sm:$0xff] }
 0x6fe   : > { %v2141_v55 = vpop.xlane.xlu0 %2140 }
 0x6ff   : > { %v2151_v35 = vadd.f32 %v2141_v55, %v2138_v19  ;;  %v6518_v19 = vld [vmem:[#allocation6 + $0x10] sm:$0xff] }
 0x701   : > { %v2152_v56 = vadd.f32 %v2151_v35, %v2144_v25 }
 0x706   : > { %v2150_v44 = vpop.xlane.xlu2 %2149 }
 0x70e   : > { %v2147_v14 = vpop.xlane.xlu1 %2146  ;;  %v1523_v30 = vpop.permute.xlu2 %1522 }
 0x70f   : > { %v2153_v45 = vadd.f32 %v2152_v56, %v2147_v14  ;;  %v7911_v47 = vadd.f32 %v1546_v15, %v1523_v30  ;;  %v7913_v32 = vadd.f32 %v1566_v58, %v1523_v30 }
 0x711   : > { %v2154_v10 = vadd.f32 %v2153_v45, %v2150_v44  ;;  %v6520_v44 = vld [vmem:[%s9478_s4] sm:$0x1f] }
 0x713   : > { %v2162_v31 = vmul.f32 %v7861_v39, %v2154_v10 }
 0x715   : > { %v7866_v9 = vsub.f32 %v7803_v36, %v2162_v31  ;;  %v7869_v49 = vsub.f32 %v7806_v28, %v2162_v31  ;;  %v7872_v18 = vsub.f32 %v7760_v62, %v2162_v31  ;;  %v7875_v5 = vsub.f32 %v7763_v24, %v2162_v31 }
 0x716   : > { %v7886_v28 = vsub.f32 %v7714_v22, %v960_v38  ;;  %v7889_v62 = vsub.f32 %v7717_v23, %v960_v38  ;;  %v7892_v60 = vsub.f32 %v7821_v0, %v2162_v31  ;;  %v7895_v33 = vsub.f32 %v7824_v54, %v2162_v31 }
 0x717   : > { %v2175_v6 = vmul.f32 %v7866_v9, %v7866_v9  ;;  %v2176_v26 = vmul.f32 %v7869_v49, %v7869_v49  ;;  %v2173_v52 = vmul.f32 %v7872_v18, %v7872_v18  ;;  %v2174_v36 = vmul.f32 %v7875_v5, %v7875_v5 }
 0x718   : > { %9588 = vst [vmem:[#allocation31_spill] sm:$0xff] %v7886_v28  ;;  %v2179_v53 = vmul.f32 %v7892_v60, %v7892_v60  ;;  %v2180_v22 = vmul.f32 %v7895_v33, %v7895_v33  ;;  %v963_v23 = vmul.f32 %v7886_v28, %v7886_v28  ;;  %v964_v27 = vmul.f32 %v7889_v62, %v7889_v62 }
 0x719   : > { %9589 = vst [vmem:[#allocation28_spill] sm:$0xff] %v7889_v62  ;;  %v2186_v24 = vadd.f32 %v2176_v26, %v2175_v6  ;;  %v2183_v63 = vadd.f32 %v2174_v36, %v2173_v52  ;;  %v7906_v50 = vsub.f32 %v7795_v2, %v2162_v31  ;;  %v7909_v54 = vsub.f32 %v7798_v12, %v2162_v31 }
 0x71a   : > { %v2192_v61 = vadd.f32 %v2180_v22, %v2179_v53  ;;  %v965_v0 = vadd.f32 %v964_v27, %v963_v23  ;;  %v1569_v2 = vadd.f32 %v7913_v32, %v7911_v47  ;;  %v7922_v13 = vsub.f32 %v7812_v46, %v2162_v31  ;;  %v6521_v27 = vld [vmem:[#allocation6 + $0x18] sm:$0xff] }
 0x71b   : > { %2187 = vadd.xlane.f32.xlu0 %v2186_v24  ;;  %2184 = vadd.xlane.f32.xlu1 %v2183_v63  ;;  %v2177_v16 = vmul.f32 %v7906_v50, %v7906_v50  ;;  %v2178_v20 = vmul.f32 %v7909_v54, %v7909_v54  ;;  %v7925_v29 = vsub.f32 %v7815_v43, %v2162_v31  ;;  %v9591_v52 = vmov 0  }
 0x71c   : > { %v2181_v21 = vmul.f32 %v7922_v13, %v7922_v13 }
 0x71d   : > { %v2189_v12 = vadd.f32 %v2178_v20, %v2177_v16  ;;  %v2182_v34 = vmul.f32 %v7925_v29, %v7925_v29 }
 0x71f   : > { %v2195_v11 = vadd.f32 %v2182_v34, %v2181_v21 }
 0x723   : > { %2193 = vadd.xlane.f32.xlu0 %v2192_v61  ;;  %966 = vadd.xlane.f32.xlu1 %v965_v0  ;;  %v6522_v0 = vld [vmem:[#allocation6 + $0x20] sm:$0xff] }
 0x72b   : > { %1570 = vadd.xlane.f32.xlu0 %v1569_v2  ;;  %2190 = vadd.xlane.f32.xlu1 %v2189_v12 }
 0x733   : > { %2196 = vadd.xlane.f32.xlu1 %v2195_v11 }
 0x74d   : > { %v2647_v57 = vpop.xlane.xlu1 %2646 }
 0x74e   : > { %v2698_v3 = vperm.slane %v2647_v57, %v9590_v8 }
 0x74f   : > { %v2653_v48 = vpop.xlane.xlu0 %2652 }
 0x750   : > { %v2700_v46 = vperm.slane %v2653_v48, %v9590_v8  ;;  %v2738_v59 = vmul.f32 %v6517_v4, %v2698_v3  ;;  %v2659_v63 = vpop.xlane.xlu2 %2658 }
 0x751   : > { %v2702_v23 = vperm.slane %v2659_v63, %v9590_v8  ;;  %v9592_v63 = vld [vmem:[#allocation27_spill] sm:$0xff] }
 0x752   : > { %v2743_v43 = vsel %vm755_vm15, %v2738_v59, 0.0  ;;  %v2740_v55 = vmul.f32 %v6518_v19, %v2700_v46 }
 0x753   : > { %2744 = vadd.xlane.f32.xlu1 %v2743_v43  ;;  %v2742_v30 = vmul.f32 %v6522_v0, %v2702_v23  ;;  %v7979_v0 = vld [vmem:[%s6917_s13 + $0x38] sm:$0xff] }
 0x754   : > { %v2749_v25 = vsel %vm755_vm15, %v2740_v55, 0.0 }
 0x755   : > { %2750 = vadd.xlane.f32.xlu2 %v2749_v25  ;;  %v2650_v37 = vpop.xlane.xlu1 %2649  ;;  %v2755_v20 = vsel %vm755_vm15, %v2742_v30, 0.0 }
 0x756   : > { %v2699_v35 = vperm.slane %v2650_v37, %v9590_v8 }
 0x757   : > { %v2656_v24 = vpop.xlane.xlu0 %2655 }
 0x758   : > { %v2739_v56 = vmul.f32 %v6519_v40, %v2699_v35  ;;  %v2701_v53 = vperm.slane %v2656_v24, %v9590_v8 }
 0x75a   : > { %v2746_v14 = vsel %vm755_vm15, %v2739_v56, 0.0  ;;  %v2741_v61 = vmul.f32 %v6521_v27, %v2701_v53 }
 0x75b   : > { %2747 = vadd.xlane.f32.xlu0 %v2746_v14 }
 0x75c   : > { %v2752_v15 = vsel %vm755_vm15, %v2741_v61, 0.0  ;;  %v7976_v61 = vld [vmem:[%s6917_s13 + $0x30] sm:$0xff] }
 0x75d   : > { %v2692_v45 = vpop.xlane.xlu1 %2691 }
 0x75e   : > { %v2758_v10 = vmul.f32 %v6520_v44, %v2692_v45 }
 0x760   : > { %v2760_v31 = vperm.slane %v2758_v10, 0  ;;  %v2774_v38 = vperm.slane %v2758_v10, 2  ;;  %v2767_v6 = vperm.slane %v2758_v10, 1  ;;  %v2781_v26 = vperm.slane %v2758_v10, 3 }
 0x761   : > { %v2788_v36 = vperm.slane %v2758_v10, 4 }
 0x76c   : > { %2765 = vperm.xlu1 %6257, %v2760_v31  }
 0x76d   : > { %2779 = vperm.xlu2 %6256, %v2774_v38  }
 0x76f   : > { %2772 = vperm.xlu0 %6258, %v2767_v6  }
 0x774   : > { %6260 = vset.pattern.permute.xlu1 %v9591_v52 }
 0x775   : > { %2786 = vperm.xlu2 %6256, %v2781_v26  }
 0x77d   : > { %2793 = vperm.xlu2 %6256, %v2788_v36  }
 0x785   : > { %6259 = vset.pattern.permute.xlu2 %v9591_v52 }
 0x78e   : > { %v2185_v22 = vpop.xlane.xlu1 %2184  ;;  %v2188_v12 = vpop.xlane.xlu0 %2187 }
 0x78f   : > { %v2198_v57 = vadd.f32 %v2188_v12, %v2185_v22 }
 0x796   : > { %2753 = vadd.xlane.f32.xlu1 %v2752_v15  ;;  %v967_v58 = vpop.xlane.xlu1 %966  ;;  %v2194_v4 = vpop.xlane.xlu0 %2193 }
 0x797   : > { %v968_v16 = vrot.slane %v967_v58, 4 }
 0x799   : > { %v969_v2 = vadd.f32 %v968_v16, %v967_v58  ;;  %2756 = vadd.xlane.f32.xlu0 %v2755_v20  ;;  %v7984_v16 = vld [vmem:[%s6917_s13 + $0x50] sm:$0xff]  ;;  %v7987_v20 = vld [vmem:[%s6917_s13 + $0x60] sm:$0xff] }
 0x79b   : > { %v970_v21 = vrot.slane %v969_v2, 2 }
 0x79d   : > { %v971_v34 = vadd.f32 %v970_v21, %v969_v2  ;;  %v9594_v2 = vld [vmem:[#allocation21_spill] sm:$0xff] }
 0x79e   : > { %v2191_v11 = vpop.xlane.xlu1 %2190  ;;  %v1571_v58 = vpop.xlane.xlu0 %1570  ;;  %v3041_v12 = vmul.f32 %v7976_v61, %v9594_v2  ;;  %v3042_v21 = vmul.f32 %v7979_v0, %v9594_v2 }
 0x79f   : > { %v972_v3 = vrot.slane %v971_v34, 1  ;;  %v2199_v48 = vadd.f32 %v2198_v57, %v2191_v11  ;;  %v7995_v57 = vld [vmem:[%s6917_s13 + $0x58] sm:$0xff] }
 0x7a1   : > { %v973_v46 = vadd.f32 %v972_v3, %v971_v34  ;;  %v2200_v59 = vadd.f32 %v2199_v48, %v2194_v4  ;;  %v7998_v3 = vld [vmem:[%s6917_s13 + $0x68] sm:$0xff]  ;;  %v9595_v48 = vld [vmem:[#allocation17_spill] sm:$0xff]  ;;  %v9596_v4 = vld [vmem:[#allocation18_spill] sm:$0xff] }
 0x7a3   : > { %6111 = vpush %v973_v46  ;;  %v3045_v46 = vmul.f32 %v7984_v16, %v9595_v48 }
 0x7a6   : > { %v2197_v43 = vpop.xlane.xlu1 %2196 }
 0x7a7   : > { %v2201_v19 = vadd.f32 %v2200_v59, %v2197_v43  ;;  %v3047_v59 = vmul.f32 %v7987_v20, %v9596_v4 }
 0x7a9   : > { %v2202_v55 = vmul.f32 %v2201_v19, %v7861_v39 }
 0x7ab   : > { %v2203_v25 = vadd.f32 1e-05, %v2202_v55  ;;  %v3046_v55 = vmul.f32 %v7995_v57, %v9595_v48 }
 0x7ad   : > { %6382 = vrsqrt.f32 %v2203_v25  ;;  %vm2210_vm8 = vweird.f32 %v2203_v25 }
 0x7b3   : > { %v6383_v37 = vpop.eup %6382 }
 0x7b4   : > { %v2205_v35 = vmul.f32 %v6383_v37, %v2203_v25  ;;  %vm2211_vm10 = vweird.f32 %v6383_v37  ;;  %v3048_v25 = vmul.f32 %v7998_v3, %v9596_v4 }
 0x7b5   : > { %vm2212_vm9 = vmor %vm2210_vm8, %vm2211_vm10 }
 0x7b6   : > { %v2206_v40 = vmul.f32 %v6383_v37, %v2205_v35  ;;  %v1572_v35 = vrot.slane %v1571_v58, 4 }
 0x7b8   : > { %v2207_v56 = vmul.f32 0.5, %v2206_v40 }
 0x7ba   : > { %v2208_v14 = vsub.f32 1.5, %v2207_v56  ;;  %v3061_v56 = vrot.slane %v3041_v12, 4 }
 0x7bc   : > { %v2209_v45 = vmul.f32 %v6383_v37, %v2208_v14  ;;  %v3067_v14 = vrot.slane %v3042_v21, 4 }
 0x7be   : > { %v2213_v44 = vsel %vm2212_vm9, %v6383_v37, %v2209_v45 }
 0x7bf   : > { %v2222_v10 = vmul.f32 %v2213_v44, %v7922_v13  ;;  %v2223_v31 = vmul.f32 %v2213_v44, %v7925_v29  ;;  %v2220_v38 = vmul.f32 %v2213_v44, %v7892_v60  ;;  %v2221_v6 = vmul.f32 %v2213_v44, %v7895_v33 }
 0x7c0   : > { %v2218_v26 = vmul.f32 %v2213_v44, %v7906_v50  ;;  %v2219_v36 = vmul.f32 %v2213_v44, %v7909_v54  ;;  %v2216_v13 = vmul.f32 %v2213_v44, %v7866_v9  ;;  %v2217_v29 = vmul.f32 %v2213_v44, %v7869_v49  ;;  %v7958_v50 = vld [vmem:[%s6917_s13 + $0x20] sm:$0xff]  ;;  %v7961_v54 = vld [vmem:[%s6917_s13 + $0x28] sm:$0xff] }
 0x7c1   : > { %2252 = vmatpush.msrb.mxu0 %v2222_v10  ;;  %2272 = vmatpush.msrb.mxu1 %v2223_v31  ;;  %v2214_v60 = vmul.f32 %v2213_v44, %v7872_v18  ;;  %v2215_v33 = vmul.f32 %v2213_v44, %v7875_v5  ;;  %v7964_v9 = vld [vmem:[%s6917_s13 + $0x40] sm:$0xff]  ;;  %v7967_v49 = vld [vmem:[%s6917_s13 + $0x48] sm:$0xff]  ;;  %v3039_v53 = vmul.f32 %v7958_v50, %v9592_v63  ;;  %v9593_v5 = vld [vmem:[#allocation16_spill] sm:$0xff]  ;;  %v3085_v31 = vrot.slane %v3045_v46, 4 }
 0x7c2   : > { %v3040_v18 = vmul.f32 %v7961_v54, %v9592_v63  ;;  %v3043_v23 = vmul.f32 %v7964_v9, %v9593_v5  ;;  %v3044_v30 = vmul.f32 %v7967_v49, %v9593_v5 }
 0x7c3   : > { %2253 = vmatpush.msrb.mxu0 %v2220_v38  ;;  %2273 = vmatpush.msrb.mxu1 %v2221_v6  ;;  %v3049_v15 = vrot.slane %v3039_v53, 4  ;;  %v3097_v38 = vrot.slane %v3047_v59, 4 }
 0x7c4   : > { %v3055_v34 = vrot.slane %v3040_v18, 4  ;;  %v3073_v11 = vrot.slane %v3043_v23, 4  ;;  %v3079_v43 = vrot.slane %v3044_v30, 4 }
 0x7c5   : > { %2254 = vmatpush.msrb.mxu0 %v2218_v26  ;;  %2274 = vmatpush.msrb.mxu1 %v2219_v36  ;;  %v3050_v37 = vadd.f32 %v3049_v15, %v3039_v53  ;;  %v3091_v26 = vrot.slane %v3046_v55, 4  ;;  %v3103_v36 = vrot.slane %v3048_v25, 4 }
 0x7c6   : > { %v2745_v19 = vpop.xlane.xlu1 %2744  ;;  %v3056_v40 = vadd.f32 %v3055_v34, %v3040_v18  ;;  %v3074_v45 = vadd.f32 %v3073_v11, %v3043_v23  ;;  %v3080_v10 = vadd.f32 %v3079_v43, %v3044_v30  ;;  %v3098_v18 = vadd.f32 %v3097_v38, %v3047_v59 }
 0x7c7   : > { %2255 = vmatpush.msrb.mxu0 %v2216_v13  ;;  %2275 = vmatpush.msrb.mxu1 %v2217_v29  ;;  %v3051_v6 = vrot.slane %v3050_v37, 2  ;;  %v1573_v13 = vadd.f32 %v1572_v35, %v1571_v58  ;;  %v3092_v15 = vadd.f32 %v3091_v26, %v3046_v55  ;;  %v3104_v34 = vadd.f32 %v3103_v36, %v3048_v25 }
 0x7c8   : > { %v2751_v24 = vpop.xlane.xlu2 %2750  ;;  %v3075_v53 = vrot.slane %v3074_v45, 2  ;;  %v3081_v30 = vrot.slane %v3080_v10, 2 }
 0x7c9   : > { %2256 = vmatpush.msrb.mxu0 %v2214_v60  ;;  %2276 = vmatpush.msrb.mxu1 %v2215_v33  ;;  %v3057_v60 = vrot.slane %v3056_v40, 2  ;;  %v3062_v33 = vadd.f32 %v3061_v56, %v3041_v12  ;;  %v1574_v43 = vrot.slane %v1573_v13, 2  ;;  %v3093_v59 = vrot.slane %v3092_v15, 2 }
 0x7ca   : > { %v3076_v35 = vadd.f32 %v3075_v53, %v3074_v45 }
 0x7cb   : > { %v3058_v28 = vadd.f32 %v3057_v60, %v3056_v40  ;;  %v3063_v41 = vrot.slane %v3062_v33, 2  ;;  %v3094_v53 = vadd.f32 %v3093_v59, %v3092_v15 }
 0x7cd   : > { %v3059_v25 = vrot.slane %v3058_v28, 1 }
 0x7ce   : > { %v2748_v29 = vpop.xlane.xlu0 %2747 }
 0x7d0   : > { %v2780_v22 = vpop.permute.xlu2 %2779 }
 0x7d1   : > { %v2802_v27 = vadd.f32 %v2780_v22, %v2751_v24  ;;  %v3068_v24 = vadd.f32 %v3067_v14, %v3042_v21  ;;  %v3086_v22 = vadd.f32 %v3085_v31, %v3045_v46  ;;  %v3099_v21 = vrot.slane %v3098_v18, 2 }
 0x7d2   : > { %v3082_v46 = vadd.f32 %v3081_v30, %v3080_v10  ;;  %v3105_v14 = vrot.slane %v3104_v34, 2  ;;  %v1575_v31 = vadd.f32 %v1574_v43, %v1573_v13  ;;  %v3060_v30 = vadd.f32 %v3059_v25, %v3058_v28 }
 0x7d3   : > { %2817 = vperm.xlu1 %6260, %v2802_v27   ;;  %v3052_v27 = vadd.f32 %v3051_v6, %v3050_v37  ;;  %v3069_v58 = vrot.slane %v3068_v24, 2  ;;  %v3087_v12 = vrot.slane %v3086_v22, 2  ;;  %v3077_v6 = vrot.slane %v3076_v35, 1 }
 0x7d4   : > { %s6112_s30 = spop %6111  ;;  %v3100_v36 = vadd.f32 %v3099_v21, %v3098_v18  ;;  %v3083_v60 = vrot.slane %v3082_v46, 1  ;;  %v1576_v10 = vrot.slane %v1575_v31, 1  ;;  %v3110_v28 = vadd.f32 %v3060_v30, %v6977_v42 }
 0x7d5   : > { %s983_s25 = smul.f32 %s6112_s30, %s7859_s29  ;;  %v3053_v56 = vrot.slane %v3052_v27, 1  ;;  %v3070_v38 = vadd.f32 %v3069_v58, %v3068_v24  ;;  %v3088_v26 = vadd.f32 %v3087_v12, %v3086_v22  ;;  %v3078_v13 = vadd.f32 %v3077_v6, %v3076_v35 }
 0x7d6   : > { %v3084_v24 = vadd.f32 %v3083_v60, %v3082_v46  ;;  %v3095_v22 = vrot.slane %v3094_v53, 1  ;;  %v1577_v15 = vadd.f32 %v1576_v10, %v1575_v31  ;;  %v3128_v59 = vsel %vm535_vm0, %v3110_v28, -inf  ;;  %v9598_v31 = vld [vmem:[#allocation20_spill] sm:$0xff] }
 0x7d7   : > { %s984_s19 = sadd.f32 1e-05, %s983_s25  ;;  %v3054_v45 = vadd.f32 %v3053_v56, %v3052_v27 }
 0x7d8   : > { %v3096_v12 = vadd.f32 %v3095_v22, %v3094_v53  ;;  %v3114_v56 = vadd.f32 %v3084_v24, %v6980_v51 }
 0x7d9   : > { %v8008_v44 = vstv %s984_s19 }
 0x7da   : > { %6384 = vrsqrt.f32 %v8008_v44  ;;  %vm992_vm6 = vweird.f32 %v8008_v44 }
 0x7db   : > { %6261 = vset.pattern.permute.xlu1 %v6928_v1 }
 0x7de   : > { %v2766_v23 = vpop.permute.xlu1 %2765 }
 0x7df   : > { %v2800_v11 = vadd.f32 %v2766_v23, %v2745_v19  ;;  %v3064_v19 = vadd.f32 %v3063_v41, %v3062_v33  ;;  %v3106_v23 = vadd.f32 %v3105_v14, %v3104_v34  ;;  %v3089_v41 = vrot.slane %v3088_v26, 1  ;;  %v9597_v14 = vld [vmem:[#allocation19_spill] sm:$0xff] }
 0x7e0   : > { %v6385_v62 = vpop.eup %6384  ;;  %v3101_v33 = vrot.slane %v3100_v36, 1 }
 0x7e1   : > { %v987_v4 = vmul.f32 %v6385_v62, %v8008_v44  ;;  %2807 = vperm.xlu2 %6259, %v2800_v11   ;;  %v2773_v55 = vpop.permute.xlu0 %2772  ;;  %vm993_vm11 = vweird.f32 %v6385_v62  ;;  %v3065_v2 = vrot.slane %v3064_v19, 1  ;;  %v3107_v18 = vrot.slane %v3106_v23, 1 }
 0x7e2   : > { %v2801_v48 = vadd.f32 %v2773_v55, %v2748_v29  ;;  %vm994_vm7 = vmor %vm992_vm6, %vm993_vm11  ;;  %v3109_v29 = vadd.f32 %v3054_v45, %v6977_v42  ;;  %v3102_v35 = vadd.f32 %v3101_v33, %v3100_v36  ;;  %v3113_v44 = vadd.f32 %v3078_v13, %v6980_v51 }
 0x7e3   : > { %v988_v37 = vmul.f32 %v6385_v62, %v987_v4  ;;  %v3071_v4 = vrot.slane %v3070_v38, 1  ;;  %v3066_v34 = vadd.f32 %v3065_v2, %v3064_v19  ;;  %v3108_v21 = vadd.f32 %v3107_v18, %v3106_v23 }
 0x7e4   : > { %v3119_v46 = vsel %vm535_vm0, %v3109_v29, -inf  ;;  %v3117_v55 = vadd.f32 %v3102_v35, %v9598_v31  ;;  %v3121_v25 = vsel %vm535_vm0, %v3113_v44, -inf  ;;  %v3116_v19 = vadd.f32 %v3096_v12, %v9597_v14 }
 0x7e5   : > { %v989_v40 = vmul.f32 0.5, %v988_v37  ;;  %v3072_v58 = vadd.f32 %v3071_v4, %v3070_v38  ;;  %v3118_v38 = vadd.f32 %v3108_v21, %v9598_v31  ;;  %v3122_v6 = vmax.f32 %v3119_v46, %v3121_v25 }
 0x7e6   : > { %v3125_v60 = vsel %vm535_vm0, %v3117_v55, -inf }
 0x7e7   : > { %v990_v11 = vsub.f32 1.5, %v989_v40  ;;  %v3112_v2 = vadd.f32 %v3072_v58, %v7060_v7  ;;  %v3130_v40 = vsel %vm535_vm0, %v3114_v56, -inf  ;;  %v3126_v53 = vmax.f32 %v3122_v6, %v3125_v60  ;;  %v2787_v58 = vpop.permute.xlu2 %2786 }
 0x7e8   : > { %v3134_v10 = vsel %vm535_vm0, %v3118_v38, -inf }
 0x7e9   : > { %2812 = vperm.xlu2 %6259, %v2801_v48   ;;  %v991_v43 = vmul.f32 %v6385_v62, %v990_v11  ;;  %v3090_v48 = vadd.f32 %v3089_v41, %v3088_v26  ;;  %v3131_v26 = vmax.f32 %v3128_v59, %v3130_v40  ;;  %v3129_v23 = vsel %vm535_vm0, %v3112_v2, -inf }
 0x7ea   : > { %v3132_v11 = vsel %vm535_vm0, %v3116_v19, -inf }
 0x7eb   : > { %v995_v27 = vsel %vm994_vm7, %v6385_v62, %v991_v43  ;;  %v3111_v62 = vadd.f32 %v3066_v34, %v7060_v7  ;;  %v3115_v37 = vadd.f32 %v3090_v48, %v9597_v14  ;;  %v3135_v30 = vmax.f32 %v3131_v26, %v3134_v10 }
 0x7ec   : > { %6113 = vpush %v995_v27  ;;  %v3133_v13 = vmax.f32 %v3129_v23, %v3132_v11 }
 0x7ed   : > { %6115 = vpush %v1577_v15  ;;  %v3120_v36 = vsel %vm535_vm0, %v3111_v62, -inf  ;;  %v3123_v45 = vsel %vm535_vm0, %v3115_v37, -inf }
 0x7ee   : > { %v3124_v4 = vmax.f32 %v3120_v36, %v3123_v45  ;;  %v3136_v41 = vmax.f32 %v3135_v30, %v3133_v13 }
 0x7f0   : > { %v3127_v43 = vmax.f32 %v3126_v53, %v3124_v4  ;;  %v3138_v24 = vperm.slane %v3136_v41, 0 }
 0x7f2   : > { %v3137_v33 = vperm.slane %v3127_v43, 0  ;;  %v3142_v18 = vsub.f32 %v3112_v2, %v3138_v24  ;;  %v3144_v15 = vsub.f32 %v3114_v56, %v3138_v24  ;;  %v3140_v21 = vsub.f32 %v3110_v28, %v3138_v24 }
 0x7f3   : > { %v3146_v40 = vsub.f32 %v3116_v19, %v3138_v24 }
 0x7f4   : > { %v3141_v22 = vsub.f32 %v3111_v62, %v3137_v33  ;;  %v3143_v27 = vsub.f32 %v3113_v44, %v3137_v33  ;;  %v3155_v48 = vmul.f32 1.442695, %v3142_v18  ;;  %v3139_v35 = vsub.f32 %v3109_v29, %v3137_v33 }
 0x7f5   : > { %v3145_v25 = vsub.f32 %v3115_v37, %v3137_v33  ;;  %v3159_v6 = vmul.f32 1.442695, %v3144_v15  ;;  %v3147_v36 = vsub.f32 %v3117_v55, %v3137_v33  ;;  %v3151_v62 = vmul.f32 1.442695, %v3140_v21  ;;  %v2794_v37 = vpop.permute.xlu2 %2793 }
 0x7f6   : > { %v3153_v34 = vmul.f32 1.442695, %v3141_v22  ;;  %v3157_v46 = vmul.f32 1.442695, %v3143_v27  ;;  %v3149_v26 = vmul.f32 1.442695, %v3139_v35  ;;  %v3148_v44 = vsub.f32 %v3118_v38, %v3138_v24 }
 0x7f7   : > { %v3161_v56 = vmul.f32 1.442695, %v3145_v25  ;;  %v3163_v45 = vmul.f32 1.442695, %v3146_v40  ;;  %v3165_v60 = vmul.f32 1.442695, %v3147_v36 }
 0x7f8   : > { %6386 = vpow2.f32 %v3153_v34  ;;  %v3167_v53 = vmul.f32 1.442695, %v3148_v44 }
 0x7f9   : > { %6388 = vpow2.f32 %v3155_v48 }
 0x7fa   : > { %6390 = vpow2.f32 %v3157_v46 }
 0x7fb   : > { %6392 = vpow2.f32 %v3159_v6 }
 0x7fc   : > { %6394 = vpow2.f32 %v3149_v26 }
 0x7fd   : > { %6396 = vpow2.f32 %v3151_v62 }
 0x7fe   : > { %v8034_v29 = vpop.eup %6386  ;;  %6398 = vpow2.f32 %v3161_v56 }
 0x7ff   : > { %v8036_v28 = vpop.eup %6388  ;;  %6400 = vpow2.f32 %v3163_v45  ;;  %v3179_v55 = vrot.slane %v8034_v29, 7 }
 0x800   : > { %v8038_v23 = vpop.eup %6390  ;;  %v3187_v11 = vrot.slane %v8036_v28, 7  ;;  %6402 = vpow2.f32 %v3165_v60 }
 0x801   : > { %v8041_v38 = vpop.eup %6392  ;;  %6404 = vpow2.f32 %v3167_v53  ;;  %v3181_v30 = vrot.slane %v8038_v23, 6 }
 0x802   : > { %v8044_v10 = vpop.eup %6394  ;;  %v3189_v43 = vrot.slane %v8041_v38, 6 }
 0x803   : > { %v8047_v4 = vpop.eup %6396  ;;  %v3180_v13 = vsel %vm573_vm1, %v3179_v55, %v8044_v10 }
 0x804   : > { %v8052_v41 = vpop.eup %6398  ;;  %v3188_v33 = vsel %vm573_vm1, %v3187_v11, %v8047_v4  ;;  %v3182_v22 = vsel %vm576_vm2, %v3181_v30, %v3180_v13  ;;  %v6523_v11 = vld [vmem:[%s6917_s13 + $0x10] sm:$0xff]  ;;  %v6524_v13 = vld [vmem:[%s6917_s13 + $0x18] sm:$0xff] }
 0x805   : > { %v8056_v24 = vpop.eup %6400  ;;  %v3183_v27 = vrot.slane %v8052_v41, 5  ;;  %v3190_v15 = vsel %vm576_vm2, %v3189_v43, %v3188_v33 }
 0x806   : > { %v8059_v18 = vpop.eup %6402 }
 0x807   : > { %v8063_v34 = vpop.eup %6404  ;;  %v3184_v48 = vsel %vm727_vm13, %v3183_v27, %v3182_v22  ;;  %v3185_v35 = vrot.slane %v8059_v18, 4 }
 0x808   : > { %v3193_v21 = vrot.slane %v8063_v34, 4 }
 0x809   : > { %v2754_v12 = vpop.xlane.xlu1 %2753  ;;  %v3186_v46 = vsel %vm729_vm4, %v3185_v35, %v3184_v48  ;;  %v6526_v35 = vld [vmem:[%s6917_s13 + $0x28] sm:$0xff] }
 0x80a   : > { %v2803_v59 = vadd.f32 %v2787_v58, %v2754_v12  ;;  %v3191_v58 = vrot.slane %v8056_v24, 5  ;;  %v3197_v25 = vsel %vm1812_vm5, %v3186_v46, 0.0  ;;  %v6527_v46 = vld [vmem:[%s6917_s13 + $0x30] sm:$0xff] }
 0x80b   : > { %v3198_v40 = vrot.slane %v3197_v25, 4 }
 0x80c   : > { %2822 = vperm.xlu2 %6259, %v2803_v59   ;;  %v2757_v2 = vpop.xlane.xlu0 %2756  ;;  %v3192_v12 = vsel %vm727_vm13, %v3191_v58, %v3190_v15  ;;  %v6525_v58 = vld [vmem:[%s6917_s13 + $0x20] sm:$0xff] }
 0x80d   : > { %v2804_v19 = vadd.f32 %v2794_v37, %v2757_v2  ;;  %v3194_v59 = vsel %vm729_vm4, %v3193_v21, %v3192_v12  ;;  %v3199_v36 = vadd.f32 %v3198_v40, %v3197_v25  ;;  %v6528_v25 = vld [vmem:[%s6917_s13 + $0x38] sm:$0xff] }
 0x80e   : > { %v3204_v6 = vsel %vm1812_vm5, %v3194_v59, 0.0 }
 0x80f   : > { %v3205_v26 = vrot.slane %v3204_v6, 4  ;;  %v3200_v44 = vrot.slane %v3199_v36, 2 }
 0x811   : > { %v3206_v62 = vadd.f32 %v3205_v26, %v3204_v6  ;;  %v3201_v2 = vadd.f32 %v3200_v44, %v3199_v36 }
 0x813   : > { %v3207_v56 = vrot.slane %v3206_v62, 2  ;;  %v3202_v37 = vrot.slane %v3201_v2, 1 }
 0x814   : > { %2827 = vperm.xlu2 %6259, %v2804_v19  }
 0x815   : > { %v3208_v45 = vadd.f32 %v3207_v56, %v3206_v62  ;;  %v3203_v19 = vadd.f32 %v3202_v37, %v3201_v2 }
 0x817   : > { %v3209_v60 = vrot.slane %v3208_v45, 1  ;;  %v3211_v22 = vperm.slane %v3203_v19, 0 }
 0x819   : > { %v3210_v55 = vadd.f32 %v3209_v60, %v3208_v45  ;;  %6406 = vrcp.f32 %v3211_v22  ;;  %vm3218_vm9 = vweird.f32 %v3211_v22 }
 0x81b   : > { %v3212_v27 = vperm.slane %v3210_v55, 0  ;;  %v3224_v55 = vand.u32 2147483648, %v3211_v22 }
 0x81c   : > { %6262 = vset.pattern.permute.xlu2 %v6928_v1 }
 0x81d   : > { %6408 = vrcp.f32 %v3212_v27  ;;  %vm3233_vm6 = vweird.f32 %v3212_v27  ;;  %s8148_s28 = spop %6113 }
 0x81e   : > { %s6116_s26 = spop %6115 }
 0x81f   : > { %v6407_v26 = vpop.eup %6406  ;;  %s1587_s3 = smul.f32 %s6116_s26, %s7859_s29 }
 0x820   : > { %v3214_v44 = vmul.f32 %v6407_v26, %v3211_v22  ;;  %vm3219_vm10 = vweird.f32 %v6407_v26 }
 0x821   : > { %vm3220_vm11 = vmor %vm3218_vm9, %vm3219_vm10  ;;  %vm2238_vm10 = vcmask 326656  }
 0x822   : > { %v3215_v2 = vsub.f32 1.0, %v3214_v44  ;;  %v6530_v44 = vld [vmem:[%s6917_s13 + $0x40] sm:$0xff] }
 0x823   : > { %v6409_v62 = vpop.eup %6408 }
 0x824   : > { %v3229_v56 = vmul.f32 %v6409_v62, %v3212_v27  ;;  %v3216_v37 = vmul.f32 %v6407_v26, %v3215_v2  ;;  %vm3234_vm8 = vweird.f32 %v6409_v62  ;;  %v6531_v2 = vld [vmem:[%s6917_s13 + $0x48] sm:$0xff] }
 0x825   : > { %vm3235_vm7 = vmor %vm3233_vm6, %vm3234_vm8 }
 0x826   : > { %v3230_v45 = vsub.f32 1.0, %v3229_v56  ;;  %v3217_v19 = vadd.f32 %v6407_v26, %v3216_v37 }
 0x828   : > { %v3231_v60 = vmul.f32 %v6409_v62, %v3230_v45 }
 0x83b   : > { %v2808_v53 = vpop.permute.xlu2 %2807 }
 0x83c   : > { %v8076_v30 = vadd.f32 %v6523_v11, %v2808_v53  ;;  %v8079_v43 = vadd.f32 %v6524_v13, %v2808_v53  ;;  %v3232_v53 = vadd.f32 %v6409_v62, %v3231_v60  ;;  %v3239_v11 = vand.u32 2147483648, %v3212_v27 }
 0x83d   : > { %v3222_v13 = vand.u32 2147483647, %v3211_v22  ;;  %v8108_v22 = vld [vmem:[%s9479_s5] sm:$0xff] }
 0x83e   : > { %v2840_v33 = vadd.f32 %v8079_v43, %v8076_v30  ;;  %6000 = vmatmul.msk.f32.vlgmr.msrb.gmra.mxu0 %vm2238_vm10, %v8108_v22  ;;  %6001 = vmatmul.msk.f32.vlgmr.msrb.gmra.mxu1 %vm2238_vm10, %v8108_v22 }
 0x83f   : > { %vm3223_vm3 = vcmp.eq.f32.partialorder %v3222_v13, 8.507059e+37 }
 0x840   : > { %2841 = vadd.xlane.f32.xlu2 %v2840_v33  ;;  %v3237_v33 = vand.u32 2147483647, %v3212_v27 }
 0x842   : > { %vm3238_vm12 = vcmp.eq.f32.partialorder %v3237_v33, 8.507059e+37 }
 0x843   : > { %v2813_v15 = vpop.permute.xlu2 %2812 }
 0x844   : > { %v8084_v48 = vadd.f32 %v6525_v58, %v2813_v15  ;;  %v8087_v12 = vadd.f32 %v6526_v35, %v2813_v15  ;;  %v3221_v15 = vsel %vm3220_vm11, %v6407_v26, %v3217_v19  ;;  %v3236_v58 = vsel %vm3235_vm7, %v6409_v62, %v3232_v53 }
 0x845   : > { %v2818_v21 = vpop.permute.xlu1 %2817  ;;  %v3225_v35 = vor.u32 1.1754944e-38, %v3224_v55 }
 0x846   : > { %v8090_v59 = vadd.f32 %v6527_v46, %v2818_v21  ;;  %v8093_v6 = vadd.f32 %v6528_v25, %v2818_v21  ;;  %v2843_v40 = vadd.f32 %v8087_v12, %v8084_v48  ;;  %v3240_v21 = vor.u32 1.1754944e-38, %v3239_v11 }
 0x847   : > { %v3226_v46 = vsel %vm3223_vm3, %v3225_v35, %v3221_v15  ;;  %v6532_v35 = vld [vmem:[%s6917_s13 + $0x50] sm:$0xff] }
 0x848   : > { %2844 = vadd.xlane.f32.xlu0 %v2843_v40  ;;  %v2846_v36 = vadd.f32 %v8093_v6, %v8090_v59  ;;  %v3241_v25 = vsel %vm3238_vm12, %v3240_v21, %v3236_v58  ;;  %v8100_v40 = vmul.f32 %v8034_v29, %v3226_v46  ;;  %v8115_v27 = vmul.f32 %v8038_v23, %v3226_v46 }
 0x849   : > { %v8118_v29 = vmul.f32 %v8041_v38, %v3241_v25  ;;  %v8129_v37 = vmul.f32 %v8044_v10, %v3226_v46  ;;  %v8132_v23 = vmul.f32 %v8047_v4, %v3241_v25  ;;  %v8139_v53 = vmul.f32 %v8052_v41, %v3226_v46 }
 0x84a   : > { %2847 = vadd.xlane.f32.xlu1 %v2846_v36  ;;  %v8103_v36 = vmul.f32 %v8036_v28, %v3241_v25  ;;  %v3261_v26 = vrot.slane %v8100_v40, 7  ;;  %v3263_v60 = vrot.slane %v8115_v27, 6  ;;  %v8142_v55 = vmul.f32 %v8056_v24, %v3241_v25 }
 0x84b   : > { %v3271_v19 = vrot.slane %v8118_v29, 6  ;;  %v8151_v11 = vmul.f32 %v8059_v18, %v3226_v46  ;;  %v8154_v13 = vmul.f32 %v8063_v34, %v3241_v25  ;;  %v3265_v15 = vrot.slane %v8139_v53, 5 }
 0x84c   : > { %v3269_v62 = vrot.slane %v8103_v36, 7  ;;  %v3262_v10 = vsel %vm573_vm1, %v3261_v26, %v8129_v37  ;;  %v3273_v58 = vrot.slane %v8142_v55, 5  ;;  %vm2224_vm12 = vcmask 61440  }
 0x84d   : > { %v3264_v41 = vsel %vm576_vm2, %v3263_v60, %v3262_v10  ;;  %v3267_v26 = vrot.slane %v8151_v11, 4 }
 0x84e   : > { %v3270_v4 = vsel %vm573_vm1, %v3269_v62, %v8132_v23  ;;  %v3266_v34 = vsel %vm727_vm13, %v3265_v15, %v3264_v41  ;;  %v3275_v62 = vrot.slane %v8154_v13, 4 }
 0x84f   : > { %v3272_v24 = vsel %vm576_vm2, %v3271_v19, %v3270_v4 }
 0x850   : > { %v3274_v46 = vsel %vm727_vm13, %v3273_v58, %v3272_v24  ;;  %v6534_v24 = vld [vmem:[%s9480_s6] sm:$0x1f] }
 0x866   : > { %v2823_v28 = vpop.permute.xlu2 %2822 }
 0x867   : > { %v8123_v56 = vadd.f32 %v6530_v44, %v2823_v28  ;;  %v8126_v45 = vadd.f32 %v6531_v2, %v2823_v28  ;;  %v6533_v28 = vld [vmem:[%s6917_s13 + $0x58] sm:$0xff]  ;;  %v3268_v44 = vsel %vm729_vm4, %v3267_v26, %v3266_v34  ;;  %v3276_v2 = vsel %vm729_vm4, %v3275_v62, %v3274_v46 }
 0x868   : > { %v3279_v60 = vsel %vm1812_vm5, %v3268_v44, 0.0  ;;  %v3280_v19 = vsel %vm1812_vm5, %v3276_v2, 0.0 }
 0x869   : > { %v2849_v38 = vadd.f32 %v8126_v45, %v8123_v56  ;;  %v3281_v41 = vadd.f32 %v3280_v19, %v3279_v60 }
 0x86b   : > { %2850 = vadd.xlane.f32.xlu0 %v2849_v38  ;;  %v1588_v38 = vstv %s1587_s3 }
 0x86c   : > { %v8178_v10 = vsub.f32 %v7911_v47, %v1588_v38  ;;  %v8181_v4 = vsub.f32 %v7913_v32, %v1588_v38 }
 0x86e   : > { %v2828_v33 = vpop.permute.xlu2 %2827  ;;  %9599 = vst [vmem:[#allocation29_spill] sm:$0xff] %v8178_v10  ;;  %v1591_v15 = vmul.f32 %v8178_v10, %v8178_v10  ;;  %v1592_v58 = vmul.f32 %v8181_v4, %v8181_v4 }
 0x86f   : > { %v8161_v21 = vadd.f32 %v6532_v35, %v2828_v33  ;;  %v8164_v18 = vadd.f32 %v6533_v28, %v2828_v33  ;;  %9600 = vst [vmem:[#allocation25_spill] sm:$0xff] %v8181_v4  ;;  %v2225_v33 = vsel %vm2224_vm12, %v6534_v24, 0.0 }
 0x870   : > { %v2226_v35 = vrot.slane %v2225_v33, 4  ;;  %v1593_v47 = vadd.f32 %v1592_v58, %v1591_v15 }
 0x871   : > { %v2852_v25 = vadd.f32 %v8164_v18, %v8161_v21 }
 0x872   : > { %v2227_v28 = vadd.f32 %v2226_v35, %v2225_v33 }
 0x873   : > { %2853 = vadd.xlane.f32.xlu0 %v2852_v25 }
 0x874   : > { %v2228_v32 = vrot.slane %v2227_v28, 2 }
 0x876   : > { %v2229_v34 = vadd.f32 %v2228_v32, %v2227_v28 }
 0x878   : > { %v2230_v46 = vrot.slane %v2229_v34, 1 }
 0x87a   : > { %v2231_v25 = vadd.f32 %v2230_v46, %v2229_v34 }
 0x87b   : > { %3282 = vadd.xlane.f32.xlu0 %v3281_v41 }
 0x883   : > { %1594 = vadd.xlane.f32.xlu0 %v1593_v47 }
 0x897   : > { %2236 = vperm.xlu0 %6258, %v2231_v25  }
 0x8b3   : > { %v2842_v62 = vpop.xlane.xlu2 %2841 }
 0x8bb   : > { %v2845_v26 = vpop.xlane.xlu0 %2844 }
 0x8bc   : > { %v2855_v2 = vadd.f32 %v2845_v26, %v2842_v62 }
 0x8bd   : > { %v2848_v38 = vpop.xlane.xlu1 %2847 }
 0x8be   : > { %v2856_v60 = vadd.f32 %v2855_v2, %v2848_v38 }
 0x8de   : > { %v2851_v44 = vpop.xlane.xlu0 %2850 }
 0x8df   : > { %v2857_v19 = vadd.f32 %v2856_v60, %v2851_v44 }
 0x8e6   : > { %v2854_v41 = vpop.xlane.xlu0 %2853 }
 0x8e7   : > { %v2858_v24 = vadd.f32 %v2857_v19, %v2854_v41 }
 0x8e9   : > { %v2859_v4 = vmul.f32 %v2858_v24, %v7861_v39 }
 0x8eb   : > { %v8192_v15 = vsub.f32 %v8084_v48, %v2859_v4  ;;  %v8195_v33 = vsub.f32 %v8087_v12, %v2859_v4  ;;  %v8198_v58 = vsub.f32 %v8076_v30, %v2859_v4  ;;  %v8201_v35 = vsub.f32 %v8079_v43, %v2859_v4 }
 0x8ec   : > { %v8204_v47 = vsub.f32 %v8123_v56, %v2859_v4  ;;  %v8207_v28 = vsub.f32 %v8126_v45, %v2859_v4  ;;  %v8210_v32 = vsub.f32 %v8090_v59, %v2859_v4  ;;  %v8213_v48 = vsub.f32 %v8093_v6, %v2859_v4 }
 0x8ed   : > { %v2872_v12 = vmul.f32 %v8192_v15, %v8192_v15  ;;  %v2873_v30 = vmul.f32 %v8195_v33, %v8195_v33  ;;  %v2870_v43 = vmul.f32 %v8198_v58, %v8198_v58  ;;  %v2871_v56 = vmul.f32 %v8201_v35, %v8201_v35 }
 0x8ee   : > { %v3283_v45 = vpop.xlane.xlu0 %3282  ;;  %v2876_v59 = vmul.f32 %v8204_v47, %v8204_v47  ;;  %v2877_v25 = vmul.f32 %v8207_v28, %v8207_v28  ;;  %v2874_v26 = vmul.f32 %v8210_v32, %v8210_v32  ;;  %v2875_v62 = vmul.f32 %v8213_v48, %v8213_v48 }
 0x8ef   : > { %v3284_v34 = vmul.f32 %v3283_v45, %v7022_v17  ;;  %v2883_v6 = vadd.f32 %v2873_v30, %v2872_v12  ;;  %v2880_v46 = vadd.f32 %v2871_v56, %v2870_v43  ;;  %v8233_v44 = vsub.f32 %v8161_v21, %v2859_v4 }
 0x8f0   : > { %v2889_v41 = vadd.f32 %v2877_v25, %v2876_v59  ;;  %v8240_v30 = vsub.f32 %v8164_v18, %v2859_v4  ;;  %v2886_v43 = vadd.f32 %v2875_v62, %v2874_v26 }
 0x8f1   : > { %2884 = vadd.xlane.f32.xlu1 %v2883_v6  ;;  %2881 = vadd.xlane.f32.xlu2 %v2880_v46  ;;  %v3286_v2 = vrot.slane %v3284_v34, 1  ;;  %v3295_v38 = vmul.f32 %v3284_v34, %v8129_v37  ;;  %v3296_v60 = vmul.f32 %v3284_v34, %v8132_v23  ;;  %v3287_v19 = vrot.slane %v3284_v34, 2 }
 0x8f2   : > { %v2878_v21 = vmul.f32 %v8233_v44, %v8233_v44  ;;  %v3288_v56 = vrot.slane %v3284_v34, 3  ;;  %v2879_v26 = vmul.f32 %v8240_v30, %v8240_v30 }
 0x8f3   : > { %v3297_v24 = vmul.f32 %v3286_v2, %v8100_v40  ;;  %v3298_v12 = vmul.f32 %v3286_v2, %v8103_v36  ;;  %v3299_v45 = vmul.f32 %v3287_v19, %v8115_v27  ;;  %v3305_v59 = vperm.slane %v3295_v38, 0 }
 0x8f4   : > { %v3306_v25 = vperm.slane %v3296_v60, 0  ;;  %v3289_v40 = vrot.slane %v3284_v34, 4  ;;  %v3300_v36 = vmul.f32 %v3287_v19, %v8118_v29  ;;  %v3301_v27 = vmul.f32 %v3288_v56, %v8139_v53 }
 0x8f5   : > { %v3307_v6 = vperm.slane %v3297_v24, 0  ;;  %v3308_v37 = vperm.slane %v3298_v12, 0  ;;  %v3350_v46 = vrot.slane %v3297_v24, 7  ;;  %v3358_v23 = vrot.slane %v3298_v12, 7 }
 0x8f6   : > { %v1595_v10 = vpop.xlane.xlu0 %1594  ;;  %v3302_v62 = vmul.f32 %v3288_v56, %v8142_v55  ;;  %v3352_v12 = vrot.slane %v3299_v45, 6  ;;  %v3303_v19 = vmul.f32 %v3289_v40, %v8151_v11  ;;  %v3304_v53 = vmul.f32 %v3289_v40, %v8154_v13 }
 0x8f7   : > { %v1596_v2 = vrot.slane %v1595_v10, 4  ;;  %v3317_v18 = vmul.f32 %v7976_v61, %v3307_v6  ;;  %v3318_v4 = vmul.f32 %v7979_v0, %v3308_v37  ;;  %v3351_v24 = vsel %vm573_vm1, %v3350_v46, %v3295_v38 }
 0x8f8   : > { %v3359_v29 = vsel %vm573_vm1, %v3358_v23, %v3296_v60  ;;  %v3315_v61 = vmul.f32 %v7958_v50, %v3305_v59  ;;  %v3316_v0 = vmul.f32 %v7961_v54, %v3306_v25  ;;  %v3360_v6 = vrot.slane %v3300_v36, 6 }
 0x8f9   : > { %v1597_v17 = vadd.f32 %v1596_v2, %v1595_v10  ;;  %2890 = vadd.xlane.f32.xlu1 %v2889_v41  ;;  %2887 = vadd.xlane.f32.xlu2 %v2886_v43  ;;  %v3328_v34 = vadd.f32 %v3318_v4, %v3317_v18  ;;  %v3353_v55 = vsel %vm576_vm2, %v3352_v12, %v3351_v24  ;;  %v3354_v38 = vrot.slane %v3301_v27, 5 }
 0x8fa   : > { %v3361_v10 = vsel %vm576_vm2, %v3360_v6, %v3359_v29  ;;  %v3362_v41 = vrot.slane %v3302_v62, 5  ;;  %v2892_v43 = vadd.f32 %v2879_v26, %v2878_v21  ;;  %v3325_v60 = vadd.f32 %v3316_v0, %v3315_v61  ;;  %v2258_v0 = vpop.f32.mrf.mxu0 }
 0x8fb   : > { %v1598_v37 = vrot.slane %v1597_v17, 2  ;;  %3329 = vadd.xlane.f32.xlu0 %v3328_v34  ;;  %v3355_v50 = vsel %vm727_vm13, %v3354_v38, %v3353_v55  ;;  %v3356_v46 = vrot.slane %v3303_v19, 4  ;;  %v3364_v23 = vrot.slane %v3304_v53, 4 }
 0x8fc   : > { %v3363_v54 = vsel %vm727_vm13, %v3362_v41, %v3361_v10  ;;  %v3309_v59 = vperm.slane %v3299_v45, 0  ;;  %v3310_v25 = vperm.slane %v3300_v36, 0  ;;  %v3313_v26 = vperm.slane %v3303_v19, 0  ;;  %v2278_v19 = vpop.f32.mrf.mxu1 }
 0x8fd   : > { %v1599_v56 = vadd.f32 %v1598_v37, %v1597_v17  ;;  %v3357_v40 = vsel %vm729_vm4, %v3356_v46, %v3355_v50  ;;  %v3365_v2 = vsel %vm729_vm4, %v3364_v23, %v3363_v54  ;;  %v3314_v24 = vperm.slane %v3304_v53, 0 }
 0x8fe   : > { %v3319_v17 = vmul.f32 %v7964_v9, %v3309_v59  ;;  %v3320_v21 = vmul.f32 %v7967_v49, %v3310_v25  ;;  %v3368_v18 = vsel %vm1812_vm5, %v3357_v40, 0.0  ;;  %v3369_v4 = vsel %vm1812_vm5, %v3365_v2, 0.0  ;;  %v8284_v25 = vld [vmem:[#allocation6 + $0x8] sm:$0xff] }
 0x8ff   : > { %v1600_v11 = vrot.slane %v1599_v56, 1  ;;  %v3370_v45 = vadd.f32 %v3369_v4, %v3368_v18  ;;  %v3311_v12 = vperm.slane %v3301_v27, 0  ;;  %v3312_v34 = vperm.slane %v3302_v62, 0 }
 0x900   : > { %v3331_v36 = vadd.f32 %v3320_v21, %v3319_v17  ;;  %v3323_v29 = vmul.f32 %v7987_v20, %v3313_v26  ;;  %v3324_v61 = vmul.f32 %v7998_v3, %v3314_v24  ;;  %v8290_v24 = vld [vmem:[#allocation6] sm:$0xff] }
 0x901   : > { %2893 = vadd.xlane.f32.xlu1 %v2892_v43  ;;  %3326 = vadd.xlane.f32.xlu2 %v3325_v60  ;;  %v1601_v13 = vadd.f32 %v1600_v11, %v1599_v56  ;;  %v3321_v9 = vmul.f32 %v7984_v16, %v3311_v12  ;;  %v3322_v49 = vmul.f32 %v7995_v57, %v3312_v34 }
 0x902   : > { %v3337_v6 = vadd.f32 %v3324_v61, %v3323_v29  ;;  %v8295_v61 = vld [vmem:[#allocation6 + $0x10] sm:$0xff] }
 0x903   : > { %6117 = vpush %v1601_v13  ;;  %v3334_v37 = vadd.f32 %v3322_v49, %v3321_v9 }
 0x909   : > { %3371 = vadd.xlane.f32.xlu1 %v3370_v45  ;;  %3332 = vadd.xlane.f32.xlu2 %v3331_v36  ;;  %v8272_v53 = vpop.permute.xlu0 %2236 }
 0x90a   : > { %v8275_v27 = vadd.f32 %v2258_v0, %v8272_v53  ;;  %v8278_v20 = vadd.f32 %v2278_v19, %v8272_v53 }
 0x90c   : > { %v2281_v3 = vadd.f32 %v8278_v20, %v8275_v27 }
 0x911   : > { %3338 = vadd.xlane.f32.xlu1 %v3337_v6  ;;  %3335 = vadd.xlane.f32.xlu2 %v3334_v37 }
 0x919   : > { %2282 = vadd.xlane.f32.xlu2 %v2281_v3 }
 0x934   : > { %s6118_s22 = spop %6117 }
 0x935   : > { %s1611_s30 = smul.f32 %s6118_s22, %s7859_s29 }
 0x937   : > { %s1612_s25 = sadd.f32 1e-05, %s1611_s30 }
 0x939   : > { %v1613_v16 = vstv %s1612_s25 }
 0x93a   : > { %6410 = vrsqrt.f32 %v1613_v16  ;;  %vm1620_vm8 = vweird.f32 %v1613_v16 }
 0x940   : > { %v6411_v57 = vpop.eup %6410 }
 0x941   : > { %v1615_v62 = vmul.f32 %v6411_v57, %v1613_v16  ;;  %vm1621_vm3 = vweird.f32 %v6411_v57 }
 0x942   : > { %vm1622_vm9 = vmor %vm1620_vm8, %vm1621_vm3 }
 0x943   : > { %v1616_v55 = vmul.f32 %v6411_v57, %v1615_v62 }
 0x945   : > { %v1617_v38 = vmul.f32 0.5, %v1616_v55 }
 0x947   : > { %v1618_v10 = vsub.f32 1.5, %v1617_v38 }
 0x949   : > { %v1619_v41 = vmul.f32 %v6411_v57, %v1618_v10 }
 0x94b   : > { %v1623_v43 = vsel %vm1622_vm9, %v6411_v57, %v1619_v41  ;;  %v8304_v57 = vld [vmem:[%s9478_s4] sm:$0x1f] }
 0x94c   : > { %6119 = vpush %v1623_v43 }
 0x964   : > { %v2885_v56 = vpop.xlane.xlu1 %2884  ;;  %v2882_v60 = vpop.xlane.xlu2 %2881 }
 0x965   : > { %v2895_v54 = vadd.f32 %v2885_v56, %v2882_v60 }
 0x96c   : > { %v2891_v50 = vpop.xlane.xlu1 %2890  ;;  %v2888_v46 = vpop.xlane.xlu2 %2887 }
 0x96d   : > { %v2896_v23 = vadd.f32 %v2895_v54, %v2888_v46 }
 0x96e   : > { %v3330_v11 = vpop.xlane.xlu0 %3329 }
 0x96f   : > { %v3379_v59 = vperm.slane %v3330_v11, %v9590_v8  ;;  %v2897_v40 = vadd.f32 %v2896_v23, %v2891_v50 }
 0x971   : > { %v3419_v13 = vmul.f32 %v8284_v25, %v3379_v59 }
 0x973   : > { %v3426_v2 = vsel %vm755_vm15, %v3419_v13, 0.0 }
 0x974   : > { %v2894_v17 = vpop.xlane.xlu1 %2893  ;;  %3427 = vadd.xlane.f32.xlu2 %v3426_v2  ;;  %v3327_v21 = vpop.xlane.xlu2 %3326 }
 0x975   : > { %v2898_v18 = vadd.f32 %v2897_v40, %v2894_v17  ;;  %v3378_v4 = vperm.slane %v3327_v21, %v9590_v8 }
 0x977   : > { %v2899_v26 = vmul.f32 %v2898_v18, %v7861_v39  ;;  %v3418_v45 = vmul.f32 %v8290_v24, %v3378_v4  ;;  %v8338_v18 = vld [vmem:[%s6917_s13 + $0x50] sm:$0xff] }
 0x978   : > { %v3723_v4 = vmul.f32 %v8338_v18, %v9593_v5 }
 0x979   : > { %v2900_v36 = vadd.f32 1e-05, %v2899_v26  ;;  %v3423_v12 = vsel %vm755_vm15, %v3418_v45, 0.0  ;;  %v8343_v26 = vld [vmem:[%s6917_s13 + $0x70] sm:$0xff]  ;;  %v8346_v45 = vld [vmem:[%s6917_s13 + $0x58] sm:$0xff] }
 0x97a   : > { %3424 = vadd.xlane.f32.xlu1 %v3423_v12 }
 0x97b   : > { %6412 = vrsqrt.f32 %v2900_v36  ;;  %vm2907_vm6 = vweird.f32 %v2900_v36 }
 0x97c   : > { %v3333_v34 = vpop.xlane.xlu2 %3332  ;;  %v3372_v37 = vpop.xlane.xlu1 %3371 }
 0x97d   : > { %v3380_v29 = vperm.slane %v3333_v34, %v9590_v8  ;;  %v8307_v62 = vmul.f32 %v8304_v57, %v3372_v37  ;;  %s8546_s23 = spop %6119 }
 0x97f   : > { %v3420_v9 = vmul.f32 %v8295_v61, %v3380_v29  ;;  %v3447_v10 = vperm.slane %v8307_v62, 1  ;;  %v3440_v40 = vperm.slane %v8307_v62, 0  ;;  %v3468_v34 = vperm.slane %v8307_v62, 4  ;;  %v8357_v29 = vld [vmem:[%s6917_s13 + $0x40] sm:$0xff] }
 0x981   : > { %v6413_v49 = vpop.eup %6412  ;;  %v3429_v0 = vsel %vm755_vm15, %v3420_v9, 0.0  ;;  %v9601_v9 = vld [vmem:[#allocation21_spill] sm:$0xff] }
 0x982   : > { %v2902_v6 = vmul.f32 %v6413_v49, %v2900_v36  ;;  %3430 = vadd.xlane.f32.xlu0 %v3429_v0  ;;  %vm2908_vm11 = vweird.f32 %v6413_v49  ;;  %v8351_v36 = vld [vmem:[%s6917_s13 + $0x78] sm:$0xff]  ;;  %v8362_v0 = vld [vmem:[%s6917_s13 + $0x48] sm:$0xff] }
 0x983   : > { %vm2909_vm7 = vmor %vm2907_vm6, %vm2908_vm11 }
 0x984   : > { %v2903_v19 = vmul.f32 %v6413_v49, %v2902_v6  ;;  %v8299_v3 = vpop.xlane.xlu2 %3335  ;;  %v3722_v6 = vmul.f32 %v8362_v0, %v9601_v9 }
 0x986   : > { %v2904_v16 = vmul.f32 0.5, %v2903_v19  ;;  %v8367_v19 = vld [vmem:[%s6917_s13 + $0x60] sm:$0xff] }
 0x988   : > { %v2905_v55 = vsub.f32 1.5, %v2904_v16  ;;  %v9602_v16 = vld [vmem:[#allocation17_spill] sm:$0xff] }
 0x98a   : > { %v2906_v38 = vmul.f32 %v6413_v49, %v2905_v55  ;;  %v9603_v55 = vld [vmem:[#allocation18_spill] sm:$0xff] }
 0x98c   : > { %v2910_v41 = vsel %vm2909_vm7, %v6413_v49, %v2906_v38  ;;  %3452 = vperm.xlu2 %6262, %v3447_v10   ;;  %v2283_v43 = vpop.xlane.xlu2 %2282  ;;  %v3721_v49 = vmul.f32 %v8357_v29, %v9601_v9  ;;  %v3727_v38 = vmul.f32 %v8343_v26, %v9603_v55  ;;  %v3753_v10 = vrot.slane %v3723_v4, 4 }
 0x98d   : > { %v2284_v56 = vrot.slane %v2283_v43, 4  ;;  %v2919_v60 = vmul.f32 %v2910_v41, %v8233_v44  ;;  %v2920_v50 = vmul.f32 %v2910_v41, %v8240_v30  ;;  %v2917_v54 = vmul.f32 %v2910_v41, %v8204_v47 }
 0x98e   : > { %v2918_v11 = vmul.f32 %v2910_v41, %v8207_v28  ;;  %v2915_v59 = vmul.f32 %v2910_v41, %v8210_v32  ;;  %v2916_v13 = vmul.f32 %v2910_v41, %v8213_v48  ;;  %v3461_v44 = vperm.slane %v8307_v62, 3 }
 0x98f   : > { %v2285_v46 = vadd.f32 %v2284_v56, %v2283_v43  ;;  %2932 = vmatpush.msrb.mxu2 %v2919_v60  ;;  %2952 = vmatpush.msrb.mxu3 %v2920_v50  ;;  %v2913_v30 = vmul.f32 %v2910_v41, %v8192_v15  ;;  %v2914_v47 = vmul.f32 %v2910_v41, %v8195_v33  ;;  %v3454_v28 = vperm.slane %v8307_v62, 2  ;;  %v8324_v33 = vld [vmem:[%s6917_s13 + $0x30] sm:$0xff] }
 0x990   : > { %v2911_v32 = vmul.f32 %v2910_v41, %v8198_v58  ;;  %v2912_v48 = vmul.f32 %v2910_v41, %v8201_v35  ;;  %v3719_v21 = vmul.f32 %v8324_v33, %v9592_v63  ;;  %v8333_v58 = vld [vmem:[%s6917_s13 + $0x38] sm:$0xff]  ;;  %v3725_v62 = vmul.f32 %v8367_v19, %v9602_v16  ;;  %v8374_v41 = vld [vmem:[%s6917_s13 + $0x68] sm:$0xff] }
 0x991   : > { %v2286_v23 = vrot.slane %v2285_v46, 2  ;;  %2933 = vmatpush.msrb.mxu2 %v2917_v54  ;;  %2953 = vmatpush.msrb.mxu3 %v2918_v11  ;;  %v3720_v35 = vmul.f32 %v8333_v58, %v9592_v63  ;;  %v3726_v43 = vmul.f32 %v8374_v41, %v9602_v16  ;;  %v3728_v56 = vmul.f32 %v8351_v36, %v9603_v55 }
 0x992   : > { %v3729_v12 = vrot.slane %v3719_v21, 4  ;;  %v3741_v54 = vrot.slane %v3721_v49, 4  ;;  %v3747_v11 = vrot.slane %v3722_v6, 4 }
 0x993   : > { %2934 = vmatpush.msrb.mxu2 %v2915_v59  ;;  %2954 = vmatpush.msrb.mxu3 %v2916_v13  ;;  %v2287_v2 = vadd.f32 %v2286_v23, %v2285_v46  ;;  %v3735_v37 = vrot.slane %v3720_v35, 4  ;;  %v3754_v23 = vadd.f32 %v3753_v10, %v3723_v4  ;;  %v3765_v59 = vrot.slane %v3725_v62, 4 }
 0x994   : > { %3445 = vperm.xlu1 %6261, %v3440_v40   ;;  %3466 = vperm.xlu2 %6262, %v3461_v44   ;;  %v3730_v50 = vadd.f32 %v3729_v12, %v3719_v21  ;;  %v3777_v13 = vrot.slane %v3727_v38, 4  ;;  %v3771_v44 = vrot.slane %v3726_v43, 4 }
 0x995   : > { %2935 = vmatpush.msrb.mxu2 %v2913_v30  ;;  %2955 = vmatpush.msrb.mxu3 %v2914_v47  ;;  %v2288_v17 = vrot.slane %v2287_v2, 1  ;;  %v3736_v46 = vadd.f32 %v3735_v37, %v3720_v35  ;;  %v3783_v30 = vrot.slane %v3728_v56, 4 }
 0x996   : > { %3459 = vperm.xlu0 %6258, %v3454_v28   ;;  %v3731_v47 = vrot.slane %v3730_v50, 2  ;;  %v3742_v28 = vadd.f32 %v3741_v54, %v3721_v49  ;;  %v3772_v21 = vadd.f32 %v3771_v44, %v3726_v43 }
 0x997   : > { %2936 = vmatpush.msrb.mxu2 %v2911_v32  ;;  %2956 = vmatpush.msrb.mxu3 %v2912_v48  ;;  %v2289_v15 = vadd.f32 %v2288_v17, %v2287_v2  ;;  %v3737_v2 = vrot.slane %v3736_v46, 2  ;;  %v3748_v32 = vadd.f32 %v3747_v11, %v3722_v6  ;;  %v3755_v48 = vrot.slane %v3754_v23, 2 }
 0x998   : > { %6012 = vmatmul.msk.f32.vlgmr.msrb.gmra.mxu2 %vm2238_vm10, %v8108_v22  ;;  %6013 = vmatmul.msk.f32.vlgmr.msrb.gmra.mxu3 %vm2238_vm10, %v8108_v22  ;;  %v3724_v22 = vmul.f32 %v8346_v45, %v9593_v5  ;;  %v3766_v17 = vadd.f32 %v3765_v59, %v3725_v62  ;;  %v3784_v35 = vadd.f32 %v3783_v30, %v3728_v56  ;;  %v3743_v4 = vrot.slane %v3742_v28, 2 }
 0x999   : > { %6121 = vpush %v2289_v15  ;;  %v3778_v15 = vadd.f32 %v3777_v13, %v3727_v38  ;;  %v3732_v12 = vadd.f32 %v3731_v47, %v3730_v50  ;;  %v3738_v37 = vadd.f32 %v3737_v2, %v3736_v46  ;;  %v3749_v55 = vrot.slane %v3748_v32, 2 }
 0x99a   : > { %v3759_v60 = vrot.slane %v3724_v22, 4  ;;  %v3756_v10 = vadd.f32 %v3755_v48, %v3754_v23  ;;  %v3773_v5 = vrot.slane %v3772_v21, 2  ;;  %v3785_v9 = vrot.slane %v3784_v35, 2  ;;  %v3339_v23 = vpop.xlane.xlu1 %3338 }
 0x99b   : > { %v3733_v49 = vrot.slane %v3732_v12, 1  ;;  %v3739_v6 = vrot.slane %v3738_v37, 1  ;;  %v3744_v54 = vadd.f32 %v3743_v4, %v3742_v28  ;;  %v3750_v62 = vadd.f32 %v3749_v55, %v3748_v32 }
 0x99c   : > { %6265 = vset.pattern.permute.xlu2 %v9591_v52  ;;  %6264 = vset.pattern.permute.xlu1 %v9591_v52  ;;  %v3760_v40 = vadd.f32 %v3759_v60, %v3724_v22  ;;  %v3767_v22 = vrot.slane %v3766_v17, 2  ;;  %v3779_v60 = vrot.slane %v3778_v15, 2  ;;  %v3757_v38 = vrot.slane %v3756_v10, 1 }
 0x99d   : > { %v3774_v43 = vadd.f32 %v3773_v5, %v3772_v21  ;;  %v3786_v56 = vadd.f32 %v3785_v9, %v3784_v35  ;;  %v3734_v50 = vadd.f32 %v3733_v49, %v3732_v12  ;;  %v3740_v46 = vadd.f32 %v3739_v6, %v3738_v37  ;;  %v8395_v6 = vld [vmem:[#allocation6 + $0x18] sm:$0xff] }
 0x99e   : > { %3473 = vperm.xlu0 %6258, %v3468_v34   ;;  %v3761_v34 = vrot.slane %v3760_v40, 2  ;;  %v3768_v11 = vadd.f32 %v3767_v22, %v3766_v17  ;;  %v3780_v59 = vadd.f32 %v3779_v60, %v3778_v15  ;;  %v3745_v44 = vrot.slane %v3744_v54, 1 }
 0x99f   : > { %v3751_v30 = vrot.slane %v3750_v62, 1  ;;  %v3758_v47 = vadd.f32 %v3757_v38, %v3756_v10  ;;  %v3787_v63 = vrot.slane %v3786_v56, 1  ;;  %v3789_v28 = vadd.f32 %v3734_v50, %v6977_v42  ;;  %v8389_v10 = vld [vmem:[#allocation6 + $0x20] sm:$0xff] }
 0x9a0   : > { %v3762_v16 = vadd.f32 %v3761_v34, %v3760_v40  ;;  %v3769_v2 = vrot.slane %v3768_v11, 1  ;;  %v3781_v40 = vrot.slane %v3780_v59, 1  ;;  %v3775_v34 = vrot.slane %v3774_v43, 1 }
 0x9a1   : > { %v3382_v32 = vperm.slane %v3339_v23, %v9590_v8  ;;  %v3746_v17 = vadd.f32 %v3745_v44, %v3744_v54  ;;  %v3752_v15 = vadd.f32 %v3751_v30, %v3750_v62  ;;  %v3790_v5 = vadd.f32 %v3740_v46, %v6977_v42 }
 0x9a2   : > { %v3763_v13 = vrot.slane %v3762_v16, 1  ;;  %v3381_v9 = vperm.slane %v8299_v3, %v9590_v8  ;;  %v3770_v21 = vadd.f32 %v3769_v2, %v3768_v11  ;;  %v3782_v35 = vadd.f32 %v3781_v40, %v3780_v59 }
 0x9a3   : > { %v3793_v12 = vadd.f32 %v3758_v47, %v6980_v51  ;;  %v3776_v37 = vadd.f32 %v3775_v34, %v3774_v43  ;;  %v3788_v4 = vadd.f32 %v3787_v63, %v3786_v56  ;;  %v3799_v55 = vsel %vm535_vm0, %v3789_v28, -inf }
 0x9a4   : > { %v3764_v48 = vadd.f32 %v3763_v13, %v3762_v16  ;;  %v3422_v22 = vmul.f32 %v8389_v10, %v3382_v32  ;;  %v3791_v60 = vadd.f32 %v3746_v17, %v7060_v7  ;;  %v3792_v49 = vadd.f32 %v3752_v15, %v7060_v7 }
 0x9a5   : > { %v3808_v3 = vsel %vm535_vm0, %v3790_v5, -inf  ;;  %v3421_v54 = vmul.f32 %v8395_v6, %v3381_v9  ;;  %v3795_v63 = vadd.f32 %v3770_v21, %v9597_v14  ;;  %v3797_v62 = vadd.f32 %v3782_v35, %v9598_v31 }
 0x9a6   : > { %6263 = vset.pattern.permute.xlu0 %v9591_v52  ;;  %v3794_v16 = vadd.f32 %v3764_v48, %v6980_v51  ;;  %v3801_v38 = vsel %vm535_vm0, %v3793_v12, -inf  ;;  %v3796_v11 = vadd.f32 %v3776_v37, %v9597_v14  ;;  %v3798_v59 = vadd.f32 %v3788_v4, %v9598_v31 }
 0x9a7   : > { %v3802_v13 = vmax.f32 %v3799_v55, %v3801_v38  ;;  %v3435_v50 = vsel %vm755_vm15, %v3422_v22, 0.0  ;;  %v3432_v46 = vsel %vm755_vm15, %v3421_v54, 0.0  ;;  %v3800_v44 = vsel %vm535_vm0, %v3791_v60, -inf }
 0x9a8   : > { %v3810_v43 = vsel %vm535_vm0, %v3794_v16, -inf  ;;  %v3803_v30 = vsel %vm535_vm0, %v3795_v63, -inf  ;;  %v3805_v23 = vsel %vm535_vm0, %v3797_v62, -inf  ;;  %v3809_v2 = vsel %vm535_vm0, %v3792_v49, -inf }
 0x9a9   : > { %v3811_v56 = vmax.f32 %v3808_v3, %v3810_v43  ;;  %v3806_v47 = vmax.f32 %v3802_v13, %v3805_v23  ;;  %v3812_v31 = vsel %vm535_vm0, %v3796_v11, -inf  ;;  %v3814_v40 = vsel %vm535_vm0, %v3798_v59, -inf }
 0x9aa   : > { %v3804_v34 = vmax.f32 %v3800_v44, %v3803_v30  ;;  %v3813_v32 = vmax.f32 %v3809_v2, %v3812_v31 }
 0x9ab   : > { %v3815_v48 = vmax.f32 %v3811_v56, %v3814_v40 }
 0x9ac   : > { %v3807_v17 = vmax.f32 %v3806_v47, %v3804_v34 }
 0x9ad   : > { %v3816_v15 = vmax.f32 %v3815_v48, %v3813_v32 }
 0x9ae   : > { %v3817_v9 = vperm.slane %v3807_v17, 0 }
 0x9af   : > { %v3818_v21 = vperm.slane %v3816_v15, 0 }
 0x9b0   : > { %v3821_v35 = vsub.f32 %v3791_v60, %v3817_v9  ;;  %v3823_v4 = vsub.f32 %v3793_v12, %v3817_v9  ;;  %v3819_v54 = vsub.f32 %v3789_v28, %v3817_v9  ;;  %v3825_v43 = vsub.f32 %v3795_v63, %v3817_v9 }
 0x9b1   : > { %v3822_v37 = vsub.f32 %v3792_v49, %v3818_v21  ;;  %v3824_v55 = vsub.f32 %v3794_v16, %v3818_v21  ;;  %v3820_v38 = vsub.f32 %v3790_v5, %v3818_v21  ;;  %v3827_v44 = vsub.f32 %v3797_v62, %v3817_v9 }
 0x9b2   : > { %v3833_v22 = vmul.f32 1.442695, %v3821_v35  ;;  %v3837_v13 = vmul.f32 1.442695, %v3823_v4  ;;  %v3829_v56 = vmul.f32 1.442695, %v3819_v54  ;;  %v3828_v23 = vsub.f32 %v3798_v59, %v3818_v21 }
 0x9b3   : > { %v3835_v3 = vmul.f32 1.442695, %v3822_v37  ;;  %v3831_v30 = vmul.f32 1.442695, %v3820_v38  ;;  %v3841_v60 = vmul.f32 1.442695, %v3825_v43 }
 0x9b4   : > { %6414 = vpow2.f32 %v3833_v22  ;;  %v3845_v28 = vmul.f32 1.442695, %v3827_v44  ;;  %v3847_v5 = vmul.f32 1.442695, %v3828_v23 }
 0x9b5   : > { %6416 = vpow2.f32 %v3835_v3 }
 0x9b6   : > { %6418 = vpow2.f32 %v3837_v13 }
 0x9ba   : > { %v8412_v12 = vpop.eup %6414 }
 0x9bb   : > { %v8414_v16 = vpop.eup %6416  ;;  %v3859_v62 = vrot.slane %v8412_v12, 7 }
 0x9bc   : > { %v8416_v63 = vpop.eup %6418  ;;  %v3867_v59 = vrot.slane %v8414_v16, 7 }
 0x9bd   : > { %3436 = vadd.xlane.f32.xlu2 %v3435_v50  ;;  %v3839_v50 = vmul.f32 1.442695, %v3824_v55  ;;  %v3861_v2 = vrot.slane %v8416_v63, 6 }
 0x9be   : > { %3433 = vadd.xlane.f32.xlu1 %v3432_v46  ;;  %v3826_v46 = vsub.f32 %v3796_v11, %v3818_v21 }
 0x9bf   : > { %6420 = vpow2.f32 %v3839_v50 }
 0x9c0   : > { %v3843_v49 = vmul.f32 1.442695, %v3826_v46  ;;  %6422 = vpow2.f32 %v3829_v56 }
 0x9c1   : > { %6424 = vpow2.f32 %v3831_v30 }
 0x9c2   : > { %6426 = vpow2.f32 %v3841_v60 }
 0x9c3   : > { %6428 = vpow2.f32 %v3843_v49 }
 0x9c4   : > { %6430 = vpow2.f32 %v3845_v28 }
 0x9c5   : > { %v8419_v11 = vpop.eup %6420  ;;  %6432 = vpow2.f32 %v3847_v5 }
 0x9c6   : > { %v8422_v47 = vpop.eup %6422  ;;  %v3869_v48 = vrot.slane %v8419_v11, 6 }
 0x9c7   : > { %v8425_v31 = vpop.eup %6424  ;;  %v3860_v40 = vsel %vm573_vm1, %v3859_v62, %v8422_v47 }
 0x9c8   : > { %v8430_v34 = vpop.eup %6426  ;;  %v3868_v32 = vsel %vm573_vm1, %v3867_v59, %v8425_v31  ;;  %v3862_v15 = vsel %vm576_vm2, %v3861_v2, %v3860_v40 }
 0x9c9   : > { %v8434_v17 = vpop.eup %6428  ;;  %v3863_v21 = vrot.slane %v8430_v34, 5  ;;  %v3870_v35 = vsel %vm576_vm2, %v3869_v48, %v3868_v32 }
 0x9ca   : > { %v8437_v9 = vpop.eup %6430  ;;  %v3871_v4 = vrot.slane %v8434_v17, 5  ;;  %s8550_s26 = spop %6121 }
 0x9cb   : > { %v8441_v37 = vpop.eup %6432  ;;  %v3864_v55 = vsel %vm727_vm13, %v3863_v21, %v3862_v15  ;;  %v3865_v22 = vrot.slane %v8437_v9, 4  ;;  %s2299_s3 = smul.f32 %s8550_s26, %s7859_s29 }
 0x9cc   : > { %v3872_v3 = vsel %vm727_vm13, %v3871_v4, %v3870_v35  ;;  %v3873_v54 = vrot.slane %v8441_v37, 4 }
 0x9cd   : > { %v3866_v38 = vsel %vm729_vm4, %v3865_v22, %v3864_v55 }
 0x9ce   : > { %v3874_v13 = vsel %vm729_vm4, %v3873_v54, %v3872_v3  ;;  %v3877_v43 = vsel %vm1812_vm5, %v3866_v38, 0.0 }
 0x9cf   : > { %v3884_v50 = vsel %vm1812_vm5, %v3874_v13, 0.0  ;;  %v3878_v46 = vrot.slane %v3877_v43, 4 }
 0x9d0   : > { %v3885_v56 = vrot.slane %v3884_v50, 4 }
 0x9d1   : > { %v3879_v44 = vadd.f32 %v3878_v46, %v3877_v43 }
 0x9d2   : > { %v3886_v30 = vadd.f32 %v3885_v56, %v3884_v50 }
 0x9d3   : > { %v3880_v23 = vrot.slane %v3879_v44, 2 }
 0x9d4   : > { %v3887_v60 = vrot.slane %v3886_v30, 2 }
 0x9d5   : > { %v3881_v49 = vadd.f32 %v3880_v23, %v3879_v44 }
 0x9d6   : > { %v3888_v28 = vadd.f32 %v3887_v60, %v3886_v30 }
 0x9d7   : > { %v3882_v62 = vrot.slane %v3881_v49, 1 }
 0x9d8   : > { %v3889_v59 = vrot.slane %v3888_v28, 1 }
 0x9d9   : > { %v3883_v40 = vadd.f32 %v3882_v62, %v3881_v49 }
 0x9da   : > { %v3890_v48 = vadd.f32 %v3889_v59, %v3888_v28 }
 0x9db   : > { %v3891_v15 = vperm.slane %v3883_v40, 0 }
 0x9dc   : > { %v3892_v35 = vperm.slane %v3890_v48, 0 }
 0x9dd   : > { %6434 = vrcp.f32 %v3891_v15  ;;  %vm3898_vm8 = vweird.f32 %v3891_v15  ;;  %v3904_v49 = vand.u32 2147483648, %v3891_v15 }
 0x9de   : > { %6436 = vrcp.f32 %v3892_v35  ;;  %v3919_v28 = vand.u32 2147483648, %v3892_v35  ;;  %vm3913_vm11 = vweird.f32 %v3892_v35  ;;  %v3917_v62 = vand.u32 2147483647, %v3892_v35 }
 0x9df   : > { %v3905_v40 = vor.u32 1.1754944e-38, %v3904_v49 }
 0x9e0   : > { %v3920_v48 = vor.u32 1.1754944e-38, %v3919_v28  ;;  %vm3918_vm14 = vcmp.eq.f32.partialorder %v3917_v62, 8.507059e+37 }
 0x9e3   : > { %v6435_v3 = vpop.eup %6434 }
 0x9e4   : > { %v6437_v54 = vpop.eup %6436  ;;  %v3894_v13 = vmul.f32 %v6435_v3, %v3891_v15  ;;  %vm3899_vm12 = vweird.f32 %v6435_v3 }
 0x9e5   : > { %v3909_v43 = vmul.f32 %v6437_v54, %v3892_v35  ;;  %vm3914_vm3 = vweird.f32 %v6437_v54  ;;  %vm3900_vm9 = vmor %vm3898_vm8, %vm3899_vm12 }
 0x9e6   : > { %v3895_v46 = vsub.f32 1.0, %v3894_v13  ;;  %vm3915_vm6 = vmor %vm3913_vm11, %vm3914_vm3 }
 0x9e7   : > { %v3428_v2 = vpop.xlane.xlu2 %3427  ;;  %v3910_v56 = vsub.f32 1.0, %v3909_v43 }
 0x9e8   : > { %v3896_v44 = vmul.f32 %v6435_v3, %v3895_v46 }
 0x9e9   : > { %v3911_v30 = vmul.f32 %v6437_v54, %v3910_v56 }
 0x9ea   : > { %v3897_v23 = vadd.f32 %v6435_v3, %v3896_v44 }
 0x9eb   : > { %v3912_v60 = vadd.f32 %v6437_v54, %v3911_v30 }
 0x9ec   : > { %v3901_v59 = vsel %vm3900_vm9, %v6435_v3, %v3897_v23  ;;  %vm9610_vm9 = vcmask 1043456  }
 0x9ed   : > { %v3425_v5 = vpop.xlane.xlu1 %3424  ;;  %vm9611_vm11 = vmmov %vm9610_vm9 }
 0x9ef   : > { %v3453_v4 = vpop.permute.xlu2 %3452 }
 0x9f0   : > { %v3481_v22 = vadd.f32 %v3453_v4, %v3428_v2  ;;  %v3916_v2 = vsel %vm3915_vm6, %v6437_v54, %v3912_v60 }
 0x9f5   : > { %v3431_v55 = vpop.xlane.xlu0 %3430 }
 0x9f7   : > { %v3467_v4 = vpop.permute.xlu2 %3466 }
 0xa06   : > { %v3446_v32 = vpop.permute.xlu1 %3445 }
 0xa07   : > { %v3480_v21 = vadd.f32 %v3446_v32, %v3425_v5  ;;  %v3902_v5 = vand.u32 2147483647, %v3891_v15 }
 0xa08   : > { %v3460_v38 = vpop.permute.xlu0 %3459 }
 0xa09   : > { %3487 = vperm.xlu0 %6263, %v3480_v21   ;;  %v3482_v50 = vadd.f32 %v3460_v38, %v3431_v55  ;;  %vm3903_vm7 = vcmp.eq.f32.partialorder %v3902_v5, 8.507059e+37  ;;  %v3921_v21 = vsel %vm3918_vm14, %v3920_v48, %v3916_v2 }
 0xa0a   : > { %v3906_v32 = vsel %vm3903_vm7, %v3905_v40, %v3901_v59  ;;  %v8463_v35 = vmul.f32 %v8419_v11, %v3921_v21  ;;  %v8475_v44 = vmul.f32 %v8434_v17, %v3921_v21 }
 0xa0b   : > { %v8454_v55 = vmul.f32 %v8412_v12, %v3906_v32  ;;  %v8460_v15 = vmul.f32 %v8416_v63, %v3906_v32  ;;  %v3907_v43 = vmul.f32 %v8422_v47, %v3906_v32  ;;  %v3922_v12 = vmul.f32 %v8425_v31, %v3921_v21 }
 0xa0c   : > { %v3951_v11 = vrot.slane %v8463_v35, 6  ;;  %v8480_v47 = vmul.f32 %v8437_v9, %v3906_v32  ;;  %v8483_v31 = vmul.f32 %v8441_v37, %v3921_v21  ;;  %v3953_v49 = vrot.slane %v8475_v44, 5 }
 0xa0d   : > { %v3941_v3 = vrot.slane %v8454_v55, 7  ;;  %v3943_v63 = vrot.slane %v8460_v15, 6 }
 0xa0e   : > { %v3947_v9 = vrot.slane %v8480_v47, 4  ;;  %v3955_v62 = vrot.slane %v8483_v31, 4 }
 0xa0f   : > { %v3942_v30 = vsel %vm573_vm1, %v3941_v3, %v3907_v43  ;;  %v6550_v3 = vld [vmem:[%s6917_s13 + $0x28] sm:$0xff] }
 0xa10   : > { %v3474_v38 = vpop.permute.xlu0 %3473 }
 0xa11   : > { %3492 = vperm.xlu0 %6263, %v3481_v22   ;;  %v8457_v22 = vmul.f32 %v8414_v16, %v3921_v21  ;;  %v8470_v16 = vmul.f32 %v8430_v34, %v3906_v32  ;;  %v3944_v34 = vsel %vm576_vm2, %v3943_v63, %v3942_v30  ;;  %v6549_v21 = vld [vmem:[%s6917_s13 + $0x20] sm:$0xff] }
 0xa13   : > { %v3949_v54 = vrot.slane %v8457_v22, 7  ;;  %v3945_v17 = vrot.slane %v8470_v16, 5 }
 0xa15   : > { %v3950_v23 = vsel %vm573_vm1, %v3949_v54, %v3922_v12  ;;  %v3946_v28 = vsel %vm727_vm13, %v3945_v17, %v3944_v34 }
 0xa16   : > { %v3952_v60 = vsel %vm576_vm2, %v3951_v11, %v3950_v23  ;;  %v3948_v37 = vsel %vm729_vm4, %v3947_v9, %v3946_v28 }
 0xa17   : > { %v3954_v5 = vsel %vm727_vm13, %v3953_v49, %v3952_v60  ;;  %v3959_v2 = vsel %vm1812_vm5, %v3948_v37, 0.0 }
 0xa18   : > { %v3956_v59 = vsel %vm729_vm4, %v3955_v62, %v3954_v5 }
 0xa19   : > { %3497 = vperm.xlu0 %6263, %v3482_v50   ;;  %v3960_v40 = vsel %vm1812_vm5, %v3956_v59, 0.0  ;;  %v9604_v59 = vld [vmem:[#allocation22_spill] sm:$0xff] }
 0xa1a   : > { %v3961_v48 = vadd.f32 %v3960_v40, %v3959_v2 }
 0xa21   : > { %6268 = vset.pattern.permute.xlu0 %v6928_v1 }
 0xa30   : > { %v3437_v13 = vpop.xlane.xlu2 %3436 }
 0xa31   : > { %v3434_v50 = vpop.xlane.xlu1 %3433  ;;  %v3484_v46 = vadd.f32 %v3474_v38, %v3437_v13 }
 0xa32   : > { %v3483_v56 = vadd.f32 %v3467_v4, %v3434_v50 }
 0xa33   : > { %3507 = vperm.xlu2 %6265, %v3484_v46  }
 0xa34   : > { %3502 = vperm.xlu1 %6264, %v3483_v56  }
 0xa3b   : > { %6267 = vset.pattern.permute.xlu2 %v6928_v1 }
 0xa3c   : > { %6266 = vset.pattern.permute.xlu1 %v6928_v1 }
 0xa43   : > { %3962 = vadd.xlane.f32.xlu0 %v3961_v48 }
 0xa7b   : > { %v3488_v32 = vpop.permute.xlu0 %3487 }
 0xa7c   : > { %v8500_v4 = vadd.f32 %v6549_v21, %v3488_v32  ;;  %v8503_v54 = vadd.f32 %v6550_v3, %v3488_v32 }
 0xa7e   : > { %v3520_v38 = vadd.f32 %v8503_v54, %v8500_v4 }
 0xa80   : > { %3521 = vadd.xlane.f32.xlu1 %v3520_v38 }
 0xa83   : > { %v3493_v13 = vpop.permute.xlu0 %3492 }
 0xa84   : > { %v8508_v50 = vadd.f32 %v8324_v33, %v3493_v13  ;;  %v8511_v46 = vadd.f32 %v8333_v58, %v3493_v13 }
 0xa86   : > { %v3523_v63 = vadd.f32 %v8511_v46, %v8508_v50 }
 0xa88   : > { %3524 = vadd.xlane.f32.xlu2 %v3523_v63 }
 0xa8b   : > { %v3498_v11 = vpop.permute.xlu0 %3497 }
 0xa8c   : > { %v8516_v56 = vadd.f32 %v8357_v29, %v3498_v11  ;;  %v8519_v30 = vadd.f32 %v8362_v0, %v3498_v11 }
 0xa8d   : > { %v3508_v28 = vpop.permute.xlu2 %3507 }
 0xa8e   : > { %v3526_v23 = vadd.f32 %v8519_v30, %v8516_v56  ;;  %v8532_v5 = vadd.f32 %v8367_v19, %v3508_v28  ;;  %v8535_v9 = vadd.f32 %v8374_v41, %v3508_v28 }
 0xa90   : > { %3527 = vadd.xlane.f32.xlu0 %v3526_v23  ;;  %v3532_v62 = vadd.f32 %v8535_v9, %v8532_v5 }
 0xaa6   : > { %v3503_v34 = vpop.permute.xlu1 %3502 }
 0xaa7   : > { %v8524_v60 = vadd.f32 %v8338_v18, %v3503_v34  ;;  %v8527_v17 = vadd.f32 %v8346_v45, %v3503_v34 }
 0xaa9   : > { %v3529_v49 = vadd.f32 %v8527_v17, %v8524_v60 }
 0xaab   : > { %3530 = vadd.xlane.f32.xlu0 %v3529_v49 }
 0xab3   : > { %3533 = vadd.xlane.f32.xlu0 %v3532_v62 }
 0xab6   : > { %v3963_v37 = vpop.xlane.xlu0 %3962 }
 0xab7   : > { %v3964_v2 = vmul.f32 %v3963_v37, %v9604_v59 }
 0xab9   : > { %v3975_v40 = vmul.f32 %v3964_v2, %v3907_v43  ;;  %v3976_v48 = vmul.f32 %v3964_v2, %v3922_v12  ;;  %v3967_v32 = vrot.slane %v3964_v2, 2  ;;  %v3966_v21 = vrot.slane %v3964_v2, 1 }
 0xaba   : > { %v3968_v3 = vrot.slane %v3964_v2, 3  ;;  %v3969_v38 = vrot.slane %v3964_v2, 4 }
 0xabb   : > { %v3985_v13 = vperm.slane %v3975_v40, 0  ;;  %v3986_v63 = vperm.slane %v3976_v48, 0  ;;  %v3979_v11 = vmul.f32 %v3967_v32, %v8460_v15  ;;  %v3980_v23 = vmul.f32 %v3967_v32, %v8463_v35 }
 0xabc   : > { %v3977_v34 = vmul.f32 %v3966_v21, %v8454_v55  ;;  %v3978_v49 = vmul.f32 %v3966_v21, %v8457_v22  ;;  %v3981_v28 = vmul.f32 %v3968_v3, %v8470_v16  ;;  %v3982_v62 = vmul.f32 %v3968_v3, %v8475_v44 }
 0xabd   : > { %v3995_v43 = vmul.f32 %v8324_v33, %v3985_v13  ;;  %v3996_v12 = vmul.f32 %v8333_v58, %v3986_v63  ;;  %v3989_v37 = vperm.slane %v3979_v11, 0  ;;  %v3990_v2 = vperm.slane %v3980_v23, 0 }
 0xabe   : > { %v4032_v15 = vrot.slane %v3979_v11, 6  ;;  %v4040_v55 = vrot.slane %v3980_v23, 6  ;;  %v3987_v35 = vperm.slane %v3977_v34, 0  ;;  %v3988_v22 = vperm.slane %v3978_v49, 0 }
 0xabf   : > { %v4005_v32 = vadd.f32 %v3996_v12, %v3995_v43  ;;  %v3999_v16 = vmul.f32 %v8338_v18, %v3989_v37  ;;  %v4000_v44 = vmul.f32 %v8346_v45, %v3990_v2  ;;  %v4030_v21 = vrot.slane %v3977_v34, 7 }
 0xac0   : > { %v3997_v33 = vmul.f32 %v8357_v29, %v3987_v35  ;;  %v3998_v58 = vmul.f32 %v8362_v0, %v3988_v22  ;;  %v4038_v3 = vrot.slane %v3978_v49, 7  ;;  %v3983_v13 = vmul.f32 %v3969_v38, %v8480_v47 }
 0xac1   : > { %4006 = vadd.xlane.f32.xlu2 %v4005_v32  ;;  %v4011_v63 = vadd.f32 %v4000_v44, %v3999_v16  ;;  %v3984_v11 = vmul.f32 %v3969_v38, %v8483_v31  ;;  %v4031_v23 = vsel %vm573_vm1, %v4030_v21, %v3975_v40  ;;  %v4034_v43 = vrot.slane %v3981_v28, 5 }
 0xac2   : > { %v4008_v12 = vadd.f32 %v3998_v58, %v3997_v33  ;;  %v4033_v18 = vsel %vm576_vm2, %v4032_v15, %v4031_v23  ;;  %v4036_v45 = vrot.slane %v3983_v13, 4  ;;  %v4039_v34 = vsel %vm573_vm1, %v4038_v3, %v3976_v48 }
 0xac3   : > { %4012 = vadd.xlane.f32.xlu1 %v4011_v63  ;;  %v4035_v29 = vsel %vm727_vm13, %v4034_v43, %v4033_v18  ;;  %v4041_v0 = vsel %vm576_vm2, %v4040_v55, %v4039_v34  ;;  %v4042_v47 = vrot.slane %v3982_v62, 5  ;;  %v4044_v49 = vrot.slane %v3984_v11, 4 }
 0xac4   : > { %4009 = vadd.xlane.f32.xlu0 %v4008_v12  ;;  %v4037_v37 = vsel %vm729_vm4, %v4036_v45, %v4035_v29  ;;  %v3993_v31 = vperm.slane %v3983_v13, 0  ;;  %v3994_v38 = vperm.slane %v3984_v11, 0  ;;  %v3991_v40 = vperm.slane %v3981_v28, 0 }
 0xac5   : > { %v2300_v2 = vstv %s2299_s3  ;;  %v4043_v35 = vsel %vm727_vm13, %v4042_v47, %v4041_v0  ;;  %v4048_v15 = vsel %vm1812_vm5, %v4037_v37, 0.0  ;;  %v3992_v22 = vperm.slane %v3982_v62, 0 }
 0xac6   : > { %v4045_v48 = vsel %vm729_vm4, %v4044_v49, %v4043_v35  ;;  %v4003_v32 = vmul.f32 %v8343_v26, %v3993_v31  ;;  %v4004_v55 = vmul.f32 %v8351_v36, %v3994_v38  ;;  %v4001_v16 = vmul.f32 %v8367_v19, %v3991_v40  ;;  %v2958_v35 = vpop.f32.mrf.mxu3 }
 0xac7   : > { %v4049_v44 = vsel %vm1812_vm5, %v4045_v48, 0.0  ;;  %v4002_v21 = vmul.f32 %v8374_v41, %v3992_v22  ;;  %v8575_v28 = vsub.f32 %v8275_v27, %v2300_v2  ;;  %v8578_v58 = vsub.f32 %v8278_v20, %v2300_v2  ;;  %v2938_v2 = vpop.f32.mrf.mxu2 }
 0xac8   : > { %v4050_v33 = vadd.f32 %v4049_v44, %v4048_v15  ;;  %v4017_v62 = vadd.f32 %v4004_v55, %v4003_v32  ;;  %v8628_v32 = vadd.f32 %v2938_v2, %v8272_v53 }
 0xac9   : > { %9605 = vst [vmem:[#allocation24_spill] sm:$0xff] %v8578_v58  ;;  %v4014_v3 = vadd.f32 %v4002_v21, %v4001_v16  ;;  %v2303_v26 = vmul.f32 %v8575_v28, %v8575_v28  ;;  %v2304_v36 = vmul.f32 %v8578_v58, %v8578_v58 }
 0xaca   : > { %4051 = vadd.xlane.f32.xlu2 %v4050_v33 }
 0xacb   : > { %4018 = vadd.xlane.f32.xlu1 %v4017_v62  ;;  %v2305_v19 = vadd.f32 %v2304_v36, %v2303_v26 }
 0xacc   : > { %4015 = vadd.xlane.f32.xlu0 %v4014_v3 }
 0xad3   : > { %2306 = vadd.xlane.f32.xlu1 %v2305_v19 }
 0xaf3   : > { %v3522_v63 = vpop.xlane.xlu1 %3521 }
 0xafb   : > { %v3525_v13 = vpop.xlane.xlu2 %3524 }
 0xafc   : > { %v3535_v11 = vadd.f32 %v3525_v13, %v3522_v63 }
 0xb03   : > { %v3528_v41 = vpop.xlane.xlu0 %3527 }
 0xb04   : > { %v3536_v20 = vadd.f32 %v3535_v11, %v3528_v41 }
 0xb1e   : > { %v3531_v27 = vpop.xlane.xlu0 %3530 }
 0xb1f   : > { %v3537_v23 = vadd.f32 %v3536_v20, %v3531_v27 }
 0xb26   : > { %v3534_v43 = vpop.xlane.xlu0 %3533 }
 0xb27   : > { %v3538_v12 = vadd.f32 %v3537_v23, %v3534_v43 }
 0xb29   : > { %v3539_v18 = vmul.f32 %v3538_v12, %v7861_v39 }
 0xb2b   : > { %v8586_v45 = vsub.f32 %v8516_v56, %v3539_v18  ;;  %v8589_v34 = vsub.f32 %v8519_v30, %v3539_v18  ;;  %v8592_v29 = vsub.f32 %v8508_v50, %v3539_v18  ;;  %v8595_v0 = vsub.f32 %v8511_v46, %v3539_v18 }
 0xb2c   : > { %v8598_v47 = vsub.f32 %v8500_v4, %v3539_v18  ;;  %v8601_v49 = vsub.f32 %v8503_v54, %v3539_v18  ;;  %v8616_v38 = vsub.f32 %v8532_v5, %v3539_v18  ;;  %v8619_v40 = vsub.f32 %v8535_v9, %v3539_v18 }
 0xb2d   : > { %v3554_v37 = vmul.f32 %v8586_v45, %v8586_v45  ;;  %v3555_v56 = vmul.f32 %v8589_v34, %v8589_v34  ;;  %v3552_v30 = vmul.f32 %v8592_v29, %v8592_v29  ;;  %v3553_v50 = vmul.f32 %v8595_v0, %v8595_v0 }
 0xb2e   : > { %v3550_v46 = vmul.f32 %v8598_v47, %v8598_v47  ;;  %v3551_v4 = vmul.f32 %v8601_v49, %v8601_v49  ;;  %v8622_v22 = vsub.f32 %v8524_v60, %v3539_v18  ;;  %v8625_v48 = vsub.f32 %v8527_v17, %v3539_v18 }
 0xb2f   : > { %v3566_v54 = vadd.f32 %v3555_v56, %v3554_v37  ;;  %v3563_v31 = vadd.f32 %v3553_v50, %v3552_v30  ;;  %v8631_v5 = vadd.f32 %v2958_v35, %v8272_v53  ;;  %v3558_v9 = vmul.f32 %v8616_v38, %v8616_v38 }
 0xb30   : > { %v3560_v15 = vadd.f32 %v3551_v4, %v3550_v46  ;;  %v3559_v55 = vmul.f32 %v8619_v40, %v8619_v40  ;;  %v3556_v60 = vmul.f32 %v8622_v22, %v8622_v22  ;;  %v3557_v17 = vmul.f32 %v8625_v48, %v8625_v48 }
 0xb31   : > { %3567 = vadd.xlane.f32.xlu1 %v3566_v54  ;;  %3564 = vadd.xlane.f32.xlu0 %v3563_v31  ;;  %v2961_v21 = vadd.f32 %v8631_v5, %v8628_v32 }
 0xb32   : > { %3561 = vadd.xlane.f32.xlu2 %v3560_v15  ;;  %v3572_v62 = vadd.f32 %v3559_v55, %v3558_v9  ;;  %v3569_v26 = vadd.f32 %v3557_v17, %v3556_v60 }
 0xb34   : > { %v4007_v16 = vpop.xlane.xlu2 %4006 }
 0xb35   : > { %v4058_v36 = vperm.slane %v4007_v16, %v9590_v8 }
 0xb36   : > { %v4013_v44 = vpop.xlane.xlu1 %4012 }
 0xb37   : > { %v4010_v33 = vpop.xlane.xlu0 %4009  ;;  %v4098_v41 = vmul.f32 %v8290_v24, %v4058_v36  ;;  %v4060_v27 = vperm.slane %v4013_v44, %v9590_v8 }
 0xb38   : > { %v4059_v3 = vperm.slane %v4010_v33, %v9590_v8 }
 0xb39   : > { %2962 = vadd.xlane.f32.xlu1 %v2961_v21  ;;  %3573 = vadd.xlane.f32.xlu0 %v3572_v62  ;;  %v4103_v11 = vsel %vm755_vm15, %v4098_v41, 0.0  ;;  %v4100_v20 = vmul.f32 %v8295_v61, %v4060_v27 }
 0xb3a   : > { %3570 = vadd.xlane.f32.xlu2 %v3569_v26  ;;  %v4099_v19 = vmul.f32 %v8284_v25, %v4059_v3 }
 0xb3b   : > { %v4109_v12 = vsel %vm755_vm15, %v4100_v20, 0.0 }
 0xb3c   : > { %v4106_v63 = vsel %vm755_vm15, %v4099_v19, 0.0 }
 0xb3d   : > { %v4052_v18 = vpop.xlane.xlu2 %4051 }
 0xb3e   : > { %v4019_v13 = vpop.xlane.xlu1 %4018  ;;  %v4118_v24 = vmul.f32 %v8304_v57, %v4052_v18 }
 0xb3f   : > { %v4016_v57 = vpop.xlane.xlu0 %4015  ;;  %v4062_v9 = vperm.slane %v4019_v13, %v9590_v8 }
 0xb40   : > { %v4120_v50 = vperm.slane %v4118_v24, 0  ;;  %v4127_v4 = vperm.slane %v4118_v24, 1  ;;  %v4134_v61 = vperm.slane %v4118_v24, 2  ;;  %v4141_v54 = vperm.slane %v4118_v24, 3 }
 0xb41   : > { %4107 = vadd.xlane.f32.xlu0 %v4106_v63  ;;  %v4148_v31 = vperm.slane %v4118_v24, 4  ;;  %v4061_v2 = vperm.slane %v4016_v57, %v9590_v8  ;;  %v4102_v55 = vmul.f32 %v8389_v10, %v4062_v9 }
 0xb42   : > { %4104 = vadd.xlane.f32.xlu2 %v4103_v11 }
 0xb43   : > { %v4101_v35 = vmul.f32 %v8395_v6, %v4061_v2  ;;  %v4115_v17 = vsel %vm755_vm15, %v4102_v55, 0.0 }
 0xb45   : > { %v4112_v15 = vsel %vm755_vm15, %v4101_v35, 0.0 }
 0xb46   : > { %v2307_v23 = vpop.xlane.xlu1 %2306 }
 0xb47   : > { %v2308_v43 = vrot.slane %v2307_v23, 4 }
 0xb49   : > { %v2309_v37 = vadd.f32 %v2308_v43, %v2307_v23  ;;  %4110 = vadd.xlane.f32.xlu0 %v4109_v12 }
 0xb4b   : > { %v2310_v25 = vrot.slane %v2309_v37, 2 }
 0xb4d   : > { %v2311_v56 = vadd.f32 %v2310_v25, %v2309_v37 }
 0xb4f   : > { %v2312_v30 = vrot.slane %v2311_v56, 1 }
 0xb51   : > { %v2313_v46 = vadd.f32 %v2312_v30, %v2311_v56 }
 0xb52   : > { %4125 = vperm.xlu1 %6266, %v4120_v50  }
 0xb53   : > { %6123 = vpush %v2313_v46 }
 0xb5a   : > { %4132 = vperm.xlu2 %6267, %v4127_v4   ;;  %6270 = vset.pattern.permute.xlu1 %v9591_v52 }
 0xb5d   : > { %4139 = vperm.xlu0 %6268, %v4134_v61  }
 0xb62   : > { %4146 = vperm.xlu2 %6267, %v4141_v54  }
 0xb65   : > { %4153 = vperm.xlu0 %6268, %v4148_v31  }
 0xb6a   : > { %6271 = vset.pattern.permute.xlu2 %v9591_v52 }
 0xb6d   : > { %6269 = vset.pattern.permute.xlu0 %v9591_v52 }
 0xb7c   : > { %4113 = vadd.xlane.f32.xlu1 %v4112_v15 }
 0xb84   : > { %s6124_s15 = spop %6123 }
 0xb85   : > { %s2323_s16 = smul.f32 %s6124_s15, %s7859_s29 }
 0xb87   : > { %s2324_s22 = sadd.f32 1e-05, %s2323_s16 }
 0xb89   : > { %v2325_v60 = vstv %s2324_s22 }
 0xb8a   : > { %6438 = vrsqrt.f32 %v2325_v60  ;;  %vm2332_vm4 = vweird.f32 %v2325_v60 }
 0xb8b   : > { %4116 = vadd.xlane.f32.xlu2 %v4115_v17 }
 0xb90   : > { %v6439_v16 = vpop.eup %6438 }
 0xb91   : > { %v2327_v44 = vmul.f32 %v6439_v16, %v2325_v60  ;;  %vm2333_vm14 = vweird.f32 %v6439_v16 }
 0xb92   : > { %vm2334_vm5 = vmor %vm2332_vm4, %vm2333_vm14 }
 0xb93   : > { %v2328_v21 = vmul.f32 %v6439_v16, %v2327_v44 }
 0xb95   : > { %v2329_v33 = vmul.f32 0.5, %v2328_v21 }
 0xb97   : > { %v2330_v6 = vsub.f32 1.5, %v2329_v33 }
 0xb99   : > { %v2331_v62 = vmul.f32 %v6439_v16, %v2330_v6  ;;  %v8672_v6 = vld [vmem:[%s6917_s13 + $0x40] sm:$0xff] }
 0xb9b   : > { %v2335_v3 = vsel %vm2334_vm5, %v6439_v16, %v2331_v62 }
 0xb9c   : > { %6125 = vpush %v2335_v3  ;;  %v8680_v3 = vld [vmem:[%s6917_s13 + $0x50] sm:$0xff] }
 0xba4   : > { %v3568_v26 = vpop.xlane.xlu1 %3567  ;;  %v3565_v36 = vpop.xlane.xlu0 %3564 }
 0xba5   : > { %v3562_v10 = vpop.xlane.xlu2 %3561 }
 0xba6   : > { %v3575_v19 = vadd.f32 %v3565_v36, %v3562_v10  ;;  %v9606_v36 = vld [vmem:[#allocation27_spill] sm:$0xff] }
 0xba7   : > { %v4397_v10 = vmul.f32 %v8672_v6, %v9606_v36 }
 0xba8   : > { %v3576_v13 = vadd.f32 %v3575_v19, %v3568_v26 }
 0xbac   : > { %v2963_v41 = vpop.xlane.xlu1 %2962  ;;  %v3574_v23 = vpop.xlane.xlu0 %3573 }
 0xbad   : > { %v2964_v27 = vrot.slane %v2963_v41, 4  ;;  %v3571_v63 = vpop.xlane.xlu2 %3570 }
 0xbae   : > { %v3577_v11 = vadd.f32 %v3576_v13, %v3571_v63  ;;  %v8698_v13 = vld [vmem:[%s6917_s13 + $0x70] sm:$0xff]  ;;  %v9607_v63 = vld [vmem:[#allocation21_spill] sm:$0xff] }
 0xbaf   : > { %v2965_v20 = vadd.f32 %v2964_v27, %v2963_v41  ;;  %v8701_v27 = vld [vmem:[%s6917_s13 + $0x78] sm:$0xff] }
 0xbb0   : > { %v3578_v43 = vadd.f32 %v3577_v11, %v3574_v23  ;;  %v4399_v11 = vmul.f32 %v8680_v3, %v9607_v63 }
 0xbb1   : > { %v2966_v12 = vrot.slane %v2965_v20, 2 }
 0xbb2   : > { %v3579_v18 = vmul.f32 %v3578_v43, %v7861_v39  ;;  %v9609_v43 = vld [vmem:[#allocation17_spill] sm:$0xff] }
 0xbb3   : > { %v2967_v37 = vadd.f32 %v2966_v12, %v2965_v20  ;;  %v9608_v20 = vld [vmem:[#allocation16_spill] sm:$0xff]  ;;  %v4403_v12 = vmul.f32 %v8698_v13, %v9609_v43 }
 0xbb4   : > { %v3580_v25 = vadd.f32 1e-05, %v3579_v18  ;;  %v4108_v4 = vpop.xlane.xlu0 %4107  ;;  %v4404_v18 = vmul.f32 %v8701_v27, %v9609_v43 }
 0xbb5   : > { %v4105_v24 = vpop.xlane.xlu2 %4104  ;;  %v2968_v56 = vrot.slane %v2967_v37, 1 }
 0xbb6   : > { %6440 = vrsqrt.f32 %v3580_v25  ;;  %vm3587_vm3 = vweird.f32 %v3580_v25 }
 0xbb7   : > { %v2969_v30 = vadd.f32 %v2968_v56, %v2967_v37  ;;  %v8718_v37 = vld [vmem:[%s9479_s5] sm:$0xff]  ;;  %v4417_v56 = vrot.slane %v4399_v11, 4 }
 0xbb9   : > { %6127 = vpush %v2969_v30 }
 0xbbc   : > { %v6441_v50 = vpop.eup %6440  ;;  %v4111_v60 = vpop.xlane.xlu0 %4110 }
 0xbbd   : > { %v3582_v46 = vmul.f32 %v6441_v50, %v3580_v25  ;;  %v4133_v61 = vpop.permute.xlu2 %4132  ;;  %vm3588_vm12 = vweird.f32 %v6441_v50  ;;  %v4405_v25 = vrot.slane %v4397_v10, 4 }
 0xbbe   : > { %v4161_v54 = vadd.f32 %v4133_v61, %v4108_v4  ;;  %vm3589_vm8 = vmor %vm3587_vm3, %vm3588_vm12  ;;  %v4447_v61 = vrot.slane %v4404_v18, 4 }
 0xbbf   : > { %v3583_v31 = vmul.f32 %v6441_v50, %v3582_v46 }
 0xbc0   : > { %4172 = vperm.xlu1 %6270, %v4161_v54   ;;  %v4406_v54 = vadd.f32 %v4405_v25, %v4397_v10 }
 0xbc1   : > { %v3584_v57 = vmul.f32 0.5, %v3583_v31 }
 0xbc3   : > { %v3585_v2 = vsub.f32 1.5, %v3584_v57  ;;  %v4418_v57 = vadd.f32 %v4417_v56, %v4399_v11 }
 0xbc4   : > { %v4126_v35 = vpop.permute.xlu1 %4125 }
 0xbc5   : > { %v3586_v15 = vmul.f32 %v6441_v50, %v3585_v2  ;;  %v4160_v9 = vadd.f32 %v4126_v35, %v4105_v24 }
 0xbc7   : > { %v3590_v55 = vsel %vm3589_vm8, %v6441_v50, %v3586_v15  ;;  %4167 = vperm.xlu0 %6269, %v4160_v9   ;;  %v4441_v50 = vrot.slane %v4403_v12, 4 }
 0xbc8   : > { %v3599_v17 = vmul.f32 %v3590_v55, %v8616_v38  ;;  %v3600_v16 = vmul.f32 %v3590_v55, %v8619_v40  ;;  %6272 = vset.pattern.permute.xlu1 %v6928_v1  ;;  %v3597_v44 = vmul.f32 %v3590_v55, %v8622_v22  ;;  %v3598_v21 = vmul.f32 %v3590_v55, %v8625_v48  ;;  %v8675_v40 = vld [vmem:[%s6917_s13 + $0x48] sm:$0xff]  ;;  %v8683_v48 = vld [vmem:[%s6917_s13 + $0x60] sm:$0xff] }
 0xbc9   : > { %v3595_v33 = vmul.f32 %v3590_v55, %v8586_v45  ;;  %v3596_v38 = vmul.f32 %v3590_v55, %v8589_v34  ;;  %v3593_v62 = vmul.f32 %v3590_v55, %v8592_v29  ;;  %v3594_v22 = vmul.f32 %v3590_v55, %v8595_v0  ;;  %v8686_v45 = vld [vmem:[%s6917_s13 + $0x58] sm:$0xff]  ;;  %v8689_v34 = vld [vmem:[%s6917_s13 + $0x68] sm:$0xff] }
 0xbca   : > { %3612 = vmatpush.msra.mxu0 %v3599_v17  ;;  %3632 = vmatpush.msra.mxu1 %v3600_v16  ;;  %v4398_v19 = vmul.f32 %v8675_v40, %v9606_v36  ;;  %v3591_v29 = vmul.f32 %v3590_v55, %v8598_v47  ;;  %v3592_v0 = vmul.f32 %v3590_v55, %v8601_v49  ;;  %v4419_v16 = vrot.slane %v4418_v57, 2 }
 0xbcb   : > { %v4401_v23 = vmul.f32 %v8683_v48, %v9608_v20  ;;  %v4400_v47 = vmul.f32 %v8686_v45, %v9607_v63  ;;  %v4402_v49 = vmul.f32 %v8689_v34, %v9608_v20  ;;  %v4442_v35 = vadd.f32 %v4441_v50, %v4403_v12 }
 0xbcc   : > { %3613 = vmatpush.msra.mxu0 %v3597_v44  ;;  %3633 = vmatpush.msra.mxu1 %v3598_v21  ;;  %v4411_v24 = vrot.slane %v4398_v19, 4  ;;  %v4448_v55 = vadd.f32 %v4447_v61, %v4404_v18  ;;  %v4420_v10 = vadd.f32 %v4419_v16, %v4418_v57  ;;  %v4147_v16 = vpop.permute.xlu2 %4146 }
 0xbcd   : > { %v4429_v30 = vrot.slane %v4401_v23, 4  ;;  %v4423_v46 = vrot.slane %v4400_v47, 4  ;;  %v4435_v4 = vrot.slane %v4402_v49, 4  ;;  %v4443_v21 = vrot.slane %v4442_v35, 2  ;;  %s8774_s19 = spop %6125 }
 0xbce   : > { %3614 = vmatpush.msra.mxu0 %v3595_v33  ;;  %3634 = vmatpush.msra.mxu1 %v3596_v38  ;;  %v4412_v31 = vadd.f32 %v4411_v24, %v4398_v19  ;;  %v4421_v12 = vrot.slane %v4420_v10, 1 }
 0xbcf   : > { %v4140_v26 = vpop.permute.xlu0 %4139  ;;  %v4430_v2 = vadd.f32 %v4429_v30, %v4401_v23  ;;  %v4424_v15 = vadd.f32 %v4423_v46, %v4400_v47  ;;  %v4436_v9 = vadd.f32 %v4435_v4, %v4402_v49 }
 0xbd0   : > { %v4162_v41 = vadd.f32 %v4140_v26, %v4111_v60  ;;  %3615 = vmatpush.msra.mxu0 %v3593_v62  ;;  %3635 = vmatpush.msra.mxu1 %v3594_v22  ;;  %v4407_v60 = vrot.slane %v4406_v54, 2  ;;  %v4413_v17 = vrot.slane %v4412_v31, 2  ;;  %v4449_v62 = vrot.slane %v4448_v55, 2 }
 0xbd1   : > { %v4431_v44 = vrot.slane %v4430_v2, 2  ;;  %v4425_v33 = vrot.slane %v4424_v15, 2  ;;  %v4437_v38 = vrot.slane %v4436_v9, 2  ;;  %v4422_v50 = vadd.f32 %v4421_v12, %v4420_v10 }
 0xbd2   : > { %3616 = vmatpush.msra.mxu0 %v3591_v29  ;;  %3636 = vmatpush.msra.mxu1 %v3592_v0  ;;  %v4408_v22 = vadd.f32 %v4407_v60, %v4406_v54  ;;  %v4414_v26 = vadd.f32 %v4413_v17, %v4412_v31  ;;  %v4450_v11 = vadd.f32 %v4449_v62, %v4448_v55 }
 0xbd3   : > { %4177 = vperm.xlu2 %6271, %v4162_v41   ;;  %6024 = vmatmul.msk.f32.vlgmr.msra.gmra.mxu0 %vm2238_vm10, %v8718_v37  ;;  %v4432_v19 = vadd.f32 %v4431_v44, %v4430_v2  ;;  %v4444_v41 = vadd.f32 %v4443_v21, %v4442_v35  ;;  %v4426_v29 = vadd.f32 %v4425_v33, %v4424_v15 }
 0xbd4   : > { %6025 = vmatmul.msk.f32.vlgmr.msra.gmra.mxu1 %vm2238_vm10, %v8718_v37  ;;  %v4438_v0 = vadd.f32 %v4437_v38, %v4436_v9  ;;  %v4409_v23 = vrot.slane %v4408_v22, 1  ;;  %v4415_v43 = vrot.slane %v4414_v26, 1  ;;  %v4451_v24 = vrot.slane %v4450_v11, 1 }
 0xbd5   : > { %v4433_v47 = vrot.slane %v4432_v19, 1  ;;  %v4445_v49 = vrot.slane %v4444_v41, 1  ;;  %v4427_v18 = vrot.slane %v4426_v29, 1  ;;  %v4455_v35 = vadd.f32 %v4422_v50, %v7060_v7 }
 0xbd6   : > { %v4439_v25 = vrot.slane %v4438_v0, 1  ;;  %v4410_v56 = vadd.f32 %v4409_v23, %v4408_v22  ;;  %v4416_v30 = vadd.f32 %v4415_v43, %v4414_v26  ;;  %v4452_v31 = vadd.f32 %v4451_v24, %v4450_v11 }
 0xbd7   : > { %v4434_v46 = vadd.f32 %v4433_v47, %v4432_v19  ;;  %v4446_v4 = vadd.f32 %v4445_v49, %v4444_v41  ;;  %v4428_v61 = vadd.f32 %v4427_v18, %v4426_v29  ;;  %v4462_v62 = vsel %vm535_vm0, %v4455_v35, -inf  ;;  %v4154_v49 = vpop.permute.xlu0 %4153 }
 0xbd8   : > { %v4440_v54 = vadd.f32 %v4439_v25, %v4438_v0  ;;  %v4453_v57 = vadd.f32 %v4410_v56, %v6977_v42  ;;  %v4454_v2 = vadd.f32 %v4416_v30, %v6977_v42  ;;  %v4460_v17 = vadd.f32 %v4452_v31, %v9597_v14 }
 0xbd9   : > { %v4457_v15 = vadd.f32 %v4434_v46, %v6980_v51  ;;  %v4459_v9 = vadd.f32 %v4446_v4, %v9597_v14  ;;  %v4456_v55 = vadd.f32 %v4428_v61, %v7060_v7 }
 0xbda   : > { %v4458_v60 = vadd.f32 %v4440_v54, %v6980_v51  ;;  %v4461_v21 = vsel %vm535_vm0, %v4453_v57, -inf  ;;  %v4468_v38 = vsel %vm535_vm0, %v4454_v2, -inf  ;;  %v4472_v14 = vsel %vm535_vm0, %v4460_v17, -inf }
 0xbdb   : > { %6273 = vset.pattern.permute.xlu2 %v6928_v1  ;;  %v4463_v22 = vsel %vm535_vm0, %v4457_v15, -inf  ;;  %v4465_v26 = vsel %vm535_vm0, %v4459_v9, -inf  ;;  %v4469_v19 = vsel %vm535_vm0, %v4456_v55, -inf }
 0xbdc   : > { %v4464_v10 = vmax.f32 %v4461_v21, %v4463_v22  ;;  %v4470_v41 = vsel %vm535_vm0, %v4458_v60, -inf  ;;  %v4466_v0 = vmax.f32 %v4462_v62, %v4465_v26  ;;  %v4473_v11 = vmax.f32 %v4469_v19, %v4472_v14 }
 0xbdd   : > { %v4471_v29 = vmax.f32 %v4468_v38, %v4470_v41 }
 0xbde   : > { %v4467_v23 = vmax.f32 %v4464_v10, %v4466_v0 }
 0xbdf   : > { %v4474_v43 = vmax.f32 %v4471_v29, %v4473_v11 }
 0xbe0   : > { %v4475_v12 = vperm.slane %v4467_v23, 0 }
 0xbe1   : > { %v4476_v47 = vperm.slane %v4474_v43, 0 }
 0xbe2   : > { %v4479_v25 = vsub.f32 %v4455_v35, %v4475_v12  ;;  %v4481_v30 = vsub.f32 %v4457_v15, %v4475_v12  ;;  %v4477_v61 = vsub.f32 %v4453_v57, %v4475_v12 }
 0xbe3   : > { %v4480_v56 = vsub.f32 %v4456_v55, %v4476_v47  ;;  %v4482_v50 = vsub.f32 %v4458_v60, %v4476_v47  ;;  %v4478_v54 = vsub.f32 %v4454_v2, %v4476_v47  ;;  %v4484_v21 = vsub.f32 %v4460_v17, %v4476_v47 }
 0xbe4   : > { %v4489_v46 = vmul.f32 1.442695, %v4479_v25  ;;  %v4493_v31 = vmul.f32 1.442695, %v4481_v30 }
 0xbe5   : > { %v4491_v4 = vmul.f32 1.442695, %v4480_v56  ;;  %v4487_v38 = vmul.f32 1.442695, %v4478_v54  ;;  %v4499_v55 = vmul.f32 1.442695, %v4484_v21 }
 0xbe6   : > { %6442 = vpow2.f32 %v4489_v46  ;;  %v6553_v21 = vld [vmem:[%s6917_s13 + $0x58] sm:$0xff] }
 0xbe7   : > { %6444 = vpow2.f32 %v4491_v4 }
 0xbe8   : > { %6446 = vpow2.f32 %v4493_v31 }
 0xbea   : > { %s6128_s7 = spop %6127 }
 0xbeb   : > { %s2979_s26 = smul.f32 %s6128_s7, %s7859_s29 }
 0xbec   : > { %v8742_v15 = vpop.eup %6442 }
 0xbed   : > { %v8744_v60 = vpop.eup %6444  ;;  %v4509_v2 = vrot.slane %v8742_v15, 7  ;;  %v2980_v54 = vstv %s2979_s26 }
 0xbee   : > { %v8746_v57 = vpop.eup %6446  ;;  %v4515_v17 = vrot.slane %v8744_v60, 7 }
 0xbef   : > { %v4114_v44 = vpop.xlane.xlu1 %4113  ;;  %v4511_v22 = vrot.slane %v8746_v57, 6 }
 0xbf0   : > { %v4163_v33 = vadd.f32 %v4147_v16, %v4114_v44  ;;  %v4483_v16 = vsub.f32 %v4459_v9, %v4475_v12  ;;  %v4495_v44 = vmul.f32 1.442695, %v4482_v50 }
 0xbf2   : > { %4182 = vperm.xlu0 %6269, %v4163_v33   ;;  %v4485_v33 = vmul.f32 1.442695, %v4477_v61  ;;  %6448 = vpow2.f32 %v4495_v44  ;;  %v4497_v35 = vmul.f32 1.442695, %v4483_v16  ;;  %v6552_v16 = vld [vmem:[%s6917_s13 + $0x50] sm:$0xff] }
 0xbf4   : > { %6450 = vpow2.f32 %v4485_v33 }
 0xbf5   : > { %6452 = vpow2.f32 %v4487_v38 }
 0xbf6   : > { %6454 = vpow2.f32 %v4497_v35  ;;  %v8784_v35 = vsub.f32 %v8628_v32, %v2980_v54 }
 0xbf7   : > { %6456 = vpow2.f32 %v4499_v55  ;;  %v8787_v55 = vsub.f32 %v8631_v5, %v2980_v54 }
 0xbf8   : > { %v8749_v9 = vpop.eup %6448  ;;  %9612 = vst [vmem:[#allocation23_spill] sm:$0xff] %v8784_v35  ;;  %v2983_v32 = vmul.f32 %v8784_v35, %v8784_v35 }
 0xbf9   : > { %v4517_v19 = vrot.slane %v8749_v9, 6  ;;  %9613 = vst [vmem:[#allocation19_spill] sm:$0xff] %v8787_v55  ;;  %v2984_v5 = vmul.f32 %v8787_v55, %v8787_v55 }
 0xbfa   : > { %v8752_v62 = vpop.eup %6450 }
 0xbfb   : > { %v8755_v26 = vpop.eup %6452  ;;  %v4510_v10 = vsel %vm573_vm1, %v4509_v2, %v8752_v62 }
 0xbfc   : > { %v8760_v41 = vpop.eup %6454  ;;  %v4516_v14 = vsel %vm573_vm1, %v4515_v17, %v8755_v26  ;;  %v4512_v0 = vsel %vm576_vm2, %v4511_v22, %v4510_v10  ;;  %v6554_v10 = vld [vmem:[%s6917_s13 + $0x40] sm:$0xff] }
 0xbfd   : > { %v8764_v29 = vpop.eup %6456  ;;  %v4513_v11 = vrot.slane %v8760_v41, 5  ;;  %v4518_v23 = vsel %vm576_vm2, %v4517_v19, %v4516_v14  ;;  %v6555_v14 = vld [vmem:[%s6917_s13 + $0x48] sm:$0xff] }
 0xbfe   : > { %v4117_v18 = vpop.xlane.xlu2 %4116  ;;  %v4519_v43 = vrot.slane %v8764_v29, 5 }
 0xbff   : > { %v4164_v24 = vadd.f32 %v4154_v49, %v4117_v18  ;;  %v4514_v12 = vsel %vm727_vm13, %v4513_v11, %v4512_v0 }
 0xc00   : > { %v4520_v47 = vsel %vm727_vm13, %v4519_v43, %v4518_v23  ;;  %v4523_v49 = vsel %vm9610_vm9, %v4514_v12, 0.0 }
 0xc01   : > { %4187 = vperm.xlu0 %6269, %v4164_v24   ;;  %v4530_v18 = vsel %vm9611_vm11, %v4520_v47, 0.0  ;;  %v4524_v25 = vrot.slane %v4523_v49, 4  ;;  %v2985_v47 = vadd.f32 %v2984_v5, %v2983_v32  ;;  %vm9614_vm11 = vmmov %vm9610_vm9 }
 0xc02   : > { %v4531_v24 = vrot.slane %v4530_v18, 4 }
 0xc03   : > { %v4525_v56 = vadd.f32 %v4524_v25, %v4523_v49  ;;  %v6556_v25 = vld [vmem:[%s6917_s13 + $0x30] sm:$0xff] }
 0xc04   : > { %v4532_v30 = vadd.f32 %v4531_v24, %v4530_v18 }
 0xc05   : > { %v4526_v50 = vrot.slane %v4525_v56, 2 }
 0xc06   : > { %v4533_v46 = vrot.slane %v4532_v30, 2 }
 0xc07   : > { %v4527_v4 = vadd.f32 %v4526_v50, %v4525_v56  ;;  %v6557_v56 = vld [vmem:[%s6917_s13 + $0x38] sm:$0xff] }
 0xc08   : > { %v4534_v61 = vadd.f32 %v4533_v46, %v4532_v30 }
 0xc09   : > { %6274 = vset.pattern.permute.xlu0 %v6928_v1  ;;  %v4528_v38 = vrot.slane %v4527_v4, 1 }
 0xc0a   : > { %v4535_v17 = vrot.slane %v4534_v61, 1 }
 0xc0b   : > { %v4529_v11 = vadd.f32 %v4528_v38, %v4527_v4 }
 0xc0c   : > { %v4536_v23 = vadd.f32 %v4535_v17, %v4534_v61 }
 0xc0d   : > { %v4537_v12 = vperm.slane %v4529_v11, 0 }
 0xc0e   : > { %v4538_v49 = vperm.slane %v4536_v23, 0 }
 0xc0f   : > { %6458 = vrcp.f32 %v4537_v12  ;;  %vm4544_vm14 = vweird.f32 %v4537_v12 }
 0xc10   : > { %6460 = vrcp.f32 %v4538_v49  ;;  %vm4559_vm5 = vweird.f32 %v4538_v49  ;;  %v4563_v11 = vand.u32 2147483647, %v4538_v49 }
 0xc12   : > { %vm4564_vm8 = vcmp.eq.f32.partialorder %v4563_v11, 8.507059e+37 }
 0xc15   : > { %v6459_v46 = vpop.eup %6458 }
 0xc16   : > { %v6461_v4 = vpop.eup %6460  ;;  %v4540_v61 = vmul.f32 %v6459_v46, %v4537_v12  ;;  %vm4545_vm6 = vweird.f32 %v6459_v46 }
 0xc17   : > { %v4555_v54 = vmul.f32 %v6461_v4, %v4538_v49  ;;  %vm4560_vm7 = vweird.f32 %v6461_v4  ;;  %vm4546_vm4 = vmor %vm4544_vm14, %vm4545_vm6 }
 0xc18   : > { %vm4561_vm12 = vmor %vm4559_vm5, %vm4560_vm7 }
 0xc19   : > { %vm9615_vm14 = vmmov %vm9610_vm9 }
 0xc1a   : > { %vm9616_vm5 = vmmov %vm9610_vm9 }
 0xc2d   : > { %v4178_v31 = vpop.permute.xlu2 %4177 }
 0xc2e   : > { %v8778_v44 = vadd.f32 %v6552_v16, %v4178_v31  ;;  %v8781_v33 = vadd.f32 %v6553_v21, %v4178_v31  ;;  %v4541_v31 = vsub.f32 1.0, %v4540_v61  ;;  %v4556_v16 = vsub.f32 1.0, %v4555_v54 }
 0xc30   : > { %v4206_v2 = vadd.f32 %v8781_v33, %v8778_v44  ;;  %v4542_v21 = vmul.f32 %v6459_v46, %v4541_v31  ;;  %v4557_v38 = vmul.f32 %v6461_v4, %v4556_v16 }
 0xc32   : > { %v4173_v22 = vpop.permute.xlu1 %4172  ;;  %4207 = vadd.xlane.f32.xlu2 %v4206_v2  ;;  %v4543_v2 = vadd.f32 %v6459_v46, %v4542_v21  ;;  %v4558_v17 = vadd.f32 %v6461_v4, %v4557_v38  ;;  %v6558_v21 = vld [vmem:[%s6917_s13 + $0x60] sm:$0xff] }
 0xc33   : > { %v8792_v19 = vadd.f32 %v6554_v10, %v4173_v22  ;;  %v8795_v0 = vadd.f32 %v6555_v14, %v4173_v22  ;;  %v4550_v22 = vand.u32 2147483648, %v4537_v12  ;;  %v4565_v10 = vand.u32 2147483648, %v4538_v49 }
 0xc34   : > { %v4548_v14 = vand.u32 2147483647, %v4537_v12  ;;  %v4547_v32 = vsel %vm4546_vm4, %v6459_v46, %v4543_v2  ;;  %v4562_v5 = vsel %vm4561_vm12, %v6461_v4, %v4558_v17 }
 0xc35   : > { %v4203_v43 = vadd.f32 %v8795_v0, %v8792_v19  ;;  %v4551_v23 = vor.u32 1.1754944e-38, %v4550_v22 }
 0xc36   : > { %vm4549_vm3 = vcmp.eq.f32.partialorder %v4548_v14, 8.507059e+37 }
 0xc37   : > { %4204 = vadd.xlane.f32.xlu0 %v4203_v43  ;;  %v4566_v43 = vor.u32 1.1754944e-38, %v4565_v10 }
 0xc39   : > { %v4168_v18 = vpop.permute.xlu0 %4167 }
 0xc3a   : > { %v8804_v24 = vadd.f32 %v6556_v25, %v4168_v18  ;;  %v8807_v30 = vadd.f32 %v6557_v56, %v4168_v18  ;;  %2986 = vadd.xlane.f32.xlu2 %v2985_v47  ;;  %v4552_v47 = vsel %vm4549_vm3, %v4551_v23, %v4547_v32  ;;  %v4567_v18 = vsel %vm4564_vm8, %v4566_v43, %v4562_v5  ;;  %v6560_v43 = vld [vmem:[%s6917_s13 + $0x70] sm:$0xff] }
 0xc3b   : > { %v4569_v25 = vmul.f32 %v8742_v15, %v4552_v47  ;;  %v8813_v56 = vmul.f32 %v8744_v60, %v4567_v18  ;;  %v8816_v12 = vmul.f32 %v8746_v57, %v4552_v47  ;;  %v8819_v49 = vmul.f32 %v8749_v9, %v4567_v18 }
 0xc3c   : > { %v4200_v50 = vadd.f32 %v8807_v30, %v8804_v24  ;;  %v4553_v4 = vmul.f32 %v8752_v62, %v4552_v47  ;;  %v4568_v61 = vmul.f32 %v8755_v26, %v4567_v18  ;;  %v8827_v60 = vmul.f32 %v8760_v41, %v4552_v47  ;;  %v6559_v62 = vld [vmem:[%s6917_s13 + $0x68] sm:$0xff] }
 0xc3d   : > { %v4589_v46 = vrot.slane %v8813_v56, 7  ;;  %v4585_v54 = vrot.slane %v8816_v12, 6  ;;  %v4591_v15 = vrot.slane %v8819_v49, 6  ;;  %v8830_v57 = vmul.f32 %v8764_v29, %v4567_v18  ;;  %v6561_v18 = vld [vmem:[%s6917_s13 + $0x78] sm:$0xff] }
 0xc3e   : > { %4201 = vadd.xlane.f32.xlu1 %v4200_v50  ;;  %v4583_v50 = vrot.slane %v4569_v25, 7  ;;  %v4587_v17 = vrot.slane %v8827_v60, 5 }
 0xc3f   : > { %v4590_v31 = vsel %vm573_vm1, %v4589_v46, %v4568_v61  ;;  %v4593_v22 = vrot.slane %v8830_v57, 5 }
 0xc40   : > { %v4584_v9 = vsel %vm573_vm1, %v4583_v50, %v4553_v4  ;;  %v4592_v41 = vsel %vm576_vm2, %v4591_v15, %v4590_v31 }
 0xc41   : > { %v4586_v2 = vsel %vm576_vm2, %v4585_v54, %v4584_v9  ;;  %v4594_v14 = vsel %vm727_vm13, %v4593_v22, %v4592_v41 }
 0xc42   : > { %v4588_v10 = vsel %vm727_vm13, %v4587_v17, %v4586_v2  ;;  %v4598_v32 = vsel %vm9614_vm11, %v4594_v14, 0.0 }
 0xc43   : > { %v4597_v11 = vsel %vm9610_vm9, %v4588_v10, 0.0 }
 0xc44   : > { %v4599_v5 = vadd.f32 %v4598_v32, %v4597_v11 }
 0xc64   : > { %v4183_v16 = vpop.permute.xlu0 %4182 }
 0xc65   : > { %v8835_v38 = vadd.f32 %v6558_v21, %v4183_v16  ;;  %v8838_v26 = vadd.f32 %v6559_v62, %v4183_v16 }
 0xc67   : > { %v4209_v29 = vadd.f32 %v8838_v26, %v8835_v38 }
 0xc69   : > { %4210 = vadd.xlane.f32.xlu1 %v4209_v29 }
 0xc71   : > { %4600 = vadd.xlane.f32.xlu1 %v4599_v5 }
 0xc73   : > { %v4188_v23 = vpop.permute.xlu0 %4187 }
 0xc74   : > { %v4198_v47 = vadd.f32 %v6560_v43, %v4188_v23  ;;  %v4199_v50 = vadd.f32 %v6561_v18, %v4188_v23 }
 0xc76   : > { %v4212_v46 = vadd.f32 %v4199_v50, %v4198_v47 }
 0xc78   : > { %4213 = vadd.xlane.f32.xlu0 %v4212_v46 }
 0xca5   : > { %v4208_v54 = vpop.xlane.xlu2 %4207 }
 0xcaa   : > { %v4205_v17 = vpop.xlane.xlu0 %4204 }
 0xcad   : > { %v2987_v15 = vpop.xlane.xlu2 %2986 }
 0xcae   : > { %v2988_v9 = vrot.slane %v2987_v15, 4 }
 0xcb0   : > { %v2989_v31 = vadd.f32 %v2988_v9, %v2987_v15 }
 0xcb1   : > { %v4202_v41 = vpop.xlane.xlu1 %4201 }
 0xcb2   : > { %v2990_v16 = vrot.slane %v2989_v31, 2  ;;  %v4215_v22 = vadd.f32 %v4205_v17, %v4202_v41 }
 0xcb4   : > { %v2991_v21 = vadd.f32 %v2990_v16, %v2989_v31  ;;  %v4216_v32 = vadd.f32 %v4215_v22, %v4208_v54 }
 0xcb6   : > { %v2992_v62 = vrot.slane %v2991_v21, 1 }
 0xcb8   : > { %v2993_v2 = vadd.f32 %v2992_v62, %v2991_v21 }
 0xcba   : > { %6129 = vpush %v2993_v2 }
 0xcdc   : > { %v4211_v29 = vpop.xlane.xlu1 %4210 }
 0xcdd   : > { %v4217_v5 = vadd.f32 %v4216_v32, %v4211_v29 }
 0xce4   : > { %v4601_v10 = vpop.xlane.xlu1 %4600 }
 0xce5   : > { %v4602_v14 = vmul.f32 %v4601_v10, %v9604_v59 }
 0xce7   : > { %v4604_v11 = vrot.slane %v4602_v14, 1  ;;  %v4605_v23 = vrot.slane %v4602_v14, 2  ;;  %v4611_v46 = vmul.f32 %v4602_v14, %v4553_v4  ;;  %v4612_v15 = vmul.f32 %v4602_v14, %v4568_v61 }
 0xce8   : > { %v4606_v31 = vrot.slane %v4602_v14, 3 }
 0xce9   : > { %v8853_v43 = vmul.f32 %v4604_v11, %v4569_v25  ;;  %v8857_v16 = vmul.f32 %v4604_v11, %v8813_v56  ;;  %v8861_v62 = vmul.f32 %v4605_v23, %v8816_v12  ;;  %v4619_v54 = vperm.slane %v4611_v46, 0 }
 0xcea   : > { %v4620_v2 = vperm.slane %v4612_v15, 0  ;;  %v8864_v25 = vmul.f32 %v4605_v23, %v8819_v49  ;;  %v4617_v35 = vmul.f32 %v4606_v31, %v8827_v60 }
 0xceb   : > { %v4214_v18 = vpop.xlane.xlu0 %4213  ;;  %s6130_s3 = spop %6129  ;;  %v4655_v4 = vrot.slane %v8853_v43, 7  ;;  %v4657_v22 = vrot.slane %v8861_v62, 6  ;;  %v4661_v10 = vrot.slane %v8857_v16, 7 }
 0xcec   : > { %v4218_v9 = vadd.f32 %v4217_v5, %v4214_v18  ;;  %s3003_s15 = smul.f32 %s6130_s3, %s7859_s29 }
 0xced   : > { %v4656_v5 = vsel %vm573_vm1, %v4655_v4, %v4611_v46  ;;  %v4663_v46 = vrot.slane %v8864_v25, 6 }
 0xcee   : > { %v4219_v21 = vmul.f32 %v4218_v9, %v7861_v39  ;;  %s3004_s16 = sadd.f32 1e-05, %s3003_s15 }
 0xcf0   : > { %v8867_v61 = vstv %s3004_s16  ;;  %v8870_v41 = vsub.f32 %v8778_v44, %v4219_v21  ;;  %v8873_v56 = vsub.f32 %v8781_v33, %v4219_v21  ;;  %v8876_v29 = vsub.f32 %v8792_v19, %v4219_v21 }
 0xcf1   : > { %6462 = vrsqrt.f32 %v8867_v61  ;;  %v8880_v12 = vsub.f32 %v8795_v0, %v4219_v21  ;;  %v8883_v49 = vsub.f32 %v8804_v24, %v4219_v21  ;;  %v8886_v17 = vsub.f32 %v8807_v30, %v4219_v21 }
 0xcf2   : > { %v4234_v44 = vmul.f32 %v8870_v41, %v8870_v41  ;;  %v4235_v33 = vmul.f32 %v8873_v56, %v8873_v56  ;;  %v4232_v19 = vmul.f32 %v8876_v29, %v8876_v29  ;;  %v8902_v11 = vsub.f32 %v4198_v47, %v4219_v21 }
 0xcf3   : > { %v4233_v0 = vmul.f32 %v8880_v12, %v8880_v12  ;;  %v4230_v24 = vmul.f32 %v8883_v49, %v8883_v49  ;;  %v4231_v30 = vmul.f32 %v8886_v17, %v8886_v17  ;;  %v8904_v32 = vsub.f32 %v4199_v50, %v4219_v21 }
 0xcf4   : > { %v4246_v14 = vadd.f32 %v4235_v33, %v4234_v44  ;;  %v8908_v9 = vsub.f32 %v8835_v38, %v4219_v21  ;;  %v8911_v55 = vsub.f32 %v8838_v26, %v4219_v21  ;;  %v4627_v47 = vmul.f32 %v8672_v6, %v4619_v54 }
 0xcf5   : > { %v4243_v23 = vadd.f32 %v4233_v0, %v4232_v19  ;;  %v4240_v18 = vadd.f32 %v4231_v30, %v4230_v24  ;;  %v4618_v50 = vmul.f32 %v4606_v31, %v8830_v57  ;;  %v4628_v38 = vmul.f32 %v8675_v40, %v4620_v2 }
 0xcf6   : > { %4247 = vadd.xlane.f32.xlu2 %v4246_v14  ;;  %v4658_v44 = vsel %vm576_vm2, %v4657_v22, %v4656_v5  ;;  %v4662_v26 = vsel %vm573_vm1, %v4661_v10, %v4612_v15  ;;  %v4238_v60 = vmul.f32 %v8902_v11, %v8902_v11  ;;  %v4239_v21 = vmul.f32 %v8904_v32, %v8904_v32 }
 0xcf7   : > { %v6463_v58 = vpop.eup %6462  ;;  %4244 = vadd.xlane.f32.xlu1 %v4243_v23  ;;  %4241 = vadd.xlane.f32.xlu0 %v4240_v18  ;;  %v4236_v6 = vmul.f32 %v8908_v9, %v8908_v9  ;;  %v4237_v57 = vmul.f32 %v8911_v55, %v8911_v55  ;;  %v4659_v54 = vrot.slane %v4617_v35, 5  ;;  %v4664_v40 = vsel %vm576_vm2, %v4663_v46, %v4662_v26 }
 0xcf8   : > { %v3007_v4 = vmul.f32 %v6463_v58, %v8867_v61  ;;  %v4665_v2 = vrot.slane %v4618_v50, 5  ;;  %v4623_v33 = vperm.slane %v8861_v62, 0  ;;  %v4635_v19 = vadd.f32 %v4628_v38, %v4627_v47 }
 0xcf9   : > { %v4660_v22 = vsel %vm727_vm13, %v4659_v54, %v4658_v44  ;;  %v4624_v0 = vperm.slane %v8864_v25, 0  ;;  %v4252_v24 = vadd.f32 %v4239_v21, %v4238_v60  ;;  %v4249_v30 = vadd.f32 %v4237_v57, %v4236_v6  ;;  %v3618_v21 = vpop.f32.mrf.mxu0  ;;  %v3638_v6 = vpop.f32.mrf.mxu1 }
 0xcfa   : > { %v3008_v31 = vmul.f32 %v6463_v58, %v3007_v4  ;;  %v4621_v10 = vperm.slane %v8853_v43, 0  ;;  %v4622_v14 = vperm.slane %v8857_v16, 0  ;;  %vm3013_vm6 = vweird.f32 %v6463_v58 }
 0xcfb   : > { %v4666_v23 = vsel %vm727_vm13, %v4665_v2, %v4664_v40  ;;  %vm3012_vm7 = vweird.f32 %v8867_v61  ;;  %v4669_v18 = vsel %vm9615_vm14, %v4660_v22, 0.0  ;;  %v4631_v25 = vmul.f32 %v8683_v48, %v4623_v33 }
 0xcfc   : > { %v3009_v15 = vmul.f32 0.5, %v3008_v31  ;;  %vm3014_vm4 = vmor %vm3012_vm7, %vm3013_vm6  ;;  %v4670_v47 = vsel %vm9616_vm5, %v4666_v23, 0.0  ;;  %v4632_v43 = vmul.f32 %v8689_v34, %v4624_v0  ;;  %v4629_v16 = vmul.f32 %v8680_v3, %v4621_v10 }
 0xcfd   : > { %v4630_v46 = vmul.f32 %v8686_v45, %v4622_v14  ;;  %v4671_v38 = vadd.f32 %v4670_v47, %v4669_v18  ;;  %v4625_v60 = vperm.slane %v4617_v35, 0  ;;  %v4626_v61 = vperm.slane %v4618_v50, 0  ;;  %v8954_v14 = vld [vmem:[#allocation6] sm:$0xff] }
 0xcfe   : > { %v3010_v5 = vsub.f32 1.5, %v3009_v15  ;;  %4636 = vadd.xlane.f32.xlu2 %v4635_v19  ;;  %v4641_v44 = vadd.f32 %v4632_v43, %v4631_v25  ;;  %v8944_v57 = vadd.f32 %v3618_v21, %v8272_v53  ;;  %v8947_v31 = vadd.f32 %v3638_v6, %v8272_v53 }
 0xcff   : > { %4253 = vadd.xlane.f32.xlu1 %v4252_v24  ;;  %4250 = vadd.xlane.f32.xlu0 %v4249_v30  ;;  %v4638_v26 = vadd.f32 %v4630_v46, %v4629_v16  ;;  %v4633_v54 = vmul.f32 %v8698_v13, %v4625_v60  ;;  %v8962_v46 = vld [vmem:[%s9478_s4] sm:$0x1f] }
 0xd00   : > { %v3011_v62 = vmul.f32 %v6463_v58, %v3010_v5  ;;  %v3641_v40 = vadd.f32 %v8947_v31, %v8944_v57 }
 0xd02   : > { %v3015_v4 = vsel %vm3014_vm4, %v6463_v58, %v3011_v62  ;;  %v4634_v58 = vmul.f32 %v8701_v27, %v4626_v61 }
 0xd03   : > { %6131 = vpush %v3015_v4 }
 0xd04   : > { %v4644_v35 = vadd.f32 %v4634_v58, %v4633_v54  ;;  %v8971_v58 = vld [vmem:[#allocation6 + $0x10] sm:$0xff] }
 0xd06   : > { %4672 = vadd.xlane.f32.xlu2 %v4671_v38 }
 0xd07   : > { %4642 = vadd.xlane.f32.xlu1 %v4641_v44  ;;  %4639 = vadd.xlane.f32.xlu0 %v4638_v26  ;;  %v8966_v26 = vld [vmem:[#allocation6 + $0x8] sm:$0xff] }
 0xd0f   : > { %3642 = vadd.xlane.f32.xlu1 %v3641_v40  ;;  %4645 = vadd.xlane.f32.xlu0 %v4644_v35 }
 0xd34   : > { %s9073_s25 = spop %6131 }
 0xd69   : > { %v4248_v50 = vpop.xlane.xlu2 %4247 }
 0xd6a   : > { %v4245_v2 = vpop.xlane.xlu1 %4244  ;;  %v4242_v33 = vpop.xlane.xlu0 %4241 }
 0xd6b   : > { %v4255_v15 = vadd.f32 %v4245_v2, %v4242_v33 }
 0xd6d   : > { %v4256_v19 = vadd.f32 %v4255_v15, %v4248_v50 }
 0xd71   : > { %v4637_v22 = vpop.xlane.xlu2 %4636 }
 0xd72   : > { %v4254_v0 = vpop.xlane.xlu1 %4253  ;;  %v4251_v24 = vpop.xlane.xlu0 %4250  ;;  %v4678_v30 = vperm.slane %v4637_v22, %v9590_v8 }
 0xd73   : > { %v4257_v10 = vadd.f32 %v4256_v19, %v4251_v24 }
 0xd74   : > { %v4710_v5 = vmul.f32 %v8954_v14, %v4678_v30 }
 0xd75   : > { %v4258_v23 = vadd.f32 %v4257_v10, %v4254_v0 }
 0xd76   : > { %v4714_v62 = vsel %vm755_vm15, %v4710_v5, 0.0 }
 0xd77   : > { %v4259_v18 = vmul.f32 %v4258_v23, %v7861_v39  ;;  %4715 = vadd.xlane.f32.xlu2 %v4714_v62 }
 0xd79   : > { %v4260_v25 = vadd.f32 1e-05, %v4259_v18  ;;  %v4673_v47 = vpop.xlane.xlu2 %4672 }
 0xd7a   : > { %v4643_v43 = vpop.xlane.xlu1 %4642  ;;  %v4640_v16 = vpop.xlane.xlu0 %4639  ;;  %v4726_v4 = vmul.f32 %v8962_v46, %v4673_v47 }
 0xd7b   : > { %6464 = vrsqrt.f32 %v4260_v25  ;;  %v4679_v38 = vperm.slane %v4640_v16, %v9590_v8  ;;  %v4680_v60 = vperm.slane %v4643_v43, %v9590_v8  ;;  %vm4267_vm12 = vweird.f32 %v4260_v25 }
 0xd7c   : > { %v4728_v44 = vperm.slane %v4726_v4, 0  ;;  %v4735_v18 = vperm.slane %v4726_v4, 1 }
 0xd7d   : > { %v4711_v39 = vmul.f32 %v8966_v26, %v4679_v38  ;;  %v4712_v40 = vmul.f32 %v8971_v58, %v4680_v60 }
 0xd7e   : > { %4733 = vperm.xlu1 %6272, %v4728_v44   ;;  %v4988_v44 = vmul.f32 %v8680_v3, %v9606_v36 }
 0xd7f   : > { %v4717_v61 = vsel %vm755_vm15, %v4711_v39, 0.0  ;;  %v4720_v19 = vsel %vm755_vm15, %v4712_v40, 0.0  ;;  %v4993_v39 = vmul.f32 %v8701_v27, %v9608_v20 }
 0xd80   : > { %4718 = vadd.xlane.f32.xlu0 %v4717_v61  ;;  %v4994_v60 = vrot.slane %v4988_v44, 4 }
 0xd81   : > { %v6465_v21 = vpop.eup %6464  ;;  %v5024_v40 = vrot.slane %v4993_v39, 4 }
 0xd82   : > { %v4262_v6 = vmul.f32 %v6465_v21, %v4260_v25  ;;  %v3643_v54 = vpop.xlane.xlu1 %3642  ;;  %vm4268_vm13 = vweird.f32 %v6465_v21  ;;  %v4995_v3 = vadd.f32 %v4994_v60, %v4988_v44 }
 0xd83   : > { %v3644_v35 = vrot.slane %v3643_v54, 4  ;;  %vm4269_vm3 = vmor %vm4267_vm12, %vm4268_vm13 }
 0xd84   : > { %v4263_v50 = vmul.f32 %v6465_v21, %v4262_v6 }
 0xd85   : > { %v3645_v2 = vadd.f32 %v3644_v35, %v3643_v54  ;;  %v4991_v54 = vmul.f32 %v8689_v34, %v9607_v63 }
 0xd86   : > { %v4264_v33 = vmul.f32 0.5, %v4263_v50 }
 0xd87   : > { %v3646_v15 = vrot.slane %v3645_v2, 2 }
 0xd88   : > { %v4265_v22 = vsub.f32 1.5, %v4264_v33  ;;  %4721 = vadd.xlane.f32.xlu0 %v4720_v19 }
 0xd89   : > { %v3647_v0 = vadd.f32 %v3646_v15, %v3645_v2  ;;  %v5025_v2 = vadd.f32 %v5024_v40, %v4993_v39 }
 0xd8a   : > { %v4266_v24 = vmul.f32 %v6465_v21, %v4265_v22 }
 0xd8b   : > { %v3648_v30 = vrot.slane %v3647_v0, 1  ;;  %v5026_v19 = vrot.slane %v5025_v2, 2 }
 0xd8c   : > { %v4270_v10 = vsel %vm4269_vm3, %v6465_v21, %v4266_v24  ;;  %v4990_v21 = vmul.f32 %v8683_v48, %v9607_v63 }
 0xd8d   : > { %v3649_v5 = vadd.f32 %v3648_v30, %v3647_v0  ;;  %v4279_v23 = vmul.f32 %v4270_v10, %v8902_v11  ;;  %v4280_v62 = vmul.f32 %v4270_v10, %v8904_v32  ;;  %v4277_v47 = vmul.f32 %v4270_v10, %v8908_v9 }
 0xd8e   : > { %v4278_v43 = vmul.f32 %v4270_v10, %v8911_v55  ;;  %v4275_v25 = vmul.f32 %v4270_v10, %v8870_v41  ;;  %v4276_v16 = vmul.f32 %v4270_v10, %v8873_v56  ;;  %v4273_v11 = vmul.f32 %v4270_v10, %v8876_v29  ;;  %v4646_v56 = vpop.xlane.xlu0 %4645 }
 0xd8f   : > { %6133 = vpush %v3649_v5  ;;  %4292 = vmatpush.msra.mxu2 %v4279_v23  ;;  %4312 = vmatpush.msra.mxu3 %v4280_v62  ;;  %v4274_v32 = vmul.f32 %v4270_v10, %v8880_v12  ;;  %v4271_v38 = vmul.f32 %v4270_v10, %v8883_v49  ;;  %v4749_v55 = vperm.slane %v4726_v4, 3  ;;  %v4742_v41 = vperm.slane %v4726_v4, 2  ;;  %v6566_v12 = vld [vmem:[#allocation6 + $0x18] sm:$0xff] }
 0xd90   : > { %4740 = vperm.xlu2 %6273, %v4735_v18   ;;  %v4272_v9 = vmul.f32 %v4270_v10, %v8886_v17  ;;  %v4681_v29 = vperm.slane %v4646_v56, %v9590_v8  ;;  %v4992_v4 = vmul.f32 %v8698_v13, %v9608_v20  ;;  %v5006_v50 = vrot.slane %v4990_v21, 4 }
 0xd91   : > { %4293 = vmatpush.msra.mxu2 %v4277_v47  ;;  %4313 = vmatpush.msra.mxu3 %v4278_v43  ;;  %v4996_v13 = vrot.slane %v4995_v3, 2  ;;  %v5027_v34 = vadd.f32 %v5026_v19, %v5025_v2 }
 0xd92   : > { %v4713_v49 = vmul.f32 %v6566_v12, %v4681_v29  ;;  %v5018_v6 = vrot.slane %v4992_v4, 4  ;;  %v5007_v15 = vadd.f32 %v5006_v50, %v4990_v21 }
 0xd93   : > { %4294 = vmatpush.msra.mxu2 %v4275_v25  ;;  %4314 = vmatpush.msra.mxu3 %v4276_v16  ;;  %v4997_v0 = vadd.f32 %v4996_v13, %v4995_v3  ;;  %v5028_v25 = vrot.slane %v5027_v34, 1 }
 0xd94   : > { %v4723_v17 = vsel %vm755_vm15, %v4713_v49, 0.0  ;;  %v5008_v24 = vrot.slane %v5007_v15, 2 }
 0xd95   : > { %4295 = vmatpush.msra.mxu2 %v4273_v11  ;;  %4315 = vmatpush.msra.mxu3 %v4274_v32  ;;  %v4998_v5 = vrot.slane %v4997_v0, 1  ;;  %v5029_v56 = vadd.f32 %v5028_v25, %v5027_v34 }
 0xd96   : > { %v5009_v18 = vadd.f32 %v5008_v24, %v5007_v15 }
 0xd97   : > { %4296 = vmatpush.msra.mxu2 %v4271_v38  ;;  %4316 = vmatpush.msra.mxu3 %v4272_v9  ;;  %v4999_v16 = vadd.f32 %v4998_v5, %v4997_v0 }
 0xd98   : > { %6036 = vmatmul.msk.f32.vlgmr.msra.gmra.mxu2 %vm2238_vm10, %v8718_v37  ;;  %6037 = vmatmul.msk.f32.vlgmr.msra.gmra.mxu3 %vm2238_vm10, %v8718_v37  ;;  %v4989_v37 = vmul.f32 %v8686_v45, %v9606_v36  ;;  %v5019_v45 = vadd.f32 %v5018_v6, %v4992_v4  ;;  %v5012_v36 = vrot.slane %v4991_v54, 4  ;;  %v5010_v9 = vrot.slane %v5009_v18, 1 }
 0xd99   : > { %4754 = vperm.xlu2 %6273, %v4749_v55   ;;  %v5030_v29 = vadd.f32 %v4999_v16, %v6977_v42  ;;  %v5035_v4 = vadd.f32 %v5029_v56, %v6980_v51 }
 0xd9a   : > { %v5000_v61 = vrot.slane %v4989_v37, 4  ;;  %v5020_v27 = vrot.slane %v5019_v45, 2  ;;  %v5013_v20 = vadd.f32 %v5012_v36, %v4991_v54 }
 0xd9b   : > { %v5036_v39 = vsel %vm535_vm0, %v5030_v29, -inf }
 0xd9c   : > { %4747 = vperm.xlu0 %6274, %v4742_v41   ;;  %v5001_v35 = vadd.f32 %v5000_v61, %v4989_v37  ;;  %v5021_v30 = vadd.f32 %v5020_v27, %v5019_v45  ;;  %v5014_v10 = vrot.slane %v5013_v20, 2 }
 0xd9e   : > { %v5002_v33 = vrot.slane %v5001_v35, 2  ;;  %v5022_v47 = vrot.slane %v5021_v30, 1  ;;  %v5015_v43 = vadd.f32 %v5014_v10, %v5013_v20 }
 0xda0   : > { %v5003_v48 = vadd.f32 %v5002_v33, %v5001_v35  ;;  %v5023_v55 = vadd.f32 %v5022_v47, %v5021_v30  ;;  %v5016_v41 = vrot.slane %v5015_v43, 1 }
 0xda1   : > { %6275 = vset.pattern.permute.xlu2 %v9591_v52 }
 0xda2   : > { %v5004_v62 = vrot.slane %v5003_v48, 1  ;;  %v5034_v44 = vadd.f32 %v5023_v55, %v6980_v51  ;;  %v5017_v37 = vadd.f32 %v5016_v41, %v5015_v43 }
 0xda4   : > { %6276 = vset.pattern.permute.xlu0 %v9591_v52  ;;  %v5005_v11 = vadd.f32 %v5004_v62, %v5003_v48  ;;  %v5038_v21 = vsel %vm535_vm0, %v5034_v44, -inf  ;;  %v5033_v6 = vadd.f32 %v5017_v37, %v7060_v7 }
 0xda5   : > { %v5039_v54 = vmax.f32 %v5036_v39, %v5038_v21 }
 0xda6   : > { %v5031_v49 = vadd.f32 %v5005_v11, %v6977_v42  ;;  %v5043_v42 = vsel %vm535_vm0, %v5035_v4, -inf  ;;  %v5042_v50 = vsel %vm535_vm0, %v5033_v6, -inf }
 0xda8   : > { %4724 = vadd.xlane.f32.xlu1 %v4723_v17  ;;  %v5011_v17 = vadd.f32 %v5010_v9, %v5009_v18  ;;  %v5041_v60 = vsel %vm535_vm0, %v5031_v49, -inf }
 0xda9   : > { %v5044_v40 = vmax.f32 %v5041_v60, %v5043_v42 }
 0xdaa   : > { %v5032_v61 = vadd.f32 %v5011_v17, %v7060_v7 }
 0xdab   : > { %v5045_v51 = vmax.f32 %v5044_v40, %v5042_v50 }
 0xdac   : > { %v5037_v3 = vsel %vm535_vm0, %v5032_v61, -inf  ;;  %vm9617_vm0 = vcmask 1042432  }
 0xdad   : > { %v5040_v35 = vmax.f32 %v5039_v54, %v5037_v3  ;;  %v5047_v2 = vperm.slane %v5045_v51, 0  ;;  %vm9618_vm10 = vmmov %vm9617_vm0 }
 0xdae   : > { %vm9619_vm13 = vmmov %vm9617_vm0 }
 0xdaf   : > { %v5046_v36 = vperm.slane %v5040_v35, 0  ;;  %v5051_v33 = vsub.f32 %v5033_v6, %v5047_v2  ;;  %v5053_v19 = vsub.f32 %v5035_v4, %v5047_v2  ;;  %v5049_v48 = vsub.f32 %v5031_v49, %v5047_v2  ;;  %vm9620_vm12 = vmmov %vm9617_vm0 }
 0xdb0   : > { %vm9622_vm3 = vmmov %vm9617_vm0 }
 0xdb1   : > { %v5050_v13 = vsub.f32 %v5032_v61, %v5046_v36  ;;  %v5052_v27 = vsub.f32 %v5034_v44, %v5046_v36  ;;  %v5048_v0 = vsub.f32 %v5030_v29, %v5046_v36  ;;  %v5064_v30 = vmul.f32 1.442695, %v5053_v19  ;;  %v6567_v36 = vld [vmem:[%s6917_s13 + $0x40] sm:$0xff] }
 0xdb2   : > { %v5056_v34 = vmul.f32 1.442695, %v5049_v48 }
 0xdb3   : > { %v5058_v7 = vmul.f32 1.442695, %v5050_v13  ;;  %v5062_v24 = vmul.f32 1.442695, %v5052_v27  ;;  %v5054_v10 = vmul.f32 1.442695, %v5048_v0 }
 0xdb4   : > { %v6568_v13 = vld [vmem:[%s6917_s13 + $0x48] sm:$0xff]  ;;  %v9052_v0 = vld [vmem:[%s6917_s13 + $0x50] sm:$0xff] }
 0xdb5   : > { %6466 = vpow2.f32 %v5058_v7 }
 0xdc0   : > { %s6134_s7 = spop %6133 }
 0xdc1   : > { %s3659_s26 = smul.f32 %s6134_s7, %s7859_s29 }
 0xdea   : > { %v4716_v22 = vpop.xlane.xlu2 %4715 }
 0xdf0   : > { %v4734_v63 = vpop.permute.xlu1 %4733 }
 0xdf1   : > { %v4760_v23 = vadd.f32 %v4734_v63, %v4716_v22  ;;  %v5060_v22 = vmul.f32 1.442695, %v5051_v33  ;;  %v9017_v63 = vpop.eup %6466 }
 0xdf2   : > { %v4741_v38 = vpop.permute.xlu2 %4740  ;;  %v5072_v47 = vrot.slane %v9017_v63, 7 }
 0xdf3   : > { %4766 = vperm.xlu2 %6275, %v4760_v23   ;;  %v4719_v32 = vpop.xlane.xlu0 %4718  ;;  %6468 = vpow2.f32 %v5060_v22 }
 0xdf4   : > { %v4761_v12 = vadd.f32 %v4741_v38, %v4719_v32  ;;  %6470 = vpow2.f32 %v5062_v24  ;;  %v9058_v24 = vld [vmem:[%s6917_s13 + $0x58] sm:$0xff] }
 0xdf5   : > { %6472 = vpow2.f32 %v5064_v30 }
 0xdf6   : > { %6474 = vpow2.f32 %v5054_v10 }
 0xdf7   : > { %6476 = vpow2.f32 %v5056_v34 }
 0xdf9   : > { %v9020_v5 = vpop.eup %6468 }
 0xdfa   : > { %v9022_v23 = vpop.eup %6470  ;;  %v4755_v62 = vpop.permute.xlu2 %4754  ;;  %v5076_v16 = vrot.slane %v9020_v5, 7 }
 0xdfb   : > { %4771 = vperm.xlu2 %6275, %v4761_v12   ;;  %v4722_v45 = vpop.xlane.xlu0 %4721  ;;  %v9025_v43 = vpop.eup %6472  ;;  %v5074_v32 = vrot.slane %v9022_v23, 6 }
 0xdfc   : > { %v9028_v11 = vpop.eup %6474  ;;  %v5078_v55 = vrot.slane %v9025_v43, 6 }
 0xdfd   : > { %v9031_v38 = vpop.eup %6476  ;;  %v5073_v9 = vsel %vm573_vm1, %v5072_v47, %v9028_v11 }
 0xdfe   : > { %v5077_v41 = vsel %vm573_vm1, %v5076_v16, %v9031_v38  ;;  %v5075_v56 = vsel %vm576_vm2, %v5074_v32, %v5073_v9 }
 0xdff   : > { %v5079_v29 = vsel %vm576_vm2, %v5078_v55, %v5077_v41  ;;  %v5082_v12 = vsel %vm9617_vm0, %v5075_v56, 0.0 }
 0xe00   : > { %v5089_v49 = vsel %vm9618_vm10, %v5079_v29, 0.0  ;;  %v5083_v17 = vrot.slane %v5082_v12, 4 }
 0xe01   : > { %v5090_v44 = vrot.slane %v5089_v49, 4 }
 0xe02   : > { %v5084_v37 = vadd.f32 %v5083_v17, %v5082_v12 }
 0xe03   : > { %v5091_v4 = vadd.f32 %v5090_v44, %v5089_v49 }
 0xe04   : > { %v5085_v39 = vrot.slane %v5084_v37, 2 }
 0xe05   : > { %v5092_v60 = vrot.slane %v5091_v4, 2 }
 0xe06   : > { %v5086_v61 = vadd.f32 %v5085_v39, %v5084_v37 }
 0xe07   : > { %v5093_v21 = vadd.f32 %v5092_v60, %v5091_v4 }
 0xe08   : > { %v5087_v6 = vrot.slane %v5086_v61, 1 }
 0xe09   : > { %v5094_v54 = vrot.slane %v5093_v21, 1 }
 0xe0a   : > { %v5088_v42 = vadd.f32 %v5087_v6, %v5086_v61 }
 0xe0b   : > { %v5095_v40 = vadd.f32 %v5094_v54, %v5093_v21 }
 0xe0c   : > { %v5096_v3 = vperm.slane %v5088_v42, 0 }
 0xe0d   : > { %v5097_v35 = vperm.slane %v5095_v40, 0 }
 0xe0e   : > { %v4748_v15 = vpop.permute.xlu0 %4747  ;;  %6478 = vrcp.f32 %v5096_v3  ;;  %vm5103_vm11 = vweird.f32 %v5096_v3  ;;  %v5107_v32 = vand.u32 2147483647, %v5096_v3 }
 0xe0f   : > { %v4762_v20 = vadd.f32 %v4748_v15, %v4722_v45  ;;  %6480 = vrcp.f32 %v5097_v35  ;;  %v5124_v16 = vand.u32 2147483648, %v5097_v35  ;;  %vm5118_vm7 = vweird.f32 %v5097_v35 }
 0xe10   : > { %v5122_v9 = vand.u32 2147483647, %v5097_v35  ;;  %vm5108_vm4 = vcmp.eq.f32.partialorder %v5107_v32, 8.507059e+37 }
 0xe11   : > { %4776 = vperm.xlu2 %6275, %v4762_v20   ;;  %v5125_v29 = vor.u32 1.1754944e-38, %v5124_v16 }
 0xe12   : > { %vm5123_vm5 = vcmp.eq.f32.partialorder %v5122_v9, 8.507059e+37 }
 0xe14   : > { %v6479_v50 = vpop.eup %6478 }
 0xe15   : > { %v6481_v51 = vpop.eup %6480  ;;  %v5099_v15 = vmul.f32 %v6479_v50, %v5096_v3  ;;  %vm5104_vm8 = vweird.f32 %v6479_v50 }
 0xe16   : > { %v5114_v27 = vmul.f32 %v6481_v51, %v5097_v35  ;;  %vm5119_vm9 = vweird.f32 %v6481_v51  ;;  %vm5105_vm6 = vmor %vm5103_vm11, %vm5104_vm8 }
 0xe17   : > { %v5100_v19 = vsub.f32 1.0, %v5099_v15  ;;  %vm5120_vm14 = vmor %vm5118_vm7, %vm5119_vm9 }
 0xe18   : > { %v5115_v7 = vsub.f32 1.0, %v5114_v27 }
 0xe19   : > { %6277 = vset.pattern.permute.xlu2 %v6928_v1  ;;  %v5101_v10 = vmul.f32 %v6479_v50, %v5100_v19 }
 0xe1a   : > { %v5116_v34 = vmul.f32 %v6481_v51, %v5115_v7 }
 0xe1b   : > { %v4725_v18 = vpop.xlane.xlu1 %4724 }
 0xe1c   : > { %v4763_v25 = vadd.f32 %v4755_v62, %v4725_v18  ;;  %v5102_v18 = vadd.f32 %v6479_v50, %v5101_v10  ;;  %v5117_v47 = vadd.f32 %v6481_v51, %v5116_v34 }
 0xe1e   : > { %4781 = vperm.xlu0 %6276, %v4763_v25   ;;  %v5109_v25 = vand.u32 2147483648, %v5096_v3  ;;  %v5106_v55 = vsel %vm5105_vm6, %v6479_v50, %v5102_v18  ;;  %v5121_v41 = vsel %vm5120_vm14, %v6481_v51, %v5117_v47  ;;  %v3660_v50 = vstv %s3659_s26 }
 0xe1f   : > { %v5126_v49 = vsel %vm5123_vm5, %v5125_v29, %v5121_v41  ;;  %vm9623_vm6 = vcmask 261120   ;;  %vm9625_vm14 = vcmask 60416  }
 0xe20   : > { %v5110_v56 = vor.u32 1.1754944e-38, %v5109_v25  ;;  %v5129_v44 = vmul.f32 %v9020_v5, %v5126_v49  ;;  %v9071_v4 = vmul.f32 %v9025_v43, %v5126_v49  ;;  %v5127_v6 = vmul.f32 %v9031_v38, %v5126_v49  ;;  %vm9624_vm7 = vmmov %vm9623_vm6 }
 0xe22   : > { %v5111_v12 = vsel %vm5108_vm4, %v5110_v56, %v5106_v55  ;;  %v5142_v60 = vrot.slane %v5129_v44, 7  ;;  %v5144_v42 = vrot.slane %v9071_v4, 6  ;;  %vm9626_vm4 = vcmask 59392  }
 0xe23   : > { %v5128_v17 = vmul.f32 %v9017_v63, %v5111_v12  ;;  %v9068_v37 = vmul.f32 %v9022_v23, %v5111_v12  ;;  %v5112_v21 = vmul.f32 %v9028_v11, %v5111_v12  ;;  %v9078_v63 = vld [vmem:[%s6917_s13 + $0x60] sm:$0xff]  ;;  %v9082_v23 = vld [vmem:[%s6917_s13 + $0x68] sm:$0xff] }
 0xe24   : > { %v5143_v3 = vsel %vm573_vm1, %v5142_v60, %v5127_v6 }
 0xe25   : > { %v5138_v39 = vrot.slane %v5128_v17, 7  ;;  %v5140_v54 = vrot.slane %v9068_v37, 6  ;;  %v5145_v35 = vsel %vm576_vm2, %v5144_v42, %v5143_v3  ;;  %v9621_v42 = vld [vmem:[#allocation30_spill] sm:$0xff] }
 0xe26   : > { %6278 = vset.pattern.permute.xlu0 %v6928_v1 }
 0xe27   : > { %v5139_v40 = vsel %vm573_vm1, %v5138_v39, %v5112_v21 }
 0xe28   : > { %v5141_v38 = vsel %vm576_vm2, %v5140_v54, %v5139_v40 }
 0xe29   : > { %v5148_v51 = vsel %vm9619_vm13, %v5141_v38, 0.0 }
 0xe4d   : > { %v4767_v45 = vpop.permute.xlu2 %4766 }
 0xe4e   : > { %v9044_v2 = vadd.f32 %v6567_v36, %v4767_v45  ;;  %v9047_v33 = vadd.f32 %v6568_v13, %v4767_v45  ;;  %v5149_v45 = vsel %vm9620_vm12, %v5145_v35, 0.0  ;;  %v9095_v36 = vsub.f32 %v8944_v57, %v3660_v50  ;;  %v9109_v57 = vld [vmem:[%s6917_s13 + $0x78] sm:$0xff] }
 0xe4f   : > { %v9098_v13 = vsub.f32 %v8947_v31, %v3660_v50  ;;  %v5150_v15 = vadd.f32 %v5149_v45, %v5148_v51 }
 0xe50   : > { %v4792_v20 = vadd.f32 %v9047_v33, %v9044_v2  ;;  %v3663_v27 = vmul.f32 %v9095_v36, %v9095_v36 }
 0xe52   : > { %4793 = vadd.xlane.f32.xlu2 %v4792_v20  ;;  %v3664_v20 = vmul.f32 %v9098_v13, %v9098_v13 }
 0xe54   : > { %v3665_v19 = vadd.f32 %v3664_v20, %v3663_v27 }
 0xe55   : > { %v4772_v22 = vpop.permute.xlu2 %4771 }
 0xe56   : > { %v9055_v48 = vadd.f32 %v9052_v0, %v4772_v22  ;;  %v9061_v30 = vadd.f32 %v9058_v24, %v4772_v22  ;;  %v9105_v22 = vld [vmem:[%s6917_s13 + $0x70] sm:$0xff] }
 0xe58   : > { %v4795_v62 = vadd.f32 %v9061_v30, %v9055_v48 }
 0xe5a   : > { %4796 = vadd.xlane.f32.xlu0 %v4795_v62 }
 0xe6b   : > { %v4777_v61 = vpop.permute.xlu2 %4776 }
 0xe6c   : > { %v4788_v5 = vadd.f32 %v9078_v63, %v4777_v61  ;;  %v4789_v43 = vadd.f32 %v9082_v23, %v4777_v61 }
 0xe6e   : > { %v4798_v11 = vadd.f32 %v4789_v43, %v4788_v5 }
 0xe70   : > { %4799 = vadd.xlane.f32.xlu1 %v4798_v11 }
 0xe78   : > { %5151 = vadd.xlane.f32.xlu1 %v5150_v15 }
 0xe80   : > { %3666 = vadd.xlane.f32.xlu1 %v3665_v19 }
 0xe90   : > { %v4782_v7 = vpop.permute.xlu0 %4781 }
 0xe91   : > { %v4790_v10 = vadd.f32 %v9105_v22, %v4782_v7  ;;  %v4791_v31 = vadd.f32 %v9109_v57, %v4782_v7 }
 0xe93   : > { %v4801_v34 = vadd.f32 %v4791_v31, %v4790_v10 }
 0xe95   : > { %4802 = vadd.xlane.f32.xlu1 %v4801_v34 }
 0xec5   : > { %v4794_v29 = vpop.xlane.xlu2 %4793 }
 0xecd   : > { %v4797_v56 = vpop.xlane.xlu0 %4796 }
 0xece   : > { %v4804_v49 = vadd.f32 %v4797_v56, %v4794_v29 }
 0xee3   : > { %v4800_v62 = vpop.xlane.xlu1 %4799 }
 0xee4   : > { %v4805_v39 = vadd.f32 %v4804_v49, %v4800_v62 }
 0xeeb   : > { %v5152_v18 = vpop.xlane.xlu1 %5151 }
 0xeec   : > { %v5153_v12 = vmul.f32 %v5152_v18, %v9604_v59 }
 0xeee   : > { %v5155_v60 = vrot.slane %v5153_v12, 1  ;;  %v5156_v3 = vrot.slane %v5153_v12, 2  ;;  %v5160_v59 = vmul.f32 %v5153_v12, %v5112_v21  ;;  %v5161_v15 = vmul.f32 %v5153_v12, %v5127_v6 }
 0xef0   : > { %v5162_v11 = vmul.f32 %v5155_v60, %v5128_v17  ;;  %v5163_v38 = vmul.f32 %v5155_v60, %v5129_v44  ;;  %v5166_v62 = vperm.slane %v5160_v59, 0  ;;  %v5167_v18 = vperm.slane %v5161_v15, 0 }
 0xef2   : > { %v5169_v6 = vperm.slane %v5163_v38, 0 }
 0xef3   : > { %v3667_v47 = vpop.xlane.xlu1 %3666 }
 0xef4   : > { %v3668_v25 = vrot.slane %v3667_v47, 4 }
 0xef6   : > { %v3669_v16 = vadd.f32 %v3668_v25, %v3667_v47  ;;  %v5164_v47 = vmul.f32 %v5156_v3, %v9068_v37  ;;  %v5165_v25 = vmul.f32 %v5156_v3, %v9071_v4  ;;  %v5173_v37 = vmul.f32 %v9058_v24, %v5167_v18 }
 0xef8   : > { %v3670_v32 = vrot.slane %v3669_v16, 2  ;;  %v5195_v4 = vrot.slane %v5164_v47, 6  ;;  %v5199_v56 = vrot.slane %v5165_v25, 6 }
 0xefa   : > { %v3671_v9 = vadd.f32 %v3670_v32, %v3669_v16  ;;  %v5193_v16 = vrot.slane %v5162_v11, 7  ;;  %v5197_v32 = vrot.slane %v5163_v38, 7 }
 0xefc   : > { %v3672_v55 = vrot.slane %v3671_v9, 1  ;;  %v5194_v29 = vsel %vm573_vm1, %v5193_v16, %v5160_v59  ;;  %v5198_v12 = vsel %vm573_vm1, %v5197_v32, %v5161_v15 }
 0xefd   : > { %v5200_v3 = vsel %vm576_vm2, %v5199_v56, %v5198_v12 }
 0xefe   : > { %v3673_v41 = vadd.f32 %v3672_v55, %v3671_v9  ;;  %v5175_v55 = vmul.f32 %v9082_v23, %v5169_v6  ;;  %v5204_v38 = vsel %vm9617_vm0, %v5200_v3, 0.0 }
 0xf00   : > { %6135 = vpush %v3673_v41  ;;  %v5172_v41 = vmul.f32 %v9052_v0, %v5166_v62 }
 0xf02   : > { %v5178_v60 = vadd.f32 %v5173_v37, %v5172_v41 }
 0xf08   : > { %v4803_v61 = vpop.xlane.xlu1 %4802 }
 0xf09   : > { %v4806_v54 = vadd.f32 %v4805_v39, %v4803_v61  ;;  %v5170_v61 = vperm.slane %v5164_v47, 0 }
 0xf0b   : > { %v4807_v40 = vmul.f32 %v4806_v54, %v9621_v42  ;;  %v5171_v54 = vperm.slane %v5165_v25, 0  ;;  %v5176_v59 = vmul.f32 %v9105_v22, %v5170_v61 }
 0xf0d   : > { %v9114_v35 = vsub.f32 %v4788_v5, %v4807_v40  ;;  %v9116_v50 = vsub.f32 %v4789_v43, %v4807_v40  ;;  %v9119_v51 = vsub.f32 %v9055_v48, %v4807_v40  ;;  %v9122_v45 = vsub.f32 %v9061_v30, %v4807_v40 }
 0xf0e   : > { %v9125_v27 = vsub.f32 %v9044_v2, %v4807_v40  ;;  %v9128_v20 = vsub.f32 %v9047_v33, %v4807_v40  ;;  %v5168_v33 = vperm.slane %v5162_v11, 0  ;;  %v9142_v19 = vsub.f32 %v4790_v10, %v4807_v40 }
 0xf0f   : > { %v4820_v17 = vmul.f32 %v9114_v35, %v9114_v35  ;;  %v4821_v44 = vmul.f32 %v9116_v50, %v9116_v50  ;;  %v4818_v48 = vmul.f32 %v9119_v51, %v9119_v51  ;;  %v4819_v30 = vmul.f32 %v9122_v45, %v9122_v45 }
 0xf10   : > { %v4816_v21 = vmul.f32 %v9125_v27, %v9125_v27  ;;  %v4817_v2 = vmul.f32 %v9128_v20, %v9128_v20  ;;  %v9144_v7 = vsub.f32 %v4791_v31, %v4807_v40  ;;  %v4822_v9 = vmul.f32 %v9142_v19, %v9142_v19 }
 0xf11   : > { %v4830_v5 = vadd.f32 %v4821_v44, %v4820_v17  ;;  %v4827_v43 = vadd.f32 %v4819_v30, %v4818_v48  ;;  %v5174_v31 = vmul.f32 %v9078_v63, %v5168_v33  ;;  %v5196_v40 = vsel %vm576_vm2, %v5195_v4, %v5194_v29  ;;  %v4298_v48 = vpop.f32.mrf.mxu2  ;;  %v4318_v30 = vpop.f32.mrf.mxu3 }
 0xf12   : > { %v4824_v34 = vadd.f32 %v4817_v2, %v4816_v21  ;;  %v4823_v10 = vmul.f32 %v9144_v7, %v9144_v7  ;;  %v5203_v11 = vsel %vm9622_vm3, %v5196_v40, 0.0  ;;  %v5177_v15 = vmul.f32 %v9109_v57, %v5171_v54 }
 0xf13   : > { %4831 = vadd.xlane.f32.xlu0 %v4830_v5  ;;  %4828 = vadd.xlane.f32.xlu1 %v4827_v43  ;;  %v5181_v39 = vadd.f32 %v5175_v55, %v5174_v31  ;;  %v5205_v17 = vadd.f32 %v5204_v38, %v5203_v11  ;;  %v9165_v21 = vadd.f32 %v4298_v48, %v8272_v53 }
 0xf14   : > { %4825 = vadd.xlane.f32.xlu2 %v4824_v34  ;;  %v4833_v49 = vadd.f32 %v4823_v10, %v4822_v9  ;;  %v5184_v44 = vadd.f32 %v5177_v15, %v5176_v59  ;;  %v9168_v2 = vadd.f32 %v4318_v30, %v8272_v53 }
 0xf16   : > { %v4321_v33 = vadd.f32 %v9168_v2, %v9165_v21 }
 0xf1b   : > { %4834 = vadd.xlane.f32.xlu0 %v4833_v49  ;;  %5182 = vadd.xlane.f32.xlu1 %v5181_v39 }
 0xf1c   : > { %5179 = vadd.xlane.f32.xlu2 %v5178_v60 }
 0xf23   : > { %5206 = vadd.xlane.f32.xlu1 %v5205_v17 }
 0xf24   : > { %5185 = vadd.xlane.f32.xlu2 %v5184_v44 }
 0xf2c   : > { %4322 = vadd.xlane.f32.xlu2 %v4321_v33 }
 0xf31   : > { %s6136_s3 = spop %6135 }
 0xf32   : > { %s3683_s15 = smul.f32 %s6136_s3, %s7859_s29 }
 0xf34   : > { %s3684_s16 = sadd.f32 1e-05, %s3683_s15 }
 0xf36   : > { %v3685_v6 = vstv %s3684_s16 }
 0xf37   : > { %6482 = vrsqrt.f32 %v3685_v6  ;;  %vm3692_vm2 = vweird.f32 %v3685_v6 }
 0xf3d   : > { %v6483_v5 = vpop.eup %6482 }
 0xf3e   : > { %v3687_v43 = vmul.f32 %v6483_v5, %v3685_v6  ;;  %vm3693_vm1 = vweird.f32 %v6483_v5 }
 0xf3f   : > { %vm3694_vm10 = vmor %vm3692_vm2, %vm3693_vm1  ;;  %vm9628_vm2 = vcmask 195584  }
 0xf40   : > { %v3688_v34 = vmul.f32 %v6483_v5, %v3687_v43 }
 0xf42   : > { %v3689_v62 = vmul.f32 0.5, %v3688_v34 }
 0xf44   : > { %v3690_v18 = vsub.f32 1.5, %v3689_v62 }
 0xf46   : > { %v3691_v47 = vmul.f32 %v6483_v5, %v3690_v18 }
 0xf48   : > { %v3695_v53 = vsel %vm3694_vm10, %v6483_v5, %v3691_v47  ;;  %vm9629_vm10 = vmmov %vm9628_vm2 }
 0xf49   : > { %6137 = vpush %v3695_v53 }
 0xf7a   : > { %s9205_s7 = spop %6137 }
 0xf86   : > { %v4832_v25 = vpop.xlane.xlu0 %4831  ;;  %v4829_v16 = vpop.xlane.xlu1 %4828 }
 0xf87   : > { %v4826_v32 = vpop.xlane.xlu2 %4825 }
 0xf88   : > { %v4836_v9 = vadd.f32 %v4829_v16, %v4826_v32 }
 0xf8a   : > { %v4837_v10 = vadd.f32 %v4836_v9, %v4832_v25 }
 0xf8e   : > { %v4835_v31 = vpop.xlane.xlu0 %4834  ;;  %v5183_v55 = vpop.xlane.xlu1 %5182 }
 0xf8f   : > { %v4838_v41 = vadd.f32 %v4837_v10, %v4835_v31  ;;  %v5212_v37 = vperm.slane %v5183_v55, %v9590_v8  ;;  %v5180_v4 = vpop.xlane.xlu2 %5179 }
 0xf90   : > { %v5211_v56 = vperm.slane %v5180_v4, %v9590_v8 }
 0xf91   : > { %v4839_v29 = vmul.f32 %v4838_v41, %v9621_v42  ;;  %v5236_v12 = vmul.f32 %v8966_v26, %v5212_v37 }
 0xf92   : > { %v5235_v49 = vmul.f32 %v8954_v14, %v5211_v56 }
 0xf93   : > { %v4840_v39 = vadd.f32 1e-05, %v4839_v29  ;;  %v5241_v60 = vsel %vm755_vm15, %v5236_v12, 0.0 }
 0xf94   : > { %5242 = vadd.xlane.f32.xlu0 %v5241_v60  ;;  %v5238_v61 = vsel %vm755_vm15, %v5235_v49, 0.0 }
 0xf95   : > { %6484 = vrsqrt.f32 %v4840_v39  ;;  %5239 = vadd.xlane.f32.xlu1 %v5238_v61  ;;  %vm4847_vm9 = vweird.f32 %v4840_v39 }
 0xf96   : > { %v5207_v54 = vpop.xlane.xlu1 %5206 }
 0xf97   : > { %v5247_v40 = vmul.f32 %v8962_v46, %v5207_v54  ;;  %v5186_v3 = vpop.xlane.xlu2 %5185 }
 0xf98   : > { %v5213_v11 = vperm.slane %v5186_v3, %v9590_v8  ;;  %v6576_v3 = vld [vmem:[%s9480_s6] sm:$0x1f] }
 0xf99   : > { %v5249_v38 = vperm.slane %v5247_v40, 0  ;;  %v5256_v16 = vperm.slane %v5247_v40, 1  ;;  %v5263_v32 = vperm.slane %v5247_v40, 2 }
 0xf9a   : > { %v5237_v42 = vmul.f32 %v8971_v58, %v5213_v11  ;;  %v4859_v11 = vsel %vm9625_vm14, %v6576_v3, 0.0 }
 0xf9b   : > { %v6485_v26 = vpop.eup %6484  ;;  %5254 = vperm.xlu2 %6277, %v5249_v38  }
 0xf9c   : > { %v4842_v14 = vmul.f32 %v6485_v26, %v4840_v39  ;;  %v5244_v59 = vsel %vm755_vm15, %v5237_v42, 0.0  ;;  %vm4848_vm8 = vweird.f32 %v6485_v26  ;;  %v4860_v42 = vrot.slane %v4859_v11, 4 }
 0xf9d   : > { %5245 = vadd.xlane.f32.xlu0 %v5244_v59  ;;  %vm4849_vm11 = vmor %vm4847_vm9, %vm4848_vm8 }
 0xf9e   : > { %v4843_v15 = vmul.f32 %v6485_v26, %v4842_v14 }
 0xf9f   : > { %v4323_v17 = vpop.xlane.xlu2 %4322 }
 0xfa0   : > { %v4844_v44 = vmul.f32 0.5, %v4843_v15  ;;  %v4324_v48 = vrot.slane %v4323_v17, 4 }
 0xfa2   : > { %v4845_v30 = vsub.f32 1.5, %v4844_v44  ;;  %v4325_v33 = vadd.f32 %v4324_v48, %v4323_v17 }
 0xfa3   : > { %6279 = vset.pattern.permute.xlu2 %v9591_v52 }
 0xfa4   : > { %v4846_v46 = vmul.f32 %v6485_v26, %v4845_v30  ;;  %v4326_v8 = vrot.slane %v4325_v33, 2 }
 0xfa6   : > { %v4850_v58 = vsel %vm4849_vm11, %v6485_v26, %v4846_v46  ;;  %v4327_v6 = vadd.f32 %v4326_v8, %v4325_v33  ;;  %v4861_v26 = vadd.f32 %v4860_v42, %v4859_v11  ;;  %v448_v33 = vld [vmem:[%s9483_s9] sm:$0xff] }
 0xfa7   : > { %v4857_v5 = vmul.f32 %v4850_v58, %v9142_v19  ;;  %v4858_v43 = vmul.f32 %v4850_v58, %v9144_v7  ;;  %v4855_v62 = vmul.f32 %v4850_v58, %v9114_v35  ;;  %v4856_v18 = vmul.f32 %v4850_v58, %v9116_v50  ;;  %v9196_v35 = vld [vmem:[%s9479_s5] sm:$0xff] }
 0xfa8   : > { %v4328_v34 = vrot.slane %v4327_v6, 1  ;;  %v4853_v53 = vmul.f32 %v4850_v58, %v9119_v51  ;;  %v4854_v25 = vmul.f32 %v4850_v58, %v9122_v45  ;;  %v4851_v19 = vmul.f32 %v4850_v58, %v9125_v27 }
 0xfa9   : > { %4886 = vmatpush.msrb.mxu0 %v4857_v5  ;;  %4906 = vmatpush.msrb.mxu1 %v4858_v43  ;;  %v4852_v7 = vmul.f32 %v4850_v58, %v9128_v20  ;;  %v4862_v14 = vrot.slane %v4861_v26, 2 }
 0xfaa   : > { %v4329_v47 = vadd.f32 %v4328_v34, %v4327_v6 }
 0xfab   : > { %4887 = vmatpush.msrb.mxu0 %v4855_v62  ;;  %4907 = vmatpush.msrb.mxu1 %v4856_v18  ;;  %v4863_v59 = vadd.f32 %v4862_v14, %v4861_v26 }
 0xfac   : > { %6139 = vpush %v4329_v47 }
 0xfad   : > { %4888 = vmatpush.msrb.mxu0 %v4853_v53  ;;  %4908 = vmatpush.msrb.mxu1 %v4854_v25  ;;  %v4864_v17 = vrot.slane %v4863_v59, 1 }
 0xfae   : > { %5261 = vperm.xlu1 %6272, %v5256_v16   ;;  %v9627_v16 = vld [vmem:[#allocation26_spill] sm:$0xff] }
 0xfaf   : > { %4889 = vmatpush.msrb.mxu0 %v4851_v19  ;;  %4909 = vmatpush.msrb.mxu1 %v4852_v7  ;;  %v4865_v44 = vadd.f32 %v4864_v17, %v4863_v59 }
 0xfb0   : > { %6046 = vmatmul.msk.f32.vlgmr.msrb.gmra.mxu0 %vm9623_vm6, %v9196_v35  ;;  %6047 = vmatmul.msk.f32.vlgmr.msrb.gmra.mxu1 %vm9624_vm7, %v9196_v35 }
 0xfb1   : > { %5268 = vperm.xlu0 %6278, %v5263_v32  }
 0xfb6   : > { %6280 = vset.pattern.permute.xlu1 %v9591_v52 }
 0xfb9   : > { %6283 = vset.pattern.permute.xlu0 %v9591_v52 }
 0xfdd   : > { %s6140_s26 = spop %6139 }
 0xfde   : > { %s4339_s3 = smul.f32 %s6140_s26, %s7859_s29 }
 0xfe0   : > { %v4340_v41 = vstv %s4339_s3 }
 0xfe1   : > { %v9211_v29 = vsub.f32 %v9165_v21, %v4340_v41  ;;  %v9214_v12 = vsub.f32 %v9168_v2, %v4340_v41 }
 0xfe3   : > { %v4344_v39 = vmul.f32 %v9214_v12, %v9214_v12 }
 0xff5   : > { %v5255_v50 = vpop.permute.xlu2 %5254 }
0x1007   : > { %v5243_v27 = vpop.xlane.xlu0 %5242 }
0x1008   : > { %v5240_v51 = vpop.xlane.xlu1 %5239 }
0x1009   : > { %v5273_v45 = vadd.f32 %v5255_v50, %v5240_v51 }
0x100b   : > { %5278 = vperm.xlu2 %6279, %v5273_v45  }
0x1010   : > { %v5246_v20 = vpop.xlane.xlu0 %5245 }
0x1020   : > { %v5262_v9 = vpop.permute.xlu1 %5261 }
0x1021   : > { %v5274_v10 = vadd.f32 %v5262_v9, %v5243_v27 }
0x1023   : > { %5283 = vperm.xlu1 %6280, %v5274_v10   ;;  %v5269_v31 = vpop.permute.xlu0 %5268 }
0x1024   : > { %v5275_v55 = vadd.f32 %v5269_v31, %v5246_v20 }
0x1026   : > { %5288 = vperm.xlu2 %6279, %v5275_v55  }
0x102e   : > { %6281 = vset.pattern.permute.xlu2 %v6928_v1  ;;  %v4343_v1 = vmul.f32 %v9211_v29, %v9211_v29 }
0x1030   : > { %v4345_v60 = vadd.f32 %v4344_v39, %v4343_v1 }
0x1065   : > { %v5279_v37 = vpop.permute.xlu2 %5278 }
0x1066   : > { %v5291_v4 = vadd.f32 %v9052_v0, %v5279_v37  ;;  %v5292_v56 = vadd.f32 %v9058_v24, %v5279_v37 }
0x1068   : > { %v5297_v49 = vadd.f32 %v5292_v56, %v5291_v4 }
0x106a   : > { %5298 = vadd.xlane.f32.xlu1 %v5297_v49 }
0x1072   : > { %4346 = vadd.xlane.f32.xlu1 %v4345_v60 }
0x1080   : > { %v5289_v61 = vpop.permute.xlu2 %5288 }
0x1081   : > { %v5295_v0 = vadd.f32 %v9105_v22, %v5289_v61  ;;  %v5296_v24 = vadd.f32 %v9109_v57, %v5289_v61  ;;  %v5350_v22 = vsel %vm9626_vm4, %v6576_v3, 0.0 }
0x1082   : > { %v5351_v57 = vrot.slane %v5350_v22, 4 }
0x1083   : > { %v5303_v21 = vadd.f32 %v5296_v24, %v5295_v0 }
0x1084   : > { %v5352_v15 = vadd.f32 %v5351_v57, %v5350_v22 }
0x1085   : > { %5304 = vadd.xlane.f32.xlu0 %v5303_v21 }
0x1095   : > { %v5284_v54 = vpop.permute.xlu1 %5283 }
0x1096   : > { %v5293_v2 = vadd.f32 %v9078_v63, %v5284_v54  ;;  %v5294_v40 = vadd.f32 %v9082_v23, %v5284_v54  ;;  %v5353_v63 = vrot.slane %v5352_v15, 2 }
0x1098   : > { %v5300_v38 = vadd.f32 %v5294_v40, %v5293_v2  ;;  %v5354_v23 = vadd.f32 %v5353_v63, %v5352_v15 }
0x109a   : > { %5301 = vadd.xlane.f32.xlu2 %v5300_v38  ;;  %v5355_v48 = vrot.slane %v5354_v23, 1 }
0x109c   : > { %v5356_v30 = vadd.f32 %v5355_v48, %v5354_v23 }
0x10b2   : > { %4870 = vperm.xlu2 %6281, %v4865_v44  }
0x10ba   : > { %5361 = vperm.xlu2 %6281, %v5356_v30  }
0x10c2   : > { %6282 = vset.pattern.permute.xlu2 %v9591_v52 }
0x10c3   : > { %1002 = vperm.xlu2 %6282, %v448_v33  }
0x10dd   : > { %v5299_v46 = vpop.xlane.xlu1 %5298 }
0x10e5   : > { %v4347_v8 = vpop.xlane.xlu1 %4346 }
0x10e6   : > { %v4348_v58 = vrot.slane %v4347_v8, 4 }
0x10e8   : > { %v4349_v6 = vadd.f32 %v4348_v58, %v4347_v8 }
0x10ea   : > { %v4350_v5 = vrot.slane %v4349_v6, 2 }
0x10ec   : > { %v4351_v43 = vadd.f32 %v4350_v5, %v4349_v6 }
0x10ee   : > { %v4352_v34 = vrot.slane %v4351_v43, 1 }
0x10f0   : > { %v4353_v62 = vadd.f32 %v4352_v34, %v4351_v43 }
0x10f2   : > { %6141 = vpush %v4353_v62 }
0x10f8   : > { %v5305_v53 = vpop.xlane.xlu0 %5304 }
0x110d   : > { %v5302_v18 = vpop.xlane.xlu2 %5301 }
0x110e   : > { %v5306_v47 = vadd.f32 %v5302_v18, %v5299_v46 }
0x1110   : > { %v5307_v25 = vadd.f32 %v5306_v47, %v5305_v53 }
0x1112   : > { %v5308_v19 = vmul.f32 %v5307_v25, %v9627_v16 }
0x1114   : > { %v9234_v7 = vsub.f32 %v5295_v0, %v5308_v19  ;;  %v9236_v32 = vsub.f32 %v5296_v24, %v5308_v19  ;;  %v9238_v52 = vsub.f32 %v5291_v4, %v5308_v19  ;;  %v9240_v50 = vsub.f32 %v5292_v56, %v5308_v19  ;;  %v4891_v4 = vpop.f32.mrf.mxu0  ;;  %v4911_v56 = vpop.f32.mrf.mxu1 }
0x1115   : > { %v5311_v31 = vsub.f32 %v5293_v2, %v5308_v19  ;;  %v5312_v55 = vsub.f32 %v5294_v40, %v5308_v19  ;;  %v4871_v1 = vpop.permute.xlu2 %4870 }
0x1116   : > { %v5319_v51 = vmul.f32 %v9234_v7, %v9234_v7  ;;  %v5320_v45 = vmul.f32 %v9236_v32, %v9236_v32  ;;  %v5315_v27 = vmul.f32 %v9238_v52, %v9238_v52  ;;  %v5316_v20 = vmul.f32 %v9240_v50, %v9240_v50 }
0x1117   : > { %v5317_v41 = vmul.f32 %v5311_v31, %v5311_v31  ;;  %v5318_v37 = vmul.f32 %v5312_v55, %v5312_v55  ;;  %v9250_v39 = vadd.f32 %v4891_v4, %v4871_v1  ;;  %v9252_v60 = vadd.f32 %v4911_v56, %v4871_v1 }
0x1118   : > { %v5327_v9 = vadd.f32 %v5320_v45, %v5319_v51  ;;  %v5321_v10 = vadd.f32 %v5316_v20, %v5315_v27 }
0x1119   : > { %v5324_v49 = vadd.f32 %v5318_v37, %v5317_v41  ;;  %v4914_v61 = vadd.f32 %v9252_v60, %v9250_v39 }
0x111a   : > { %5328 = vadd.xlane.f32.xlu0 %v5327_v9  ;;  %5322 = vadd.xlane.f32.xlu1 %v5321_v10  ;;  %v449_v10 = vld [vmem:[%s9484_s10] sm:$0xff] }
0x1122   : > { %5325 = vadd.xlane.f32.xlu1 %v5324_v49 }
0x1123   : > { %s6142_s26 = spop %6141 }
0x1124   : > { %s4363_s3 = smul.f32 %s6142_s26, %s7859_s29  ;;  %s6687_s26 = scalar_lea.hbm %s9485_s11, 256 }
0x1126   : > { %s4364_s15 = sadd.f32 1e-05, %s4363_s3 }
0x1128   : > { %v4365_v0 = vstv %s4364_s15 }
0x1129   : > { %6486 = vrsqrt.f32 %v4365_v0  ;;  %vm4372_vm13 = vweird.f32 %v4365_v0 }
0x112a   : > { %4915 = vadd.xlane.f32.xlu1 %v4914_v61 }
0x112f   : > { %v6487_v24 = vpop.eup %6486 }
0x1130   : > { %v4367_v21 = vmul.f32 %v6487_v24, %v4365_v0  ;;  %vm4373_vm5 = vweird.f32 %v6487_v24 }
0x1131   : > { %vm4374_vm12 = vmor %vm4372_vm13, %vm4373_vm5 }
0x1132   : > { %v4368_v54 = vmul.f32 %v6487_v24, %v4367_v21 }
0x1134   : > { %v4369_v2 = vmul.f32 0.5, %v4368_v54 }
0x1136   : > { %v4370_v40 = vsub.f32 1.5, %v4369_v2 }
0x1138   : > { %v4371_v3 = vmul.f32 %v6487_v24, %v4370_v40 }
0x113a   : > { %v4375_v11 = vsel %vm4374_vm12, %v6487_v24, %v4371_v3 }
0x113b   : > { %6143 = vpush %v4375_v11 }
0x116c   : > { %s9266_s16 = spop %6143 }
0x118d   : > { %v5323_v38 = vpop.xlane.xlu1 %5322  ;;  %v5329_v22 = vpop.xlane.xlu0 %5328 }
0x1195   : > { %v5326_v42 = vpop.xlane.xlu1 %5325 }
0x1196   : > { %v5330_v26 = vadd.f32 %v5326_v42, %v5323_v38 }
0x1198   : > { %v5331_v57 = vadd.f32 %v5330_v26, %v5329_v22  ;;  %v4377_v22 = vstv %s9266_s16 }
0x119a   : > { %v5332_v14 = vmul.f32 %v5331_v57, %v9627_v16  ;;  %v997_v57 = vstv %s8148_s28 }
0x119c   : > { %v5333_v59 = vadd.f32 1e-05, %v5332_v14  ;;  %v1625_v14 = vstv %s8546_s23 }
0x119d   : > { %v4916_v15 = vpop.xlane.xlu1 %4915 }
0x119e   : > { %6488 = vrsqrt.f32 %v5333_v59  ;;  %v4917_v17 = vrot.slane %v4916_v15, 4  ;;  %vm5340_vm0 = vweird.f32 %v5333_v59 }
0x11a0   : > { %v4918_v63 = vadd.f32 %v4917_v17, %v4916_v15  ;;  %v3017_v15 = vstv %s9073_s25  ;;  %v3697_v17 = vstv %s9205_s7 }
0x11a2   : > { %v4919_v44 = vrot.slane %v4918_v63, 2 }
0x11a4   : > { %v6489_v23 = vpop.eup %6488  ;;  %v4920_v48 = vadd.f32 %v4919_v44, %v4918_v63  ;;  %v4378_v63 = vmul.f32 %v4377_v22, %v9211_v29  ;;  %v4379_v44 = vmul.f32 %v4377_v22, %v9214_v12  ;;  %v3698_v12 = vmul.f32 %v3697_v17, %v9095_v36 }
0x11a5   : > { %v5335_v30 = vmul.f32 %v6489_v23, %v5333_v59  ;;  %vm5341_vm3 = vweird.f32 %v6489_v23  ;;  %v2337_v59 = vstv %s8774_s19 }
0x11a6   : > { %v4921_v33 = vrot.slane %v4920_v48, 1  ;;  %vm5342_vm1 = vmor %vm5340_vm0, %vm5341_vm3 }
0x11a7   : > { %v5336_v46 = vmul.f32 %v6489_v23, %v5335_v30  ;;  %v9631_v30 = vld [vmem:[#allocation28_spill] sm:$0xff] }
0x11a8   : > { %v4922_v8 = vadd.f32 %v4921_v33, %v4920_v48  ;;  %v999_v33 = vmul.f32 %v997_v57, %v9631_v30 }
0x11a9   : > { %v5337_v58 = vmul.f32 0.5, %v5336_v46 }
0x11aa   : > { %6145 = vpush %v4922_v8  ;;  %v9632_v8 = vld [vmem:[#allocation29_spill] sm:$0xff] }
0x11ab   : > { %v5338_v6 = vsub.f32 1.5, %v5337_v58  ;;  %v1626_v58 = vmul.f32 %v1625_v14, %v9632_v8 }
0x11ad   : > { %v5339_v5 = vmul.f32 %v6489_v23, %v5338_v6  ;;  %v9633_v6 = vld [vmem:[#allocation25_spill] sm:$0xff] }
0x11af   : > { %v5343_v43 = vsel %vm5342_vm1, %v6489_v23, %v5339_v5  ;;  %v9630_v23 = vld [vmem:[#allocation31_spill] sm:$0xff]  ;;  %v1627_v5 = vmul.f32 %v1625_v14, %v9633_v6 }
0x11b0   : > { %v5348_v34 = vmul.f32 %v5343_v43, %v9234_v7  ;;  %v5349_v62 = vmul.f32 %v5343_v43, %v9236_v32  ;;  %v5346_v18 = vmul.f32 %v5343_v43, %v5311_v31  ;;  %v5347_v47 = vmul.f32 %v5343_v43, %v5312_v55 }
0x11b1   : > { %v5344_v53 = vmul.f32 %v5343_v43, %v9238_v52  ;;  %v5345_v25 = vmul.f32 %v5343_v43, %v9240_v50  ;;  %v998_v48 = vmul.f32 %v997_v57, %v9630_v23  ;;  %v2338_v43 = vmul.f32 %v2337_v59, %v8575_v28 }
0x11b2   : > { %5378 = vmatpush.msrb.mxu2 %v5348_v34  ;;  %5398 = vmatpush.msrb.mxu3 %v5349_v62  ;;  %v9634_v34 = vld [vmem:[#allocation24_spill] sm:$0xff] }
0x11b3   : > { %v2339_v62 = vmul.f32 %v2337_v59, %v9634_v34 }
0x11b4   : > { %5379 = vmatpush.msrb.mxu2 %v5346_v18  ;;  %5399 = vmatpush.msrb.mxu3 %v5347_v47  ;;  %v9635_v18 = vld [vmem:[#allocation23_spill] sm:$0xff] }
0x11b5   : > { %v3018_v47 = vmul.f32 %v3017_v15, %v9635_v18 }
0x11b6   : > { %5380 = vmatpush.msrb.mxu2 %v5344_v53  ;;  %5400 = vmatpush.msrb.mxu3 %v5345_v25  ;;  %v9636_v53 = vld [vmem:[#allocation19_spill] sm:$0xff]  ;;  %v3699_v25 = vmul.f32 %v3697_v17, %v9098_v13 }
0x11b7   : > { %6054 = vmatmul.msk.f32.vlgmr.msrb.gmra.mxu2 %vm9628_vm2, %v9196_v35  ;;  %6055 = vmatmul.msk.f32.vlgmr.msrb.gmra.mxu3 %vm9629_vm10, %v9196_v35  ;;  %v5362_v35 = vpop.permute.xlu2 %5361  ;;  %v3019_v29 = vmul.f32 %v3017_v15, %v9636_v53 }
0x11bf   : > { %v9299_v46 = vpop.permute.xlu2 %1002 }
0x11c0   : > { %v1628_v28 = vmul.f32 %v1626_v58, %v9299_v46  ;;  %v3020_v36 = vmul.f32 %v3018_v47, %v9299_v46  ;;  %v3021_v13 = vmul.f32 %v3019_v29, %v9299_v46 }
0x11db   : > { %s6146_s22 = spop %6145 }
0x11dc   : > { %s4932_s30 = smul.f32 %s6146_s22, %s7859_s29 }
0x11de   : > { %v4933_v16 = vstv %s4932_s30 }
0x11df   : > { %v9270_v19 = vsub.f32 %v9250_v39, %v4933_v16  ;;  %v9273_v7 = vsub.f32 %v9252_v60, %v4933_v16  ;;  %v4380_v16 = vmul.f32 %v4378_v63, %v9299_v46 }
0x11e1   : > { %v4936_v32 = vmul.f32 %v9270_v19, %v9270_v19  ;;  %v4937_v52 = vmul.f32 %v9273_v7, %v9273_v7 }
0x11e3   : > { %v4938_v50 = vadd.f32 %v4937_v52, %v4936_v32  ;;  %v4381_v32 = vmul.f32 %v4379_v44, %v9299_v46  ;;  %v1005_v52 = vmul.f32 %v9299_v46, %v998_v48 }
0x11e5   : > { %4939 = vadd.xlane.f32.xlu0 %v4938_v50  ;;  %v1006_v50 = vmul.f32 %v9299_v46, %v999_v33 }
0x123a   : > { %v5382_v51 = vpop.f32.mrf.mxu2  ;;  %v5402_v45 = vpop.f32.mrf.mxu3 }
0x123b   : > { %v9279_v27 = vadd.f32 %v5382_v51, %v5362_v35  ;;  %v9281_v20 = vadd.f32 %v5402_v45, %v5362_v35  ;;  %v1629_v35 = vmul.f32 %v1627_v5, %v9299_v46  ;;  %v2340_v51 = vmul.f32 %v2338_v43, %v9299_v46 }
0x123c   : > { %v2341_v45 = vmul.f32 %v2339_v62, %v9299_v46 }
0x123d   : > { %v5405_v9 = vadd.f32 %v9281_v20, %v9279_v27 }
0x123f   : > { %5406 = vadd.xlane.f32.xlu1 %v5405_v9 }
0x1258   : > { %v4940_v31 = vpop.xlane.xlu0 %4939  ;;  %1009 = vperm.xlu1 %6280, %v449_v10   ;;  %v3700_v10 = vmul.f32 %v3698_v12, %v9299_v46 }
0x1259   : > { %v4941_v55 = vrot.slane %v4940_v31, 4 }
0x125b   : > { %v4942_v41 = vadd.f32 %v4941_v55, %v4940_v31  ;;  %v3701_v31 = vmul.f32 %v3699_v25, %v9299_v46 }
0x125d   : > { %v4943_v37 = vrot.slane %v4942_v41, 2 }
0x125f   : > { %v4944_v4 = vadd.f32 %v4943_v37, %v4942_v41 }
0x1261   : > { %v4945_v56 = vrot.slane %v4944_v4, 1 }
0x1263   : > { %v4946_v49 = vadd.f32 %v4945_v56, %v4944_v4 }
0x1265   : > { %6147 = vpush %v4946_v49 }
0x1296   : > { %s6148_s15 = spop %6147 }
0x1297   : > { %s4956_s22 = smul.f32 %s6148_s15, %s7859_s29  ;;  %s9405_s15 = scalar_lea.vmem [#allocation9], %s5992_s27 }
0x1298   : > { %s6106_s27 = sshll.u32 %s6836_s21, 7  ;;  %s5876_s21 = scalar_lea.sflag [#allocation5], %s6911_s14 }
0x1299   : > { %s4957_s30 = sadd.f32 1e-05, %s4956_s22 }
0x129b   : > { %v4958_v1 = vstv %s4957_s30 }
0x129c   : > { %6490 = vrsqrt.f32 %v4958_v1  ;;  %vm4965_vm9 = vweird.f32 %v4958_v1 }
0x12a2   : > { %v6491_v39 = vpop.eup %6490 }
0x12a3   : > { %v4960_v60 = vmul.f32 %v6491_v39, %v4958_v1  ;;  %vm4966_vm8 = vweird.f32 %v6491_v39 }
0x12a4   : > { %vm4967_vm11 = vmor %vm4965_vm9, %vm4966_vm8 }
0x12a5   : > { %v4961_v61 = vmul.f32 %v6491_v39, %v4960_v60 }
0x12a7   : > { %v4962_v0 = vmul.f32 0.5, %v4961_v61 }
0x12a9   : > { %v4963_v24 = vsub.f32 1.5, %v4962_v0 }
0x12ab   : > { %v4964_v21 = vmul.f32 %v6491_v39, %v4963_v24 }
0x12ad   : > { %v4968_v54 = vsel %vm4967_vm11, %v6491_v39, %v4964_v21 }
0x12ae   : > { %6149 = vpush %v4968_v54 }
0x12b2   : > { %v5407_v2 = vpop.xlane.xlu1 %5406 }
0x12b3   : > { %v5408_v40 = vrot.slane %v5407_v2, 4 }
0x12b5   : > { %v5409_v3 = vadd.f32 %v5408_v40, %v5407_v2 }
0x12b7   : > { %v5410_v11 = vrot.slane %v5409_v3, 2 }
0x12b9   : > { %v5411_v38 = vadd.f32 %v5410_v11, %v5409_v3 }
0x12bb   : > { %v5412_v42 = vrot.slane %v5411_v38, 1 }
0x12bd   : > { %v5413_v26 = vadd.f32 %v5412_v42, %v5411_v38  ;;  %v9333_v38 = vld [vmem:[#allocation8] sm:$0xff] }
0x12bf   : > { %6151 = vpush %v5413_v26 }
0x12ca   : > { %v9317_v9 = vpop.permute.xlu1 %1009 }
0x12cb   : > { %v1012_v55 = vadd.f32 %v9317_v9, %v1005_v52  ;;  %v1013_v41 = vadd.f32 %v9317_v9, %v1006_v50  ;;  %v1630_v37 = vadd.f32 %v1628_v28, %v9317_v9  ;;  %v1631_v4 = vadd.f32 %v1629_v35, %v9317_v9  ;;  %v5489_v35 = vld [vmem:[%s9482_s8] sm:$0xff] }
0x12cc   : > { %v2342_v56 = vadd.f32 %v2340_v51, %v9317_v9  ;;  %v2343_v49 = vadd.f32 %v2341_v45, %v9317_v9  ;;  %v3022_v1 = vadd.f32 %v3020_v36, %v9317_v9  ;;  %v3023_v39 = vadd.f32 %v3021_v13, %v9317_v9 }
0x12cd   : > { %v1014_v60 = vmax.f32 %v1012_v55, 0.0  ;;  %v1015_v61 = vmax.f32 %v1013_v41, 0.0  ;;  %v1632_v0 = vmax.f32 %v1630_v37, 0.0  ;;  %v1633_v24 = vmax.f32 %v1631_v4, 0.0 }
0x12ce   : > { %v2344_v21 = vmax.f32 %v2342_v56, 0.0  ;;  %v2345_v54 = vmax.f32 %v2343_v49, 0.0  ;;  %v3024_v2 = vmax.f32 %v3022_v1, 0.0  ;;  %v3025_v40 = vmax.f32 %v3023_v39, 0.0 }
0x12cf   : > { %5513 = vmatpush.msra.mxu0 %v1014_v60  ;;  %5533 = vmatpush.msra.mxu1 %v1015_v61  ;;  %v3702_v3 = vadd.f32 %v3700_v10, %v9317_v9  ;;  %v3703_v11 = vadd.f32 %v3701_v31, %v9317_v9  ;;  %v4382_v42 = vadd.f32 %v4380_v16, %v9317_v9 }
0x12d0   : > { %5553 = vmatpush.msra.mxu2 %v1632_v0  ;;  %5573 = vmatpush.msra.mxu3 %v1633_v24  ;;  %v4383_v26 = vadd.f32 %v4381_v32, %v9317_v9 }
0x12d1   : > { %5593 = vmatpush.msrb.mxu0 %v2344_v21  ;;  %5613 = vmatpush.msrb.mxu1 %v2345_v54  ;;  %v3704_v22 = vmax.f32 %v3702_v3, 0.0  ;;  %v3705_v57 = vmax.f32 %v3703_v11, 0.0  ;;  %v4384_v14 = vmax.f32 %v4382_v42, 0.0  ;;  %v5818_v21 = vld [vmem:[%s6917_s13] sm:$0xff]  ;;  %v5819_v54 = vld [vmem:[%s6917_s13 + $0x8] sm:$0xff]  ;;  %v6073_v42 = vld [vmem:[%s6917_s13 + $0x18] sm:$0xff] }
0x12d2   : > { %5633 = vmatpush.msrb.mxu2 %v3024_v2  ;;  %5653 = vmatpush.msrb.mxu3 %v3025_v40  ;;  %v4385_v59 = vmax.f32 %v4383_v26, 0.0  ;;  %v6072_v2 = vld [vmem:[%s6917_s13 + $0x10] sm:$0xff] }
0x12d3   : > { %6056 = vmatmul.msk.f32.vlgmr.msra.gmra.mxu0 %vm755_vm15, %v9333_v38  ;;  %6057 = vmatmul.msk.f32.vlgmr.msra.gmra.mxu1 %vm755_vm15, %v9333_v38 }
0x12d4   : > { %6058 = vmatmul.msk.f32.vlgmr.msra.gmra.mxu2 %vm755_vm15, %v9333_v38  ;;  %6059 = vmatmul.msk.f32.vlgmr.msra.gmra.mxu3 %vm755_vm15, %v9333_v38 }
0x12d5   : > { %5673 = vmatpush.msra.mxu0 %v3704_v22  ;;  %5693 = vmatpush.msra.mxu1 %v3705_v57  ;;  %v6076_v22 = vld [vmem:[%s6917_s13 + $0x20] sm:$0xff] }
0x12d6   : > { %5713 = vmatpush.msra.mxu2 %v4384_v14  ;;  %5733 = vmatpush.msra.mxu3 %v4385_v59 }
0x12db   : > { %6060 = vmatmul.msk.f32.vlgmr.msrb.gmra.mxu0 %vm755_vm15, %v9333_v38  ;;  %6061 = vmatmul.msk.f32.vlgmr.msrb.gmra.mxu1 %vm755_vm15, %v9333_v38 }
0x12dc   : > { %6062 = vmatmul.msk.f32.vlgmr.msrb.gmra.mxu2 %vm755_vm15, %v9333_v38  ;;  %6063 = vmatmul.msk.f32.vlgmr.msrb.gmra.mxu3 %vm755_vm15, %v9333_v38 }
0x12df   : > { %s6150_s28 = spop %6149 }
0x12e0   : > { %v4970_v15 = vstv %s6150_s28  ;;  %s5887_s28 = scalar_lea.hbm %s9485_s11, %s6106_s27 }
0x12e1   : > { %v4971_v17 = vmul.f32 %v4970_v15, %v9270_v19  ;;  %v4972_v63 = vmul.f32 %v4970_v15, %v9273_v7 }
0x12e3   : > { %v4973_v44 = vmul.f32 %v4971_v17, %v9299_v46  ;;  %v4974_v23 = vmul.f32 %v4972_v63, %v9299_v46  ;;  %6064 = vmatmul.msk.f32.vlgmr.msra.gmra.mxu0 %vm755_vm15, %v9333_v38  ;;  %6065 = vmatmul.msk.f32.vlgmr.msra.gmra.mxu1 %vm755_vm15, %v9333_v38  ;;  %v6077_v17 = vld [vmem:[%s6917_s13 + $0x28] sm:$0xff] }
0x12e4   : > { %6066 = vmatmul.msk.f32.vlgmr.msra.gmra.mxu2 %vm755_vm15, %v9333_v38  ;;  %6067 = vmatmul.msk.f32.vlgmr.msra.gmra.mxu3 %vm755_vm15, %v9333_v38 }
0x12e5   : > { %v4975_v19 = vadd.f32 %v4973_v44, %v9317_v9  ;;  %v4976_v7 = vadd.f32 %v4974_v23, %v9317_v9  ;;  %v6080_v23 = vld [vmem:[%s6917_s13 + $0x30] sm:$0xff] }
0x12e7   : > { %v4977_v48 = vmax.f32 %v4975_v19, 0.0  ;;  %v4978_v30 = vmax.f32 %v4976_v7, 0.0 }
0x12e9   : > { %5753 = vmatpush.msrb.mxu0 %v4977_v48  ;;  %5773 = vmatpush.msrb.mxu1 %v4978_v30  ;;  %v6081_v30 = vld [vmem:[%s6917_s13 + $0x38] sm:$0xff] }
0x12eb   : > { %6068 = vmatmul.msk.f32.vlgmr.msrb.gmra.mxu0 %vm755_vm15, %v9333_v38  ;;  %6069 = vmatmul.msk.f32.vlgmr.msrb.gmra.mxu1 %vm755_vm15, %v9333_v38 }
0x12f0   : > { %s6152_s23 = spop %6151 }
0x12f1   : > { %s5423_s19 = smul.f32 %s6152_s23, %s7859_s29  ;;  %s5888_s23 = sshll.u32 %s9405_s15, 4  ;;  %s5889_s23 = int_to_ptr.vmem [resolvable:$true] %s5888_s23 }
0x12f3   : > { %v5424_v33 = vstv %s5423_s19  ;;  %s5890_s19 = sshll.u32 %s5887_s28, 4  ;;  %s5891_s19 = int_to_ptr.hbm [resolvable:$true] %s5890_s19 }
0x12f4   : > { %v5425_v8 = vsub.f32 %v9279_v27, %v5424_v33  ;;  %v5426_v58 = vsub.f32 %v9281_v20, %v5424_v33 }
0x12f6   : > { %v5427_v6 = vmul.f32 %v5425_v8, %v5425_v8  ;;  %v5428_v5 = vmul.f32 %v5426_v58, %v5426_v58 }
0x12f8   : > { %v5429_v43 = vadd.f32 %v5428_v5, %v5427_v6  ;;  %v6084_v6 = vld [vmem:[%s6917_s13 + $0x40] sm:$0xff] }
0x12fa   : > { %5430 = vadd.xlane.f32.xlu0 %v5429_v43 }
0x130e   : > { %5492 = vperm.xlu0 %6283, %v5489_v35  }
0x1350   : > { %v5515_v4 = vpop.f32.mrf.mxu0  ;;  %v5535_v56 = vpop.f32.mrf.mxu1 }
0x1357   : > { %v5575_v49 = vpop.f32.mrf.mxu3 }
0x1358   : > { %v5595_v1 = vpop.f32.mrf.mxu0 }
0x135f   : > { %v5655_v60 = vpop.f32.mrf.mxu3 }
0x1360   : > { %v5675_v61 = vpop.f32.mrf.mxu0 }
0x1368   : > { %v5755_v43 = vpop.f32.mrf.mxu0 }
0x136d   : > { %v5431_v34 = vpop.xlane.xlu0 %5430 }
0x136e   : > { %v5432_v62 = vrot.slane %v5431_v34, 4 }
0x1370   : > { %v5433_v18 = vadd.f32 %v5432_v62, %v5431_v34  ;;  %v6085_v62 = vld [vmem:[%s6917_s13 + $0x48] sm:$0xff] }
0x1372   : > { %v5434_v47 = vrot.slane %v5433_v18, 2 }
0x1374   : > { %v5435_v53 = vadd.f32 %v5434_v47, %v5433_v18 }
0x1376   : > { %v5436_v29 = vrot.slane %v5435_v53, 1 }
0x1378   : > { %v5437_v12 = vadd.f32 %v5436_v29, %v5435_v53  ;;  %v6088_v29 = vld [vmem:[%s6917_s13 + $0x50] sm:$0xff] }
0x137a   : > { %6153 = vpush %v5437_v12 }
0x1380   : > { %v9386_v24 = vpop.permute.xlu0 %5492 }
0x1381   : > { %v5516_v40 = vadd.f32 %v5515_v4, %v9386_v24  ;;  %v5536_v3 = vadd.f32 %v5535_v56, %v9386_v24  ;;  %v5596_v26 = vadd.f32 %v5595_v1, %v9386_v24  ;;  %v5656_v19 = vadd.f32 %v5655_v60, %v9386_v24 }
0x1382   : > { %v5676_v33 = vadd.f32 %v5675_v61, %v9386_v24 }
0x1383   : > { %v5820_v14 = vadd.f32 %v5818_v21, %v5516_v40  ;;  %v5821_v59 = vadd.f32 %v5819_v54, %v5536_v3  ;;  %v5833_v48 = vadd.f32 %v6076_v22, %v5596_v26  ;;  %v5841_v53 = vadd.f32 %v6081_v30, %v5656_v19 }
0x1385   : > { %5822 = vst [vmem:[%s9405_s15] sm:$0xff] %v5820_v14 }
0x1386   : > { %5823 = vst [vmem:[%s9405_s15 + $0x8] sm:$0xff] %v5821_v59 }
0x1387   : > { %6078 = vst [vmem:[%s9405_s15 + $0x20] sm:$0xff] %v5833_v48 }
0x1388   : > { %6083 = vst [vmem:[%s9405_s15 + $0x38] sm:$0xff] %v5841_v53 }
0x13ab   : > { %s6154_s25 = spop %6153 }
0x13ac   : > { %s5447_s7 = smul.f32 %s6154_s25, %s7859_s29  ;;  %s6681_s25 = sshra.s32 %s5891_s19, 4  ;;  %s6682_s25 = int_to_ptr.hbm [resolvable:$true] %s6681_s25 }
0x13ad   : > { %p6688_p11 = scmp.lt.s32.totalorder %s6682_s25, %s9485_s11 }
0x13ae   : > { %s5448_s16 = sadd.f32 1e-05, %s5447_s7  ;;  %s6683_s7 = scalar_lea.hbm %s6682_s25, 128 }
0x13af   : > { %p6684_p1 = scmp.ne.s32.totalorder %s6682_s25, %s6683_s7  ;;  %p6689_p2 = scmp.lt.s32.totalorder %s6687_s26, %s6683_s7 }
0x13b0   : > { %v5449_v25 = vstv %s5448_s16 }
0x13b1   : > { %6492 = vrsqrt.f32 %v5449_v25  ;;  %vm5456_vm7 = vweird.f32 %v5449_v25  ;;  %p6685_p4 = pnand %p6684_p1, %p6881_p3  ;;  %p6690_p9 = por %p6689_p2, %p6688_p11 }
0x13b3   : > { %p6686_p8 = pneg %p6685_p4 }
0x13b5   : > { %p6691_p10 = pnand %p6690_p9, %p6686_p8 }
0x13b7   : > { %v6493_v27 = vpop.eup %6492 }
0x13b8   : > { %v5451_v16 = vmul.f32 %v6493_v27, %v5449_v25  ;;  %vm5457_vm6 = vweird.f32 %v6493_v27  ;;  %v5847_v25 = vadd.f32 %v6084_v6, %v5676_v33 }
0x13b9   : > { %vm5458_vm14 = vmor %vm5456_vm7, %vm5457_vm6 }
0x13ba   : > { %v5452_v20 = vmul.f32 %v6493_v27, %v5451_v16  ;;  %v5756_v16 = vadd.f32 %v5755_v43, %v9386_v24  ;;  %6086 = vst [vmem:[%s9405_s15 + $0x40] sm:$0xff] %v5847_v25 }
0x13bc   : > { %v5453_v32 = vmul.f32 0.5, %v5452_v20 }
0x13be   : > { %v5454_v52 = vsub.f32 1.5, %v5453_v32  ;;  %v6092_v32 = vld [vmem:[%s6917_s13 + $0x60] sm:$0xff] }
0x13c0   : > { %v5455_v50 = vmul.f32 %v6493_v27, %v5454_v52 }
0x13c2   : > { %v5459_v28 = vsel %vm5458_vm14, %v6493_v27, %v5455_v50  ;;  %v6089_v27 = vld [vmem:[%s6917_s13 + $0x58] sm:$0xff] }
0x13c3   : > { %6155 = vpush %v5459_v28  ;;  %v6093_v28 = vld [vmem:[%s6917_s13 + $0x68] sm:$0xff] }
0x13f4   : > { %s6156_s29 = spop %6155 }
0x13f5   : > { %v5461_v51 = vstv %s6156_s29 }
0x13f6   : > { %v5462_v45 = vmul.f32 %v5461_v51, %v5425_v8  ;;  %v5463_v36 = vmul.f32 %v5461_v51, %v5426_v58  ;;  %v5735_v8 = vpop.f32.mrf.mxu3  ;;  %v5862_v51 = vadd.f32 %v6092_v32, %v5756_v16 }
0x13f7   : > { %v5736_v12 = vadd.f32 %v5735_v8, %v9386_v24 }
0x13f8   : > { %v5464_v13 = vmul.f32 %v5462_v45, %v9299_v46  ;;  %v5465_v10 = vmul.f32 %v5463_v36, %v9299_v46  ;;  %v5555_v46 = vpop.f32.mrf.mxu2  ;;  %6094 = vst [vmem:[%s9405_s15 + $0x60] sm:$0xff] %v5862_v51 }
0x13f9   : > { %v5556_v11 = vadd.f32 %v5555_v46, %v9386_v24  ;;  %v5855_v35 = vadd.f32 %v6089_v27, %v5736_v12 }
0x13fa   : > { %v5466_v31 = vadd.f32 %v5464_v13, %v9317_v9  ;;  %v5467_v55 = vadd.f32 %v5465_v10, %v9317_v9  ;;  %v5615_v9 = vpop.f32.mrf.mxu1  ;;  %v6096_v13 = vld [vmem:[%s6917_s13 + $0x70] sm:$0xff] }
0x13fb   : > { %v5616_v57 = vadd.f32 %v5615_v9, %v9386_v24  ;;  %v5826_v15 = vadd.f32 %v6072_v2, %v5556_v11  ;;  %6091 = vst [vmem:[%s9405_s15 + $0x58] sm:$0xff] %v5855_v35 }
0x13fc   : > { %v5468_v41 = vmax.f32 %v5466_v31, 0.0  ;;  %v5469_v37 = vmax.f32 %v5467_v55, 0.0  ;;  %v6097_v31 = vld [vmem:[%s6917_s13 + $0x78] sm:$0xff] }
0x13fd   : > { %v5834_v58 = vadd.f32 %v6077_v17, %v5616_v57  ;;  %6074 = vst [vmem:[%s9405_s15 + $0x10] sm:$0xff] %v5826_v15 }
0x13fe   : > { %5793 = vmatpush.msrb.mxu2 %v5468_v41  ;;  %5813 = vmatpush.msrb.mxu3 %v5469_v37 }
0x13ff   : > { %6070 = vmatmul.msk.f32.vlgmr.msrb.gmra.mxu2 %vm755_vm15, %v9333_v38  ;;  %6071 = vmatmul.msk.f32.vlgmr.msrb.gmra.mxu3 %vm755_vm15, %v9333_v38  ;;  %v5576_v38 = vadd.f32 %v5575_v49, %v9386_v24  ;;  %6079 = vst [vmem:[%s9405_s15 + $0x28] sm:$0xff] %v5834_v58 }
0x1400   : > { %v5635_v39 = vpop.f32.mrf.mxu2 }
0x1401   : > { %v5636_v63 = vadd.f32 %v5635_v39, %v9386_v24  ;;  %v5827_v44 = vadd.f32 %v6073_v42, %v5576_v38 }
0x1402   : > { %v5695_v0 = vpop.f32.mrf.mxu1 }
0x1403   : > { %v5696_v5 = vadd.f32 %v5695_v0, %v9386_v24  ;;  %v5840_v34 = vadd.f32 %v6080_v23, %v5636_v63  ;;  %6075 = vst [vmem:[%s9405_s15 + $0x18] sm:$0xff] %v5827_v44 }
0x1405   : > { %v5848_v20 = vadd.f32 %v6085_v62, %v5696_v5  ;;  %6082 = vst [vmem:[%s9405_s15 + $0x30] sm:$0xff] %v5840_v34 }
0x1407   : > { %6087 = vst [vmem:[%s9405_s15 + $0x48] sm:$0xff] %v5848_v20 }
0x1408   : > { %v5715_v7 = vpop.f32.mrf.mxu2 }
0x1409   : > { %v5716_v18 = vadd.f32 %v5715_v7, %v9386_v24 }
0x140a   : > { %v5775_v47 = vpop.f32.mrf.mxu1 }
0x140b   : > { %v5776_v52 = vadd.f32 %v5775_v47, %v9386_v24  ;;  %v5854_v50 = vadd.f32 %v6088_v29, %v5716_v18 }
0x140d   : > { %v5863_v45 = vadd.f32 %v6093_v28, %v5776_v52  ;;  %6090 = vst [vmem:[%s9405_s15 + $0x50] sm:$0xff] %v5854_v50 }
0x140f   : > { %6095 = vst [vmem:[%s9405_s15 + $0x68] sm:$0xff] %v5863_v45 }
0x1482   : > { %v5795_v36 = vpop.f32.mrf.mxu2  ;;  %v5815_v10 = vpop.f32.mrf.mxu3 }
0x1483   : > { %v5796_v55 = vadd.f32 %v5795_v36, %v9386_v24  ;;  %v5816_v41 = vadd.f32 %v5815_v10, %v9386_v24 }
0x1485   : > { %v5870_v37 = vadd.f32 %v6096_v13, %v5796_v55  ;;  %v5871_v4 = vadd.f32 %v6097_v31, %v5816_v41 }
0x1487   : > { %6098 = vst [vmem:[%s9405_s15 + $0x70] sm:$0xff] %v5870_v37 }
0x1488   : > { %6099 = vst [vmem:[%s9405_s15 + $0x78] sm:$0xff] %v5871_v4 }
0x1489   : > { %6694 = shalt.err (!%p6691_p10)
}
0x148a   : > { %s6753_s14 = smov 256   ;;  %s6754_s15 = smov 16  }
0x148b   : > { %6167 = dma.vmem_to_hbm [thread:$0]  (%p6881_p3), %s5889_s23, 2048, %s5891_s19, %s5876_s21, %s6753_s14, %s6753_s14, %s6754_s15  }
0x148c PF: > { %s5905_s27 = sand.u32 1, %s6725_s17   ;;  %p9637_p12 = scmp.ge.s32.totalorder %s6737_s20, 2 }
0x148d   : > { %s5906_s22 = scalar_lea.sflag [#allocation5], %s5905_s27 }
0x148e   : > { %p6181_p13 = pnand %p9637_p12, %p6850_p6 }
0x1490   : > { %p6182_p0 = pneg %p6181_p13 }
0x1492   : > { %6720 = dma.done.wait (%p6182_p0), %s5906_s22, 2048  }
0x1493   : > { %6722 = vsyncadd (%p6182_p0), %s5906_s22, 4294965248  ;;  %s9638_s20 = sld [smem:[#allocation14_spill]]  ;;  %s9641_s17 = smov %s6729_s18 }
0x1494   : > { %s9639_s30 = sld [smem:[#allocation13_spill]] }
0x1495   : > { %s9640_s19 = sld [smem:[#allocation15_spill]] }
0x1499   : > { %p25_p5 = scmp.ge.s32.totalorder %s9638_s20, 4  }
0x149a   : > { %s9642_s18 = smov %s9639_s30 }
0x149b   :  { %27 = sbr.rel (!%p25_p5) target bundleno = 9 (0x9), region = 131 }
0x14a0   :  { %5912 = vsyncpa [#allocation4], 1 }
0x14a1   :  { %5914 = vsyncpa [#allocation4 + $0x1], 1 }
0x14a2   :  { %5915 = vsyncpa [#allocation7], 1 }
0x14a3   :  { %5916 = vsyncpa [#allocation5], 1 }
0x14a4   :  { %5918 = vsyncpa [#allocation5 + $0x1], 1 }

</bundles_post_ra>
